<compile_context>
chip_gen: v7x
topology: tpu7x:2x2x1
jax: 0.10.0
libtpu: 0.0.40
codegen_flags: <defaults>
</compile_context>

<pallas_src>
import jax
import jax.numpy as jnp
from jax.experimental import pallas as pl
from jax.experimental.pallas import tpu as pltpu


# ----------------------------- Pallas kernel --------------------------------

def _basic_block_kernel(x_ref, w1_ref, b1_ref, w2_ref, b2_ref, o_ref,
                        xpad_ref, midpad_ref, acc_ref):
    """Fused BasicBlock: conv1+bn1+relu -> conv2+bn2 -> +identity -> relu.

    x_ref   : (1, H, W, C)   input image (NHWC), f32 or bf16
    w*_ref  : (3, 3, C, C)   HWIO conv weights with BN scale folded in
    b*_ref  : (1, C)         folded BN bias (f32)
    o_ref   : (1, H*W, C)    output slab (f32)
    scratch : xpad/midpad (H+2, W+2, C) compute dtype, acc (H*W, C) f32
    """
    _, h, w, c = x_ref.shape
    mxu_dtype = w1_ref.dtype          # f32 or bf16 MXU inputs

    def _zero_halo(buf):
        # Only the 1-pixel border needs zeroing; the interior is overwritten.
        zrow = jnp.zeros((1, w + 2, c), buf.dtype)
        zcol = jnp.zeros((h + 2, 1, c), buf.dtype)
        buf[0:1, :, :] = zrow
        buf[h + 1:h + 2, :, :] = zrow
        buf[:, 0:1, :] = zcol
        buf[:, w + 1:w + 2, :] = zcol

    def _conv3x3(src_pad, w_ref):
        # 9 statically-unrolled taps; first tap initializes the accumulator.
        first = True
        for dy in range(3):
            for dx in range(3):
                patch = src_pad[dy:dy + h, dx:dx + w, :].reshape(h * w, c)
                prod = jnp.dot(patch, w_ref[dy, dx],
                               preferred_element_type=jnp.float32)
                if first:
                    acc_ref[...] = prod
                    first = False
                else:
                    acc_ref[...] += prod

    # ---- in-kernel zero padding of the input (no HBM pad copy) -------------
    _zero_halo(xpad_ref)
    xpad_ref[1:h + 1, 1:w + 1, :] = x_ref[0].astype(xpad_ref.dtype)

    # ---- conv1 (BN1 scale folded into w1) + bias + ReLU ---------------------
    _conv3x3(xpad_ref, w1_ref)
    mid = jnp.maximum(acc_ref[...] + b1_ref[...], 0.0)

    # ---- intermediate activation stays resident in VMEM (padded for conv2) -
    _zero_halo(midpad_ref)
    midpad_ref[1:h + 1, 1:w + 1, :] = mid.reshape(h, w, c).astype(
        midpad_ref.dtype)

    # ---- conv2 (BN2 scale folded into w2) + bias + residual + ReLU ----------
    _conv3x3(midpad_ref, w2_ref)
    identity = x_ref[0].reshape(h * w, c).astype(jnp.float32)
    out = jnp.maximum(acc_ref[...] + b2_ref[...] + identity, 0.0)
    o_ref[...] = out.reshape(1, h * w, c).astype(o_ref.dtype)


# ------------------------------- Wrapper -------------------------------------

def basic_block_forward(x_nchw, params, *, eps=1e-5,
                        compute_dtype=jnp.float32):
    """BasicBlock forward. Input NCHW (PyTorch convention), output NCHW.

    compute_dtype: dtype fed to the MXU (jnp.float32 or jnp.bfloat16).
    Accumulation and BN bias math always stay in f32.
    """
    x = jnp.transpose(x_nchw, (0, 2, 3, 1))           # NCHW -> NHWC
    n, h, w, c = x.shape

    # Fold eval-mode BatchNorm into the conv weights (scale) + a bias vector.
    def fold(w_oihw, g, b, m, v):
        scale = g / jnp.sqrt(v + eps)                  # (Cout,)
        bias = (b - m * scale).reshape(1, -1).astype(jnp.float32)
        w_hwio = jnp.transpose(w_oihw, (2, 3, 1, 0)) * scale   # scale over Cout
        return w_hwio.astype(compute_dtype), bias

    w1, b1 = fold(params["w1"], params["g1"], params["b1"],
                  params["m1"], params["v1"])
    w2, b2 = fold(params["w2"], params["g2"], params["b2"],
                  params["m2"], params["v2"])
    xin = x.astype(compute_dtype)

    out2d = pl.pallas_call(
        _basic_block_kernel,
        out_shape=jax.ShapeDtypeStruct((n, h * w, c), jnp.float32),
        grid_spec=pltpu.PrefetchScalarGridSpec(
            num_scalar_prefetch=0,
            grid=(n,),
            in_specs=[
                pl.BlockSpec((1, h, w, c), lambda i: (i, 0, 0, 0)),   # x
                pl.BlockSpec((3, 3, c, c), lambda i: (0, 0, 0, 0)),   # w1
                pl.BlockSpec((1, c), lambda i: (0, 0)),               # b1
                pl.BlockSpec((3, 3, c, c), lambda i: (0, 0, 0, 0)),   # w2
                pl.BlockSpec((1, c), lambda i: (0, 0)),               # b2
            ],
            out_specs=pl.BlockSpec((1, h * w, c), lambda i: (i, 0, 0)),
            scratch_shapes=[
                pltpu.VMEM((h + 2, w + 2, c), compute_dtype),  # padded input
                pltpu.VMEM((h + 2, w + 2, c), compute_dtype),  # padded conv1 out
                pltpu.VMEM((h * w, c), jnp.float32),           # f32 accumulator
            ],
        ),
        compiler_params=pltpu.CompilerParams(
            dimension_semantics=("parallel",)),
    )(xin, w1, b1, w2, b2)

    out = out2d.reshape(n, h, w, c)
    return jnp.transpose(out, (0, 3, 1, 2))            # NHWC -> NCHW


# ------------------------------ Reference -------------------------------------

def _reference(x_nchw, params, eps=1e-5):
    x = jnp.transpose(x_nchw, (0, 2, 3, 1))
    w1 = jnp.transpose(params["w1"], (2, 3, 1, 0))
    w2 = jnp.transpose(params["w2"], (2, 3, 1, 0))

    def conv(a, wt):
        return jax.lax.conv_general_dilated(
            a, wt, (1, 1), "SAME", dimension_numbers=("NHWC", "HWIO", "NHWC"))

    def bn(a, g, b, m, v):
        return (a - m) / jnp.sqrt(v + eps) * g + b

    out = jax.nn.relu(bn(conv(x, w1), params["g1"], params["b1"],
                         params["m1"], params["v1"]))
    out = bn(conv(out, w2), params["g2"], params["b2"],
             params["m2"], params["v2"])
    out = jax.nn.relu(out + x)
    return jnp.transpose(out, (0, 3, 1, 2))


# --------------------------------- Main ---------------------------------------

if __name__ == "__main__":
    N, C, H, W = 2, 4, 16, 16
    key = jax.random.PRNGKey(0)
    ks = jax.random.split(key, 11)

    params = {
        "w1": 0.1 * jax.random.normal(ks[0], (C, C, 3, 3), jnp.float32),  # OIHW
        "w2": 0.1 * jax.random.normal(ks[1], (C, C, 3, 3), jnp.float32),
        "g1": 1.0 + 0.1 * jax.random.normal(ks[2], (C,), jnp.float32),
        "b1": 0.1 * jax.random.normal(ks[3], (C,), jnp.float32),
        "m1": 0.1 * jax.random.normal(ks[4], (C,), jnp.float32),
        "v1": 1.0 + 0.1 * jnp.abs(jax.random.normal(ks[5], (C,), jnp.float32)),
        "g2": 1.0 + 0.1 * jax.random.normal(ks[6], (C,), jnp.float32),
        "b2": 0.1 * jax.random.normal(ks[7], (C,), jnp.float32),
        "m2": 0.1 * jax.random.normal(ks[8], (C,), jnp.float32),
        "v2": 1.0 + 0.1 * jnp.abs(jax.random.normal(ks[9], (C,), jnp.float32)),
    }
    x = jax.random.normal(ks[10], (N, C, H, W), jnp.float32)

    ref = jax.block_until_ready(_reference(x, params))

    # f32 path (strict tolerance)
    out = jax.block_until_ready(basic_block_forward(x, params))
    assert out.shape == (N, C, H, W), out.shape
    assert jnp.allclose(out, ref, atol=1e-4, rtol=1e-4), (
        float(jnp.max(jnp.abs(out - ref))))

    # bf16 MXU path (f32 accumulation), looser tolerance
    out_bf16 = jax.block_until_ready(
        basic_block_forward(x, params, compute_dtype=jnp.bfloat16))
    assert jnp.allclose(out_bf16, ref, atol=5e-2, rtol=5e-2), (
        float(jnp.max(jnp.abs(out_bf16 - ref))))

    print("KERNEL_OK")
</pallas_src>

<mosaic_0001>
module attributes {stable_mosaic.version = 11 : i64} {
  func.func @_basic_block_kernel(%arg0: i32, %arg1: memref<1x16x16x4xf32, #tpu.memory_space<vmem>>, %arg2: memref<3x3x4x4xf32, #tpu.memory_space<vmem>>, %arg3: memref<1x4xf32, #tpu.memory_space<vmem>>, %arg4: memref<3x3x4x4xf32, #tpu.memory_space<vmem>>, %arg5: memref<1x4xf32, #tpu.memory_space<vmem>>, %arg6: memref<1x256x4xf32, #tpu.memory_space<vmem>>, %arg7: memref<18x18x4xf32, #tpu.memory_space<vmem>>, %arg8: memref<18x18x4xf32, #tpu.memory_space<vmem>>, %arg9: memref<256x4xf32, #tpu.memory_space<vmem>>) attributes {dimension_semantics = [#tpu.dimension_semantics<parallel>], iteration_bounds = array<i64: 2>, scalar_prefetch = 0 : i64, scratch_operands = 3 : i64, tpu.core_type = #tpu.core_type<tc>, window_params = [{transform_indices = @transform_0, window_bounds = array<i64: 1, 16, 16, 4>}, {pipeline_mode = #tpu.pipeline_mode<synchronous>, transform_indices = @transform_1, window_bounds = array<i64: 3, 3, 4, 4>}, {pipeline_mode = #tpu.pipeline_mode<synchronous>, transform_indices = @transform_2, window_bounds = array<i64: 1, 4>}, {pipeline_mode = #tpu.pipeline_mode<synchronous>, transform_indices = @transform_3, window_bounds = array<i64: 3, 3, 4, 4>}, {pipeline_mode = #tpu.pipeline_mode<synchronous>, transform_indices = @transform_4, window_bounds = array<i64: 1, 4>}, {transform_indices = @transform_5, window_bounds = array<i64: 1, 256, 4>}]} {
    %cst = arith.constant 0.000000e+00 : f32
    %0 = vector.broadcast %cst : f32 to vector<1x18x4xf32>
    %cst_0 = arith.constant 0.000000e+00 : f32
    %1 = vector.broadcast %cst_0 : f32 to vector<18x1x4xf32>
    %c0 = arith.constant 0 : index
    %c0_1 = arith.constant 0 : index
    %c0_2 = arith.constant 0 : index
    %2 = vector.load %arg7[%c0, %c0_1, %c0_2] : memref<18x18x4xf32, #tpu.memory_space<vmem>>, vector<1x18x4xf32>
    tpu.vector_store %arg7[%c0, %c0_1, %c0_2], %0 {strides = array<i32>} : memref<18x18x4xf32, #tpu.memory_space<vmem>>, vector<1x18x4xf32>,
    %c17 = arith.constant 17 : index
    %c0_3 = arith.constant 0 : index
    %c0_4 = arith.constant 0 : index
    %3 = vector.load %arg7[%c17, %c0_3, %c0_4] : memref<18x18x4xf32, #tpu.memory_space<vmem>>, vector<1x18x4xf32>
    tpu.vector_store %arg7[%c17, %c0_3, %c0_4], %0 {strides = array<i32>} : memref<18x18x4xf32, #tpu.memory_space<vmem>>, vector<1x18x4xf32>,
    %c0_5 = arith.constant 0 : index
    %c0_6 = arith.constant 0 : index
    %c0_7 = arith.constant 0 : index
    %4 = vector.load %arg7[%c0_5, %c0_6, %c0_7] : memref<18x18x4xf32, #tpu.memory_space<vmem>>, vector<18x1x4xf32>
    tpu.vector_store %arg7[%c0_5, %c0_6, %c0_7], %1 {strides = array<i32>} : memref<18x18x4xf32, #tpu.memory_space<vmem>>, vector<18x1x4xf32>,
    %c0_8 = arith.constant 0 : index
    %c17_9 = arith.constant 17 : index
    %c0_10 = arith.constant 0 : index
    %5 = vector.load %arg7[%c0_8, %c17_9, %c0_10] : memref<18x18x4xf32, #tpu.memory_space<vmem>>, vector<18x1x4xf32>
    tpu.vector_store %arg7[%c0_8, %c17_9, %c0_10], %1 {strides = array<i32>} : memref<18x18x4xf32, #tpu.memory_space<vmem>>, vector<18x1x4xf32>,
    %c0_11 = arith.constant 0 : index
    %c0_12 = arith.constant 0 : index
    %c0_13 = arith.constant 0 : index
    %c0_14 = arith.constant 0 : index
    %6 = vector.load %arg1[%c0_11, %c0_12, %c0_13, %c0_14] : memref<1x16x16x4xf32, #tpu.memory_space<vmem>>, vector<1x16x16x4xf32>
    %7 = vector.shape_cast %6 : vector<1x16x16x4xf32> to vector<16x16x4xf32>
    %c1 = arith.constant 1 : index
    %c1_15 = arith.constant 1 : index
    %c0_16 = arith.constant 0 : index
    %8 = vector.load %arg7[%c1, %c1_15, %c0_16] : memref<18x18x4xf32, #tpu.memory_space<vmem>>, vector<16x16x4xf32>
    tpu.vector_store %arg7[%c1, %c1_15, %c0_16], %7 {strides = array<i32>} : memref<18x18x4xf32, #tpu.memory_space<vmem>>, vector<16x16x4xf32>,
    %c0_17 = arith.constant 0 : index
    %c0_18 = arith.constant 0 : index
    %c0_19 = arith.constant 0 : index
    %9 = vector.load %arg7[%c0_17, %c0_18, %c0_19] : memref<18x18x4xf32, #tpu.memory_space<vmem>>, vector<16x16x4xf32>
    %10 = vector.shape_cast %9 : vector<16x16x4xf32> to vector<256x4xf32>
    %c0_20 = arith.constant 0 : index
    %c0_21 = arith.constant 0 : index
    %c0_22 = arith.constant 0 : index
    %c0_23 = arith.constant 0 : index
    %11 = vector.load %arg2[%c0_20, %c0_21, %c0_22, %c0_23] : memref<3x3x4x4xf32, #tpu.memory_space<vmem>>, vector<1x1x4x4xf32>
    %12 = vector.shape_cast %11 : vector<1x1x4x4xf32> to vector<4x4xf32>
    %cst_24 = arith.constant dense<0.000000e+00> : vector<256x4xf32>
    %13 = tpu.matmul %10, %12, %cst_24 {dimension_numbers = #tpu.dot_dimension_numbers<[1], [0], [0], [1], [0, 0, 1, 1], [], []>} : vector<256x4xf32>, vector<4x4xf32>, vector<256x4xf32> -> vector<256x4xf32>
    %c0_25 = arith.constant 0 : index
    %c0_26 = arith.constant 0 : index
    %14 = vector.load %arg9[%c0_25, %c0_26] : memref<256x4xf32, #tpu.memory_space<vmem>>, vector<256x4xf32>
    tpu.vector_store %arg9[%c0_25, %c0_26], %13 {strides = array<i32>} : memref<256x4xf32, #tpu.memory_space<vmem>>, vector<256x4xf32>,
    %c0_27 = arith.constant 0 : index
    %c1_28 = arith.constant 1 : index
    %c0_29 = arith.constant 0 : index
    %15 = vector.load %arg7[%c0_27, %c1_28, %c0_29] : memref<18x18x4xf32, #tpu.memory_space<vmem>>, vector<16x16x4xf32>
    %16 = vector.shape_cast %15 : vector<16x16x4xf32> to vector<256x4xf32>
    %c0_30 = arith.constant 0 : index
    %c1_31 = arith.constant 1 : index
    %c0_32 = arith.constant 0 : index
    %c0_33 = arith.constant 0 : index
    %17 = vector.load %arg2[%c0_30, %c1_31, %c0_32, %c0_33] : memref<3x3x4x4xf32, #tpu.memory_space<vmem>>, vector<1x1x4x4xf32>
    %18 = vector.shape_cast %17 : vector<1x1x4x4xf32> to vector<4x4xf32>
    %cst_34 = arith.constant dense<0.000000e+00> : vector<256x4xf32>
    %19 = tpu.matmul %16, %18, %cst_34 {dimension_numbers = #tpu.dot_dimension_numbers<[1], [0], [0], [1], [0, 0, 1, 1], [], []>} : vector<256x4xf32>, vector<4x4xf32>, vector<256x4xf32> -> vector<256x4xf32>
    %c0_35 = arith.constant 0 : index
    %c0_36 = arith.constant 0 : index
    %20 = vector.load %arg9[%c0_35, %c0_36] : memref<256x4xf32, #tpu.memory_space<vmem>>, vector<256x4xf32>
    %21 = arith.addf %20, %19 : vector<256x4xf32>
    %c0_37 = arith.constant 0 : index
    %c0_38 = arith.constant 0 : index
    %22 = vector.load %arg9[%c0_37, %c0_38] : memref<256x4xf32, #tpu.memory_space<vmem>>, vector<256x4xf32>
    tpu.vector_store %arg9[%c0_37, %c0_38], %21 {strides = array<i32>} : memref<256x4xf32, #tpu.memory_space<vmem>>, vector<256x4xf32>,
    %c0_39 = arith.constant 0 : index
    %c2 = arith.constant 2 : index
    %c0_40 = arith.constant 0 : index
    %23 = vector.load %arg7[%c0_39, %c2, %c0_40] : memref<18x18x4xf32, #tpu.memory_space<vmem>>, vector<16x16x4xf32>
    %24 = vector.shape_cast %23 : vector<16x16x4xf32> to vector<256x4xf32>
    %c0_41 = arith.constant 0 : index
    %c2_42 = arith.constant 2 : index
    %c0_43 = arith.constant 0 : index
    %c0_44 = arith.constant 0 : index
    %25 = vector.load %arg2[%c0_41, %c2_42, %c0_43, %c0_44] : memref<3x3x4x4xf32, #tpu.memory_space<vmem>>, vector<1x1x4x4xf32>
    %26 = vector.shape_cast %25 : vector<1x1x4x4xf32> to vector<4x4xf32>
    %cst_45 = arith.constant dense<0.000000e+00> : vector<256x4xf32>
    %27 = tpu.matmul %24, %26, %cst_45 {dimension_numbers = #tpu.dot_dimension_numbers<[1], [0], [0], [1], [0, 0, 1, 1], [], []>} : vector<256x4xf32>, vector<4x4xf32>, vector<256x4xf32> -> vector<256x4xf32>
    %c0_46 = arith.constant 0 : index
    %c0_47 = arith.constant 0 : index
    %28 = vector.load %arg9[%c0_46, %c0_47] : memref<256x4xf32, #tpu.memory_space<vmem>>, vector<256x4xf32>
    %29 = arith.addf %28, %27 : vector<256x4xf32>
    %c0_48 = arith.constant 0 : index
    %c0_49 = arith.constant 0 : index
    %30 = vector.load %arg9[%c0_48, %c0_49] : memref<256x4xf32, #tpu.memory_space<vmem>>, vector<256x4xf32>
    tpu.vector_store %arg9[%c0_48, %c0_49], %29 {strides = array<i32>} : memref<256x4xf32, #tpu.memory_space<vmem>>, vector<256x4xf32>,
    %c1_50 = arith.constant 1 : index
    %c0_51 = arith.constant 0 : index
    %c0_52 = arith.constant 0 : index
    %31 = vector.load %arg7[%c1_50, %c0_51, %c0_52] : memref<18x18x4xf32, #tpu.memory_space<vmem>>, vector<16x16x4xf32>
    %32 = vector.shape_cast %31 : vector<16x16x4xf32> to vector<256x4xf32>
    %c1_53 = arith.constant 1 : index
    %c0_54 = arith.constant 0 : index
    %c0_55 = arith.constant 0 : index
    %c0_56 = arith.constant 0 : index
    %33 = vector.load %arg2[%c1_53, %c0_54, %c0_55, %c0_56] : memref<3x3x4x4xf32, #tpu.memory_space<vmem>>, vector<1x1x4x4xf32>
    %34 = vector.shape_cast %33 : vector<1x1x4x4xf32> to vector<4x4xf32>
    %cst_57 = arith.constant dense<0.000000e+00> : vector<256x4xf32>
    %35 = tpu.matmul %32, %34, %cst_57 {dimension_numbers = #tpu.dot_dimension_numbers<[1], [0], [0], [1], [0, 0, 1, 1], [], []>} : vector<256x4xf32>, vector<4x4xf32>, vector<256x4xf32> -> vector<256x4xf32>
    %c0_58 = arith.constant 0 : index
    %c0_59 = arith.constant 0 : index
    %36 = vector.load %arg9[%c0_58, %c0_59] : memref<256x4xf32, #tpu.memory_space<vmem>>, vector<256x4xf32>
    %37 = arith.addf %36, %35 : vector<256x4xf32>
    %c0_60 = arith.constant 0 : index
    %c0_61 = arith.constant 0 : index
    %38 = vector.load %arg9[%c0_60, %c0_61] : memref<256x4xf32, #tpu.memory_space<vmem>>, vector<256x4xf32>
    tpu.vector_store %arg9[%c0_60, %c0_61], %37 {strides = array<i32>} : memref<256x4xf32, #tpu.memory_space<vmem>>, vector<256x4xf32>,
    %c1_62 = arith.constant 1 : index
    %c1_63 = arith.constant 1 : index
    %c0_64 = arith.constant 0 : index
    %39 = vector.load %arg7[%c1_62, %c1_63, %c0_64] : memref<18x18x4xf32, #tpu.memory_space<vmem>>, vector<16x16x4xf32>
    %40 = vector.shape_cast %39 : vector<16x16x4xf32> to vector<256x4xf32>
    %c1_65 = arith.constant 1 : index
    %c1_66 = arith.constant 1 : index
    %c0_67 = arith.constant 0 : index
    %c0_68 = arith.constant 0 : index
    %41 = vector.load %arg2[%c1_65, %c1_66, %c0_67, %c0_68] : memref<3x3x4x4xf32, #tpu.memory_space<vmem>>, vector<1x1x4x4xf32>
    %42 = vector.shape_cast %41 : vector<1x1x4x4xf32> to vector<4x4xf32>
    %cst_69 = arith.constant dense<0.000000e+00> : vector<256x4xf32>
    %43 = tpu.matmul %40, %42, %cst_69 {dimension_numbers = #tpu.dot_dimension_numbers<[1], [0], [0], [1], [0, 0, 1, 1], [], []>} : vector<256x4xf32>, vector<4x4xf32>, vector<256x4xf32> -> vector<256x4xf32>
    %c0_70 = arith.constant 0 : index
    %c0_71 = arith.constant 0 : index
    %44 = vector.load %arg9[%c0_70, %c0_71] : memref<256x4xf32, #tpu.memory_space<vmem>>, vector<256x4xf32>
    %45 = arith.addf %44, %43 : vector<256x4xf32>
    %c0_72 = arith.constant 0 : index
    %c0_73 = arith.constant 0 : index
    %46 = vector.load %arg9[%c0_72, %c0_73] : memref<256x4xf32, #tpu.memory_space<vmem>>, vector<256x4xf32>
    tpu.vector_store %arg9[%c0_72, %c0_73], %45 {strides = array<i32>} : memref<256x4xf32, #tpu.memory_space<vmem>>, vector<256x4xf32>,
    %c1_74 = arith.constant 1 : index
    %c2_75 = arith.constant 2 : index
    %c0_76 = arith.constant 0 : index
    %47 = vector.load %arg7[%c1_74, %c2_75, %c0_76] : memref<18x18x4xf32, #tpu.memory_space<vmem>>, vector<16x16x4xf32>
    %48 = vector.shape_cast %47 : vector<16x16x4xf32> to vector<256x4xf32>
    %c1_77 = arith.constant 1 : index
    %c2_78 = arith.constant 2 : index
    %c0_79 = arith.constant 0 : index
    %c0_80 = arith.constant 0 : index
    %49 = vector.load %arg2[%c1_77, %c2_78, %c0_79, %c0_80] : memref<3x3x4x4xf32, #tpu.memory_space<vmem>>, vector<1x1x4x4xf32>
    %50 = vector.shape_cast %49 : vector<1x1x4x4xf32> to vector<4x4xf32>
    %cst_81 = arith.constant dense<0.000000e+00> : vector<256x4xf32>
    %51 = tpu.matmul %48, %50, %cst_81 {dimension_numbers = #tpu.dot_dimension_numbers<[1], [0], [0], [1], [0, 0, 1, 1], [], []>} : vector<256x4xf32>, vector<4x4xf32>, vector<256x4xf32> -> vector<256x4xf32>
    %c0_82 = arith.constant 0 : index
    %c0_83 = arith.constant 0 : index
    %52 = vector.load %arg9[%c0_82, %c0_83] : memref<256x4xf32, #tpu.memory_space<vmem>>, vector<256x4xf32>
    %53 = arith.addf %52, %51 : vector<256x4xf32>
    %c0_84 = arith.constant 0 : index
    %c0_85 = arith.constant 0 : index
    %54 = vector.load %arg9[%c0_84, %c0_85] : memref<256x4xf32, #tpu.memory_space<vmem>>, vector<256x4xf32>
    tpu.vector_store %arg9[%c0_84, %c0_85], %53 {strides = array<i32>} : memref<256x4xf32, #tpu.memory_space<vmem>>, vector<256x4xf32>,
    %c2_86 = arith.constant 2 : index
    %c0_87 = arith.constant 0 : index
    %c0_88 = arith.constant 0 : index
    %55 = vector.load %arg7[%c2_86, %c0_87, %c0_88] : memref<18x18x4xf32, #tpu.memory_space<vmem>>, vector<16x16x4xf32>
    %56 = vector.shape_cast %55 : vector<16x16x4xf32> to vector<256x4xf32>
    %c2_89 = arith.constant 2 : index
    %c0_90 = arith.constant 0 : index
    %c0_91 = arith.constant 0 : index
    %c0_92 = arith.constant 0 : index
    %57 = vector.load %arg2[%c2_89, %c0_90, %c0_91, %c0_92] : memref<3x3x4x4xf32, #tpu.memory_space<vmem>>, vector<1x1x4x4xf32>
    %58 = vector.shape_cast %57 : vector<1x1x4x4xf32> to vector<4x4xf32>
    %cst_93 = arith.constant dense<0.000000e+00> : vector<256x4xf32>
    %59 = tpu.matmul %56, %58, %cst_93 {dimension_numbers = #tpu.dot_dimension_numbers<[1], [0], [0], [1], [0, 0, 1, 1], [], []>} : vector<256x4xf32>, vector<4x4xf32>, vector<256x4xf32> -> vector<256x4xf32>
    %c0_94 = arith.constant 0 : index
    %c0_95 = arith.constant 0 : index
    %60 = vector.load %arg9[%c0_94, %c0_95] : memref<256x4xf32, #tpu.memory_space<vmem>>, vector<256x4xf32>
    %61 = arith.addf %60, %59 : vector<256x4xf32>
    %c0_96 = arith.constant 0 : index
    %c0_97 = arith.constant 0 : index
    %62 = vector.load %arg9[%c0_96, %c0_97] : memref<256x4xf32, #tpu.memory_space<vmem>>, vector<256x4xf32>
    tpu.vector_store %arg9[%c0_96, %c0_97], %61 {strides = array<i32>} : memref<256x4xf32, #tpu.memory_space<vmem>>, vector<256x4xf32>,
    %c2_98 = arith.constant 2 : index
    %c1_99 = arith.constant 1 : index
    %c0_100 = arith.constant 0 : index
    %63 = vector.load %arg7[%c2_98, %c1_99, %c0_100] : memref<18x18x4xf32, #tpu.memory_space<vmem>>, vector<16x16x4xf32>
    %64 = vector.shape_cast %63 : vector<16x16x4xf32> to vector<256x4xf32>
    %c2_101 = arith.constant 2 : index
    %c1_102 = arith.constant 1 : index
    %c0_103 = arith.constant 0 : index
    %c0_104 = arith.constant 0 : index
    %65 = vector.load %arg2[%c2_101, %c1_102, %c0_103, %c0_104] : memref<3x3x4x4xf32, #tpu.memory_space<vmem>>, vector<1x1x4x4xf32>
    %66 = vector.shape_cast %65 : vector<1x1x4x4xf32> to vector<4x4xf32>
    %cst_105 = arith.constant dense<0.000000e+00> : vector<256x4xf32>
    %67 = tpu.matmul %64, %66, %cst_105 {dimension_numbers = #tpu.dot_dimension_numbers<[1], [0], [0], [1], [0, 0, 1, 1], [], []>} : vector<256x4xf32>, vector<4x4xf32>, vector<256x4xf32> -> vector<256x4xf32>
    %c0_106 = arith.constant 0 : index
    %c0_107 = arith.constant 0 : index
    %68 = vector.load %arg9[%c0_106, %c0_107] : memref<256x4xf32, #tpu.memory_space<vmem>>, vector<256x4xf32>
    %69 = arith.addf %68, %67 : vector<256x4xf32>
    %c0_108 = arith.constant 0 : index
    %c0_109 = arith.constant 0 : index
    %70 = vector.load %arg9[%c0_108, %c0_109] : memref<256x4xf32, #tpu.memory_space<vmem>>, vector<256x4xf32>
    tpu.vector_store %arg9[%c0_108, %c0_109], %69 {strides = array<i32>} : memref<256x4xf32, #tpu.memory_space<vmem>>, vector<256x4xf32>,
    %c2_110 = arith.constant 2 : index
    %c2_111 = arith.constant 2 : index
    %c0_112 = arith.constant 0 : index
    %71 = vector.load %arg7[%c2_110, %c2_111, %c0_112] : memref<18x18x4xf32, #tpu.memory_space<vmem>>, vector<16x16x4xf32>
    %72 = vector.shape_cast %71 : vector<16x16x4xf32> to vector<256x4xf32>
    %c2_113 = arith.constant 2 : index
    %c2_114 = arith.constant 2 : index
    %c0_115 = arith.constant 0 : index
    %c0_116 = arith.constant 0 : index
    %73 = vector.load %arg2[%c2_113, %c2_114, %c0_115, %c0_116] : memref<3x3x4x4xf32, #tpu.memory_space<vmem>>, vector<1x1x4x4xf32>
    %74 = vector.shape_cast %73 : vector<1x1x4x4xf32> to vector<4x4xf32>
    %cst_117 = arith.constant dense<0.000000e+00> : vector<256x4xf32>
    %75 = tpu.matmul %72, %74, %cst_117 {dimension_numbers = #tpu.dot_dimension_numbers<[1], [0], [0], [1], [0, 0, 1, 1], [], []>} : vector<256x4xf32>, vector<4x4xf32>, vector<256x4xf32> -> vector<256x4xf32>
    %c0_118 = arith.constant 0 : index
    %c0_119 = arith.constant 0 : index
    %76 = vector.load %arg9[%c0_118, %c0_119] : memref<256x4xf32, #tpu.memory_space<vmem>>, vector<256x4xf32>
    %77 = arith.addf %76, %75 : vector<256x4xf32>
    %c0_120 = arith.constant 0 : index
    %c0_121 = arith.constant 0 : index
    %78 = vector.load %arg9[%c0_120, %c0_121] : memref<256x4xf32, #tpu.memory_space<vmem>>, vector<256x4xf32>
    tpu.vector_store %arg9[%c0_120, %c0_121], %77 {strides = array<i32>} : memref<256x4xf32, #tpu.memory_space<vmem>>, vector<256x4xf32>,
    %c0_122 = arith.constant 0 : index
    %c0_123 = arith.constant 0 : index
    %79 = vector.load %arg9[%c0_122, %c0_123] : memref<256x4xf32, #tpu.memory_space<vmem>>, vector<256x4xf32>
    %c0_124 = arith.constant 0 : index
    %c0_125 = arith.constant 0 : index
    %80 = vector.load %arg3[%c0_124, %c0_125] : memref<1x4xf32, #tpu.memory_space<vmem>>, vector<1x4xf32>
    %81 = vector.broadcast %80 : vector<1x4xf32> to vector<256x4xf32>
    %82 = arith.addf %79, %81 : vector<256x4xf32>
    %cst_126 = arith.constant 0.000000e+00 : f32
    %83 = vector.broadcast %cst_126 : f32 to vector<256x4xf32>
    %84 = arith.maximumf %82, %83 : vector<256x4xf32>
    %cst_127 = arith.constant 0.000000e+00 : f32
    %85 = vector.broadcast %cst_127 : f32 to vector<1x18x4xf32>
    %cst_128 = arith.constant 0.000000e+00 : f32
    %86 = vector.broadcast %cst_128 : f32 to vector<18x1x4xf32>
    %c0_129 = arith.constant 0 : index
    %c0_130 = arith.constant 0 : index
    %c0_131 = arith.constant 0 : index
    %87 = vector.load %arg8[%c0_129, %c0_130, %c0_131] : memref<18x18x4xf32, #tpu.memory_space<vmem>>, vector<1x18x4xf32>
    tpu.vector_store %arg8[%c0_129, %c0_130, %c0_131], %85 {strides = array<i32>} : memref<18x18x4xf32, #tpu.memory_space<vmem>>, vector<1x18x4xf32>,
    %c17_132 = arith.constant 17 : index
    %c0_133 = arith.constant 0 : index
    %c0_134 = arith.constant 0 : index
    %88 = vector.load %arg8[%c17_132, %c0_133, %c0_134] : memref<18x18x4xf32, #tpu.memory_space<vmem>>, vector<1x18x4xf32>
    tpu.vector_store %arg8[%c17_132, %c0_133, %c0_134], %85 {strides = array<i32>} : memref<18x18x4xf32, #tpu.memory_space<vmem>>, vector<1x18x4xf32>,
    %c0_135 = arith.constant 0 : index
    %c0_136 = arith.constant 0 : index
    %c0_137 = arith.constant 0 : index
    %89 = vector.load %arg8[%c0_135, %c0_136, %c0_137] : memref<18x18x4xf32, #tpu.memory_space<vmem>>, vector<18x1x4xf32>
    tpu.vector_store %arg8[%c0_135, %c0_136, %c0_137], %86 {strides = array<i32>} : memref<18x18x4xf32, #tpu.memory_space<vmem>>, vector<18x1x4xf32>,
    %c0_138 = arith.constant 0 : index
    %c17_139 = arith.constant 17 : index
    %c0_140 = arith.constant 0 : index
    %90 = vector.load %arg8[%c0_138, %c17_139, %c0_140] : memref<18x18x4xf32, #tpu.memory_space<vmem>>, vector<18x1x4xf32>
    tpu.vector_store %arg8[%c0_138, %c17_139, %c0_140], %86 {strides = array<i32>} : memref<18x18x4xf32, #tpu.memory_space<vmem>>, vector<18x1x4xf32>,
    %91 = vector.shape_cast %84 : vector<256x4xf32> to vector<16x16x4xf32>
    %c1_141 = arith.constant 1 : index
    %c1_142 = arith.constant 1 : index
    %c0_143 = arith.constant 0 : index
    %92 = vector.load %arg8[%c1_141, %c1_142, %c0_143] : memref<18x18x4xf32, #tpu.memory_space<vmem>>, vector<16x16x4xf32>
    tpu.vector_store %arg8[%c1_141, %c1_142, %c0_143], %91 {strides = array<i32>} : memref<18x18x4xf32, #tpu.memory_space<vmem>>, vector<16x16x4xf32>,
    %c0_144 = arith.constant 0 : index
    %c0_145 = arith.constant 0 : index
    %c0_146 = arith.constant 0 : index
    %93 = vector.load %arg8[%c0_144, %c0_145, %c0_146] : memref<18x18x4xf32, #tpu.memory_space<vmem>>, vector<16x16x4xf32>
    %94 = vector.shape_cast %93 : vector<16x16x4xf32> to vector<256x4xf32>
    %c0_147 = arith.constant 0 : index
    %c0_148 = arith.constant 0 : index
    %c0_149 = arith.constant 0 : index
    %c0_150 = arith.constant 0 : index
    %95 = vector.load %arg4[%c0_147, %c0_148, %c0_149, %c0_150] : memref<3x3x4x4xf32, #tpu.memory_space<vmem>>, vector<1x1x4x4xf32>
    %96 = vector.shape_cast %95 : vector<1x1x4x4xf32> to vector<4x4xf32>
    %cst_151 = arith.constant dense<0.000000e+00> : vector<256x4xf32>
    %97 = tpu.matmul %94, %96, %cst_151 {dimension_numbers = #tpu.dot_dimension_numbers<[1], [0], [0], [1], [0, 0, 1, 1], [], []>} : vector<256x4xf32>, vector<4x4xf32>, vector<256x4xf32> -> vector<256x4xf32>
    %c0_152 = arith.constant 0 : index
    %c0_153 = arith.constant 0 : index
    %98 = vector.load %arg9[%c0_152, %c0_153] : memref<256x4xf32, #tpu.memory_space<vmem>>, vector<256x4xf32>
    tpu.vector_store %arg9[%c0_152, %c0_153], %97 {strides = array<i32>} : memref<256x4xf32, #tpu.memory_space<vmem>>, vector<256x4xf32>,
    %c0_154 = arith.constant 0 : index
    %c1_155 = arith.constant 1 : index
    %c0_156 = arith.constant 0 : index
    %99 = vector.load %arg8[%c0_154, %c1_155, %c0_156] : memref<18x18x4xf32, #tpu.memory_space<vmem>>, vector<16x16x4xf32>
    %100 = vector.shape_cast %99 : vector<16x16x4xf32> to vector<256x4xf32>
    %c0_157 = arith.constant 0 : index
    %c1_158 = arith.constant 1 : index
    %c0_159 = arith.constant 0 : index
    %c0_160 = arith.constant 0 : index
    %101 = vector.load %arg4[%c0_157, %c1_158, %c0_159, %c0_160] : memref<3x3x4x4xf32, #tpu.memory_space<vmem>>, vector<1x1x4x4xf32>
    %102 = vector.shape_cast %101 : vector<1x1x4x4xf32> to vector<4x4xf32>
    %cst_161 = arith.constant dense<0.000000e+00> : vector<256x4xf32>
    %103 = tpu.matmul %100, %102, %cst_161 {dimension_numbers = #tpu.dot_dimension_numbers<[1], [0], [0], [1], [0, 0, 1, 1], [], []>} : vector<256x4xf32>, vector<4x4xf32>, vector<256x4xf32> -> vector<256x4xf32>
    %c0_162 = arith.constant 0 : index
    %c0_163 = arith.constant 0 : index
    %104 = vector.load %arg9[%c0_162, %c0_163] : memref<256x4xf32, #tpu.memory_space<vmem>>, vector<256x4xf32>
    %105 = arith.addf %104, %103 : vector<256x4xf32>
    %c0_164 = arith.constant 0 : index
    %c0_165 = arith.constant 0 : index
    %106 = vector.load %arg9[%c0_164, %c0_165] : memref<256x4xf32, #tpu.memory_space<vmem>>, vector<256x4xf32>
    tpu.vector_store %arg9[%c0_164, %c0_165], %105 {strides = array<i32>} : memref<256x4xf32, #tpu.memory_space<vmem>>, vector<256x4xf32>,
    %c0_166 = arith.constant 0 : index
    %c2_167 = arith.constant 2 : index
    %c0_168 = arith.constant 0 : index
    %107 = vector.load %arg8[%c0_166, %c2_167, %c0_168] : memref<18x18x4xf32, #tpu.memory_space<vmem>>, vector<16x16x4xf32>
    %108 = vector.shape_cast %107 : vector<16x16x4xf32> to vector<256x4xf32>
    %c0_169 = arith.constant 0 : index
    %c2_170 = arith.constant 2 : index
    %c0_171 = arith.constant 0 : index
    %c0_172 = arith.constant 0 : index
    %109 = vector.load %arg4[%c0_169, %c2_170, %c0_171, %c0_172] : memref<3x3x4x4xf32, #tpu.memory_space<vmem>>, vector<1x1x4x4xf32>
    %110 = vector.shape_cast %109 : vector<1x1x4x4xf32> to vector<4x4xf32>
    %cst_173 = arith.constant dense<0.000000e+00> : vector<256x4xf32>
    %111 = tpu.matmul %108, %110, %cst_173 {dimension_numbers = #tpu.dot_dimension_numbers<[1], [0], [0], [1], [0, 0, 1, 1], [], []>} : vector<256x4xf32>, vector<4x4xf32>, vector<256x4xf32> -> vector<256x4xf32>
    %c0_174 = arith.constant 0 : index
    %c0_175 = arith.constant 0 : index
    %112 = vector.load %arg9[%c0_174, %c0_175] : memref<256x4xf32, #tpu.memory_space<vmem>>, vector<256x4xf32>
    %113 = arith.addf %112, %111 : vector<256x4xf32>
    %c0_176 = arith.constant 0 : index
    %c0_177 = arith.constant 0 : index
    %114 = vector.load %arg9[%c0_176, %c0_177] : memref<256x4xf32, #tpu.memory_space<vmem>>, vector<256x4xf32>
    tpu.vector_store %arg9[%c0_176, %c0_177], %113 {strides = array<i32>} : memref<256x4xf32, #tpu.memory_space<vmem>>, vector<256x4xf32>,
    %c1_178 = arith.constant 1 : index
    %c0_179 = arith.constant 0 : index
    %c0_180 = arith.constant 0 : index
    %115 = vector.load %arg8[%c1_178, %c0_179, %c0_180] : memref<18x18x4xf32, #tpu.memory_space<vmem>>, vector<16x16x4xf32>
    %116 = vector.shape_cast %115 : vector<16x16x4xf32> to vector<256x4xf32>
    %c1_181 = arith.constant 1 : index
    %c0_182 = arith.constant 0 : index
    %c0_183 = arith.constant 0 : index
    %c0_184 = arith.constant 0 : index
    %117 = vector.load %arg4[%c1_181, %c0_182, %c0_183, %c0_184] : memref<3x3x4x4xf32, #tpu.memory_space<vmem>>, vector<1x1x4x4xf32>
    %118 = vector.shape_cast %117 : vector<1x1x4x4xf32> to vector<4x4xf32>
    %cst_185 = arith.constant dense<0.000000e+00> : vector<256x4xf32>
    %119 = tpu.matmul %116, %118, %cst_185 {dimension_numbers = #tpu.dot_dimension_numbers<[1], [0], [0], [1], [0, 0, 1, 1], [], []>} : vector<256x4xf32>, vector<4x4xf32>, vector<256x4xf32> -> vector<256x4xf32>
    %c0_186 = arith.constant 0 : index
    %c0_187 = arith.constant 0 : index
    %120 = vector.load %arg9[%c0_186, %c0_187] : memref<256x4xf32, #tpu.memory_space<vmem>>, vector<256x4xf32>
    %121 = arith.addf %120, %119 : vector<256x4xf32>
    %c0_188 = arith.constant 0 : index
    %c0_189 = arith.constant 0 : index
    %122 = vector.load %arg9[%c0_188, %c0_189] : memref<256x4xf32, #tpu.memory_space<vmem>>, vector<256x4xf32>
    tpu.vector_store %arg9[%c0_188, %c0_189], %121 {strides = array<i32>} : memref<256x4xf32, #tpu.memory_space<vmem>>, vector<256x4xf32>,
    %c1_190 = arith.constant 1 : index
    %c1_191 = arith.constant 1 : index
    %c0_192 = arith.constant 0 : index
    %123 = vector.load %arg8[%c1_190, %c1_191, %c0_192] : memref<18x18x4xf32, #tpu.memory_space<vmem>>, vector<16x16x4xf32>
    %124 = vector.shape_cast %123 : vector<16x16x4xf32> to vector<256x4xf32>
    %c1_193 = arith.constant 1 : index
    %c1_194 = arith.constant 1 : index
    %c0_195 = arith.constant 0 : index
    %c0_196 = arith.constant 0 : index
    %125 = vector.load %arg4[%c1_193, %c1_194, %c0_195, %c0_196] : memref<3x3x4x4xf32, #tpu.memory_space<vmem>>, vector<1x1x4x4xf32>
    %126 = vector.shape_cast %125 : vector<1x1x4x4xf32> to vector<4x4xf32>
    %cst_197 = arith.constant dense<0.000000e+00> : vector<256x4xf32>
    %127 = tpu.matmul %124, %126, %cst_197 {dimension_numbers = #tpu.dot_dimension_numbers<[1], [0], [0], [1], [0, 0, 1, 1], [], []>} : vector<256x4xf32>, vector<4x4xf32>, vector<256x4xf32> -> vector<256x4xf32>
    %c0_198 = arith.constant 0 : index
    %c0_199 = arith.constant 0 : index
    %128 = vector.load %arg9[%c0_198, %c0_199] : memref<256x4xf32, #tpu.memory_space<vmem>>, vector<256x4xf32>
    %129 = arith.addf %128, %127 : vector<256x4xf32>
    %c0_200 = arith.constant 0 : index
    %c0_201 = arith.constant 0 : index
    %130 = vector.load %arg9[%c0_200, %c0_201] : memref<256x4xf32, #tpu.memory_space<vmem>>, vector<256x4xf32>
    tpu.vector_store %arg9[%c0_200, %c0_201], %129 {strides = array<i32>} : memref<256x4xf32, #tpu.memory_space<vmem>>, vector<256x4xf32>,
    %c1_202 = arith.constant 1 : index
    %c2_203 = arith.constant 2 : index
    %c0_204 = arith.constant 0 : index
    %131 = vector.load %arg8[%c1_202, %c2_203, %c0_204] : memref<18x18x4xf32, #tpu.memory_space<vmem>>, vector<16x16x4xf32>
    %132 = vector.shape_cast %131 : vector<16x16x4xf32> to vector<256x4xf32>
    %c1_205 = arith.constant 1 : index
    %c2_206 = arith.constant 2 : index
    %c0_207 = arith.constant 0 : index
    %c0_208 = arith.constant 0 : index
    %133 = vector.load %arg4[%c1_205, %c2_206, %c0_207, %c0_208] : memref<3x3x4x4xf32, #tpu.memory_space<vmem>>, vector<1x1x4x4xf32>
    %134 = vector.shape_cast %133 : vector<1x1x4x4xf32> to vector<4x4xf32>
    %cst_209 = arith.constant dense<0.000000e+00> : vector<256x4xf32>
    %135 = tpu.matmul %132, %134, %cst_209 {dimension_numbers = #tpu.dot_dimension_numbers<[1], [0], [0], [1], [0, 0, 1, 1], [], []>} : vector<256x4xf32>, vector<4x4xf32>, vector<256x4xf32> -> vector<256x4xf32>
    %c0_210 = arith.constant 0 : index
    %c0_211 = arith.constant 0 : index
    %136 = vector.load %arg9[%c0_210, %c0_211] : memref<256x4xf32, #tpu.memory_space<vmem>>, vector<256x4xf32>
    %137 = arith.addf %136, %135 : vector<256x4xf32>
    %c0_212 = arith.constant 0 : index
    %c0_213 = arith.constant 0 : index
    %138 = vector.load %arg9[%c0_212, %c0_213] : memref<256x4xf32, #tpu.memory_space<vmem>>, vector<256x4xf32>
    tpu.vector_store %arg9[%c0_212, %c0_213], %137 {strides = array<i32>} : memref<256x4xf32, #tpu.memory_space<vmem>>, vector<256x4xf32>,
    %c2_214 = arith.constant 2 : index
    %c0_215 = arith.constant 0 : index
    %c0_216 = arith.constant 0 : index
    %139 = vector.load %arg8[%c2_214, %c0_215, %c0_216] : memref<18x18x4xf32, #tpu.memory_space<vmem>>, vector<16x16x4xf32>
    %140 = vector.shape_cast %139 : vector<16x16x4xf32> to vector<256x4xf32>
    %c2_217 = arith.constant 2 : index
    %c0_218 = arith.constant 0 : index
    %c0_219 = arith.constant 0 : index
    %c0_220 = arith.constant 0 : index
    %141 = vector.load %arg4[%c2_217, %c0_218, %c0_219, %c0_220] : memref<3x3x4x4xf32, #tpu.memory_space<vmem>>, vector<1x1x4x4xf32>
    %142 = vector.shape_cast %141 : vector<1x1x4x4xf32> to vector<4x4xf32>
    %cst_221 = arith.constant dense<0.000000e+00> : vector<256x4xf32>
    %143 = tpu.matmul %140, %142, %cst_221 {dimension_numbers = #tpu.dot_dimension_numbers<[1], [0], [0], [1], [0, 0, 1, 1], [], []>} : vector<256x4xf32>, vector<4x4xf32>, vector<256x4xf32> -> vector<256x4xf32>
    %c0_222 = arith.constant 0 : index
    %c0_223 = arith.constant 0 : index
    %144 = vector.load %arg9[%c0_222, %c0_223] : memref<256x4xf32, #tpu.memory_space<vmem>>, vector<256x4xf32>
    %145 = arith.addf %144, %143 : vector<256x4xf32>
    %c0_224 = arith.constant 0 : index
    %c0_225 = arith.constant 0 : index
    %146 = vector.load %arg9[%c0_224, %c0_225] : memref<256x4xf32, #tpu.memory_space<vmem>>, vector<256x4xf32>
    tpu.vector_store %arg9[%c0_224, %c0_225], %145 {strides = array<i32>} : memref<256x4xf32, #tpu.memory_space<vmem>>, vector<256x4xf32>,
    %c2_226 = arith.constant 2 : index
    %c1_227 = arith.constant 1 : index
    %c0_228 = arith.constant 0 : index
    %147 = vector.load %arg8[%c2_226, %c1_227, %c0_228] : memref<18x18x4xf32, #tpu.memory_space<vmem>>, vector<16x16x4xf32>
    %148 = vector.shape_cast %147 : vector<16x16x4xf32> to vector<256x4xf32>
    %c2_229 = arith.constant 2 : index
    %c1_230 = arith.constant 1 : index
    %c0_231 = arith.constant 0 : index
    %c0_232 = arith.constant 0 : index
    %149 = vector.load %arg4[%c2_229, %c1_230, %c0_231, %c0_232] : memref<3x3x4x4xf32, #tpu.memory_space<vmem>>, vector<1x1x4x4xf32>
    %150 = vector.shape_cast %149 : vector<1x1x4x4xf32> to vector<4x4xf32>
    %cst_233 = arith.constant dense<0.000000e+00> : vector<256x4xf32>
    %151 = tpu.matmul %148, %150, %cst_233 {dimension_numbers = #tpu.dot_dimension_numbers<[1], [0], [0], [1], [0, 0, 1, 1], [], []>} : vector<256x4xf32>, vector<4x4xf32>, vector<256x4xf32> -> vector<256x4xf32>
    %c0_234 = arith.constant 0 : index
    %c0_235 = arith.constant 0 : index
    %152 = vector.load %arg9[%c0_234, %c0_235] : memref<256x4xf32, #tpu.memory_space<vmem>>, vector<256x4xf32>
    %153 = arith.addf %152, %151 : vector<256x4xf32>
    %c0_236 = arith.constant 0 : index
    %c0_237 = arith.constant 0 : index
    %154 = vector.load %arg9[%c0_236, %c0_237] : memref<256x4xf32, #tpu.memory_space<vmem>>, vector<256x4xf32>
    tpu.vector_store %arg9[%c0_236, %c0_237], %153 {strides = array<i32>} : memref<256x4xf32, #tpu.memory_space<vmem>>, vector<256x4xf32>,
    %c2_238 = arith.constant 2 : index
    %c2_239 = arith.constant 2 : index
    %c0_240 = arith.constant 0 : index
    %155 = vector.load %arg8[%c2_238, %c2_239, %c0_240] : memref<18x18x4xf32, #tpu.memory_space<vmem>>, vector<16x16x4xf32>
    %156 = vector.shape_cast %155 : vector<16x16x4xf32> to vector<256x4xf32>
    %c2_241 = arith.constant 2 : index
    %c2_242 = arith.constant 2 : index
    %c0_243 = arith.constant 0 : index
    %c0_244 = arith.constant 0 : index
    %157 = vector.load %arg4[%c2_241, %c2_242, %c0_243, %c0_244] : memref<3x3x4x4xf32, #tpu.memory_space<vmem>>, vector<1x1x4x4xf32>
    %158 = vector.shape_cast %157 : vector<1x1x4x4xf32> to vector<4x4xf32>
    %cst_245 = arith.constant dense<0.000000e+00> : vector<256x4xf32>
    %159 = tpu.matmul %156, %158, %cst_245 {dimension_numbers = #tpu.dot_dimension_numbers<[1], [0], [0], [1], [0, 0, 1, 1], [], []>} : vector<256x4xf32>, vector<4x4xf32>, vector<256x4xf32> -> vector<256x4xf32>
    %c0_246 = arith.constant 0 : index
    %c0_247 = arith.constant 0 : index
    %160 = vector.load %arg9[%c0_246, %c0_247] : memref<256x4xf32, #tpu.memory_space<vmem>>, vector<256x4xf32>
    %161 = arith.addf %160, %159 : vector<256x4xf32>
    %c0_248 = arith.constant 0 : index
    %c0_249 = arith.constant 0 : index
    %162 = vector.load %arg9[%c0_248, %c0_249] : memref<256x4xf32, #tpu.memory_space<vmem>>, vector<256x4xf32>
    tpu.vector_store %arg9[%c0_248, %c0_249], %161 {strides = array<i32>} : memref<256x4xf32, #tpu.memory_space<vmem>>, vector<256x4xf32>,
    %c0_250 = arith.constant 0 : index
    %c0_251 = arith.constant 0 : index
    %c0_252 = arith.constant 0 : index
    %c0_253 = arith.constant 0 : index
    %163 = vector.load %arg1[%c0_250, %c0_251, %c0_252, %c0_253] : memref<1x16x16x4xf32, #tpu.memory_space<vmem>>, vector<1x16x16x4xf32>
    %164 = vector.shape_cast %163 : vector<1x16x16x4xf32> to vector<16x16x4xf32>
    %165 = vector.shape_cast %164 : vector<16x16x4xf32> to vector<256x4xf32>
    %c0_254 = arith.constant 0 : index
    %c0_255 = arith.constant 0 : index
    %166 = vector.load %arg9[%c0_254, %c0_255] : memref<256x4xf32, #tpu.memory_space<vmem>>, vector<256x4xf32>
    %c0_256 = arith.constant 0 : index
    %c0_257 = arith.constant 0 : index
    %167 = vector.load %arg5[%c0_256, %c0_257] : memref<1x4xf32, #tpu.memory_space<vmem>>, vector<1x4xf32>
    %168 = vector.broadcast %167 : vector<1x4xf32> to vector<256x4xf32>
    %169 = arith.addf %166, %168 : vector<256x4xf32>
    %170 = arith.addf %169, %165 : vector<256x4xf32>
    %cst_258 = arith.constant 0.000000e+00 : f32
    %171 = vector.broadcast %cst_258 : f32 to vector<256x4xf32>
    %172 = arith.maximumf %170, %171 : vector<256x4xf32>
    %173 = vector.shape_cast %172 : vector<256x4xf32> to vector<1x256x4xf32>
    %c0_259 = arith.constant 0 : index
    %c0_260 = arith.constant 0 : index
    %c0_261 = arith.constant 0 : index
    %174 = vector.load %arg6[%c0_259, %c0_260, %c0_261] : memref<1x256x4xf32, #tpu.memory_space<vmem>>, vector<1x256x4xf32>
    tpu.vector_store %arg6[%c0_259, %c0_260, %c0_261], %173 {strides = array<i32>} : memref<1x256x4xf32, #tpu.memory_space<vmem>>, vector<1x256x4xf32>,
    return
  }
  func.func @transform_0(%arg0: i32) -> (i32, i32, i32, i32) {
    %c0_i32 = arith.constant 0 : i32
    %c0_i32_0 = arith.constant 0 : i32
    %c0_i32_1 = arith.constant 0 : i32
    %c0_i32_2 = arith.constant 0 : i32
    return %arg0, %c0_i32, %c0_i32_0, %c0_i32_1 : i32, i32, i32, i32
  }
  func.func @transform_1(%arg0: i32) -> (i32, i32, i32, i32) {
    %c0_i32 = arith.constant 0 : i32
    %c0_i32_0 = arith.constant 0 : i32
    %c0_i32_1 = arith.constant 0 : i32
    %c0_i32_2 = arith.constant 0 : i32
    %c0_i32_3 = arith.constant 0 : i32
    return %c0_i32, %c0_i32_0, %c0_i32_1, %c0_i32_2 : i32, i32, i32, i32
  }
  func.func @transform_2(%arg0: i32) -> (i32, i32) {
    %c0_i32 = arith.constant 0 : i32
    %c0_i32_0 = arith.constant 0 : i32
    %c0_i32_1 = arith.constant 0 : i32
    return %c0_i32, %c0_i32_0 : i32, i32
  }
  func.func @transform_3(%arg0: i32) -> (i32, i32, i32, i32) {
    %c0_i32 = arith.constant 0 : i32
    %c0_i32_0 = arith.constant 0 : i32
    %c0_i32_1 = arith.constant 0 : i32
    %c0_i32_2 = arith.constant 0 : i32
    %c0_i32_3 = arith.constant 0 : i32
    return %c0_i32, %c0_i32_0, %c0_i32_1, %c0_i32_2 : i32, i32, i32, i32
  }
  func.func @transform_4(%arg0: i32) -> (i32, i32) {
    %c0_i32 = arith.constant 0 : i32
    %c0_i32_0 = arith.constant 0 : i32
    %c0_i32_1 = arith.constant 0 : i32
    return %c0_i32, %c0_i32_0 : i32, i32
  }
  func.func @transform_5(%arg0: i32) -> (i32, i32, i32) {
    %c0_i32 = arith.constant 0 : i32
    %c0_i32_0 = arith.constant 0 : i32
    %c0_i32_1 = arith.constant 0 : i32
    return %arg0, %c0_i32, %c0_i32_0 : i32, i32, i32
  }
}

</mosaic_0001>

<bundles_post_ra>
// kernel: tpu_custom_call.1
= control target key start
LH: loop header
LB: loop body
LE: loop exit
PB: predicated region body
PF: predicated region fallthrough
CT: control target
= control target key end

     0   :  { %s10982_s18 = smov 0   ;;  %s13597_s0 = inlined_call_operand.vmem [shape: f32[2,16,16,4], index: 0, kind: input, shape index: {}]   ;;  %s13598_s1 = inlined_call_operand.vmem [shape: f32[3,3,4,4], index: 1, kind: input, shape index: {}]   ;;  %s13599_s2 = inlined_call_operand.vmem [shape: f32[1,4], index: 2, kind: input, shape index: {}]   ;;  %s13600_s3 = inlined_call_operand.vmem [shape: f32[3,3,4,4], index: 3, kind: input, shape index: {}]   ;;  %s13601_s4 = inlined_call_operand.vmem [shape: f32[1,4], index: 4, kind: input, shape index: {}]   ;;  %s13602_s5 = inlined_call_operand.vmem [shape: f32[2,256,4], index: 5, kind: output, shape index: {}]  }
   0x1 LB: > { %s8814_s19 = sadd.s32 4294967295, %s10949_s18   ;;  %p8818_p0 = scmp.ge.s32.totalorder %s10949_s18, 1  ;;  %s10949_s18 = sphi %s10982_s18, %s15_s18  }
   0x2   : > { %p187_p1 = scmp.lt.s32.totalorder %s10949_s18, 3 }
   0x4   : > { %p188_p2 = pnand %p8818_p0, %p187_p1 }
   0x6   : > { %191 = sbr.rel (%p188_p2) target bundleno = 1096 (0x448), region = 40 }
   0xd   : > { %v10993_v0 = vld [vmem:[%s13598_s1] sm:$0xf]  ;;  %vm465_vm0 = vcmask 1043456   ;;  %vm225_vm1 = vcmask 31744   ;;  %vm234_vm2 = vcmask 24576   ;;  %v10951_v1 = vmov 0.0  }
   0xe   : > { %10033 = vmatprep.subr.msk.mxu0 %vm465_vm0, %v10993_v0  ;;  %226 = vst.msk [vmem:[#allocation2] sm:$0xff] %vm225_vm1, %v10951_v1  ;;  %227 = vst.msk [vmem:[#allocation2 + $0x8] sm:$0xff] %vm225_vm1, %v10951_v1  ;;  %v8890_v2 = vld [vmem:[%s13598_s1 + $0x8] sm:$0xf]  ;;  %p11146_p3 = scmp.lt.s32.totalorder %s8814_s19, 1  ;;  %vm228_vm3 = vcmask 25600  }
   0xf   : > { %231 = vst.msk [vmem:[#allocation2 + $0x198] sm:$0xff] %vm225_vm1, %v10951_v1  ;;  %232 = vst.msk [vmem:[#allocation2 + $0x1a0] sm:$0xff] %vm225_vm1, %v10951_v1  ;;  %v8856_v3 = vld [vmem:[%s13598_s1 + $0x4] sm:$0xf]  ;;  %10034 = vmatpush3.msk.msra.mxu0 %vm465_vm0, %v10993_v0  ;;  %v8924_v4 = vld [vmem:[%s13598_s1 + $0xc] sm:$0xf] }
  0x10   : > { %236 = vst.msk [vmem:[#allocation2 + $0x18] sm:$0x1] %vm234_vm2, %v10951_v1  ;;  %237 = vst.msk [vmem:[#allocation2 + $0x30] sm:$0x1] %vm234_vm2, %v10951_v1  ;;  %10083 = vmatprep.subr.msk.mxu1 %vm465_vm0, %v8856_v3  ;;  %10133 = vmatprep.subr.msk.mxu0 %vm465_vm0, %v8890_v2  ;;  %s13769_s19 = smov (!%p11146_p3, %s8814_s19), 1 }
  0x11   : > { %238 = vst.msk [vmem:[#allocation2 + $0x48] sm:$0x1] %vm234_vm2, %v10951_v1  ;;  %239 = vst.msk [vmem:[#allocation2 + $0x60] sm:$0x1] %vm234_vm2, %v10951_v1  ;;  %10084 = vmatpush3.msk.msra.mxu1 %vm465_vm0, %v8856_v3  ;;  %s9437_s29 = sshll.u32 %s13769_s19, 8 }
  0x12   : > { %240 = vst.msk [vmem:[#allocation2 + $0x78] sm:$0x1] %vm234_vm2, %v10951_v1  ;;  %241 = vst.msk [vmem:[#allocation2 + $0x90] sm:$0x1] %vm234_vm2, %v10951_v1  ;;  %10183 = vmatprep.subr.msk.mxu1 %vm465_vm0, %v8924_v4  ;;  %s11194_s7 = scalar_lea.vmem %s13597_s0, %s9437_s29  ;;  %v11202_v8 = vld [vmem:[%s13598_s1 + $0x14] sm:$0xf]  ;;  %s13442_s25 = scalar_lea.vmem %s13602_s5, %s9437_s29 }
  0x13   : > { %242 = vst.msk [vmem:[#allocation2 + $0xa8] sm:$0x1] %vm234_vm2, %v10951_v1  ;;  %243 = vst.msk [vmem:[#allocation2 + $0xc0] sm:$0x1] %vm234_vm2, %v10951_v1  ;;  %v271_v5 = vld [vmem:[%s11194_s7] sm:$0xff]  ;;  %v272_v6 = vld [vmem:[%s11194_s7 + $0x8] sm:$0xff] }
  0x14   : > { %244 = vst.msk [vmem:[#allocation2 + $0xd8] sm:$0x1] %vm234_vm2, %v10951_v1  ;;  %245 = vst.msk [vmem:[#allocation2 + $0xf0] sm:$0x1] %vm234_vm2, %v10951_v1  ;;  %v273_v7 = vld [vmem:[%s11194_s7 + $0x10] sm:$0xff]  ;;  %v274_v11 = vld [vmem:[%s11194_s7 + $0x18] sm:$0xff] }
  0x15   : > { %246 = vst.msk [vmem:[#allocation2 + $0x108] sm:$0x1] %vm234_vm2, %v10951_v1  ;;  %247 = vst.msk [vmem:[#allocation2 + $0x120] sm:$0x1] %vm234_vm2, %v10951_v1  ;;  %v337_v9 = vld [vmem:[#allocation2 + $0x8] sm:$0xff]  ;;  %v275_v15 = vld [vmem:[%s11194_s7 + $0x20] sm:$0xff] }
  0x16   : > { %248 = vst.msk [vmem:[#allocation2 + $0x138] sm:$0x1] %vm234_vm2, %v10951_v1  ;;  %249 = vst.msk [vmem:[#allocation2 + $0x150] sm:$0x1] %vm234_vm2, %v10951_v1  ;;  %v726_v10 = vld [vmem:[#allocation2 + $0x1] sm:$0xff]  ;;  %v277_v17 = vld [vmem:[%s11194_s7 + $0x30] sm:$0xff] }
  0x17   : > { %250 = vst.msk [vmem:[#allocation2 + $0x168] sm:$0x1] %vm234_vm2, %v10951_v1  ;;  %251 = vst.msk [vmem:[#allocation2 + $0x180] sm:$0x1] %vm234_vm2, %v10951_v1  ;;  %v11211_v12 = vld [vmem:[%s13598_s1 + $0x10] sm:$0xf]  ;;  %10085 = vmatprep.mubr.msk.f32.mxu1 %vm225_vm1, %v726_v10 }
  0x18   : > { %254 = vst.msk [vmem:[#allocation2 + $0x29] sm:$0x1] %vm234_vm2, %v10951_v1  ;;  %255 = vst.msk [vmem:[#allocation2 + $0x41] sm:$0x1] %vm234_vm2, %v10951_v1  ;;  %v276_v16 = vld [vmem:[%s11194_s7 + $0x28] sm:$0xff]  ;;  %v278_v18 = vld [vmem:[%s11194_s7 + $0x38] sm:$0xff] }
  0x19   : > { %256 = vst.msk [vmem:[#allocation2 + $0x59] sm:$0x1] %vm234_vm2, %v10951_v1  ;;  %257 = vst.msk [vmem:[#allocation2 + $0x71] sm:$0x1] %vm234_vm2, %v10951_v1  ;;  %v279_v19 = vld [vmem:[%s11194_s7 + $0x40] sm:$0xff]  ;;  %v280_v20 = vld [vmem:[%s11194_s7 + $0x48] sm:$0xff] }
  0x1a   : > { %258 = vst.msk [vmem:[#allocation2 + $0x89] sm:$0x1] %vm234_vm2, %v10951_v1  ;;  %259 = vst.msk [vmem:[#allocation2 + $0xa1] sm:$0x1] %vm234_vm2, %v10951_v1  ;;  %v281_v21 = vld [vmem:[%s11194_s7 + $0x50] sm:$0xff]  ;;  %v282_v22 = vld [vmem:[%s11194_s7 + $0x58] sm:$0xff] }
  0x1b   : > { %260 = vst.msk [vmem:[#allocation2 + $0xb9] sm:$0x1] %vm234_vm2, %v10951_v1  ;;  %261 = vst.msk [vmem:[#allocation2 + $0xd1] sm:$0x1] %vm234_vm2, %v10951_v1  ;;  %v283_v23 = vld [vmem:[%s11194_s7 + $0x60] sm:$0xff]  ;;  %v284_v24 = vld [vmem:[%s11194_s7 + $0x68] sm:$0xff] }
  0x1c   : > { %262 = vst.msk [vmem:[#allocation2 + $0xe9] sm:$0x1] %vm234_vm2, %v10951_v1  ;;  %263 = vst.msk [vmem:[#allocation2 + $0x101] sm:$0x1] %vm234_vm2, %v10951_v1  ;;  %v285_v25 = vld [vmem:[%s11194_s7 + $0x70] sm:$0xff]  ;;  %v286_v26 = vld [vmem:[%s11194_s7 + $0x78] sm:$0xff] }
  0x1d   : > { %264 = vst.msk [vmem:[#allocation2 + $0x119] sm:$0x1] %vm234_vm2, %v10951_v1  ;;  %265 = vst.msk [vmem:[#allocation2 + $0x131] sm:$0x1] %vm234_vm2, %v10951_v1  ;;  %v287_v27 = vld [vmem:[%s11194_s7 + $0x80] sm:$0xff]  ;;  %v288_v28 = vld [vmem:[%s11194_s7 + $0x88] sm:$0xff] }
  0x1e   : > { %266 = vst.msk [vmem:[#allocation2 + $0x149] sm:$0x1] %vm234_vm2, %v10951_v1  ;;  %267 = vst.msk [vmem:[#allocation2 + $0x161] sm:$0x1] %vm234_vm2, %v10951_v1  ;;  %v289_v29 = vld [vmem:[%s11194_s7 + $0x90] sm:$0xff]  ;;  %v290_v30 = vld [vmem:[%s11194_s7 + $0x98] sm:$0xff] }
  0x1f   : > { %268 = vst.msk [vmem:[#allocation2 + $0x179] sm:$0x1] %vm234_vm2, %v10951_v1  ;;  %269 = vst.msk [vmem:[#allocation2 + $0x191] sm:$0x1] %vm234_vm2, %v10951_v1  ;;  %v291_v48 = vld [vmem:[%s11194_s7 + $0xa0] sm:$0xff]  ;;  %v292_v49 = vld [vmem:[%s11194_s7 + $0xa8] sm:$0xff] }
  0x20   : > { %4462 = vst.msk [vmem:[#allocation3] sm:$0xff] %vm225_vm1, %v10951_v1  ;;  %4463 = vst.msk [vmem:[#allocation3 + $0x8] sm:$0xff] %vm225_vm1, %v10951_v1  ;;  %v293_v52 = vld [vmem:[%s11194_s7 + $0xb0] sm:$0xff]  ;;  %v294_v54 = vld [vmem:[%s11194_s7 + $0xb8] sm:$0xff] }
  0x21   : > { %4466 = vst.msk [vmem:[#allocation3 + $0x198] sm:$0xff] %vm225_vm1, %v10951_v1  ;;  %4467 = vst.msk [vmem:[#allocation3 + $0x1a0] sm:$0xff] %vm225_vm1, %v10951_v1  ;;  %v295_v55 = vld [vmem:[%s11194_s7 + $0xc0] sm:$0xff]  ;;  %v296_v56 = vld [vmem:[%s11194_s7 + $0xc8] sm:$0xff] }
  0x22   : > { %4470 = vst.msk [vmem:[#allocation3 + $0x18] sm:$0x1] %vm234_vm2, %v10951_v1  ;;  %4471 = vst.msk [vmem:[#allocation3 + $0x30] sm:$0x1] %vm234_vm2, %v10951_v1  ;;  %v297_v57 = vld [vmem:[%s11194_s7 + $0xd0] sm:$0xff]  ;;  %v298_v58 = vld [vmem:[%s11194_s7 + $0xd8] sm:$0xff] }
  0x23   : > { %4472 = vst.msk [vmem:[#allocation3 + $0x48] sm:$0x1] %vm234_vm2, %v10951_v1  ;;  %4473 = vst.msk [vmem:[#allocation3 + $0x60] sm:$0x1] %vm234_vm2, %v10951_v1  ;;  %v299_v60 = vld [vmem:[%s11194_s7 + $0xe0] sm:$0xff]  ;;  %v300_v61 = vld [vmem:[%s11194_s7 + $0xe8] sm:$0xff] }
  0x24   : > { %4474 = vst.msk [vmem:[#allocation3 + $0x78] sm:$0x1] %vm234_vm2, %v10951_v1  ;;  %4475 = vst.msk [vmem:[#allocation3 + $0x90] sm:$0x1] %vm234_vm2, %v10951_v1 }
  0x25   : > { %4476 = vst.msk [vmem:[#allocation3 + $0xa8] sm:$0x1] %vm234_vm2, %v10951_v1  ;;  %4477 = vst.msk [vmem:[#allocation3 + $0xc0] sm:$0x1] %vm234_vm2, %v10951_v1 }
  0x26   : > { %4478 = vst.msk [vmem:[#allocation3 + $0xd8] sm:$0x1] %vm234_vm2, %v10951_v1  ;;  %4479 = vst.msk [vmem:[#allocation3 + $0xf0] sm:$0x1] %vm234_vm2, %v10951_v1 }
  0x27   : > { %4480 = vst.msk [vmem:[#allocation3 + $0x108] sm:$0x1] %vm234_vm2, %v10951_v1  ;;  %4481 = vst.msk [vmem:[#allocation3 + $0x120] sm:$0x1] %vm234_vm2, %v10951_v1 }
  0x28   : > { %4482 = vst.msk [vmem:[#allocation3 + $0x138] sm:$0x1] %vm234_vm2, %v10951_v1  ;;  %4483 = vst.msk [vmem:[#allocation3 + $0x150] sm:$0x1] %vm234_vm2, %v10951_v1 }
  0x29   : > { %4484 = vst.msk [vmem:[#allocation3 + $0x168] sm:$0x1] %vm234_vm2, %v10951_v1  ;;  %4485 = vst.msk [vmem:[#allocation3 + $0x180] sm:$0x1] %vm234_vm2, %v10951_v1 }
  0x2a   : > { %4488 = vst.msk [vmem:[#allocation3 + $0x29] sm:$0x1] %vm234_vm2, %v10951_v1  ;;  %4489 = vst.msk [vmem:[#allocation3 + $0x41] sm:$0x1] %vm234_vm2, %v10951_v1 }
  0x2b   : > { %4490 = vst.msk [vmem:[#allocation3 + $0x59] sm:$0x1] %vm234_vm2, %v10951_v1  ;;  %4491 = vst.msk [vmem:[#allocation3 + $0x71] sm:$0x1] %vm234_vm2, %v10951_v1 }
  0x2c   : > { %4492 = vst.msk [vmem:[#allocation3 + $0x89] sm:$0x1] %vm234_vm2, %v10951_v1  ;;  %4493 = vst.msk [vmem:[#allocation3 + $0xa1] sm:$0x1] %vm234_vm2, %v10951_v1 }
  0x2d   : > { %4494 = vst.msk [vmem:[#allocation3 + $0xb9] sm:$0x1] %vm234_vm2, %v10951_v1  ;;  %4495 = vst.msk [vmem:[#allocation3 + $0xd1] sm:$0x1] %vm234_vm2, %v10951_v1 }
  0x2e   : > { %4496 = vst.msk [vmem:[#allocation3 + $0xe9] sm:$0x1] %vm234_vm2, %v10951_v1  ;;  %4497 = vst.msk [vmem:[#allocation3 + $0x101] sm:$0x1] %vm234_vm2, %v10951_v1 }
  0x2f   : > { %4498 = vst.msk [vmem:[#allocation3 + $0x119] sm:$0x1] %vm234_vm2, %v10951_v1  ;;  %4499 = vst.msk [vmem:[#allocation3 + $0x131] sm:$0x1] %vm234_vm2, %v10951_v1 }
  0x30   : > { %4500 = vst.msk [vmem:[#allocation3 + $0x149] sm:$0x1] %vm234_vm2, %v10951_v1  ;;  %4501 = vst.msk [vmem:[#allocation3 + $0x161] sm:$0x1] %vm234_vm2, %v10951_v1 }
  0x31   : > { %4502 = vst.msk [vmem:[#allocation3 + $0x179] sm:$0x1] %vm234_vm2, %v10951_v1  ;;  %4503 = vst.msk [vmem:[#allocation3 + $0x191] sm:$0x1] %vm234_vm2, %v10951_v1 }
  0x32   : > { %235 = vst.msk [vmem:[#allocation2] sm:$0x1] %vm234_vm2, %v10951_v1  ;;  %252 = vst.msk [vmem:[#allocation2 + $0x198] sm:$0x1] %vm234_vm2, %v10951_v1 }
  0x33   : > { %4469 = vst.msk [vmem:[#allocation3] sm:$0x1] %vm234_vm2, %v10951_v1  ;;  %4486 = vst.msk [vmem:[#allocation3 + $0x198] sm:$0x1] %vm234_vm2, %v10951_v1 }
  0x34   : > { %229 = vst.msk [vmem:[#allocation2 + $0x10] sm:$0x3] %vm228_vm3, %v10951_v1  ;;  %233 = vst.msk [vmem:[#allocation2 + $0x1a8] sm:$0x3] %vm228_vm3, %v10951_v1 }
  0x35   : > { %4464 = vst.msk [vmem:[#allocation3 + $0x10] sm:$0x3] %vm228_vm3, %v10951_v1  ;;  %4468 = vst.msk [vmem:[#allocation3 + $0x1a8] sm:$0x3] %vm228_vm3, %v10951_v1 }
  0x36   : > { %253 = vst.msk [vmem:[#allocation2 + $0x11] sm:$0x1] %vm234_vm2, %v10951_v1  ;;  %270 = vst.msk [vmem:[#allocation2 + $0x1a9] sm:$0x1] %vm234_vm2, %v10951_v1 }
  0x37   : > { %4487 = vst.msk [vmem:[#allocation3 + $0x11] sm:$0x1] %vm234_vm2, %v10951_v1  ;;  %4504 = vst.msk [vmem:[#allocation3 + $0x1a9] sm:$0x1] %vm234_vm2, %v10951_v1 }
  0x38   : > { %304 = vst.msk [vmem:[#allocation2 + $0x19] sm:$0xff] %vm225_vm1, %v271_v5  ;;  %305 = vst.msk [vmem:[#allocation2 + $0x21] sm:$0xff] %vm225_vm1, %v272_v6 }
  0x39   : > { %306 = vst.msk [vmem:[#allocation2 + $0x31] sm:$0xff] %vm225_vm1, %v273_v7  ;;  %v336_v13 = vld [vmem:[#allocation2] sm:$0xff]  ;;  %307 = vst.msk [vmem:[#allocation2 + $0x39] sm:$0xff] %vm225_vm1, %v274_v11 }
  0x3a   : > { %10035 = vmatprep.mubr.msk.f32.mxu0 %vm225_vm1, %v336_v13  ;;  %308 = vst.msk [vmem:[#allocation2 + $0x49] sm:$0xff] %vm225_vm1, %v275_v15  ;;  %309 = vst.msk [vmem:[#allocation2 + $0x51] sm:$0xff] %vm225_vm1, %v276_v16 }
  0x3b   : > { %v727_v14 = vld [vmem:[#allocation2 + $0x9] sm:$0xff]  ;;  %10036 = vmatmul.mubr.msk.f32.vlgmr.msra.gmra.mrb[0].mxu0 %vm225_vm1, %v337_v9  ;;  %310 = vst.msk [vmem:[#allocation2 + $0x61] sm:$0xff] %vm225_vm1, %v277_v17  ;;  %311 = vst.msk [vmem:[#allocation2 + $0x69] sm:$0xff] %vm225_vm1, %v278_v18  ;;  %v302_v18 = vld [vmem:[%s11194_s7 + $0xf8] sm:$0xff] }
  0x3c   : > { %10086 = vmatmul.mubr.msk.f32.vlgmr.msra.gmra.mrb[0].mxu1 %vm225_vm1, %v727_v14  ;;  %10134 = vmatpush3.msk.msra.mxu0 %vm465_vm0, %v8890_v2  ;;  %312 = vst.msk [vmem:[#allocation2 + $0x79] sm:$0xff] %vm225_vm1, %v279_v19  ;;  %313 = vst.msk [vmem:[#allocation2 + $0x81] sm:$0xff] %vm225_vm1, %v280_v20  ;;  %v301_v17 = vld [vmem:[%s11194_s7 + $0xf0] sm:$0xff] }
  0x3d   : > { %10184 = vmatpush3.msk.msra.mxu1 %vm465_vm0, %v8924_v4  ;;  %314 = vst.msk [vmem:[#allocation2 + $0x91] sm:$0xff] %vm225_vm1, %v281_v21  ;;  %315 = vst.msk [vmem:[#allocation2 + $0x99] sm:$0xff] %vm225_vm1, %v282_v22  ;;  %10233 = vmatprep.subr.msk.mxu0 %vm465_vm0, %v11211_v12 }
  0x3e   : > { %10283 = vmatprep.subr.msk.mxu1 %vm465_vm0, %v11202_v8  ;;  %316 = vst.msk [vmem:[#allocation2 + $0xa9] sm:$0xff] %vm225_vm1, %v283_v23  ;;  %317 = vst.msk [vmem:[#allocation2 + $0xb1] sm:$0xff] %vm225_vm1, %v284_v24 }
  0x3f   : > { %318 = vst.msk [vmem:[#allocation2 + $0xc1] sm:$0xff] %vm225_vm1, %v285_v25  ;;  %319 = vst.msk [vmem:[#allocation2 + $0xc9] sm:$0xff] %vm225_vm1, %v286_v26  ;;  %v11253_v31 = vld [vmem:[#allocation2 + $0x18] sm:$0xff]  ;;  %v11255_v32 = vld [vmem:[#allocation2 + $0x20] sm:$0xff] }
  0x40   : > { %320 = vst.msk [vmem:[#allocation2 + $0xd9] sm:$0xff] %vm225_vm1, %v287_v27  ;;  %v11257_v33 = vld [vmem:[#allocation2 + $0x30] sm:$0xff]  ;;  %321 = vst.msk [vmem:[#allocation2 + $0xe1] sm:$0xff] %vm225_vm1, %v288_v28  ;;  %10038 = vmatprep.mubr.msk.f32.mxu0 %vm225_vm1, %v11253_v31  ;;  %v11264_v34 = vld [vmem:[#allocation2 + $0x19] sm:$0xff] }
  0x41   : > { %322 = vst.msk [vmem:[#allocation2 + $0xf1] sm:$0xff] %vm225_vm1, %v289_v29  ;;  %323 = vst.msk [vmem:[#allocation2 + $0xf9] sm:$0xff] %vm225_vm1, %v290_v30  ;;  %v11266_v35 = vld [vmem:[#allocation2 + $0x21] sm:$0xff]  ;;  %10039 = vmatmul.mubr.msk.f32.gmra.mrb[2].mxu0 %vm225_vm1, %v11255_v32  ;;  %10088 = vmatprep.mubr.msk.f32.mxu1 %vm225_vm1, %v11264_v34  ;;  %v11272_v36 = vld [vmem:[#allocation2 + $0x31] sm:$0xff] }
  0x42   : > { %10041 = vmatprep.mubr.msk.f32.mxu0 %vm225_vm1, %v11257_v33  ;;  %v11276_v37 = vld [vmem:[#allocation2 + $0x38] sm:$0xff]  ;;  %10089 = vmatmul.mubr.msk.f32.gmra.mrb[2].mxu1 %vm225_vm1, %v11266_v35  ;;  %v11280_v38 = vld [vmem:[#allocation2 + $0x48] sm:$0xff]  ;;  %v11292_v41 = vld [vmem:[#allocation2 + $0x50] sm:$0xff]  ;;  %324 = vst.msk [vmem:[#allocation2 + $0x109] sm:$0xff] %vm225_vm1, %v291_v48 }
  0x43   : > { %13664 = vst [vmem:[#allocation5_spill] sm:$0xff] %v11276_v37  ;;  %13665 = vst [vmem:[#allocation6_spill] sm:$0xff] %v11280_v38  ;;  %10091 = vmatprep.mubr.msk.f32.mxu1 %vm225_vm1, %v11272_v36  ;;  %v11284_v39 = vld [vmem:[#allocation2 + $0x39] sm:$0xff]  ;;  %v11286_v40 = vld [vmem:[#allocation2 + $0x49] sm:$0xff] }
  0x44   : > { %13666 = vst [vmem:[#allocation7_spill] sm:$0xff] %v11292_v41  ;;  %v11296_v42 = vld [vmem:[#allocation2 + $0x60] sm:$0xff]  ;;  %v11300_v43 = vld [vmem:[#allocation2 + $0x51] sm:$0xff]  ;;  %v11308_v45 = vld [vmem:[#allocation2 + $0x68] sm:$0xff] }
  0x45   : > { %10042 = vmatmul.mubr.msk.f32.gmra.mrb[4].mxu0 %vm225_vm1, %v11276_v37  ;;  %13667 = vst [vmem:[#allocation8_spill] sm:$0xff] %v11296_v42  ;;  %v11302_v44 = vld [vmem:[#allocation2 + $0x61] sm:$0xff]  ;;  %13668 = vst [vmem:[#allocation9_spill] sm:$0xff] %v11308_v45  ;;  %v11310_v46 = vld [vmem:[#allocation2 + $0x78] sm:$0xff] }
  0x46   : > { %10044 = vmatprep.mubr.msk.f32.mxu0 %vm225_vm1, %v11280_v38  ;;  %10092 = vmatmul.mubr.msk.f32.gmra.mrb[4].mxu1 %vm225_vm1, %v11284_v39  ;;  %13669 = vst [vmem:[#allocation10_spill] sm:$0xff] %v11310_v46  ;;  %v11316_v47 = vld [vmem:[#allocation2 + $0x69] sm:$0xff]  ;;  %v11320_v50 = vld [vmem:[#allocation2 + $0x80] sm:$0xff]  ;;  %325 = vst.msk [vmem:[#allocation2 + $0x111] sm:$0xff] %vm225_vm1, %v292_v49 }
  0x47   : > { %10094 = vmatprep.mubr.msk.f32.mxu1 %vm225_vm1, %v11286_v40  ;;  %13670 = vst [vmem:[#allocation11_spill] sm:$0xff] %v11320_v50  ;;  %v11322_v51 = vld [vmem:[#allocation2 + $0x79] sm:$0xff]  ;;  %v11329_v53 = vld [vmem:[#allocation2 + $0x90] sm:$0xff]  ;;  %326 = vst.msk [vmem:[#allocation2 + $0x121] sm:$0xff] %vm225_vm1, %v293_v52 }
  0x48   : > { %13671 = vst [vmem:[#allocation12_spill] sm:$0xff] %v11329_v53  ;;  %327 = vst.msk [vmem:[#allocation2 + $0x129] sm:$0xff] %vm225_vm1, %v294_v54  ;;  %v11345_v59 = vld [vmem:[#allocation2 + $0x81] sm:$0xff]  ;;  %v11352_v62 = vld [vmem:[#allocation2 + $0x91] sm:$0xff] }
  0x49   : > { %10045 = vmatmul.mubr.msk.f32.gmra.mrb[6].mxu0 %vm225_vm1, %v11292_v41  ;;  %328 = vst.msk [vmem:[#allocation2 + $0x139] sm:$0xff] %vm225_vm1, %v295_v55  ;;  %329 = vst.msk [vmem:[#allocation2 + $0x141] sm:$0xff] %vm225_vm1, %v296_v56  ;;  %v11360_v63 = vld [vmem:[#allocation2 + $0x98] sm:$0xff]  ;;  %v11364_v0 = vld [vmem:[#allocation2 + $0xa8] sm:$0xff] }
  0x4a   : > { %10047 = vmatprep.mubr.msk.f32.mxu0 %vm225_vm1, %v11296_v42  ;;  %10095 = vmatmul.mubr.msk.f32.gmra.mrb[6].mxu1 %vm225_vm1, %v11300_v43  ;;  %330 = vst.msk [vmem:[#allocation2 + $0x151] sm:$0xff] %vm225_vm1, %v297_v57  ;;  %331 = vst.msk [vmem:[#allocation2 + $0x159] sm:$0xff] %vm225_vm1, %v298_v58  ;;  %v11368_v1 = vld [vmem:[#allocation2 + $0x99] sm:$0xff]  ;;  %v11370_v2 = vld [vmem:[#allocation2 + $0xa9] sm:$0xff] }
  0x4b   : > { %10097 = vmatprep.mubr.msk.f32.mxu1 %vm225_vm1, %v11302_v44  ;;  %332 = vst.msk [vmem:[#allocation2 + $0x169] sm:$0xff] %vm225_vm1, %v299_v60  ;;  %333 = vst.msk [vmem:[#allocation2 + $0x171] sm:$0xff] %vm225_vm1, %v300_v61  ;;  %v11376_v3 = vld [vmem:[#allocation2 + $0xb0] sm:$0xff]  ;;  %v11380_v4 = vld [vmem:[#allocation2 + $0xc0] sm:$0xff] }
  0x4c   : > { %13672 = vst [vmem:[#allocation13_spill] sm:$0xff] %v11360_v63  ;;  %13673 = vst [vmem:[#allocation14_spill] sm:$0xff] %v11364_v0  ;;  %v11384_v5 = vld [vmem:[#allocation2 + $0xb1] sm:$0xff]  ;;  %v11386_v6 = vld [vmem:[#allocation2 + $0xc1] sm:$0xff] }
  0x4d   : > { %10048 = vmatmul.mubr.msk.f32.gmra.mrb[8].mxu0 %vm225_vm1, %v11308_v45  ;;  %13674 = vst [vmem:[#allocation15_spill] sm:$0xff] %v11376_v3  ;;  %13675 = vst [vmem:[#allocation16_spill] sm:$0xff] %v11380_v4  ;;  %v11392_v7 = vld [vmem:[#allocation2 + $0xc8] sm:$0xff]  ;;  %v11396_v9 = vld [vmem:[#allocation2 + $0xd8] sm:$0xff] }
  0x4e   : > { %10050 = vmatprep.mubr.msk.f32.mxu0 %vm225_vm1, %v11310_v46  ;;  %10098 = vmatmul.mubr.msk.f32.gmra.mrb[8].mxu1 %vm225_vm1, %v11316_v47  ;;  %13676 = vst [vmem:[#allocation17_spill] sm:$0xff] %v11392_v7  ;;  %13677 = vst [vmem:[#allocation18_spill] sm:$0xff] %v11396_v9  ;;  %v11400_v10 = vld [vmem:[#allocation2 + $0xc9] sm:$0xff]  ;;  %v11402_v11 = vld [vmem:[#allocation2 + $0xd9] sm:$0xff] }
  0x4f   : > { %10100 = vmatprep.mubr.msk.f32.mxu1 %vm225_vm1, %v11322_v51  ;;  %v11408_v13 = vld [vmem:[#allocation2 + $0xe0] sm:$0xff]  ;;  %v11412_v14 = vld [vmem:[#allocation2 + $0xf0] sm:$0xff]  ;;  %v11426_v19 = vld [vmem:[#allocation2 + $0xf8] sm:$0xff]  ;;  %334 = vst.msk [vmem:[#allocation2 + $0x181] sm:$0xff] %vm225_vm1, %v301_v17 }
  0x50   : > { %13678 = vst [vmem:[#allocation19_spill] sm:$0xff] %v11408_v13  ;;  %13679 = vst [vmem:[#allocation20_spill] sm:$0xff] %v11412_v14  ;;  %v11416_v15 = vld [vmem:[#allocation2 + $0xe1] sm:$0xff]  ;;  %v11418_v16 = vld [vmem:[#allocation2 + $0xf1] sm:$0xff] }
  0x51   : > { %10051 = vmatmul.mubr.msk.f32.gmra.mrb[10].mxu0 %vm225_vm1, %v11320_v50  ;;  %13680 = vst [vmem:[#allocation21_spill] sm:$0xff] %v11426_v19  ;;  %335 = vst.msk [vmem:[#allocation2 + $0x189] sm:$0xff] %vm225_vm1, %v302_v18  ;;  %v11432_v20 = vld [vmem:[#allocation2 + $0x108] sm:$0xff]  ;;  %v11436_v21 = vld [vmem:[#allocation2 + $0xf9] sm:$0xff] }
  0x52   : > { %10053 = vmatprep.mubr.msk.f32.mxu0 %vm225_vm1, %v11329_v53  ;;  %10101 = vmatmul.mubr.msk.f32.gmra.mrb[10].mxu1 %vm225_vm1, %v11345_v59  ;;  %13681 = vst [vmem:[#allocation22_spill] sm:$0xff] %v11432_v20  ;;  %v11438_v22 = vld [vmem:[#allocation2 + $0x109] sm:$0xff]  ;;  %v11448_v24 = vld [vmem:[#allocation2 + $0x120] sm:$0xff]  ;;  %v11452_v25 = vld [vmem:[#allocation2 + $0x111] sm:$0xff] }
  0x53   : > { %10103 = vmatprep.mubr.msk.f32.mxu1 %vm225_vm1, %v11352_v62  ;;  %v11444_v23 = vld [vmem:[#allocation2 + $0x110] sm:$0xff]  ;;  %13683 = vst [vmem:[#allocation24_spill] sm:$0xff] %v11448_v24  ;;  %v11454_v26 = vld [vmem:[#allocation2 + $0x121] sm:$0xff]  ;;  %v11464_v28 = vld [vmem:[#allocation2 + $0x138] sm:$0xff] }
  0x54   : > { %13682 = vst [vmem:[#allocation23_spill] sm:$0xff] %v11444_v23  ;;  %v11460_v27 = vld [vmem:[#allocation2 + $0x128] sm:$0xff]  ;;  %13685 = vst [vmem:[#allocation26_spill] sm:$0xff] %v11464_v28  ;;  %v11470_v30 = vld [vmem:[#allocation2 + $0x139] sm:$0xff] }
  0x55   : > { %10054 = vmatmul.mubr.msk.f32.gmra.mrb[12].mxu0 %vm225_vm1, %v11360_v63  ;;  %13684 = vst [vmem:[#allocation25_spill] sm:$0xff] %v11460_v27  ;;  %v11468_v29 = vld [vmem:[#allocation2 + $0x129] sm:$0xff]  ;;  %v11476_v48 = vld [vmem:[#allocation2 + $0x140] sm:$0xff]  ;;  %v11486_v54 = vld [vmem:[#allocation2 + $0x151] sm:$0xff] }
  0x56   : > { %10056 = vmatprep.mubr.msk.f32.mxu0 %vm225_vm1, %v11364_v0  ;;  %10104 = vmatmul.mubr.msk.f32.gmra.mrb[12].mxu1 %vm225_vm1, %v11368_v1  ;;  %13686 = vst [vmem:[#allocation27_spill] sm:$0xff] %v11476_v48  ;;  %v11480_v49 = vld [vmem:[#allocation2 + $0x150] sm:$0xff]  ;;  %v11484_v52 = vld [vmem:[#allocation2 + $0x141] sm:$0xff]  ;;  %13688 = vst [vmem:[#allocation29_spill] sm:$0xff] %v11486_v54 }
  0x57   : > { %10106 = vmatprep.mubr.msk.f32.mxu1 %vm225_vm1, %v11370_v2  ;;  %13687 = vst [vmem:[#allocation28_spill] sm:$0xff] %v11480_v49  ;;  %v11492_v55 = vld [vmem:[#allocation2 + $0x158] sm:$0xff]  ;;  %v11496_v56 = vld [vmem:[#allocation2 + $0x168] sm:$0xff]  ;;  %v11508_v60 = vld [vmem:[#allocation2 + $0x170] sm:$0xff] }
  0x58   : > { %13689 = vst [vmem:[#allocation30_spill] sm:$0xff] %v11492_v55  ;;  %v11500_v57 = vld [vmem:[#allocation2 + $0x159] sm:$0xff]  ;;  %v11502_v58 = vld [vmem:[#allocation2 + $0x169] sm:$0xff]  ;;  %13691 = vst [vmem:[#allocation32_spill] sm:$0xff] %v11508_v60 }
  0x59   : > { %10057 = vmatmul.mubr.msk.f32.gmra.mrb[14].mxu0 %vm225_vm1, %v11376_v3  ;;  %13690 = vst [vmem:[#allocation31_spill] sm:$0xff] %v11502_v58  ;;  %v1180_v61 = vld [vmem:[#allocation2 + $0x2] sm:$0xff]  ;;  %v11514_v17 = vld [vmem:[#allocation2 + $0x171] sm:$0xff] }
  0x5a   : > { %10059 = vmatprep.mubr.msk.f32.mxu0 %vm225_vm1, %v11380_v4  ;;  %10107 = vmatmul.mubr.msk.f32.gmra.mrb[14].mxu1 %vm225_vm1, %v11384_v5  ;;  %13692 = vst [vmem:[#allocation33_spill] sm:$0xff] %v11514_v17  ;;  %v1181_v18 = vld [vmem:[#allocation2 + $0xa] sm:$0xff] }
  0x5b   : > { %10109 = vmatprep.mubr.msk.f32.mxu1 %vm225_vm1, %v11386_v6 }
  0x5d   : > { %10060 = vmatmul.mubr.msk.f32.gmra.mrb[16].mxu0 %vm225_vm1, %v11392_v7 }
  0x5e   : > { %10062 = vmatprep.mubr.msk.f32.mxu0 %vm225_vm1, %v11396_v9  ;;  %10110 = vmatmul.mubr.msk.f32.gmra.mrb[16].mxu1 %vm225_vm1, %v11400_v10 }
  0x5f   : > { %10112 = vmatprep.mubr.msk.f32.mxu1 %vm225_vm1, %v11402_v11 }
  0x61   : > { %10063 = vmatmul.mubr.msk.f32.gmra.mrb[18].mxu0 %vm225_vm1, %v11408_v13 }
  0x62   : > { %10065 = vmatprep.mubr.msk.f32.mxu0 %vm225_vm1, %v11412_v14  ;;  %10113 = vmatmul.mubr.msk.f32.gmra.mrb[18].mxu1 %vm225_vm1, %v11416_v15 }
  0x63   : > { %10115 = vmatprep.mubr.msk.f32.mxu1 %vm225_vm1, %v11418_v16 }
  0x65   : > { %10066 = vmatmul.mubr.msk.f32.gmra.mrb[20].mxu0 %vm225_vm1, %v11426_v19 }
  0x66   : > { %10068 = vmatprep.mubr.msk.f32.mxu0 %vm225_vm1, %v11432_v20  ;;  %10116 = vmatmul.mubr.msk.f32.gmra.mrb[20].mxu1 %vm225_vm1, %v11436_v21 }
  0x67   : > { %10118 = vmatprep.mubr.msk.f32.mxu1 %vm225_vm1, %v11438_v22 }
  0x69   : > { %10069 = vmatmul.mubr.msk.f32.gmra.mrb[22].mxu0 %vm225_vm1, %v11444_v23 }
  0x6a   : > { %10071 = vmatprep.mubr.msk.f32.mxu0 %vm225_vm1, %v11448_v24  ;;  %10119 = vmatmul.mubr.msk.f32.gmra.mrb[22].mxu1 %vm225_vm1, %v11452_v25 }
  0x6b   : > { %10121 = vmatprep.mubr.msk.f32.mxu1 %vm225_vm1, %v11454_v26 }
  0x6d   : > { %10072 = vmatmul.mubr.msk.f32.gmra.mrb[24].mxu0 %vm225_vm1, %v11460_v27 }
  0x6e   : > { %10074 = vmatprep.mubr.msk.f32.mxu0 %vm225_vm1, %v11464_v28  ;;  %10122 = vmatmul.mubr.msk.f32.gmra.mrb[24].mxu1 %vm225_vm1, %v11468_v29 }
  0x6f   : > { %10124 = vmatprep.mubr.msk.f32.mxu1 %vm225_vm1, %v11470_v30 }
  0x71   : > { %10075 = vmatmul.mubr.msk.f32.gmra.mrb[26].mxu0 %vm225_vm1, %v11476_v48 }
  0x72   : > { %10077 = vmatprep.mubr.msk.f32.mxu0 %vm225_vm1, %v11480_v49  ;;  %10125 = vmatmul.mubr.msk.f32.gmra.mrb[26].mxu1 %vm225_vm1, %v11484_v52 }
  0x73   : > { %10127 = vmatprep.mubr.msk.f32.mxu1 %vm225_vm1, %v11486_v54  ;;  %v11521_v54 = vld [vmem:[#allocation2 + $0x1a] sm:$0xff] }
  0x75   : > { %10078 = vmatmul.mubr.msk.f32.gmra.mrb[28].mxu0 %vm225_vm1, %v11492_v55 }
  0x76   : > { %10080 = vmatprep.mubr.msk.f32.mxu0 %vm225_vm1, %v11496_v56  ;;  %10128 = vmatmul.mubr.msk.f32.gmra.mrb[28].mxu1 %vm225_vm1, %v11500_v57 }
  0x77   : > { %10130 = vmatprep.mubr.msk.f32.mxu1 %vm225_vm1, %v11502_v58  ;;  %v11528_v58 = vld [vmem:[%s13598_s1 + $0x18] sm:$0xf] }
  0x79   : > { %10081 = vmatmul.mubr.msk.f32.gmra.mrb[30].mxu0 %vm225_vm1, %v11508_v60 }
  0x7a   : > { %10135 = vmatprep.mubr.msk.f32.mxu0 %vm225_vm1, %v1180_v61  ;;  %10131 = vmatmul.mubr.msk.f32.gmra.mrb[30].mxu1 %vm225_vm1, %v11514_v17  ;;  %v11535_v61 = vld [vmem:[#allocation2 + $0x22] sm:$0xff]  ;;  %v11540_v17 = vld [vmem:[%s13598_s1 + $0x1c] sm:$0xf] }
  0x7b   : > { %10185 = vmatprep.mubr.msk.f32.mxu1 %vm225_vm1, %v11253_v31  ;;  %v11542_v31 = vld [vmem:[#allocation2 + $0x32] sm:$0xff] }
  0x7d   : > { %10136 = vmatmul.mubr.msk.f32.vlgmr.msra.gmra.mrb[32].mxu0 %vm225_vm1, %v1181_v18  ;;  %v11572_v18 = vld [vmem:[#allocation2 + $0x62] sm:$0xff] }
  0x7e   : > { %10234 = vmatpush3.msk.msra.mxu0 %vm465_vm0, %v11211_v12  ;;  %10138 = vmatprep.mubr.msk.f32.mxu0 %vm225_vm1, %v11521_v54  ;;  %v11558_v12 = vld [vmem:[#allocation2 + $0x3a] sm:$0xff] }
  0x7f   : > { %10186 = vmatmul.mubr.msk.f32.vlgmr.msra.gmra.mrb[32].mxu1 %vm225_vm1, %v11255_v32  ;;  %10333 = vmatprep.subr.msk.mxu0 %vm465_vm0, %v11528_v58  ;;  %v11560_v32 = vld [vmem:[#allocation2 + $0x4a] sm:$0xff] }
  0x80   : > { %10188 = vmatprep.mubr.msk.f32.mxu1 %vm225_vm1, %v11257_v33  ;;  %10284 = vmatpush3.msk.msra.mxu1 %vm465_vm0, %v11202_v8  ;;  %v11570_v8 = vld [vmem:[#allocation2 + $0x52] sm:$0xff] }
  0x81   : > { %10139 = vmatmul.mubr.msk.f32.gmra.mrb[34].mxu0 %vm225_vm1, %v11535_v61  ;;  %10383 = vmatprep.subr.msk.mxu1 %vm465_vm0, %v11540_v17 }
  0x82   : > { %10141 = vmatprep.mubr.msk.f32.mxu0 %vm225_vm1, %v11542_v31 }
  0x83   : > { %10189 = vmatmul.mubr.msk.f32.gmra.mrb[34].mxu1 %vm225_vm1, %v11276_v37  ;;  %v11584_v37 = vld [vmem:[#allocation2 + $0x7a] sm:$0xff] }
  0x84   : > { %10191 = vmatprep.mubr.msk.f32.mxu1 %vm225_vm1, %v11280_v38  ;;  %v11582_v38 = vld [vmem:[#allocation2 + $0x6a] sm:$0xff] }
  0x85   : > { %10142 = vmatmul.mubr.msk.f32.gmra.mrb[36].mxu0 %vm225_vm1, %v11558_v12 }
  0x86   : > { %10144 = vmatprep.mubr.msk.f32.mxu0 %vm225_vm1, %v11560_v32 }
  0x87   : > { %10192 = vmatmul.mubr.msk.f32.gmra.mrb[36].mxu1 %vm225_vm1, %v11292_v41  ;;  %v11596_v41 = vld [vmem:[#allocation2 + $0x92] sm:$0xff] }
  0x88   : > { %10194 = vmatprep.mubr.msk.f32.mxu1 %vm225_vm1, %v11296_v42  ;;  %v11594_v42 = vld [vmem:[#allocation2 + $0x82] sm:$0xff] }
  0x89   : > { %10145 = vmatmul.mubr.msk.f32.gmra.mrb[38].mxu0 %vm225_vm1, %v11570_v8 }
  0x8a   : > { %10147 = vmatprep.mubr.msk.f32.mxu0 %vm225_vm1, %v11572_v18 }
  0x8b   : > { %10195 = vmatmul.mubr.msk.f32.gmra.mrb[38].mxu1 %vm225_vm1, %v11308_v45  ;;  %v11608_v45 = vld [vmem:[#allocation2 + $0xaa] sm:$0xff] }
  0x8c   : > { %10197 = vmatprep.mubr.msk.f32.mxu1 %vm225_vm1, %v11310_v46  ;;  %v11606_v46 = vld [vmem:[#allocation2 + $0x9a] sm:$0xff] }
  0x8d   : > { %10148 = vmatmul.mubr.msk.f32.gmra.mrb[40].mxu0 %vm225_vm1, %v11582_v38 }
  0x8e   : > { %10150 = vmatprep.mubr.msk.f32.mxu0 %vm225_vm1, %v11584_v37 }
  0x8f   : > { %10198 = vmatmul.mubr.msk.f32.gmra.mrb[40].mxu1 %vm225_vm1, %v11320_v50  ;;  %v11620_v50 = vld [vmem:[#allocation2 + $0xc2] sm:$0xff] }
  0x90   : > { %10200 = vmatprep.mubr.msk.f32.mxu1 %vm225_vm1, %v11329_v53  ;;  %v11618_v53 = vld [vmem:[#allocation2 + $0xb2] sm:$0xff] }
  0x91   : > { %10151 = vmatmul.mubr.msk.f32.gmra.mrb[42].mxu0 %vm225_vm1, %v11594_v42 }
  0x92   : > { %10153 = vmatprep.mubr.msk.f32.mxu0 %vm225_vm1, %v11596_v41 }
  0x93   : > { %10201 = vmatmul.mubr.msk.f32.gmra.mrb[42].mxu1 %vm225_vm1, %v11360_v63  ;;  %v11632_v63 = vld [vmem:[#allocation2 + $0xda] sm:$0xff] }
  0x94   : > { %10203 = vmatprep.mubr.msk.f32.mxu1 %vm225_vm1, %v11364_v0  ;;  %v11630_v0 = vld [vmem:[#allocation2 + $0xca] sm:$0xff] }
  0x95   : > { %10154 = vmatmul.mubr.msk.f32.gmra.mrb[44].mxu0 %vm225_vm1, %v11606_v46 }
  0x96   : > { %10156 = vmatprep.mubr.msk.f32.mxu0 %vm225_vm1, %v11608_v45 }
  0x97   : > { %10204 = vmatmul.mubr.msk.f32.gmra.mrb[44].mxu1 %vm225_vm1, %v11376_v3  ;;  %v11644_v3 = vld [vmem:[#allocation2 + $0xf2] sm:$0xff] }
  0x98   : > { %10206 = vmatprep.mubr.msk.f32.mxu1 %vm225_vm1, %v11380_v4  ;;  %v11642_v4 = vld [vmem:[#allocation2 + $0xe2] sm:$0xff] }
  0x99   : > { %10157 = vmatmul.mubr.msk.f32.gmra.mrb[46].mxu0 %vm225_vm1, %v11618_v53 }
  0x9a   : > { %10159 = vmatprep.mubr.msk.f32.mxu0 %vm225_vm1, %v11620_v50 }
  0x9b   : > { %10207 = vmatmul.mubr.msk.f32.gmra.mrb[46].mxu1 %vm225_vm1, %v11392_v7  ;;  %v11656_v7 = vld [vmem:[#allocation2 + $0x10a] sm:$0xff] }
  0x9c   : > { %10209 = vmatprep.mubr.msk.f32.mxu1 %vm225_vm1, %v11396_v9  ;;  %v11654_v9 = vld [vmem:[#allocation2 + $0xfa] sm:$0xff] }
  0x9d   : > { %10160 = vmatmul.mubr.msk.f32.gmra.mrb[48].mxu0 %vm225_vm1, %v11630_v0 }
  0x9e   : > { %10162 = vmatprep.mubr.msk.f32.mxu0 %vm225_vm1, %v11632_v63 }
  0x9f   : > { %10210 = vmatmul.mubr.msk.f32.gmra.mrb[48].mxu1 %vm225_vm1, %v11408_v13  ;;  %v11668_v13 = vld [vmem:[#allocation2 + $0x122] sm:$0xff] }
  0xa0   : > { %10212 = vmatprep.mubr.msk.f32.mxu1 %vm225_vm1, %v11412_v14  ;;  %v11666_v14 = vld [vmem:[#allocation2 + $0x112] sm:$0xff] }
  0xa1   : > { %10163 = vmatmul.mubr.msk.f32.gmra.mrb[50].mxu0 %vm225_vm1, %v11642_v4 }
  0xa2   : > { %10165 = vmatprep.mubr.msk.f32.mxu0 %vm225_vm1, %v11644_v3 }
  0xa3   : > { %10213 = vmatmul.mubr.msk.f32.gmra.mrb[50].mxu1 %vm225_vm1, %v11426_v19  ;;  %v11680_v19 = vld [vmem:[#allocation2 + $0x13a] sm:$0xff] }
  0xa4   : > { %10215 = vmatprep.mubr.msk.f32.mxu1 %vm225_vm1, %v11432_v20  ;;  %v11678_v20 = vld [vmem:[#allocation2 + $0x12a] sm:$0xff] }
  0xa5   : > { %10166 = vmatmul.mubr.msk.f32.gmra.mrb[52].mxu0 %vm225_vm1, %v11654_v9 }
  0xa6   : > { %10168 = vmatprep.mubr.msk.f32.mxu0 %vm225_vm1, %v11656_v7 }
  0xa7   : > { %10216 = vmatmul.mubr.msk.f32.gmra.mrb[52].mxu1 %vm225_vm1, %v11444_v23  ;;  %v11692_v23 = vld [vmem:[#allocation2 + $0x152] sm:$0xff] }
  0xa8   : > { %10218 = vmatprep.mubr.msk.f32.mxu1 %vm225_vm1, %v11448_v24  ;;  %v11690_v24 = vld [vmem:[#allocation2 + $0x142] sm:$0xff] }
  0xa9   : > { %10169 = vmatmul.mubr.msk.f32.gmra.mrb[54].mxu0 %vm225_vm1, %v11666_v14 }
  0xaa   : > { %10171 = vmatprep.mubr.msk.f32.mxu0 %vm225_vm1, %v11668_v13 }
  0xab   : > { %10219 = vmatmul.mubr.msk.f32.gmra.mrb[54].mxu1 %vm225_vm1, %v11460_v27  ;;  %v11704_v27 = vld [vmem:[#allocation2 + $0x16a] sm:$0xff] }
  0xac   : > { %10221 = vmatprep.mubr.msk.f32.mxu1 %vm225_vm1, %v11464_v28  ;;  %v11702_v28 = vld [vmem:[#allocation2 + $0x15a] sm:$0xff] }
  0xad   : > { %10172 = vmatmul.mubr.msk.f32.gmra.mrb[56].mxu0 %vm225_vm1, %v11678_v20 }
  0xae   : > { %10174 = vmatprep.mubr.msk.f32.mxu0 %vm225_vm1, %v11680_v19 }
  0xaf   : > { %10222 = vmatmul.mubr.msk.f32.gmra.mrb[56].mxu1 %vm225_vm1, %v11476_v48  ;;  %v11716_v48 = vld [vmem:[#allocation2 + $0x172] sm:$0xff] }
  0xb0   : > { %10224 = vmatprep.mubr.msk.f32.mxu1 %vm225_vm1, %v11480_v49  ;;  %v11712_v49 = vld [vmem:[#allocation2 + $0x180] sm:$0xff] }
  0xb1   : > { %10175 = vmatmul.mubr.msk.f32.gmra.mrb[58].mxu0 %vm225_vm1, %v11690_v24 }
  0xb2   : > { %10177 = vmatprep.mubr.msk.f32.mxu0 %vm225_vm1, %v11692_v23 }
  0xb3   : > { %10225 = vmatmul.mubr.msk.f32.gmra.mrb[58].mxu1 %vm225_vm1, %v11492_v55  ;;  %v11722_v55 = vld [vmem:[#allocation2 + $0x188] sm:$0xff] }
  0xb4   : > { %10227 = vmatprep.mubr.msk.f32.mxu1 %vm225_vm1, %v11496_v56 }
  0xb5   : > { %10178 = vmatmul.mubr.msk.f32.gmra.mrb[60].mxu0 %vm225_vm1, %v11702_v28 }
  0xb6   : > { %10180 = vmatprep.mubr.msk.f32.mxu0 %vm225_vm1, %v11704_v27 }
  0xb7   : > { %10228 = vmatmul.mubr.msk.f32.gmra.mrb[60].mxu1 %vm225_vm1, %v11508_v60  ;;  %v11735_v60 = vld [vmem:[%s13598_s1 + $0x20] sm:$0xf] }
  0xb8   : > { %10230 = vmatprep.mubr.msk.f32.mxu1 %vm225_vm1, %v11712_v49 }
  0xb9   : > { %10181 = vmatmul.mubr.msk.f32.gmra.mrb[62].mxu0 %vm225_vm1, %v11716_v48 }
  0xba   : > { %10235 = vmatprep.mubr.msk.f32.mxu0 %vm225_vm1, %v11264_v34  ;;  %v13693_v34 = vld [vmem:[#allocation29_spill] sm:$0xff] }
  0xbb   : > { %10231 = vmatmul.mubr.msk.f32.gmra.mrb[62].mxu1 %vm225_vm1, %v11722_v55 }
  0xbc   : > { %10285 = vmatprep.mubr.msk.f32.mxu1 %vm225_vm1, %v11521_v54 }
  0xbd   : > { %10236 = vmatmul.mubr.msk.f32.vlgmr.msra.gmra.mrb[64].mxu0 %vm225_vm1, %v11266_v35  ;;  %v13694_v35 = vld [vmem:[#allocation31_spill] sm:$0xff] }
  0xbe   : > { %10334 = vmatpush3.msk.msra.mxu0 %vm465_vm0, %v11528_v58  ;;  %10238 = vmatprep.mubr.msk.f32.mxu0 %vm225_vm1, %v11272_v36 }
  0xbf   : > { %10286 = vmatmul.mubr.msk.f32.vlgmr.msra.gmra.mrb[64].mxu1 %vm225_vm1, %v11535_v61  ;;  %10433 = vmatprep.subr.msk.mxu0 %vm465_vm0, %v11735_v60 }
  0xc0   : > { %10288 = vmatprep.mubr.msk.f32.mxu1 %vm225_vm1, %v11542_v31  ;;  %10384 = vmatpush3.msk.msra.mxu1 %vm465_vm0, %v11540_v17  ;;  %v13712_v17 = vld [vmem:[#allocation21_spill] sm:$0xff] }
  0xc1   : > { %10239 = vmatmul.mubr.msk.f32.gmra.mrb[66].mxu0 %vm225_vm1, %v11284_v39 }
  0xc2   : > { %10241 = vmatprep.mubr.msk.f32.mxu0 %vm225_vm1, %v11286_v40 }
  0xc3   : > { %10289 = vmatmul.mubr.msk.f32.gmra.mrb[66].mxu1 %vm225_vm1, %v11558_v12 }
  0xc4   : > { %10291 = vmatprep.mubr.msk.f32.mxu1 %vm225_vm1, %v11560_v32 }
  0xc5   : > { %10242 = vmatmul.mubr.msk.f32.gmra.mrb[68].mxu0 %vm225_vm1, %v11300_v43 }
  0xc6   : > { %10244 = vmatprep.mubr.msk.f32.mxu0 %vm225_vm1, %v11302_v44 }
  0xc7   : > { %10292 = vmatmul.mubr.msk.f32.gmra.mrb[68].mxu1 %vm225_vm1, %v11570_v8  ;;  %v13713_v8 = vld [vmem:[#allocation22_spill] sm:$0xff] }
  0xc8   : > { %10294 = vmatprep.mubr.msk.f32.mxu1 %vm225_vm1, %v11572_v18 }
  0xc9   : > { %10245 = vmatmul.mubr.msk.f32.gmra.mrb[70].mxu0 %vm225_vm1, %v11316_v47 }
  0xca   : > { %10247 = vmatprep.mubr.msk.f32.mxu0 %vm225_vm1, %v11322_v51 }
  0xcb   : > { %10295 = vmatmul.mubr.msk.f32.gmra.mrb[70].mxu1 %vm225_vm1, %v11582_v38  ;;  %v13695_v38 = vld [vmem:[#allocation33_spill] sm:$0xff] }
  0xcc   : > { %10297 = vmatprep.mubr.msk.f32.mxu1 %vm225_vm1, %v11584_v37  ;;  %v11851_v37 = vld [vmem:[#allocation2 + $0x181] sm:$0xff] }
  0xcd   : > { %10248 = vmatmul.mubr.msk.f32.gmra.mrb[72].mxu0 %vm225_vm1, %v11345_v59 }
  0xce   : > { %10250 = vmatprep.mubr.msk.f32.mxu0 %vm225_vm1, %v11352_v62 }
  0xcf   : > { %10298 = vmatmul.mubr.msk.f32.gmra.mrb[72].mxu1 %vm225_vm1, %v11594_v42  ;;  %v11863_v42 = vld [vmem:[#allocation2 + $0x189] sm:$0xff] }
  0xd0   : > { %10300 = vmatprep.mubr.msk.f32.mxu1 %vm225_vm1, %v11596_v41  ;;  %v11859_v41 = vld [vmem:[#allocation2 + $0x182] sm:$0xff] }
  0xd1   : > { %10251 = vmatmul.mubr.msk.f32.gmra.mrb[74].mxu0 %vm225_vm1, %v11368_v1 }
  0xd2   : > { %10253 = vmatprep.mubr.msk.f32.mxu0 %vm225_vm1, %v11370_v2 }
  0xd3   : > { %10301 = vmatmul.mubr.msk.f32.gmra.mrb[74].mxu1 %vm225_vm1, %v11606_v46  ;;  %v13696_v46 = vld [vmem:[#allocation5_spill] sm:$0xff] }
  0xd4   : > { %10303 = vmatprep.mubr.msk.f32.mxu1 %vm225_vm1, %v11608_v45  ;;  %v11869_v45 = vld [vmem:[#allocation2 + $0x18a] sm:$0xff] }
  0xd5   : > { %10254 = vmatmul.mubr.msk.f32.gmra.mrb[76].mxu0 %vm225_vm1, %v11384_v5 }
  0xd6   : > { %10256 = vmatprep.mubr.msk.f32.mxu0 %vm225_vm1, %v11386_v6 }
  0xd7   : > { %10304 = vmatmul.mubr.msk.f32.gmra.mrb[76].mxu1 %vm225_vm1, %v11618_v53  ;;  %v13699_v53 = vld [vmem:[#allocation8_spill] sm:$0xff] }
  0xd8   : > { %10306 = vmatprep.mubr.msk.f32.mxu1 %vm225_vm1, %v11620_v50  ;;  %v13697_v50 = vld [vmem:[#allocation6_spill] sm:$0xff] }
  0xd9   : > { %10257 = vmatmul.mubr.msk.f32.gmra.mrb[78].mxu0 %vm225_vm1, %v11400_v10 }
  0xda   : > { %10259 = vmatprep.mubr.msk.f32.mxu0 %vm225_vm1, %v11402_v11 }
  0xdb   : > { %10307 = vmatmul.mubr.msk.f32.gmra.mrb[78].mxu1 %vm225_vm1, %v11630_v0  ;;  %v13705_v0 = vld [vmem:[#allocation14_spill] sm:$0xff] }
  0xdc   : > { %10309 = vmatprep.mubr.msk.f32.mxu1 %vm225_vm1, %v11632_v63  ;;  %v13701_v63 = vld [vmem:[#allocation10_spill] sm:$0xff] }
  0xdd   : > { %10260 = vmatmul.mubr.msk.f32.gmra.mrb[80].mxu0 %vm225_vm1, %v11416_v15 }
  0xde   : > { %10262 = vmatprep.mubr.msk.f32.mxu0 %vm225_vm1, %v11418_v16 }
  0xdf   : > { %10310 = vmatmul.mubr.msk.f32.gmra.mrb[80].mxu1 %vm225_vm1, %v11642_v4 }
  0xe0   : > { %10312 = vmatprep.mubr.msk.f32.mxu1 %vm225_vm1, %v11644_v3 }
  0xe1   : > { %10263 = vmatmul.mubr.msk.f32.gmra.mrb[82].mxu0 %vm225_vm1, %v11436_v21 }
  0xe2   : > { %10265 = vmatprep.mubr.msk.f32.mxu0 %vm225_vm1, %v11438_v22 }
  0xe3   : > { %10313 = vmatmul.mubr.msk.f32.gmra.mrb[82].mxu1 %vm225_vm1, %v11654_v9 }
  0xe4   : > { %10315 = vmatprep.mubr.msk.f32.mxu1 %vm225_vm1, %v11656_v7  ;;  %v13708_v7 = vld [vmem:[#allocation17_spill] sm:$0xff] }
  0xe5   : > { %10266 = vmatmul.mubr.msk.f32.gmra.mrb[84].mxu0 %vm225_vm1, %v11452_v25 }
  0xe6   : > { %10268 = vmatprep.mubr.msk.f32.mxu0 %vm225_vm1, %v11454_v26 }
  0xe7   : > { %10316 = vmatmul.mubr.msk.f32.gmra.mrb[84].mxu1 %vm225_vm1, %v11666_v14 }
  0xe8   : > { %10318 = vmatprep.mubr.msk.f32.mxu1 %vm225_vm1, %v11668_v13  ;;  %v13709_v13 = vld [vmem:[#allocation18_spill] sm:$0xff] }
  0xe9   : > { %10269 = vmatmul.mubr.msk.f32.gmra.mrb[86].mxu0 %vm225_vm1, %v11468_v29 }
  0xea   : > { %10271 = vmatprep.mubr.msk.f32.mxu0 %vm225_vm1, %v11470_v30 }
  0xeb   : > { %10319 = vmatmul.mubr.msk.f32.gmra.mrb[86].mxu1 %vm225_vm1, %v11678_v20 }
  0xec   : > { %10321 = vmatprep.mubr.msk.f32.mxu1 %vm225_vm1, %v11680_v19 }
  0xed   : > { %10272 = vmatmul.mubr.msk.f32.gmra.mrb[88].mxu0 %vm225_vm1, %v11484_v52 }
  0xee   : > { %10274 = vmatprep.mubr.msk.f32.mxu0 %vm225_vm1, %v13693_v34 }
  0xef   : > { %10322 = vmatmul.mubr.msk.f32.gmra.mrb[88].mxu1 %vm225_vm1, %v11690_v24  ;;  %v13710_v24 = vld [vmem:[#allocation19_spill] sm:$0xff] }
  0xf0   : > { %10324 = vmatprep.mubr.msk.f32.mxu1 %vm225_vm1, %v11692_v23 }
  0xf1   : > { %10275 = vmatmul.mubr.msk.f32.gmra.mrb[90].mxu0 %vm225_vm1, %v11500_v57 }
  0xf2   : > { %10277 = vmatprep.mubr.msk.f32.mxu0 %vm225_vm1, %v13694_v35 }
  0xf3   : > { %10325 = vmatmul.mubr.msk.f32.gmra.mrb[90].mxu1 %vm225_vm1, %v11702_v28  ;;  %v13711_v28 = vld [vmem:[#allocation20_spill] sm:$0xff] }
  0xf4   : > { %10327 = vmatprep.mubr.msk.f32.mxu1 %vm225_vm1, %v11704_v27 }
  0xf5   : > { %10278 = vmatmul.mubr.msk.f32.gmra.mrb[92].mxu0 %vm225_vm1, %v13695_v38 }
  0xf6   : > { %10280 = vmatprep.mubr.msk.f32.mxu0 %vm225_vm1, %v11851_v37 }
  0xf7   : > { %10328 = vmatmul.mubr.msk.f32.gmra.mrb[92].mxu1 %vm225_vm1, %v11716_v48 }
  0xf8   : > { %10330 = vmatprep.mubr.msk.f32.mxu1 %vm225_vm1, %v11859_v41 }
  0xf9   : > { %10281 = vmatmul.mubr.msk.f32.gmra.mrb[94].mxu0 %vm225_vm1, %v11863_v42 }
  0xfa   : > { %10335 = vmatprep.mubr.msk.f32.mxu0 %vm225_vm1, %v11257_v33  ;;  %v13698_v33 = vld [vmem:[#allocation7_spill] sm:$0xff] }
  0xfb   : > { %10331 = vmatmul.mubr.msk.f32.gmra.mrb[94].mxu1 %vm225_vm1, %v11869_v45 }
  0xfc   : > { %10385 = vmatprep.mubr.msk.f32.mxu1 %vm225_vm1, %v11272_v36  ;;  %v13700_v36 = vld [vmem:[#allocation9_spill] sm:$0xff] }
  0xfd   : > { %10336 = vmatmul.mubr.msk.f32.vlgmr.msra.gmra.mrb[96].mxu0 %vm225_vm1, %v13696_v46 }
  0xfe   : > { %10434 = vmatpush3.msk.msra.mxu0 %vm465_vm0, %v11735_v60  ;;  %10338 = vmatprep.mubr.msk.f32.mxu0 %vm225_vm1, %v13697_v50 }
  0xff   : > { %10386 = vmatmul.mubr.msk.f32.vlgmr.msra.gmra.mrb[96].mxu1 %vm225_vm1, %v11284_v39  ;;  %v13702_v39 = vld [vmem:[#allocation11_spill] sm:$0xff] }
 0x100   : > { %10388 = vmatprep.mubr.msk.f32.mxu1 %vm225_vm1, %v11286_v40  ;;  %v13703_v40 = vld [vmem:[#allocation12_spill] sm:$0xff] }
 0x101   : > { %10339 = vmatmul.mubr.msk.f32.gmra.mrb[98].mxu0 %vm225_vm1, %v13698_v33 }
 0x102   : > { %10341 = vmatprep.mubr.msk.f32.mxu0 %vm225_vm1, %v13699_v53  ;;  %v13714_v53 = vld [vmem:[#allocation23_spill] sm:$0xff] }
 0x103   : > { %10389 = vmatmul.mubr.msk.f32.gmra.mrb[98].mxu1 %vm225_vm1, %v11300_v43  ;;  %v13704_v43 = vld [vmem:[#allocation13_spill] sm:$0xff] }
 0x104   : > { %10391 = vmatprep.mubr.msk.f32.mxu1 %vm225_vm1, %v11302_v44 }
 0x105   : > { %10342 = vmatmul.mubr.msk.f32.gmra.mrb[100].mxu0 %vm225_vm1, %v13700_v36 }
 0x106   : > { %10344 = vmatprep.mubr.msk.f32.mxu0 %vm225_vm1, %v13701_v63 }
 0x107   : > { %10392 = vmatmul.mubr.msk.f32.gmra.mrb[100].mxu1 %vm225_vm1, %v11316_v47 }
 0x108   : > { %10394 = vmatprep.mubr.msk.f32.mxu1 %vm225_vm1, %v11322_v51 }
 0x109   : > { %10345 = vmatmul.mubr.msk.f32.gmra.mrb[102].mxu0 %vm225_vm1, %v13702_v39 }
 0x10a   : > { %10347 = vmatprep.mubr.msk.f32.mxu0 %vm225_vm1, %v13703_v40 }
 0x10b   : > { %10395 = vmatmul.mubr.msk.f32.gmra.mrb[102].mxu1 %vm225_vm1, %v11345_v59  ;;  %v13706_v59 = vld [vmem:[#allocation15_spill] sm:$0xff] }
 0x10c   : > { %10397 = vmatprep.mubr.msk.f32.mxu1 %vm225_vm1, %v11352_v62  ;;  %v13707_v62 = vld [vmem:[#allocation16_spill] sm:$0xff] }
 0x10d   : > { %10348 = vmatmul.mubr.msk.f32.gmra.mrb[104].mxu0 %vm225_vm1, %v13704_v43 }
 0x10e   : > { %v10037_v47 = vpop.f32.mrb[0].mxu0  ;;  %10350 = vmatprep.mubr.msk.f32.mxu0 %vm225_vm1, %v13705_v0  ;;  %v13716_v0 = vld [vmem:[#allocation25_spill] sm:$0xff] }
 0x10f   : > { %v10087_v44 = vpop.f32.mrb[0].mxu1  ;;  %695 = vst.msk [vmem:[#allocation4 + $0x8] sm:$0xff] %vm225_vm1, %v10037_v47  ;;  %v535_v3 = vpop.f32.mrb[1].mxu0  ;;  %10398 = vmatmul.mubr.msk.f32.gmra.mrb[104].mxu1 %vm225_vm1, %v11368_v1 }
 0x110   : > { %v925_v51 = vpop.f32.mrb[1].mxu1  ;;  %694 = vst.msk [vmem:[#allocation4] sm:$0xff] %vm225_vm1, %v535_v3  ;;  %10400 = vmatprep.mubr.msk.f32.mxu1 %vm225_vm1, %v11370_v2 }
 0x111   : > { %10351 = vmatmul.mubr.msk.f32.gmra.mrb[106].mxu0 %vm225_vm1, %v13706_v59 }
 0x112   : > { %10353 = vmatprep.mubr.msk.f32.mxu0 %vm225_vm1, %v13707_v62 }
 0x113   : > { %10401 = vmatmul.mubr.msk.f32.gmra.mrb[106].mxu1 %vm225_vm1, %v11384_v5 }
 0x114   : > { %v10040_v4 = vpop.f32.mrb[2].mxu0  ;;  %10403 = vmatprep.mubr.msk.f32.mxu1 %vm225_vm1, %v11386_v6 }
 0x115   : > { %697 = vst.msk [vmem:[#allocation4 + $0x18] sm:$0xff] %vm225_vm1, %v10040_v4  ;;  %v545_v1 = vpop.f32.mrb[3].mxu0  ;;  %10354 = vmatmul.mubr.msk.f32.gmra.mrb[108].mxu0 %vm225_vm1, %v13708_v7  ;;  %v10090_v2 = vpop.f32.mrb[2].mxu1 }
 0x116   : > { %696 = vst.msk [vmem:[#allocation4 + $0x10] sm:$0xff] %vm225_vm1, %v545_v1  ;;  %v1085_v9 = vld [vmem:[#allocation4 + $0x8] sm:$0xff]  ;;  %10356 = vmatprep.mubr.msk.f32.mxu0 %vm225_vm1, %v13709_v13  ;;  %v935_v14 = vpop.f32.mrb[3].mxu1 }
 0x117   : > { %v1117_v19 = vadd.f32 %v10087_v44, %v1085_v9  ;;  %v1084_v5 = vld [vmem:[#allocation4] sm:$0xff]  ;;  %10404 = vmatmul.mubr.msk.f32.gmra.mrb[108].mxu1 %vm225_vm1, %v11400_v10 }
 0x118   : > { %v10043_v6 = vpop.f32.mrb[4].mxu0  ;;  %v1116_v20 = vadd.f32 %v1084_v5, %v925_v51  ;;  %10406 = vmatprep.mubr.msk.f32.mxu1 %vm225_vm1, %v11402_v11 }
 0x119   : > { %1149 = vst.msk [vmem:[#allocation4 + $0x8] sm:$0xff] %vm225_vm1, %v1117_v19  ;;  %699 = vst.msk [vmem:[#allocation4 + $0x28] sm:$0xff] %vm225_vm1, %v10043_v6  ;;  %v555_v23 = vpop.f32.mrb[5].mxu0  ;;  %10357 = vmatmul.mubr.msk.f32.gmra.mrb[110].mxu0 %vm225_vm1, %v13710_v24  ;;  %v10093_v27 = vpop.f32.mrb[4].mxu1 }
 0x11a   : > { %1148 = vst.msk [vmem:[#allocation4] sm:$0xff] %vm225_vm1, %v1116_v20  ;;  %698 = vst.msk [vmem:[#allocation4 + $0x20] sm:$0xff] %vm225_vm1, %v555_v23  ;;  %10359 = vmatprep.mubr.msk.f32.mxu0 %vm225_vm1, %v13711_v28  ;;  %v945_v10 = vpop.f32.mrb[5].mxu1  ;;  %v13720_v23 = vld [vmem:[#allocation30_spill] sm:$0xff] }
 0x11b   : > { %10407 = vmatmul.mubr.msk.f32.gmra.mrb[110].mxu1 %vm225_vm1, %v11416_v15 }
 0x11c   : > { %v10046_v11 = vpop.f32.mrb[6].mxu0  ;;  %v1087_v48 = vld [vmem:[#allocation4 + $0x18] sm:$0xff]  ;;  %10409 = vmatprep.mubr.msk.f32.mxu1 %vm225_vm1, %v11418_v16 }
 0x11d   : > { %701 = vst.msk [vmem:[#allocation4 + $0x38] sm:$0xff] %vm225_vm1, %v10046_v11  ;;  %v1119_v54 = vadd.f32 %v10090_v2, %v1087_v48  ;;  %v565_v58 = vpop.f32.mrb[7].mxu0  ;;  %v1086_v60 = vld [vmem:[#allocation4 + $0x10] sm:$0xff]  ;;  %10360 = vmatmul.mubr.msk.f32.gmra.mrb[112].mxu0 %vm225_vm1, %v13712_v17  ;;  %v10096_v61 = vpop.f32.mrb[6].mxu1 }
 0x11e   : > { %700 = vst.msk [vmem:[#allocation4 + $0x30] sm:$0xff] %vm225_vm1, %v565_v58  ;;  %v1118_v32 = vadd.f32 %v1086_v60, %v935_v14  ;;  %10362 = vmatprep.mubr.msk.f32.mxu0 %vm225_vm1, %v13713_v8  ;;  %v955_v15 = vpop.f32.mrb[7].mxu1  ;;  %v13718_v2 = vld [vmem:[#allocation27_spill] sm:$0xff]  ;;  %v3027_v60 = vld [vmem:[#allocation2 + $0x198] sm:$0xff] }
 0x11f   : > { %1151 = vst.msk [vmem:[#allocation4 + $0x18] sm:$0xff] %vm225_vm1, %v1119_v54  ;;  %10410 = vmatmul.mubr.msk.f32.gmra.mrb[112].mxu1 %vm225_vm1, %v11436_v21  ;;  %v13715_v21 = vld [vmem:[#allocation24_spill] sm:$0xff] }
 0x120   : > { %1150 = vst.msk [vmem:[#allocation4 + $0x10] sm:$0xff] %vm225_vm1, %v1118_v32  ;;  %v10049_v16 = vpop.f32.mrb[8].mxu0  ;;  %v1089_v18 = vld [vmem:[#allocation4 + $0x28] sm:$0xff]  ;;  %10412 = vmatprep.mubr.msk.f32.mxu1 %vm225_vm1, %v11438_v22  ;;  %v13721_v54 = vld [vmem:[#allocation32_spill] sm:$0xff] }
 0x121   : > { %703 = vst.msk [vmem:[#allocation4 + $0x48] sm:$0xff] %vm225_vm1, %v10049_v16  ;;  %v1121_v46 = vadd.f32 %v10093_v27, %v1089_v18  ;;  %v575_v50 = vpop.f32.mrb[9].mxu0  ;;  %v1088_v33 = vld [vmem:[#allocation4 + $0x20] sm:$0xff]  ;;  %10363 = vmatmul.mubr.msk.f32.gmra.mrb[114].mxu0 %vm225_vm1, %v13714_v53  ;;  %v10099_v36 = vpop.f32.mrb[8].mxu1 }
 0x122   : > { %702 = vst.msk [vmem:[#allocation4 + $0x40] sm:$0xff] %vm225_vm1, %v575_v50  ;;  %v1120_v63 = vadd.f32 %v1088_v33, %v945_v10  ;;  %10365 = vmatprep.mubr.msk.f32.mxu0 %vm225_vm1, %v13715_v21  ;;  %v965_v39 = vpop.f32.mrb[9].mxu1  ;;  %v3028_v16 = vld [vmem:[#allocation2 + $0x1a0] sm:$0xff]  ;;  %v3907_v21 = vld [vmem:[#allocation2 + $0x4a] sm:$0xff] }
 0x123   : > { %1153 = vst.msk [vmem:[#allocation4 + $0x28] sm:$0xff] %vm225_vm1, %v1121_v46  ;;  %10413 = vmatmul.mubr.msk.f32.gmra.mrb[114].mxu1 %vm225_vm1, %v11452_v25  ;;  %v13717_v25 = vld [vmem:[#allocation26_spill] sm:$0xff] }
 0x124   : > { %1152 = vst.msk [vmem:[#allocation4 + $0x20] sm:$0xff] %vm225_vm1, %v1120_v63  ;;  %v10052_v22 = vpop.f32.mrb[10].mxu0  ;;  %v1091_v40 = vld [vmem:[#allocation4 + $0x38] sm:$0xff]  ;;  %10415 = vmatprep.mubr.msk.f32.mxu1 %vm225_vm1, %v11454_v26 }
 0x125   : > { %705 = vst.msk [vmem:[#allocation4 + $0x58] sm:$0xff] %vm225_vm1, %v10052_v22  ;;  %v1123_v43 = vadd.f32 %v10096_v61, %v1091_v40  ;;  %v585_v44 = vpop.f32.mrb[11].mxu0  ;;  %v1090_v47 = vld [vmem:[#allocation4 + $0x30] sm:$0xff]  ;;  %10366 = vmatmul.mubr.msk.f32.gmra.mrb[116].mxu0 %vm225_vm1, %v13716_v0  ;;  %v10102_v51 = vpop.f32.mrb[10].mxu1 }
 0x126   : > { %704 = vst.msk [vmem:[#allocation4 + $0x50] sm:$0xff] %vm225_vm1, %v585_v44  ;;  %v1122_v3 = vadd.f32 %v1090_v47, %v955_v15  ;;  %10368 = vmatprep.mubr.msk.f32.mxu0 %vm225_vm1, %v13717_v25  ;;  %v975_v59 = vpop.f32.mrb[11].mxu1  ;;  %v3481_v15 = vld [vmem:[#allocation2 + $0x199] sm:$0xff] }
 0x127   : > { %1155 = vst.msk [vmem:[#allocation4 + $0x38] sm:$0xff] %vm225_vm1, %v1123_v43  ;;  %10416 = vmatmul.mubr.msk.f32.gmra.mrb[116].mxu1 %vm225_vm1, %v11468_v29  ;;  %v13719_v29 = vld [vmem:[#allocation28_spill] sm:$0xff] }
 0x128   : > { %1154 = vst.msk [vmem:[#allocation4 + $0x30] sm:$0xff] %vm225_vm1, %v1122_v3  ;;  %v10055_v26 = vpop.f32.mrb[12].mxu0  ;;  %v1093_v62 = vld [vmem:[#allocation4 + $0x48] sm:$0xff]  ;;  %10418 = vmatprep.mubr.msk.f32.mxu1 %vm225_vm1, %v11470_v30  ;;  %v3908_v0 = vld [vmem:[#allocation2 + $0x52] sm:$0xff] }
 0x129   : > { %707 = vst.msk [vmem:[#allocation4 + $0x68] sm:$0xff] %vm225_vm1, %v10055_v26  ;;  %v1125_v4 = vadd.f32 %v10099_v36, %v1093_v62  ;;  %v595_v1 = vpop.f32.mrb[13].mxu0  ;;  %v1092_v7 = vld [vmem:[#allocation4 + $0x40] sm:$0xff]  ;;  %10369 = vmatmul.mubr.msk.f32.gmra.mrb[118].mxu0 %vm225_vm1, %v13718_v2  ;;  %v10105_v9 = vpop.f32.mrb[12].mxu1 }
 0x12a   : > { %706 = vst.msk [vmem:[#allocation4 + $0x60] sm:$0xff] %vm225_vm1, %v595_v1  ;;  %v1124_v13 = vadd.f32 %v1092_v7, %v965_v39  ;;  %10371 = vmatprep.mubr.msk.f32.mxu0 %vm225_vm1, %v13719_v29  ;;  %v985_v14 = vpop.f32.mrb[13].mxu1  ;;  %v3909_v3 = vld [vmem:[#allocation2 + $0x62] sm:$0xff]  ;;  %v3910_v7 = vld [vmem:[#allocation2 + $0x6a] sm:$0xff] }
 0x12b   : > { %1157 = vst.msk [vmem:[#allocation4 + $0x48] sm:$0xff] %vm225_vm1, %v1125_v4  ;;  %10419 = vmatmul.mubr.msk.f32.gmra.mrb[118].mxu1 %vm225_vm1, %v11484_v52 }
 0x12c   : > { %1156 = vst.msk [vmem:[#allocation4 + $0x40] sm:$0xff] %vm225_vm1, %v1124_v13  ;;  %v10058_v30 = vpop.f32.mrb[14].mxu0  ;;  %v1095_v19 = vld [vmem:[#allocation4 + $0x58] sm:$0xff]  ;;  %10421 = vmatprep.mubr.msk.f32.mxu1 %vm225_vm1, %v13693_v34 }
 0x12d   : > { %709 = vst.msk [vmem:[#allocation4 + $0x78] sm:$0xff] %vm225_vm1, %v10058_v30  ;;  %v1127_v5 = vadd.f32 %v10102_v51, %v1095_v19  ;;  %v605_v6 = vpop.f32.mrb[15].mxu0  ;;  %v1094_v20 = vld [vmem:[#allocation4 + $0x50] sm:$0xff]  ;;  %10372 = vmatmul.mubr.msk.f32.gmra.mrb[120].mxu0 %vm225_vm1, %v13720_v23  ;;  %v10108_v24 = vpop.f32.mrb[14].mxu1 }
 0x12e   : > { %708 = vst.msk [vmem:[#allocation4 + $0x70] sm:$0xff] %vm225_vm1, %v605_v6  ;;  %v1126_v27 = vadd.f32 %v1094_v20, %v975_v59  ;;  %10374 = vmatprep.mubr.msk.f32.mxu0 %vm225_vm1, %v11496_v56  ;;  %v995_v52 = vpop.f32.mrb[15].mxu1  ;;  %v3912_v20 = vld [vmem:[#allocation2 + $0x82] sm:$0xff] }
 0x12f   : > { %1159 = vst.msk [vmem:[#allocation4 + $0x58] sm:$0xff] %vm225_vm1, %v1127_v5  ;;  %10422 = vmatmul.mubr.msk.f32.gmra.mrb[120].mxu1 %vm225_vm1, %v11500_v57 }
 0x130   : > { %1158 = vst.msk [vmem:[#allocation4 + $0x50] sm:$0xff] %vm225_vm1, %v1126_v27  ;;  %v10061_v34 = vpop.f32.mrb[16].mxu0  ;;  %v1097_v28 = vld [vmem:[#allocation4 + $0x68] sm:$0xff]  ;;  %10424 = vmatprep.mubr.msk.f32.mxu1 %vm225_vm1, %v13694_v35 }
 0x131   : > { %711 = vst.msk [vmem:[#allocation4 + $0x88] sm:$0xff] %vm225_vm1, %v10061_v34  ;;  %v1129_v10 = vadd.f32 %v10105_v9, %v1097_v28  ;;  %v615_v11 = vpop.f32.mrb[17].mxu0  ;;  %v1096_v48 = vld [vmem:[#allocation4 + $0x60] sm:$0xff]  ;;  %10375 = vmatmul.mubr.msk.f32.gmra.mrb[122].mxu0 %vm225_vm1, %v13721_v54  ;;  %v10111_v56 = vpop.f32.mrb[16].mxu1 }
 0x132   : > { %710 = vst.msk [vmem:[#allocation4 + $0x80] sm:$0xff] %vm225_vm1, %v615_v11  ;;  %v1128_v58 = vadd.f32 %v1096_v48, %v985_v14  ;;  %10377 = vmatprep.mubr.msk.f32.mxu0 %vm225_vm1, %v11712_v49  ;;  %v1005_v57 = vpop.f32.mrb[17].mxu1  ;;  %v3911_v9 = vld [vmem:[#allocation2 + $0x7a] sm:$0xff] }
 0x133   : > { %1161 = vst.msk [vmem:[#allocation4 + $0x68] sm:$0xff] %vm225_vm1, %v1129_v10  ;;  %10425 = vmatmul.mubr.msk.f32.gmra.mrb[122].mxu1 %vm225_vm1, %v13695_v38  ;;  %v3914_v54 = vld [vmem:[#allocation2 + $0x9a] sm:$0xff] }
 0x134   : > { %1160 = vst.msk [vmem:[#allocation4 + $0x60] sm:$0xff] %vm225_vm1, %v1128_v58  ;;  %v10064_v35 = vpop.f32.mrb[18].mxu0  ;;  %v1099_v17 = vld [vmem:[#allocation4 + $0x78] sm:$0xff]  ;;  %10427 = vmatprep.mubr.msk.f32.mxu1 %vm225_vm1, %v11851_v37  ;;  %v3915_v58 = vld [vmem:[#allocation2 + $0xaa] sm:$0xff] }
 0x135   : > { %713 = vst.msk [vmem:[#allocation4 + $0x98] sm:$0xff] %vm225_vm1, %v10064_v35  ;;  %v1131_v61 = vadd.f32 %v10108_v24, %v1099_v17  ;;  %v625_v32 = vpop.f32.mrb[19].mxu0  ;;  %v1098_v8 = vld [vmem:[#allocation4 + $0x70] sm:$0xff]  ;;  %10378 = vmatmul.mubr.msk.f32.gmra.mrb[124].mxu0 %vm225_vm1, %v11722_v55  ;;  %v10114_v49 = vpop.f32.mrb[18].mxu1  ;;  %v3482_v55 = vld [vmem:[#allocation2 + $0x1a1] sm:$0xff] }
 0x136   : > { %712 = vst.msk [vmem:[#allocation4 + $0x90] sm:$0xff] %vm225_vm1, %v625_v32  ;;  %v1130_v38 = vadd.f32 %v1098_v8, %v995_v52  ;;  %10380 = vmatprep.mubr.msk.f32.mxu0 %vm225_vm1, %v3027_v60  ;;  %v1015_v18 = vpop.f32.mrb[19].mxu1  ;;  %v3913_v24 = vld [vmem:[#allocation2 + $0x92] sm:$0xff] }
 0x137   : > { %1163 = vst.msk [vmem:[#allocation4 + $0x78] sm:$0xff] %vm225_vm1, %v1131_v61  ;;  %10428 = vmatmul.mubr.msk.f32.gmra.mrb[124].mxu1 %vm225_vm1, %v11863_v42 }
 0x138   : > { %1162 = vst.msk [vmem:[#allocation4 + $0x70] sm:$0xff] %vm225_vm1, %v1130_v38  ;;  %v10067_v37 = vpop.f32.mrb[20].mxu0  ;;  %v1101_v46 = vld [vmem:[#allocation4 + $0x88] sm:$0xff]  ;;  %10430 = vmatprep.mubr.msk.f32.mxu1 %vm225_vm1, %v3481_v15 }
 0x139   : > { %715 = vst.msk [vmem:[#allocation4 + $0xa8] sm:$0xff] %vm225_vm1, %v10067_v37  ;;  %v1133_v50 = vadd.f32 %v10111_v56, %v1101_v46  ;;  %v635_v33 = vpop.f32.mrb[21].mxu0  ;;  %v1100_v53 = vld [vmem:[#allocation4 + $0x80] sm:$0xff]  ;;  %10381 = vmatmul.mubr.msk.f32.gmra.mrb[126].mxu0 %vm225_vm1, %v3028_v16  ;;  %v10117_v36 = vpop.f32.mrb[20].mxu1  ;;  %v1539_v37 = vld [vmem:[#allocation4 + $0x8] sm:$0xff] }
 0x13a   : > { %714 = vst.msk [vmem:[#allocation4 + $0xa0] sm:$0xff] %vm225_vm1, %v635_v33  ;;  %v1132_v63 = vadd.f32 %v1100_v53, %v1005_v57  ;;  %10435 = vmatprep.mubr.msk.f32.mxu0 %vm225_vm1, %v11542_v31  ;;  %v1025_v42 = vpop.f32.mrb[21].mxu1  ;;  %v3917_v38 = vld [vmem:[#allocation2 + $0xc2] sm:$0xff] }
 0x13b   : > { %1165 = vst.msk [vmem:[#allocation4 + $0x88] sm:$0xff] %vm225_vm1, %v1133_v50  ;;  %10431 = vmatmul.mubr.msk.f32.gmra.mrb[126].mxu1 %vm225_vm1, %v3482_v55  ;;  %v1538_v53 = vld [vmem:[#allocation4] sm:$0xff] }
 0x13c   : > { %1164 = vst.msk [vmem:[#allocation4 + $0x80] sm:$0xff] %vm225_vm1, %v1132_v63  ;;  %v10070_v39 = vpop.f32.mrb[22].mxu0  ;;  %v1103_v22 = vld [vmem:[#allocation4 + $0x98] sm:$0xff] }
 0x13d   : > { %717 = vst.msk [vmem:[#allocation4 + $0xb8] sm:$0xff] %vm225_vm1, %v10070_v39  ;;  %v1135_v40 = vadd.f32 %v10114_v49, %v1103_v22  ;;  %v645_v43 = vpop.f32.mrb[23].mxu0  ;;  %v1102_v44 = vld [vmem:[#allocation4 + $0x90] sm:$0xff]  ;;  %10436 = vmatmul.mubr.msk.f32.vlgmr.msra.gmra.mrb[128].mxu0 %vm225_vm1, %v11558_v12  ;;  %v10120_v47 = vpop.f32.mrb[22].mxu1  ;;  %v3919_v39 = vld [vmem:[#allocation2 + $0xda] sm:$0xff] }
 0x13e   : > { %716 = vst.msk [vmem:[#allocation4 + $0xb0] sm:$0xff] %vm225_vm1, %v645_v43  ;;  %v1134_v31 = vadd.f32 %v1102_v44, %v1015_v18  ;;  %10438 = vmatprep.mubr.msk.f32.mxu0 %vm225_vm1, %v3907_v21  ;;  %v1035_v51 = vpop.f32.mrb[23].mxu1  ;;  %v3916_v49 = vld [vmem:[#allocation2 + $0xb2] sm:$0xff] }
 0x13f   : > { %1167 = vst.msk [vmem:[#allocation4 + $0x98] sm:$0xff] %vm225_vm1, %v1135_v40  ;;  %v1541_v44 = vld [vmem:[#allocation4 + $0x18] sm:$0xff] }
 0x140   : > { %1166 = vst.msk [vmem:[#allocation4 + $0x90] sm:$0xff] %vm225_vm1, %v1134_v31  ;;  %v10073_v25 = vpop.f32.mrb[24].mxu0  ;;  %v1105_v59 = vld [vmem:[#allocation4 + $0xa8] sm:$0xff] }
 0x141   : > { %719 = vst.msk [vmem:[#allocation4 + $0xc8] sm:$0xff] %vm225_vm1, %v10073_v25  ;;  %v1137_v26 = vadd.f32 %v10117_v36, %v1105_v59  ;;  %v655_v62 = vpop.f32.mrb[25].mxu0  ;;  %v1104_v12 = vld [vmem:[#allocation4 + $0xa0] sm:$0xff]  ;;  %10439 = vmatmul.mubr.msk.f32.gmra.mrb[130].mxu0 %vm225_vm1, %v3908_v0  ;;  %v10123_v4 = vpop.f32.mrb[24].mxu1 }
 0x142   : > { %718 = vst.msk [vmem:[#allocation4 + $0xc0] sm:$0xff] %vm225_vm1, %v655_v62  ;;  %v1136_v1 = vadd.f32 %v1104_v12, %v1025_v42  ;;  %10441 = vmatprep.mubr.msk.f32.mxu0 %vm225_vm1, %v3909_v3  ;;  %v1045_v2 = vpop.f32.mrb[25].mxu1  ;;  %v3918_v42 = vld [vmem:[#allocation2 + $0xca] sm:$0xff]  ;;  %v3921_v12 = vld [vmem:[#allocation2 + $0xf2] sm:$0xff] }
 0x143   : > { %1169 = vst.msk [vmem:[#allocation4 + $0xa8] sm:$0xff] %vm225_vm1, %v1137_v26  ;;  %v1540_v3 = vld [vmem:[#allocation4 + $0x10] sm:$0xff]  ;;  %v3920_v26 = vld [vmem:[#allocation2 + $0xe2] sm:$0xff] }
 0x144   : > { %1168 = vst.msk [vmem:[#allocation4 + $0xa0] sm:$0xff] %vm225_vm1, %v1136_v1  ;;  %v10076_v13 = vpop.f32.mrb[26].mxu0  ;;  %v1107_v29 = vld [vmem:[#allocation4 + $0xb8] sm:$0xff] }
 0x145   : > { %721 = vst.msk [vmem:[#allocation4 + $0xd8] sm:$0xff] %vm225_vm1, %v10076_v13  ;;  %v1139_v14 = vadd.f32 %v10120_v47, %v1107_v29  ;;  %v665_v30 = vpop.f32.mrb[27].mxu0  ;;  %v1106_v19 = vld [vmem:[#allocation4 + $0xb0] sm:$0xff]  ;;  %10442 = vmatmul.mubr.msk.f32.gmra.mrb[132].mxu0 %vm225_vm1, %v3910_v7  ;;  %v10126_v5 = vpop.f32.mrb[26].mxu1  ;;  %v1543_v7 = vld [vmem:[#allocation4 + $0x28] sm:$0xff]  ;;  %v1542_v13 = vld [vmem:[#allocation4 + $0x20] sm:$0xff] }
 0x146   : > { %720 = vst.msk [vmem:[#allocation4 + $0xd0] sm:$0xff] %vm225_vm1, %v665_v30  ;;  %v1138_v6 = vadd.f32 %v1106_v19, %v1035_v51  ;;  %10444 = vmatprep.mubr.msk.f32.mxu0 %vm225_vm1, %v3911_v9  ;;  %v1055_v23 = vpop.f32.mrb[27].mxu1  ;;  %v3922_v30 = vld [vmem:[#allocation2 + $0xfa] sm:$0xff] }
 0x147   : > { %1171 = vst.msk [vmem:[#allocation4 + $0xb8] sm:$0xff] %vm225_vm1, %v1139_v14 }
 0x148   : > { %1170 = vst.msk [vmem:[#allocation4 + $0xb0] sm:$0xff] %vm225_vm1, %v1138_v6  ;;  %v10079_v27 = vpop.f32.mrb[28].mxu0  ;;  %v1109_v52 = vld [vmem:[#allocation4 + $0xc8] sm:$0xff] }
 0x149   : > { %723 = vst.msk [vmem:[#allocation4 + $0xe8] sm:$0xff] %vm225_vm1, %v10079_v27  ;;  %v1141_v34 = vadd.f32 %v10123_v4, %v1109_v52  ;;  %v675_v28 = vpop.f32.mrb[29].mxu0  ;;  %v1108_v10 = vld [vmem:[#allocation4 + $0xc0] sm:$0xff]  ;;  %10445 = vmatmul.mubr.msk.f32.gmra.mrb[134].mxu0 %vm225_vm1, %v3912_v20  ;;  %v10129_v11 = vpop.f32.mrb[28].mxu1  ;;  %v3923_v20 = vld [vmem:[#allocation2 + $0x10a] sm:$0xff]  ;;  %v1545_v52 = vld [vmem:[#allocation4 + $0x38] sm:$0xff] }
 0x14a   : > { %722 = vst.msk [vmem:[#allocation4 + $0xe0] sm:$0xff] %vm225_vm1, %v675_v28  ;;  %v1140_v48 = vadd.f32 %v1108_v10, %v1045_v2  ;;  %10447 = vmatprep.mubr.msk.f32.mxu0 %vm225_vm1, %v3913_v24  ;;  %v1065_v56 = vpop.f32.mrb[29].mxu1  ;;  %v1544_v10 = vld [vmem:[#allocation4 + $0x30] sm:$0xff] }
 0x14b   : > { %1173 = vst.msk [vmem:[#allocation4 + $0xc8] sm:$0xff] %vm225_vm1, %v1141_v34 }
 0x14c   : > { %1172 = vst.msk [vmem:[#allocation4 + $0xc0] sm:$0xff] %vm225_vm1, %v1140_v48  ;;  %v10082_v57 = vpop.f32.mrb[30].mxu0  ;;  %v1111_v60 = vld [vmem:[#allocation4 + $0xd8] sm:$0xff] }
 0x14d   : > { %725 = vst.msk [vmem:[#allocation4 + $0xf8] sm:$0xff] %vm225_vm1, %v10082_v57  ;;  %v1143_v35 = vadd.f32 %v10126_v5, %v1111_v60  ;;  %v685_v17 = vpop.f32.mrb[31].mxu0  ;;  %v1110_v61 = vld [vmem:[#allocation4 + $0xd0] sm:$0xff]  ;;  %10448 = vmatmul.mubr.msk.f32.gmra.mrb[136].mxu0 %vm225_vm1, %v3914_v54  ;;  %v10132_v32 = vpop.f32.mrb[30].mxu1  ;;  %v3925_v60 = vld [vmem:[#allocation2 + $0x122] sm:$0xff] }
 0x14e   : > { %724 = vst.msk [vmem:[#allocation4 + $0xf0] sm:$0xff] %vm225_vm1, %v685_v17  ;;  %v1142_v8 = vadd.f32 %v1110_v61, %v1055_v23  ;;  %10450 = vmatprep.mubr.msk.f32.mxu0 %vm225_vm1, %v3915_v58  ;;  %v1075_v15 = vpop.f32.mrb[31].mxu1  ;;  %v3924_v54 = vld [vmem:[#allocation2 + $0x112] sm:$0xff] }
 0x14f   : > { %1175 = vst.msk [vmem:[#allocation4 + $0xd8] sm:$0xff] %vm225_vm1, %v1143_v35 }
 0x150   : > { %1174 = vst.msk [vmem:[#allocation4 + $0xd0] sm:$0xff] %vm225_vm1, %v1142_v8  ;;  %v1113_v16 = vld [vmem:[#allocation4 + $0xe8] sm:$0xff]  ;;  %v10137_v18 = vpop.f32.mrb[32].mxu0 }
 0x151   : > { %v1145_v46 = vadd.f32 %v10129_v11, %v1113_v16  ;;  %v1571_v55 = vadd.f32 %v10137_v18, %v1539_v37  ;;  %v1112_v50 = vld [vmem:[#allocation4 + $0xe0] sm:$0xff]  ;;  %v1379_v33 = vpop.f32.mrb[33].mxu0  ;;  %10451 = vmatmul.mubr.msk.f32.gmra.mrb[138].mxu0 %vm225_vm1, %v3916_v49  ;;  %v3926_v18 = vld [vmem:[#allocation2 + $0x12a] sm:$0xff] }
 0x152   : > { %v1144_v36 = vadd.f32 %v1112_v50, %v1065_v56  ;;  %v1570_v63 = vadd.f32 %v1538_v53, %v1379_v33  ;;  %10453 = vmatprep.mubr.msk.f32.mxu0 %vm225_vm1, %v3917_v38  ;;  %v10187_v21 = vpop.f32.mrb[32].mxu1  ;;  %v3927_v50 = vld [vmem:[#allocation2 + $0x13a] sm:$0xff] }
 0x153   : > { %1177 = vst.msk [vmem:[#allocation4 + $0xe8] sm:$0xff] %vm225_vm1, %v1145_v46  ;;  %1603 = vst.msk [vmem:[#allocation4 + $0x8] sm:$0xff] %vm225_vm1, %v1571_v55  ;;  %v1833_v22 = vpop.f32.mrb[33].mxu1 }
 0x154   : > { %1176 = vst.msk [vmem:[#allocation4 + $0xe0] sm:$0xff] %vm225_vm1, %v1144_v36  ;;  %1602 = vst.msk [vmem:[#allocation4] sm:$0xff] %vm225_vm1, %v1570_v63  ;;  %v1115_v40 = vld [vmem:[#allocation4 + $0xf8] sm:$0xff]  ;;  %v10140_v43 = vpop.f32.mrb[34].mxu0 }
 0x155   : > { %v1147_v47 = vadd.f32 %v10132_v32, %v1115_v40  ;;  %v1573_v31 = vadd.f32 %v10140_v43, %v1541_v44  ;;  %v1114_v0 = vld [vmem:[#allocation4 + $0xf0] sm:$0xff]  ;;  %v1389_v51 = vpop.f32.mrb[35].mxu0  ;;  %10454 = vmatmul.mubr.msk.f32.gmra.mrb[140].mxu0 %vm225_vm1, %v3918_v42  ;;  %v1547_v32 = vld [vmem:[#allocation4 + $0x48] sm:$0xff]  ;;  %v1549_v63 = vld [vmem:[#allocation4 + $0x58] sm:$0xff] }
 0x156   : > { %v1146_v25 = vadd.f32 %v1114_v0, %v1075_v15  ;;  %v1572_v59 = vadd.f32 %v1540_v3, %v1389_v51  ;;  %10456 = vmatprep.mubr.msk.f32.mxu0 %vm225_vm1, %v3919_v39  ;;  %v10190_v62 = vpop.f32.mrb[34].mxu1  ;;  %v1546_v15 = vld [vmem:[#allocation4 + $0x40] sm:$0xff]  ;;  %v1548_v39 = vld [vmem:[#allocation4 + $0x50] sm:$0xff] }
 0x157   : > { %1179 = vst.msk [vmem:[#allocation4 + $0xf8] sm:$0xff] %vm225_vm1, %v1147_v47  ;;  %1605 = vst.msk [vmem:[#allocation4 + $0x18] sm:$0xff] %vm225_vm1, %v1573_v31  ;;  %v1843_v4 = vpop.f32.mrb[35].mxu1  ;;  %v3928_v43 = vld [vmem:[#allocation2 + $0x142] sm:$0xff]  ;;  %v3929_v0 = vld [vmem:[#allocation2 + $0x152] sm:$0xff] }
 0x158   : > { %1178 = vst.msk [vmem:[#allocation4 + $0xf0] sm:$0xff] %vm225_vm1, %v1146_v25  ;;  %1604 = vst.msk [vmem:[#allocation4 + $0x10] sm:$0xff] %vm225_vm1, %v1572_v59  ;;  %v10143_v1 = vpop.f32.mrb[36].mxu0  ;;  %v4570_v3 = vld [vmem:[%s13600_s3] sm:$0xf] }
 0x159   : > { %v1575_v2 = vadd.f32 %v10143_v1, %v1543_v7  ;;  %v1399_v9 = vpop.f32.mrb[37].mxu0  ;;  %10457 = vmatmul.mubr.msk.f32.gmra.mrb[142].mxu0 %vm225_vm1, %v3920_v26  ;;  %v1551_v26 = vld [vmem:[#allocation4 + $0x68] sm:$0xff]  ;;  %10483 = vmatprep.subr.msk.mxu1 %vm465_vm0, %v4570_v3 }
 0x15a   : > { %v1574_v29 = vadd.f32 %v1542_v13, %v1399_v9  ;;  %v1993_v14 = vld [vmem:[#allocation4 + $0x8] sm:$0xff]  ;;  %10459 = vmatprep.mubr.msk.f32.mxu0 %vm225_vm1, %v3921_v12  ;;  %v10193_v19 = vpop.f32.mrb[36].mxu1  ;;  %10484 = vmatpush3.msk.msra.mxu1 %vm465_vm0, %v4570_v3 }
 0x15b   : > { %1607 = vst.msk [vmem:[#allocation4 + $0x28] sm:$0xff] %vm225_vm1, %v1575_v2  ;;  %v2025_v5 = vadd.f32 %v10187_v21, %v1993_v14  ;;  %v1992_v6 = vld [vmem:[#allocation4] sm:$0xff]  ;;  %v1853_v23 = vpop.f32.mrb[37].mxu1  ;;  %v3931_v14 = vld [vmem:[#allocation2 + $0x16a] sm:$0xff] }
 0x15c   : > { %1606 = vst.msk [vmem:[#allocation4 + $0x20] sm:$0xff] %vm225_vm1, %v1574_v29  ;;  %v2024_v24 = vadd.f32 %v1992_v6, %v1833_v22  ;;  %v10146_v27 = vpop.f32.mrb[38].mxu0  ;;  %v3930_v2 = vld [vmem:[#allocation2 + $0x15a] sm:$0xff] }
 0x15d   : > { %2057 = vst.msk [vmem:[#allocation4 + $0x8] sm:$0xff] %vm225_vm1, %v2025_v5  ;;  %v1577_v34 = vadd.f32 %v10146_v27, %v1545_v52  ;;  %v1409_v28 = vpop.f32.mrb[39].mxu0  ;;  %10460 = vmatmul.mubr.msk.f32.gmra.mrb[144].mxu0 %vm225_vm1, %v3922_v30  ;;  %v1553_v6 = vld [vmem:[#allocation4 + $0x78] sm:$0xff] }
 0x15e   : > { %2056 = vst.msk [vmem:[#allocation4] sm:$0xff] %vm225_vm1, %v2024_v24  ;;  %v1576_v11 = vadd.f32 %v1544_v10, %v1409_v28  ;;  %v1995_v48 = vld [vmem:[#allocation4 + $0x18] sm:$0xff]  ;;  %10462 = vmatprep.mubr.msk.f32.mxu0 %vm225_vm1, %v3923_v20  ;;  %v10196_v56 = vpop.f32.mrb[38].mxu1  ;;  %v1552_v24 = vld [vmem:[#allocation4 + $0x70] sm:$0xff] }
 0x15f   : > { %1609 = vst.msk [vmem:[#allocation4 + $0x38] sm:$0xff] %vm225_vm1, %v1577_v34  ;;  %v2027_v58 = vadd.f32 %v10190_v62, %v1995_v48  ;;  %v1994_v57 = vld [vmem:[#allocation4 + $0x10] sm:$0xff]  ;;  %v1863_v35 = vpop.f32.mrb[39].mxu1 }
 0x160   : > { %1608 = vst.msk [vmem:[#allocation4 + $0x30] sm:$0xff] %vm225_vm1, %v1576_v11  ;;  %v2026_v17 = vadd.f32 %v1994_v57, %v1843_v4  ;;  %v10149_v61 = vpop.f32.mrb[40].mxu0  ;;  %v1550_v4 = vld [vmem:[#allocation4 + $0x60] sm:$0xff]  ;;  %v3932_v34 = vld [vmem:[#allocation2 + $0x172] sm:$0xff] }
 0x161   : > { %2059 = vst.msk [vmem:[#allocation4 + $0x18] sm:$0xff] %vm225_vm1, %v2027_v58  ;;  %v1579_v8 = vadd.f32 %v10149_v61, %v1547_v32  ;;  %v1419_v49 = vpop.f32.mrb[41].mxu0  ;;  %10463 = vmatmul.mubr.msk.f32.gmra.mrb[146].mxu0 %vm225_vm1, %v3924_v54  ;;  %v1555_v58 = vld [vmem:[#allocation4 + $0x88] sm:$0xff] }
 0x162   : > { %2058 = vst.msk [vmem:[#allocation4 + $0x10] sm:$0xff] %vm225_vm1, %v2026_v17  ;;  %v1578_v38 = vadd.f32 %v1546_v15, %v1419_v49  ;;  %v1997_v16 = vld [vmem:[#allocation4 + $0x28] sm:$0xff]  ;;  %10465 = vmatprep.mubr.msk.f32.mxu0 %vm225_vm1, %v3925_v60  ;;  %v10199_v37 = vpop.f32.mrb[40].mxu1  ;;  %v3935_v15 = vld [vmem:[#allocation2 + $0x19a] sm:$0xff] }
 0x163   : > { %1611 = vst.msk [vmem:[#allocation4 + $0x48] sm:$0xff] %vm225_vm1, %v1579_v8  ;;  %v2029_v46 = vadd.f32 %v10193_v19, %v1997_v16  ;;  %v1996_v55 = vld [vmem:[#allocation4 + $0x20] sm:$0xff]  ;;  %v1873_v33 = vpop.f32.mrb[41].mxu1 }
 0x164   : > { %1610 = vst.msk [vmem:[#allocation4 + $0x40] sm:$0xff] %vm225_vm1, %v1578_v38  ;;  %v2028_v53 = vadd.f32 %v1996_v55, %v1853_v23  ;;  %v10152_v36 = vpop.f32.mrb[42].mxu0 }
 0x165   : > { %2061 = vst.msk [vmem:[#allocation4 + $0x28] sm:$0xff] %vm225_vm1, %v2029_v46  ;;  %v1581_v42 = vadd.f32 %v10152_v36, %v1549_v63  ;;  %v1429_v21 = vpop.f32.mrb[43].mxu0  ;;  %10466 = vmatmul.mubr.msk.f32.gmra.mrb[148].mxu0 %vm225_vm1, %v3926_v18 }
 0x166   : > { %2060 = vst.msk [vmem:[#allocation4 + $0x20] sm:$0xff] %vm225_vm1, %v2028_v53  ;;  %v1580_v22 = vadd.f32 %v1548_v39, %v1429_v21  ;;  %v1999_v40 = vld [vmem:[#allocation4 + $0x38] sm:$0xff]  ;;  %10468 = vmatprep.mubr.msk.f32.mxu0 %vm225_vm1, %v3927_v50  ;;  %v10202_v44 = vpop.f32.mrb[42].mxu1  ;;  %v1556_v50 = vld [vmem:[#allocation4 + $0x90] sm:$0xff]  ;;  %v3936_v53 = vld [vmem:[#allocation2 + $0x1a2] sm:$0xff] }
 0x167   : > { %1613 = vst.msk [vmem:[#allocation4 + $0x58] sm:$0xff] %vm225_vm1, %v1581_v42  ;;  %v2031_v47 = vadd.f32 %v10196_v56, %v1999_v40  ;;  %v1998_v31 = vld [vmem:[#allocation4 + $0x30] sm:$0xff]  ;;  %v1883_v51 = vpop.f32.mrb[43].mxu1  ;;  %v1559_v40 = vld [vmem:[#allocation4 + $0xa8] sm:$0xff] }
 0x168   : > { %1612 = vst.msk [vmem:[#allocation4 + $0x50] sm:$0xff] %vm225_vm1, %v1580_v22  ;;  %v2030_v25 = vadd.f32 %v1998_v31, %v1863_v35  ;;  %v10155_v59 = vpop.f32.mrb[44].mxu0  ;;  %v1554_v35 = vld [vmem:[#allocation4 + $0x80] sm:$0xff] }
 0x169   : > { %2063 = vst.msk [vmem:[#allocation4 + $0x38] sm:$0xff] %vm225_vm1, %v2031_v47  ;;  %v1583_v62 = vadd.f32 %v10155_v59, %v1551_v26  ;;  %v1439_v12 = vpop.f32.mrb[45].mxu0  ;;  %10469 = vmatmul.mubr.msk.f32.gmra.mrb[150].mxu0 %vm225_vm1, %v3928_v43 }
 0x16a   : > { %2062 = vst.msk [vmem:[#allocation4 + $0x30] sm:$0xff] %vm225_vm1, %v2030_v25  ;;  %v1582_v1 = vadd.f32 %v1550_v4, %v1439_v12  ;;  %v2001_v7 = vld [vmem:[#allocation4 + $0x48] sm:$0xff]  ;;  %10471 = vmatprep.mubr.msk.f32.mxu0 %vm225_vm1, %v3929_v0  ;;  %v10205_v9 = vpop.f32.mrb[44].mxu1 }
 0x16b   : > { %1615 = vst.msk [vmem:[#allocation4 + $0x68] sm:$0xff] %vm225_vm1, %v1583_v62  ;;  %v2033_v13 = vadd.f32 %v10199_v37, %v2001_v7  ;;  %v2000_v29 = vld [vmem:[#allocation4 + $0x40] sm:$0xff]  ;;  %v1893_v30 = vpop.f32.mrb[45].mxu1  ;;  %v1557_v37 = vld [vmem:[#allocation4 + $0x98] sm:$0xff] }
 0x16c   : > { %1614 = vst.msk [vmem:[#allocation4 + $0x60] sm:$0xff] %vm225_vm1, %v1582_v1  ;;  %v2032_v19 = vadd.f32 %v2000_v29, %v1873_v33  ;;  %v10158_v5 = vpop.f32.mrb[46].mxu0  ;;  %v1561_v62 = vld [vmem:[#allocation4 + $0xb8] sm:$0xff]  ;;  %v1560_v1 = vld [vmem:[#allocation4 + $0xb0] sm:$0xff] }
 0x16d   : > { %2065 = vst.msk [vmem:[#allocation4 + $0x48] sm:$0xff] %vm225_vm1, %v2033_v13  ;;  %v1585_v20 = vadd.f32 %v10158_v5, %v1553_v6  ;;  %v1449_v23 = vpop.f32.mrb[47].mxu0  ;;  %10472 = vmatmul.mubr.msk.f32.gmra.mrb[152].mxu0 %vm225_vm1, %v3930_v2  ;;  %v1563_v5 = vld [vmem:[#allocation4 + $0xc8] sm:$0xff] }
 0x16e   : > { %2064 = vst.msk [vmem:[#allocation4 + $0x40] sm:$0xff] %vm225_vm1, %v2032_v19  ;;  %v1584_v27 = vadd.f32 %v1552_v24, %v1449_v23  ;;  %v2003_v52 = vld [vmem:[#allocation4 + $0x58] sm:$0xff]  ;;  %10474 = vmatprep.mubr.msk.f32.mxu0 %vm225_vm1, %v3931_v14  ;;  %v10208_v28 = vpop.f32.mrb[46].mxu1  ;;  %v1562_v23 = vld [vmem:[#allocation4 + $0xc0] sm:$0xff] }
 0x16f   : > { %1617 = vst.msk [vmem:[#allocation4 + $0x78] sm:$0xff] %vm225_vm1, %v1585_v20  ;;  %v2035_v10 = vadd.f32 %v10202_v44, %v2003_v52  ;;  %v2002_v11 = vld [vmem:[#allocation4 + $0x50] sm:$0xff]  ;;  %v1903_v48 = vpop.f32.mrb[47].mxu1  ;;  %v1558_v44 = vld [vmem:[#allocation4 + $0xa0] sm:$0xff] }
 0x170   : > { %1616 = vst.msk [vmem:[#allocation4 + $0x70] sm:$0xff] %vm225_vm1, %v1584_v27  ;;  %v2034_v54 = vadd.f32 %v2002_v11, %v1883_v51  ;;  %v10161_v56 = vpop.f32.mrb[48].mxu0 }
 0x171   : > { %2067 = vst.msk [vmem:[#allocation4 + $0x58] sm:$0xff] %vm225_vm1, %v2035_v10  ;;  %v1587_v57 = vadd.f32 %v10161_v56, %v1555_v58  ;;  %v1459_v60 = vpop.f32.mrb[49].mxu0  ;;  %10475 = vmatmul.mubr.msk.f32.gmra.mrb[154].mxu0 %vm225_vm1, %v3932_v34 }
 0x172   : > { %2066 = vst.msk [vmem:[#allocation4 + $0x50] sm:$0xff] %vm225_vm1, %v2034_v54  ;;  %v1586_v17 = vadd.f32 %v1554_v35, %v1459_v60  ;;  %v2005_v61 = vld [vmem:[#allocation4 + $0x68] sm:$0xff]  ;;  %10477 = vmatprep.mubr.msk.f32.mxu0 %vm225_vm1, %v11859_v41  ;;  %v10211_v32 = vpop.f32.mrb[48].mxu1  ;;  %v1565_v54 = vld [vmem:[#allocation4 + $0xd8] sm:$0xff] }
 0x173   : > { %1619 = vst.msk [vmem:[#allocation4 + $0x88] sm:$0xff] %vm225_vm1, %v1587_v57  ;;  %v2037_v8 = vadd.f32 %v10205_v9, %v2005_v61  ;;  %v2004_v49 = vld [vmem:[#allocation4 + $0x60] sm:$0xff]  ;;  %v1913_v38 = vpop.f32.mrb[49].mxu1  ;;  %v1564_v57 = vld [vmem:[#allocation4 + $0xd0] sm:$0xff] }
 0x174   : > { %1618 = vst.msk [vmem:[#allocation4 + $0x80] sm:$0xff] %vm225_vm1, %v1586_v17  ;;  %v2036_v16 = vadd.f32 %v2004_v49, %v1893_v30  ;;  %v10164_v18 = vpop.f32.mrb[50].mxu0 }
 0x175   : > { %2069 = vst.msk [vmem:[#allocation4 + $0x68] sm:$0xff] %vm225_vm1, %v2037_v8  ;;  %v1589_v46 = vadd.f32 %v10164_v18, %v1557_v37  ;;  %v1469_v55 = vpop.f32.mrb[51].mxu0  ;;  %10478 = vmatmul.mubr.msk.f32.gmra.mrb[156].mxu0 %vm225_vm1, %v11869_v45  ;;  %v1566_v37 = vld [vmem:[#allocation4 + $0xe0] sm:$0xff] }
 0x176   : > { %2068 = vst.msk [vmem:[#allocation4 + $0x60] sm:$0xff] %vm225_vm1, %v2036_v16  ;;  %v1588_v41 = vadd.f32 %v1556_v50, %v1469_v55  ;;  %v2007_v33 = vld [vmem:[#allocation4 + $0x78] sm:$0xff]  ;;  %10480 = vmatprep.mubr.msk.f32.mxu0 %vm225_vm1, %v3935_v15  ;;  %v10214_v36 = vpop.f32.mrb[50].mxu1 }
 0x177   : > { %1621 = vst.msk [vmem:[#allocation4 + $0x98] sm:$0xff] %vm225_vm1, %v1589_v46  ;;  %v2039_v63 = vadd.f32 %v10208_v28, %v2007_v33  ;;  %v2006_v42 = vld [vmem:[#allocation4 + $0x70] sm:$0xff]  ;;  %v1923_v21 = vpop.f32.mrb[51].mxu1 }
 0x178   : > { %1620 = vst.msk [vmem:[#allocation4 + $0x90] sm:$0xff] %vm225_vm1, %v1588_v41  ;;  %v2038_v39 = vadd.f32 %v2006_v42, %v1903_v48  ;;  %v10167_v22 = vpop.f32.mrb[52].mxu0  ;;  %v1569_v42 = vld [vmem:[#allocation4 + $0xf8] sm:$0xff] }
 0x179   : > { %2071 = vst.msk [vmem:[#allocation4 + $0x78] sm:$0xff] %vm225_vm1, %v2039_v63  ;;  %v1591_v45 = vadd.f32 %v10167_v22, %v1559_v40  ;;  %v1479_v43 = vpop.f32.mrb[53].mxu0  ;;  %10481 = vmatmul.mubr.msk.f32.gmra.mrb[158].mxu0 %vm225_vm1, %v3936_v53  ;;  %v1568_v22 = vld [vmem:[#allocation4 + $0xf0] sm:$0xff] }
 0x17a   : > { %2070 = vst.msk [vmem:[#allocation4 + $0x70] sm:$0xff] %vm225_vm1, %v2038_v39  ;;  %v1590_v47 = vadd.f32 %v1558_v44, %v1479_v43  ;;  %v2009_v31 = vld [vmem:[#allocation4 + $0x88] sm:$0xff]  ;;  %v10217_v0 = vpop.f32.mrb[52].mxu1 }
 0x17b   : > { %1623 = vst.msk [vmem:[#allocation4 + $0xa8] sm:$0xff] %vm225_vm1, %v1591_v45  ;;  %v2041_v51 = vadd.f32 %v10211_v32, %v2009_v31  ;;  %v2008_v3 = vld [vmem:[#allocation4 + $0x80] sm:$0xff]  ;;  %v1933_v25 = vpop.f32.mrb[53].mxu1 }
 0x17c   : > { %1622 = vst.msk [vmem:[#allocation4 + $0xa0] sm:$0xff] %vm225_vm1, %v1590_v47  ;;  %v2040_v59 = vadd.f32 %v2008_v3, %v1913_v38  ;;  %v10170_v26 = vpop.f32.mrb[54].mxu0  ;;  %v1567_v38 = vld [vmem:[#allocation4 + $0xe8] sm:$0xff] }
 0x17d   : > { %2073 = vst.msk [vmem:[#allocation4 + $0x88] sm:$0xff] %vm225_vm1, %v2041_v51  ;;  %v1593_v12 = vadd.f32 %v10170_v26, %v1561_v62  ;;  %v1489_v4 = vpop.f32.mrb[55].mxu0  ;;  %v2447_v3 = vld [vmem:[#allocation4 + $0x8] sm:$0xff]  ;;  %v2446_v26 = vld [vmem:[#allocation4] sm:$0xff] }
 0x17e   : > { %2072 = vst.msk [vmem:[#allocation4 + $0x80] sm:$0xff] %vm225_vm1, %v2040_v59  ;;  %v1592_v7 = vadd.f32 %v1560_v1, %v1489_v4  ;;  %v2011_v2 = vld [vmem:[#allocation4 + $0x98] sm:$0xff]  ;;  %v10220_v9 = vpop.f32.mrb[54].mxu1 }
 0x17f   : > { %1625 = vst.msk [vmem:[#allocation4 + $0xb8] sm:$0xff] %vm225_vm1, %v1593_v12  ;;  %v2043_v13 = vadd.f32 %v10214_v36, %v2011_v2  ;;  %v2010_v29 = vld [vmem:[#allocation4 + $0x90] sm:$0xff]  ;;  %v1943_v14 = vpop.f32.mrb[55].mxu1 }
 0x180   : > { %1624 = vst.msk [vmem:[#allocation4 + $0xb0] sm:$0xff] %vm225_vm1, %v1592_v7  ;;  %v2042_v30 = vadd.f32 %v2010_v29, %v1923_v21  ;;  %v10173_v19 = vpop.f32.mrb[56].mxu0  ;;  %v2449_v29 = vld [vmem:[#allocation4 + $0x18] sm:$0xff] }
 0x181   : > { %2075 = vst.msk [vmem:[#allocation4 + $0x98] sm:$0xff] %vm225_vm1, %v2043_v13  ;;  %v1595_v6 = vadd.f32 %v10173_v19, %v1563_v5  ;;  %v1499_v20 = vpop.f32.mrb[57].mxu0  ;;  %v2448_v19 = vld [vmem:[#allocation4 + $0x10] sm:$0xff] }
 0x182   : > { %2074 = vst.msk [vmem:[#allocation4 + $0x90] sm:$0xff] %vm225_vm1, %v2042_v30  ;;  %v1594_v24 = vadd.f32 %v1562_v23, %v1499_v20  ;;  %v2013_v27 = vld [vmem:[#allocation4 + $0xa8] sm:$0xff]  ;;  %v10223_v52 = vpop.f32.mrb[56].mxu1 }
 0x183   : > { %1627 = vst.msk [vmem:[#allocation4 + $0xc8] sm:$0xff] %vm225_vm1, %v1595_v6  ;;  %v2045_v34 = vadd.f32 %v10217_v0, %v2013_v27  ;;  %v2012_v28 = vld [vmem:[#allocation4 + $0xa0] sm:$0xff]  ;;  %v1953_v10 = vpop.f32.mrb[57].mxu1 }
 0x184   : > { %1626 = vst.msk [vmem:[#allocation4 + $0xc0] sm:$0xff] %vm225_vm1, %v1594_v24  ;;  %v2044_v11 = vadd.f32 %v2012_v28, %v1933_v25  ;;  %v10176_v48 = vpop.f32.mrb[58].mxu0  ;;  %v2451_v28 = vld [vmem:[#allocation4 + $0x28] sm:$0xff] }
 0x185   : > { %2077 = vst.msk [vmem:[#allocation4 + $0xa8] sm:$0xff] %vm225_vm1, %v2045_v34  ;;  %v1597_v56 = vadd.f32 %v10176_v48, %v1565_v54  ;;  %v1509_v58 = vpop.f32.mrb[59].mxu0  ;;  %v2450_v48 = vld [vmem:[#allocation4 + $0x20] sm:$0xff] }
 0x186   : > { %2076 = vst.msk [vmem:[#allocation4 + $0xa0] sm:$0xff] %vm225_vm1, %v2044_v11  ;;  %v1596_v60 = vadd.f32 %v1564_v57, %v1509_v58  ;;  %v2015_v35 = vld [vmem:[#allocation4 + $0xb8] sm:$0xff]  ;;  %v10226_v17 = vpop.f32.mrb[58].mxu1 }
 0x187   : > { %1629 = vst.msk [vmem:[#allocation4 + $0xd8] sm:$0xff] %vm225_vm1, %v1597_v56  ;;  %v2047_v61 = vadd.f32 %v10220_v9, %v2015_v35  ;;  %v2014_v32 = vld [vmem:[#allocation4 + $0xb0] sm:$0xff]  ;;  %v1963_v8 = vpop.f32.mrb[59].mxu1 }
 0x188   : > { %1628 = vst.msk [vmem:[#allocation4 + $0xd0] sm:$0xff] %vm225_vm1, %v1596_v60  ;;  %v2046_v49 = vadd.f32 %v2014_v32, %v1943_v14  ;;  %v10179_v15 = vpop.f32.mrb[60].mxu0  ;;  %v2453_v32 = vld [vmem:[#allocation4 + $0x38] sm:$0xff] }
 0x189   : > { %2079 = vst.msk [vmem:[#allocation4 + $0xb8] sm:$0xff] %vm225_vm1, %v2047_v61  ;;  %v1599_v16 = vadd.f32 %v10179_v15, %v1567_v38  ;;  %v1519_v18 = vpop.f32.mrb[61].mxu0  ;;  %v2452_v15 = vld [vmem:[#allocation4 + $0x30] sm:$0xff] }
 0x18a   : > { %2078 = vst.msk [vmem:[#allocation4 + $0xb0] sm:$0xff] %vm225_vm1, %v2046_v49  ;;  %v1598_v46 = vadd.f32 %v1566_v37, %v1519_v18  ;;  %v2017_v55 = vld [vmem:[#allocation4 + $0xc8] sm:$0xff]  ;;  %v10229_v50 = vpop.f32.mrb[60].mxu1 }
 0x18b   : > { %1631 = vst.msk [vmem:[#allocation4 + $0xe8] sm:$0xff] %vm225_vm1, %v1599_v16  ;;  %v2049_v41 = vadd.f32 %v10223_v52, %v2017_v55  ;;  %v2016_v33 = vld [vmem:[#allocation4 + $0xc0] sm:$0xff]  ;;  %v1973_v53 = vpop.f32.mrb[61].mxu1 }
 0x18c   : > { %1630 = vst.msk [vmem:[#allocation4 + $0xe0] sm:$0xff] %vm225_vm1, %v1598_v46  ;;  %v2048_v36 = vadd.f32 %v2016_v33, %v1953_v10  ;;  %v10182_v63 = vpop.f32.mrb[62].mxu0  ;;  %v2455_v33 = vld [vmem:[#allocation4 + $0x48] sm:$0xff] }
 0x18d   : > { %2081 = vst.msk [vmem:[#allocation4 + $0xc8] sm:$0xff] %vm225_vm1, %v2049_v41  ;;  %v1601_v21 = vadd.f32 %v10182_v63, %v1569_v42  ;;  %v1529_v39 = vpop.f32.mrb[63].mxu0  ;;  %v2454_v63 = vld [vmem:[#allocation4 + $0x40] sm:$0xff] }
 0x18e   : > { %2080 = vst.msk [vmem:[#allocation4 + $0xc0] sm:$0xff] %vm225_vm1, %v2048_v36  ;;  %v1600_v40 = vadd.f32 %v1568_v22, %v1529_v39  ;;  %v2019_v45 = vld [vmem:[#allocation4 + $0xd8] sm:$0xff]  ;;  %v10232_v43 = vpop.f32.mrb[62].mxu1  ;;  %v9162_v22 = vld [vmem:[%s13600_s3 + $0x4] sm:$0xf] }
 0x18f   : > { %1633 = vst.msk [vmem:[#allocation4 + $0xf8] sm:$0xff] %vm225_vm1, %v1601_v21  ;;  %v2051_v44 = vadd.f32 %v10226_v17, %v2019_v45  ;;  %v2018_v47 = vld [vmem:[#allocation4 + $0xd0] sm:$0xff]  ;;  %v1983_v31 = vpop.f32.mrb[63].mxu1  ;;  %10533 = vmatprep.subr.msk.mxu0 %vm465_vm0, %v9162_v22 }
 0x190   : > { %1632 = vst.msk [vmem:[#allocation4 + $0xf0] sm:$0xff] %vm225_vm1, %v1600_v40  ;;  %v2050_v0 = vadd.f32 %v2018_v47, %v1963_v8  ;;  %v10237_v51 = vpop.f32.mrb[64].mxu0  ;;  %v4538_v40 = vld [vmem:[#allocation3] sm:$0xff]  ;;  %v4539_v47 = vld [vmem:[#allocation3 + $0x8] sm:$0xff]  ;;  %10534 = vmatpush3.msk.msra.mxu0 %vm465_vm0, %v9162_v22 }
 0x191   : > { %2083 = vst.msk [vmem:[#allocation4 + $0xd8] sm:$0xff] %vm225_vm1, %v2051_v44  ;;  %v2479_v25 = vadd.f32 %v10237_v51, %v2447_v3  ;;  %v2287_v59 = vpop.f32.mrb[65].mxu0  ;;  %10485 = vmatprep.mubr.msk.f32.mxu1 %vm225_vm1, %v4538_v40  ;;  %v2457_v3 = vld [vmem:[#allocation4 + $0x58] sm:$0xff] }
 0x192   : > { %2082 = vst.msk [vmem:[#allocation4 + $0xd0] sm:$0xff] %vm225_vm1, %v2050_v0  ;;  %v2478_v62 = vadd.f32 %v2446_v26, %v2287_v59  ;;  %v2021_v12 = vld [vmem:[#allocation4 + $0xe8] sm:$0xff]  ;;  %v10287_v4 = vpop.f32.mrb[64].mxu1  ;;  %10486 = vmatmul.mubr.msk.f32.vlgmr.msra.gmra.mrb[128].mxu1 %vm225_vm1, %v4539_v47 }
 0x193   : > { %2511 = vst.msk [vmem:[#allocation4 + $0x8] sm:$0xff] %vm225_vm1, %v2479_v25  ;;  %v2053_v1 = vadd.f32 %v10229_v50, %v2021_v12  ;;  %v2020_v7 = vld [vmem:[#allocation4 + $0xe0] sm:$0xff]  ;;  %v2741_v2 = vpop.f32.mrb[65].mxu1 }
 0x194   : > { %2510 = vst.msk [vmem:[#allocation4] sm:$0xff] %vm225_vm1, %v2478_v62  ;;  %v2052_v9 = vadd.f32 %v2020_v7, %v1973_v53  ;;  %v10240_v13 = vpop.f32.mrb[66].mxu0  ;;  %v4928_v25 = vld [vmem:[#allocation3 + $0x9] sm:$0xff]  ;;  %v2456_v62 = vld [vmem:[#allocation4 + $0x50] sm:$0xff] }
 0x195   : > { %2085 = vst.msk [vmem:[#allocation4 + $0xe8] sm:$0xff] %vm225_vm1, %v2053_v1  ;;  %v2481_v14 = vadd.f32 %v10240_v13, %v2449_v29  ;;  %v2297_v30 = vpop.f32.mrb[67].mxu0 }
 0x196   : > { %2084 = vst.msk [vmem:[#allocation4 + $0xe0] sm:$0xff] %vm225_vm1, %v2052_v9  ;;  %v2480_v5 = vadd.f32 %v2448_v19, %v2297_v30  ;;  %v2023_v6 = vld [vmem:[#allocation4 + $0xf8] sm:$0xff]  ;;  %v10290_v20 = vpop.f32.mrb[66].mxu1 }
 0x197   : > { %2513 = vst.msk [vmem:[#allocation4 + $0x18] sm:$0xff] %vm225_vm1, %v2481_v14  ;;  %v2055_v23 = vadd.f32 %v10232_v43, %v2023_v6  ;;  %v2022_v24 = vld [vmem:[#allocation4 + $0xf0] sm:$0xff]  ;;  %v2751_v27 = vpop.f32.mrb[67].mxu1  ;;  %v2459_v14 = vld [vmem:[#allocation4 + $0x68] sm:$0xff] }
 0x198   : > { %2512 = vst.msk [vmem:[#allocation4 + $0x10] sm:$0xff] %vm225_vm1, %v2480_v5  ;;  %v2054_v52 = vadd.f32 %v2022_v24, %v1983_v31  ;;  %v10243_v34 = vpop.f32.mrb[68].mxu0  ;;  %v4927_v31 = vld [vmem:[#allocation3 + $0x1] sm:$0xff]  ;;  %v2458_v5 = vld [vmem:[#allocation4 + $0x60] sm:$0xff] }
 0x199   : > { %2087 = vst.msk [vmem:[#allocation4 + $0xf8] sm:$0xff] %vm225_vm1, %v2055_v23  ;;  %v2483_v10 = vadd.f32 %v10243_v34, %v2451_v28  ;;  %v2307_v11 = vpop.f32.mrb[69].mxu0  ;;  %10535 = vmatprep.mubr.msk.f32.mxu0 %vm225_vm1, %v4927_v31 }
 0x19a   : > { %2086 = vst.msk [vmem:[#allocation4 + $0xf0] sm:$0xff] %vm225_vm1, %v2054_v52  ;;  %v2482_v54 = vadd.f32 %v2450_v48, %v2307_v11  ;;  %v2901_v56 = vld [vmem:[#allocation4 + $0x8] sm:$0xff]  ;;  %v10293_v58 = vpop.f32.mrb[68].mxu1  ;;  %10536 = vmatmul.mubr.msk.f32.vlgmr.msra.gmra.mrb[160].mxu0 %vm225_vm1, %v4928_v25  ;;  %v2466_v25 = vld [vmem:[#allocation4 + $0xa0] sm:$0xff] }
 0x19b   : > { %2515 = vst.msk [vmem:[#allocation4 + $0x28] sm:$0xff] %vm225_vm1, %v2483_v10  ;;  %v2933_v57 = vadd.f32 %v10287_v4, %v2901_v56  ;;  %v2900_v60 = vld [vmem:[#allocation4] sm:$0xff]  ;;  %v2761_v35 = vpop.f32.mrb[69].mxu1  ;;  %v2461_v10 = vld [vmem:[#allocation4 + $0x78] sm:$0xff] }
 0x19c   : > { %2514 = vst.msk [vmem:[#allocation4 + $0x20] sm:$0xff] %vm225_vm1, %v2482_v54  ;;  %v2932_v17 = vadd.f32 %v2900_v60, %v2741_v2  ;;  %v10246_v61 = vpop.f32.mrb[70].mxu0  ;;  %v2460_v54 = vld [vmem:[#allocation4 + $0x70] sm:$0xff]  ;;  %v9196_v60 = vld [vmem:[%s13600_s3 + $0x8] sm:$0xf] }
 0x19d   : > { %2965 = vst.msk [vmem:[#allocation4 + $0x8] sm:$0xff] %vm225_vm1, %v2933_v57  ;;  %v2485_v8 = vadd.f32 %v10246_v61, %v2453_v32  ;;  %v2317_v49 = vpop.f32.mrb[71].mxu0  ;;  %10583 = vmatprep.subr.msk.mxu1 %vm465_vm0, %v9196_v60 }
 0x19e   : > { %2964 = vst.msk [vmem:[#allocation4] sm:$0xff] %vm225_vm1, %v2932_v17  ;;  %v2484_v38 = vadd.f32 %v2452_v15, %v2317_v49  ;;  %v2903_v16 = vld [vmem:[#allocation4 + $0x18] sm:$0xff]  ;;  %v10296_v18 = vpop.f32.mrb[70].mxu1  ;;  %v2463_v49 = vld [vmem:[#allocation4 + $0x88] sm:$0xff]  ;;  %10584 = vmatpush3.msk.msra.mxu1 %vm465_vm0, %v9196_v60 }
 0x19f   : > { %2517 = vst.msk [vmem:[#allocation4 + $0x38] sm:$0xff] %vm225_vm1, %v2485_v8  ;;  %v2935_v37 = vadd.f32 %v10290_v20, %v2903_v16  ;;  %v2902_v46 = vld [vmem:[#allocation4 + $0x10] sm:$0xff]  ;;  %v2771_v55 = vpop.f32.mrb[71].mxu1  ;;  %v2462_v16 = vld [vmem:[#allocation4 + $0x80] sm:$0xff] }
 0x1a0   : > { %2516 = vst.msk [vmem:[#allocation4 + $0x30] sm:$0xff] %vm225_vm1, %v2484_v38  ;;  %v2934_v50 = vadd.f32 %v2902_v46, %v2751_v27  ;;  %v10249_v41 = vpop.f32.mrb[72].mxu0 }
 0x1a1   : > { %2967 = vst.msk [vmem:[#allocation4 + $0x18] sm:$0xff] %vm225_vm1, %v2935_v37  ;;  %v2487_v53 = vadd.f32 %v10249_v41, %v2455_v33  ;;  %v2327_v36 = vpop.f32.mrb[73].mxu0 }
 0x1a2   : > { %2966 = vst.msk [vmem:[#allocation4 + $0x10] sm:$0xff] %vm225_vm1, %v2934_v50  ;;  %v2486_v42 = vadd.f32 %v2454_v63, %v2327_v36  ;;  %v2905_v21 = vld [vmem:[#allocation4 + $0x28] sm:$0xff]  ;;  %v10299_v39 = vpop.f32.mrb[72].mxu1  ;;  %v2465_v36 = vld [vmem:[#allocation4 + $0x98] sm:$0xff] }
 0x1a3   : > { %2519 = vst.msk [vmem:[#allocation4 + $0x48] sm:$0xff] %vm225_vm1, %v2487_v53  ;;  %v2937_v45 = vadd.f32 %v10293_v58, %v2905_v21  ;;  %v2904_v43 = vld [vmem:[#allocation4 + $0x20] sm:$0xff]  ;;  %v2781_v44 = vpop.f32.mrb[73].mxu1  ;;  %v2464_v21 = vld [vmem:[#allocation4 + $0x90] sm:$0xff] }
 0x1a4   : > { %2518 = vst.msk [vmem:[#allocation4 + $0x40] sm:$0xff] %vm225_vm1, %v2486_v42  ;;  %v2936_v0 = vadd.f32 %v2904_v43, %v2761_v35  ;;  %v10252_v51 = vpop.f32.mrb[74].mxu0 }
 0x1a5   : > { %2969 = vst.msk [vmem:[#allocation4 + $0x28] sm:$0xff] %vm225_vm1, %v2937_v45  ;;  %v2489_v59 = vadd.f32 %v10252_v51, %v2457_v3  ;;  %v2337_v26 = vpop.f32.mrb[75].mxu0 }
 0x1a6   : > { %2968 = vst.msk [vmem:[#allocation4 + $0x20] sm:$0xff] %vm225_vm1, %v2936_v0  ;;  %v2488_v12 = vadd.f32 %v2456_v62, %v2337_v26  ;;  %v2907_v4 = vld [vmem:[#allocation4 + $0x38] sm:$0xff]  ;;  %v10302_v1 = vpop.f32.mrb[74].mxu1  ;;  %v2467_v0 = vld [vmem:[#allocation4 + $0xa8] sm:$0xff] }
 0x1a7   : > { %2521 = vst.msk [vmem:[#allocation4 + $0x58] sm:$0xff] %vm225_vm1, %v2489_v59  ;;  %v2939_v7 = vadd.f32 %v10296_v18, %v2907_v4  ;;  %v2906_v2 = vld [vmem:[#allocation4 + $0x30] sm:$0xff]  ;;  %v2791_v9 = vpop.f32.mrb[75].mxu1 }
 0x1a8   : > { %2520 = vst.msk [vmem:[#allocation4 + $0x50] sm:$0xff] %vm225_vm1, %v2488_v12  ;;  %v2938_v13 = vadd.f32 %v2906_v2, %v2771_v55  ;;  %v10255_v29 = vpop.f32.mrb[76].mxu0 }
 0x1a9   : > { %2971 = vst.msk [vmem:[#allocation4 + $0x38] sm:$0xff] %vm225_vm1, %v2939_v7  ;;  %v2491_v30 = vadd.f32 %v10255_v29, %v2459_v14  ;;  %v2347_v19 = vpop.f32.mrb[77].mxu0  ;;  %v2468_v14 = vld [vmem:[#allocation4 + $0xb0] sm:$0xff] }
 0x1aa   : > { %2970 = vst.msk [vmem:[#allocation4 + $0x30] sm:$0xff] %vm225_vm1, %v2938_v13  ;;  %v2490_v6 = vadd.f32 %v2458_v5, %v2347_v19  ;;  %v2909_v20 = vld [vmem:[#allocation4 + $0x48] sm:$0xff]  ;;  %v10305_v23 = vpop.f32.mrb[76].mxu1 }
 0x1ab   : > { %2523 = vst.msk [vmem:[#allocation4 + $0x68] sm:$0xff] %vm225_vm1, %v2491_v30  ;;  %v2941_v24 = vadd.f32 %v10299_v39, %v2909_v20  ;;  %v2908_v27 = vld [vmem:[#allocation4 + $0x40] sm:$0xff]  ;;  %v2801_v52 = vpop.f32.mrb[77].mxu1 }
 0x1ac   : > { %2522 = vst.msk [vmem:[#allocation4 + $0x60] sm:$0xff] %vm225_vm1, %v2490_v6  ;;  %v2940_v34 = vadd.f32 %v2908_v27, %v2781_v44  ;;  %v10258_v28 = vpop.f32.mrb[78].mxu0 }
 0x1ad   : > { %2973 = vst.msk [vmem:[#allocation4 + $0x48] sm:$0xff] %vm225_vm1, %v2941_v24  ;;  %v2493_v11 = vadd.f32 %v10258_v28, %v2461_v10  ;;  %v2357_v48 = vpop.f32.mrb[79].mxu0  ;;  %v2470_v10 = vld [vmem:[#allocation4 + $0xc0] sm:$0xff] }
 0x1ae   : > { %2972 = vst.msk [vmem:[#allocation4 + $0x40] sm:$0xff] %vm225_vm1, %v2940_v34  ;;  %v2492_v56 = vadd.f32 %v2460_v54, %v2357_v48  ;;  %v2911_v58 = vld [vmem:[#allocation4 + $0x58] sm:$0xff]  ;;  %v10308_v57 = vpop.f32.mrb[78].mxu1 }
 0x1af   : > { %2525 = vst.msk [vmem:[#allocation4 + $0x78] sm:$0xff] %vm225_vm1, %v2493_v11  ;;  %v2943_v35 = vadd.f32 %v10302_v1, %v2911_v58  ;;  %v2910_v17 = vld [vmem:[#allocation4 + $0x50] sm:$0xff]  ;;  %v2811_v61 = vpop.f32.mrb[79].mxu1 }
 0x1b0   : > { %2524 = vst.msk [vmem:[#allocation4 + $0x70] sm:$0xff] %vm225_vm1, %v2492_v56  ;;  %v2942_v32 = vadd.f32 %v2910_v17, %v2791_v9  ;;  %v10261_v8 = vpop.f32.mrb[80].mxu0  ;;  %v2469_v9 = vld [vmem:[#allocation4 + $0xb8] sm:$0xff] }
 0x1b1   : > { %2975 = vst.msk [vmem:[#allocation4 + $0x58] sm:$0xff] %vm225_vm1, %v2943_v35  ;;  %v2495_v15 = vadd.f32 %v10261_v8, %v2463_v49  ;;  %v2367_v38 = vpop.f32.mrb[81].mxu0  ;;  %v2473_v17 = vld [vmem:[#allocation4 + $0xd8] sm:$0xff]  ;;  %v2472_v8 = vld [vmem:[#allocation4 + $0xd0] sm:$0xff] }
 0x1b2   : > { %2974 = vst.msk [vmem:[#allocation4 + $0x50] sm:$0xff] %vm225_vm1, %v2942_v32  ;;  %v2494_v18 = vadd.f32 %v2462_v16, %v2367_v38  ;;  %v2913_v37 = vld [vmem:[#allocation4 + $0x68] sm:$0xff]  ;;  %v10311_v46 = vpop.f32.mrb[80].mxu1 }
 0x1b3   : > { %2527 = vst.msk [vmem:[#allocation4 + $0x88] sm:$0xff] %vm225_vm1, %v2495_v15  ;;  %v2945_v55 = vadd.f32 %v10305_v23, %v2913_v37  ;;  %v2912_v50 = vld [vmem:[#allocation4 + $0x60] sm:$0xff]  ;;  %v2821_v41 = vpop.f32.mrb[81].mxu1 }
 0x1b4   : > { %2526 = vst.msk [vmem:[#allocation4 + $0x80] sm:$0xff] %vm225_vm1, %v2494_v18  ;;  %v2944_v33 = vadd.f32 %v2912_v50, %v2801_v52  ;;  %v10264_v53 = vpop.f32.mrb[82].mxu0  ;;  %v2471_v52 = vld [vmem:[#allocation4 + $0xc8] sm:$0xff] }
 0x1b5   : > { %2977 = vst.msk [vmem:[#allocation4 + $0x68] sm:$0xff] %vm225_vm1, %v2945_v55  ;;  %v2497_v63 = vadd.f32 %v10264_v53, %v2465_v36  ;;  %v2377_v42 = vpop.f32.mrb[83].mxu0  ;;  %v2475_v50 = vld [vmem:[#allocation4 + $0xe8] sm:$0xff]  ;;  %v2474_v53 = vld [vmem:[#allocation4 + $0xe0] sm:$0xff] }
 0x1b6   : > { %2976 = vst.msk [vmem:[#allocation4 + $0x60] sm:$0xff] %vm225_vm1, %v2944_v33  ;;  %v2496_v39 = vadd.f32 %v2464_v21, %v2377_v42  ;;  %v2915_v22 = vld [vmem:[#allocation4 + $0x78] sm:$0xff]  ;;  %v10314_v40 = vpop.f32.mrb[82].mxu1 }
 0x1b7   : > { %2529 = vst.msk [vmem:[#allocation4 + $0x98] sm:$0xff] %vm225_vm1, %v2497_v63  ;;  %v2947_v45 = vadd.f32 %v10308_v57, %v2915_v22  ;;  %v2914_v43 = vld [vmem:[#allocation4 + $0x70] sm:$0xff]  ;;  %v2831_v44 = vpop.f32.mrb[83].mxu1 }
 0x1b8   : > { %2528 = vst.msk [vmem:[#allocation4 + $0x90] sm:$0xff] %vm225_vm1, %v2496_v39  ;;  %v2946_v47 = vadd.f32 %v2914_v43, %v2811_v61  ;;  %v10267_v31 = vpop.f32.mrb[84].mxu0  ;;  %v2477_v43 = vld [vmem:[#allocation4 + $0xf8] sm:$0xff] }
 0x1b9   : > { %2979 = vst.msk [vmem:[#allocation4 + $0x78] sm:$0xff] %vm225_vm1, %v2947_v45  ;;  %v2499_v51 = vadd.f32 %v10267_v31, %v2467_v0  ;;  %v2387_v3 = vpop.f32.mrb[85].mxu0  ;;  %v2476_v31 = vld [vmem:[#allocation4 + $0xf0] sm:$0xff] }
 0x1ba   : > { %2978 = vst.msk [vmem:[#allocation4 + $0x70] sm:$0xff] %vm225_vm1, %v2946_v47  ;;  %v2498_v59 = vadd.f32 %v2466_v25, %v2387_v3  ;;  %v2917_v26 = vld [vmem:[#allocation4 + $0x88] sm:$0xff]  ;;  %v10317_v62 = vpop.f32.mrb[84].mxu1 }
 0x1bb   : > { %2531 = vst.msk [vmem:[#allocation4 + $0xa8] sm:$0xff] %vm225_vm1, %v2499_v51  ;;  %v2949_v12 = vadd.f32 %v10311_v46, %v2917_v26  ;;  %v2916_v4 = vld [vmem:[#allocation4 + $0x80] sm:$0xff]  ;;  %v2841_v1 = vpop.f32.mrb[85].mxu1 }
 0x1bc   : > { %2530 = vst.msk [vmem:[#allocation4 + $0xa0] sm:$0xff] %vm225_vm1, %v2498_v59  ;;  %v2948_v7 = vadd.f32 %v2916_v4, %v2821_v41  ;;  %v10270_v2 = vpop.f32.mrb[86].mxu0  ;;  %v3356_v4 = vld [vmem:[#allocation4 + $0x8] sm:$0xff] }
 0x1bd   : > { %2981 = vst.msk [vmem:[#allocation4 + $0x88] sm:$0xff] %vm225_vm1, %v2949_v12  ;;  %v2501_v13 = vadd.f32 %v10270_v2, %v2469_v9  ;;  %v2397_v29 = vpop.f32.mrb[87].mxu0  ;;  %v3355_v2 = vld [vmem:[#allocation4] sm:$0xff] }
 0x1be   : > { %2980 = vst.msk [vmem:[#allocation4 + $0x80] sm:$0xff] %vm225_vm1, %v2948_v7  ;;  %v2500_v30 = vadd.f32 %v2468_v14, %v2397_v29  ;;  %v2919_v19 = vld [vmem:[#allocation4 + $0x98] sm:$0xff]  ;;  %v10320_v5 = vpop.f32.mrb[86].mxu1 }
 0x1bf   : > { %2533 = vst.msk [vmem:[#allocation4 + $0xb8] sm:$0xff] %vm225_vm1, %v2501_v13  ;;  %v2951_v6 = vadd.f32 %v10314_v40, %v2919_v19  ;;  %v2918_v20 = vld [vmem:[#allocation4 + $0x90] sm:$0xff]  ;;  %v2851_v23 = vpop.f32.mrb[87].mxu1 }
 0x1c0   : > { %2532 = vst.msk [vmem:[#allocation4 + $0xb0] sm:$0xff] %vm225_vm1, %v2500_v30  ;;  %v2950_v24 = vadd.f32 %v2918_v20, %v2831_v44  ;;  %v10273_v27 = vpop.f32.mrb[88].mxu0  ;;  %v3358_v20 = vld [vmem:[#allocation4 + $0x18] sm:$0xff] }
 0x1c1   : > { %2983 = vst.msk [vmem:[#allocation4 + $0x98] sm:$0xff] %vm225_vm1, %v2951_v6  ;;  %v2503_v34 = vadd.f32 %v10273_v27, %v2471_v52  ;;  %v2407_v28 = vpop.f32.mrb[89].mxu0  ;;  %v3357_v27 = vld [vmem:[#allocation4 + $0x10] sm:$0xff] }
 0x1c2   : > { %2982 = vst.msk [vmem:[#allocation4 + $0x90] sm:$0xff] %vm225_vm1, %v2950_v24  ;;  %v2502_v11 = vadd.f32 %v2470_v10, %v2407_v28  ;;  %v2921_v48 = vld [vmem:[#allocation4 + $0xa8] sm:$0xff]  ;;  %v10323_v54 = vpop.f32.mrb[88].mxu1 }
 0x1c3   : > { %2535 = vst.msk [vmem:[#allocation4 + $0xc8] sm:$0xff] %vm225_vm1, %v2503_v34  ;;  %v2953_v56 = vadd.f32 %v10317_v62, %v2921_v48  ;;  %v2920_v58 = vld [vmem:[#allocation4 + $0xa0] sm:$0xff]  ;;  %v2861_v57 = vpop.f32.mrb[89].mxu1 }
 0x1c4   : > { %2534 = vst.msk [vmem:[#allocation4 + $0xc0] sm:$0xff] %vm225_vm1, %v2502_v11  ;;  %v2952_v60 = vadd.f32 %v2920_v58, %v2841_v1  ;;  %v10276_v35 = vpop.f32.mrb[90].mxu0  ;;  %v3360_v58 = vld [vmem:[#allocation4 + $0x28] sm:$0xff] }
 0x1c5   : > { %2985 = vst.msk [vmem:[#allocation4 + $0xa8] sm:$0xff] %vm225_vm1, %v2953_v56  ;;  %v2505_v61 = vadd.f32 %v10276_v35, %v2473_v17  ;;  %v2417_v32 = vpop.f32.mrb[91].mxu0  ;;  %v3359_v35 = vld [vmem:[#allocation4 + $0x20] sm:$0xff]  ;;  %v9230_v17 = vld [vmem:[%s13600_s3 + $0xc] sm:$0xf] }
 0x1c6   : > { %2984 = vst.msk [vmem:[#allocation4 + $0xa0] sm:$0xff] %vm225_vm1, %v2952_v60  ;;  %v2504_v49 = vadd.f32 %v2472_v8, %v2417_v32  ;;  %v2923_v15 = vld [vmem:[#allocation4 + $0xb8] sm:$0xff]  ;;  %v10326_v38 = vpop.f32.mrb[90].mxu1  ;;  %10633 = vmatprep.subr.msk.mxu0 %vm465_vm0, %v9230_v17 }
 0x1c7   : > { %2537 = vst.msk [vmem:[#allocation4 + $0xd8] sm:$0xff] %vm225_vm1, %v2505_v61  ;;  %v2955_v16 = vadd.f32 %v10320_v5, %v2923_v15  ;;  %v2922_v18 = vld [vmem:[#allocation4 + $0xb0] sm:$0xff]  ;;  %v2871_v37 = vpop.f32.mrb[91].mxu1  ;;  %10634 = vmatpush3.msk.msra.mxu0 %vm465_vm0, %v9230_v17 }
 0x1c8   : > { %2536 = vst.msk [vmem:[#allocation4 + $0xd0] sm:$0xff] %vm225_vm1, %v2504_v49  ;;  %v2954_v46 = vadd.f32 %v2922_v18, %v2851_v23  ;;  %v10279_v55 = vpop.f32.mrb[92].mxu0 }
 0x1c9   : > { %2987 = vst.msk [vmem:[#allocation4 + $0xb8] sm:$0xff] %vm225_vm1, %v2955_v16  ;;  %v2507_v41 = vadd.f32 %v10279_v55, %v2475_v50  ;;  %v2427_v33 = vpop.f32.mrb[93].mxu0  ;;  %v3361_v50 = vld [vmem:[#allocation4 + $0x30] sm:$0xff] }
 0x1ca   : > { %2986 = vst.msk [vmem:[#allocation4 + $0xb0] sm:$0xff] %vm225_vm1, %v2954_v46  ;;  %v2506_v36 = vadd.f32 %v2474_v53, %v2427_v33  ;;  %v2925_v63 = vld [vmem:[#allocation4 + $0xc8] sm:$0xff]  ;;  %v10329_v42 = vpop.f32.mrb[92].mxu1 }
 0x1cb   : > { %2539 = vst.msk [vmem:[#allocation4 + $0xe8] sm:$0xff] %vm225_vm1, %v2507_v41  ;;  %v2957_v21 = vadd.f32 %v10323_v54, %v2925_v63  ;;  %v2924_v39 = vld [vmem:[#allocation4 + $0xc0] sm:$0xff]  ;;  %v2881_v22 = vpop.f32.mrb[93].mxu1 }
 0x1cc   : > { %2538 = vst.msk [vmem:[#allocation4 + $0xe0] sm:$0xff] %vm225_vm1, %v2506_v36  ;;  %v2956_v40 = vadd.f32 %v2924_v39, %v2861_v57  ;;  %v10282_v45 = vpop.f32.mrb[94].mxu0 }
 0x1cd   : > { %2989 = vst.msk [vmem:[#allocation4 + $0xc8] sm:$0xff] %vm225_vm1, %v2957_v21  ;;  %v2509_v44 = vadd.f32 %v10282_v45, %v2477_v43  ;;  %v2437_v47 = vpop.f32.mrb[95].mxu0  ;;  %v3363_v43 = vld [vmem:[#allocation4 + $0x40] sm:$0xff] }
 0x1ce   : > { %2988 = vst.msk [vmem:[#allocation4 + $0xc0] sm:$0xff] %vm225_vm1, %v2956_v40  ;;  %v2508_v0 = vadd.f32 %v2476_v31, %v2437_v47  ;;  %v2927_v51 = vld [vmem:[#allocation4 + $0xd8] sm:$0xff]  ;;  %v10332_v3 = vpop.f32.mrb[94].mxu1 }
 0x1cf   : > { %2541 = vst.msk [vmem:[#allocation4 + $0xf8] sm:$0xff] %vm225_vm1, %v2509_v44  ;;  %v2959_v25 = vadd.f32 %v10326_v38, %v2927_v51  ;;  %v2926_v59 = vld [vmem:[#allocation4 + $0xd0] sm:$0xff]  ;;  %v2891_v26 = vpop.f32.mrb[95].mxu1 }
 0x1d0   : > { %2540 = vst.msk [vmem:[#allocation4 + $0xf0] sm:$0xff] %vm225_vm1, %v2508_v0  ;;  %v2958_v62 = vadd.f32 %v2926_v59, %v2871_v37  ;;  %v10337_v12 = vpop.f32.mrb[96].mxu0  ;;  %v3362_v37 = vld [vmem:[#allocation4 + $0x38] sm:$0xff]  ;;  %v9264_v0 = vld [vmem:[%s13600_s3 + $0x10] sm:$0xf] }
 0x1d1   : > { %2991 = vst.msk [vmem:[#allocation4 + $0xd8] sm:$0xff] %vm225_vm1, %v2959_v25  ;;  %v3388_v1 = vadd.f32 %v10337_v12, %v3356_v4  ;;  %v3196_v7 = vpop.f32.mrb[97].mxu0  ;;  %10683 = vmatprep.subr.msk.mxu1 %vm465_vm0, %v9264_v0 }
 0x1d2   : > { %2990 = vst.msk [vmem:[#allocation4 + $0xd0] sm:$0xff] %vm225_vm1, %v2958_v62  ;;  %v3387_v9 = vadd.f32 %v3355_v2, %v3196_v7  ;;  %v2929_v13 = vld [vmem:[#allocation4 + $0xe8] sm:$0xff]  ;;  %v10387_v29 = vpop.f32.mrb[96].mxu1  ;;  %v3366_v62 = vld [vmem:[#allocation4 + $0x58] sm:$0xff] }
 0x1d3   : > { %3420 = vst.msk [vmem:[#allocation4 + $0x8] sm:$0xff] %vm225_vm1, %v3388_v1  ;;  %v2961_v14 = vadd.f32 %v10329_v42, %v2929_v13  ;;  %v2928_v30 = vld [vmem:[#allocation4 + $0xe0] sm:$0xff]  ;;  %v3650_v19 = vpop.f32.mrb[97].mxu1  ;;  %v3365_v1 = vld [vmem:[#allocation4 + $0x50] sm:$0xff] }
 0x1d4   : > { %3419 = vst.msk [vmem:[#allocation4] sm:$0xff] %vm225_vm1, %v3387_v9  ;;  %v2960_v5 = vadd.f32 %v2928_v30, %v2881_v22  ;;  %v10340_v6 = vpop.f32.mrb[98].mxu0  ;;  %v3364_v22 = vld [vmem:[#allocation4 + $0x48] sm:$0xff] }
 0x1d5   : > { %2993 = vst.msk [vmem:[#allocation4 + $0xe8] sm:$0xff] %vm225_vm1, %v2961_v14  ;;  %v3390_v23 = vadd.f32 %v10340_v6, %v3358_v20  ;;  %v3206_v24 = vpop.f32.mrb[99].mxu0 }
 0x1d6   : > { %2992 = vst.msk [vmem:[#allocation4 + $0xe0] sm:$0xff] %vm225_vm1, %v2960_v5  ;;  %v3389_v52 = vadd.f32 %v3357_v27, %v3206_v24  ;;  %v2931_v34 = vld [vmem:[#allocation4 + $0xf8] sm:$0xff]  ;;  %v10390_v28 = vpop.f32.mrb[98].mxu1  ;;  %v3368_v5 = vld [vmem:[#allocation4 + $0x68] sm:$0xff] }
 0x1d7   : > { %3422 = vst.msk [vmem:[#allocation4 + $0x18] sm:$0xff] %vm225_vm1, %v3390_v23  ;;  %v2963_v10 = vadd.f32 %v10332_v3, %v2931_v34  ;;  %v2930_v11 = vld [vmem:[#allocation4 + $0xf0] sm:$0xff]  ;;  %v3660_v48 = vpop.f32.mrb[99].mxu1  ;;  %v3367_v23 = vld [vmem:[#allocation4 + $0x60] sm:$0xff] }
 0x1d8   : > { %3421 = vst.msk [vmem:[#allocation4 + $0x10] sm:$0xff] %vm225_vm1, %v3389_v52  ;;  %v2962_v54 = vadd.f32 %v2930_v11, %v2891_v26  ;;  %v10343_v56 = vpop.f32.mrb[100].mxu0 }
 0x1d9   : > { %2995 = vst.msk [vmem:[#allocation4 + $0xf8] sm:$0xff] %vm225_vm1, %v2963_v10  ;;  %v3392_v57 = vadd.f32 %v10343_v56, %v3360_v58  ;;  %v3216_v60 = vpop.f32.mrb[101].mxu0 }
 0x1da   : > { %2994 = vst.msk [vmem:[#allocation4 + $0xf0] sm:$0xff] %vm225_vm1, %v2962_v54  ;;  %v3391_v61 = vadd.f32 %v3359_v35, %v3216_v60  ;;  %v3810_v32 = vld [vmem:[#allocation4 + $0x8] sm:$0xff]  ;;  %v10393_v8 = vpop.f32.mrb[100].mxu1  ;;  %v3370_v54 = vld [vmem:[#allocation4 + $0x78] sm:$0xff] }
 0x1db   : > { %3424 = vst.msk [vmem:[#allocation4 + $0x28] sm:$0xff] %vm225_vm1, %v3392_v57  ;;  %v3842_v49 = vadd.f32 %v10387_v29, %v3810_v32  ;;  %v3809_v15 = vld [vmem:[#allocation4] sm:$0xff]  ;;  %v3670_v38 = vpop.f32.mrb[101].mxu1  ;;  %v3369_v57 = vld [vmem:[#allocation4 + $0x70] sm:$0xff] }
 0x1dc   : > { %3423 = vst.msk [vmem:[#allocation4 + $0x20] sm:$0xff] %vm225_vm1, %v3391_v61  ;;  %v3841_v16 = vadd.f32 %v3809_v15, %v3650_v19  ;;  %v10346_v18 = vpop.f32.mrb[102].mxu0 }
 0x1dd   : > { %3874 = vst.msk [vmem:[#allocation4 + $0x8] sm:$0xff] %vm225_vm1, %v3842_v49  ;;  %v3394_v46 = vadd.f32 %v10346_v18, %v3362_v37  ;;  %v3226_v55 = vpop.f32.mrb[103].mxu0  ;;  %v3371_v37 = vld [vmem:[#allocation4 + $0x80] sm:$0xff] }
 0x1de   : > { %3873 = vst.msk [vmem:[#allocation4] sm:$0xff] %vm225_vm1, %v3841_v16  ;;  %v3393_v41 = vadd.f32 %v3361_v50, %v3226_v55  ;;  %v3812_v33 = vld [vmem:[#allocation4 + $0x18] sm:$0xff]  ;;  %v10396_v53 = vpop.f32.mrb[102].mxu1 }
 0x1df   : > { %3426 = vst.msk [vmem:[#allocation4 + $0x38] sm:$0xff] %vm225_vm1, %v3394_v46  ;;  %v3844_v36 = vadd.f32 %v10390_v28, %v3812_v33  ;;  %v3811_v63 = vld [vmem:[#allocation4 + $0x10] sm:$0xff]  ;;  %v3680_v42 = vpop.f32.mrb[103].mxu1 }
 0x1e0   : > { %3425 = vst.msk [vmem:[#allocation4 + $0x30] sm:$0xff] %vm225_vm1, %v3393_v41  ;;  %v3843_v21 = vadd.f32 %v3811_v63, %v3660_v48  ;;  %v10349_v39 = vpop.f32.mrb[104].mxu0 }
 0x1e1   : > { %3876 = vst.msk [vmem:[#allocation4 + $0x18] sm:$0xff] %vm225_vm1, %v3844_v36  ;;  %v3396_v40 = vadd.f32 %v10349_v39, %v3364_v22  ;;  %v3236_v45 = vpop.f32.mrb[105].mxu0  ;;  %v3373_v22 = vld [vmem:[#allocation4 + $0x90] sm:$0xff] }
 0x1e2   : > { %3875 = vst.msk [vmem:[#allocation4 + $0x10] sm:$0xff] %vm225_vm1, %v3843_v21  ;;  %v3395_v44 = vadd.f32 %v3363_v43, %v3236_v45  ;;  %v3814_v47 = vld [vmem:[#allocation4 + $0x28] sm:$0xff]  ;;  %v10399_v31 = vpop.f32.mrb[104].mxu1 }
 0x1e3   : > { %3428 = vst.msk [vmem:[#allocation4 + $0x48] sm:$0xff] %vm225_vm1, %v3396_v40  ;;  %v3846_v51 = vadd.f32 %v10393_v8, %v3814_v47  ;;  %v3813_v3 = vld [vmem:[#allocation4 + $0x20] sm:$0xff]  ;;  %v3690_v25 = vpop.f32.mrb[105].mxu1 }
 0x1e4   : > { %3427 = vst.msk [vmem:[#allocation4 + $0x40] sm:$0xff] %vm225_vm1, %v3395_v44  ;;  %v3845_v59 = vadd.f32 %v3813_v3, %v3670_v38  ;;  %v10352_v26 = vpop.f32.mrb[106].mxu0  ;;  %v3372_v38 = vld [vmem:[#allocation4 + $0x88] sm:$0xff] }
 0x1e5   : > { %3878 = vst.msk [vmem:[#allocation4 + $0x28] sm:$0xff] %vm225_vm1, %v3846_v51  ;;  %v3398_v12 = vadd.f32 %v10352_v26, %v3366_v62  ;;  %v3246_v4 = vpop.f32.mrb[107].mxu0  ;;  %v3376_v3 = vld [vmem:[#allocation4 + $0xa8] sm:$0xff]  ;;  %v3375_v26 = vld [vmem:[#allocation4 + $0xa0] sm:$0xff] }
 0x1e6   : > { %3877 = vst.msk [vmem:[#allocation4 + $0x20] sm:$0xff] %vm225_vm1, %v3845_v59  ;;  %v3397_v7 = vadd.f32 %v3365_v1, %v3246_v4  ;;  %v3816_v2 = vld [vmem:[#allocation4 + $0x38] sm:$0xff]  ;;  %v10402_v9 = vpop.f32.mrb[106].mxu1 }
 0x1e7   : > { %3430 = vst.msk [vmem:[#allocation4 + $0x58] sm:$0xff] %vm225_vm1, %v3398_v12  ;;  %v3848_v13 = vadd.f32 %v10396_v53, %v3816_v2  ;;  %v3815_v29 = vld [vmem:[#allocation4 + $0x30] sm:$0xff]  ;;  %v3700_v14 = vpop.f32.mrb[107].mxu1 }
 0x1e8   : > { %3429 = vst.msk [vmem:[#allocation4 + $0x50] sm:$0xff] %vm225_vm1, %v3397_v7  ;;  %v3847_v30 = vadd.f32 %v3815_v29, %v3680_v42  ;;  %v10355_v19 = vpop.f32.mrb[108].mxu0  ;;  %v3374_v42 = vld [vmem:[#allocation4 + $0x98] sm:$0xff] }
 0x1e9   : > { %3880 = vst.msk [vmem:[#allocation4 + $0x38] sm:$0xff] %vm225_vm1, %v3848_v13  ;;  %v3400_v6 = vadd.f32 %v10355_v19, %v3368_v5  ;;  %v3256_v20 = vpop.f32.mrb[109].mxu0  ;;  %v3378_v29 = vld [vmem:[#allocation4 + $0xb8] sm:$0xff]  ;;  %v3377_v19 = vld [vmem:[#allocation4 + $0xb0] sm:$0xff] }
 0x1ea   : > { %3879 = vst.msk [vmem:[#allocation4 + $0x30] sm:$0xff] %vm225_vm1, %v3847_v30  ;;  %v3399_v24 = vadd.f32 %v3367_v23, %v3256_v20  ;;  %v3818_v27 = vld [vmem:[#allocation4 + $0x48] sm:$0xff]  ;;  %v10405_v52 = vpop.f32.mrb[108].mxu1 }
 0x1eb   : > { %3432 = vst.msk [vmem:[#allocation4 + $0x68] sm:$0xff] %vm225_vm1, %v3400_v6  ;;  %v3850_v34 = vadd.f32 %v10399_v31, %v3818_v27  ;;  %v3817_v28 = vld [vmem:[#allocation4 + $0x40] sm:$0xff]  ;;  %v3710_v10 = vpop.f32.mrb[109].mxu1 }
 0x1ec   : > { %3431 = vst.msk [vmem:[#allocation4 + $0x60] sm:$0xff] %vm225_vm1, %v3399_v24  ;;  %v3849_v11 = vadd.f32 %v3817_v28, %v3690_v25  ;;  %v10358_v48 = vpop.f32.mrb[110].mxu0  ;;  %v3380_v28 = vld [vmem:[#allocation4 + $0xc8] sm:$0xff] }
 0x1ed   : > { %3882 = vst.msk [vmem:[#allocation4 + $0x48] sm:$0xff] %vm225_vm1, %v3850_v34  ;;  %v3402_v56 = vadd.f32 %v10358_v48, %v3370_v54  ;;  %v3266_v58 = vpop.f32.mrb[111].mxu0  ;;  %v3379_v48 = vld [vmem:[#allocation4 + $0xc0] sm:$0xff] }
 0x1ee   : > { %3881 = vst.msk [vmem:[#allocation4 + $0x40] sm:$0xff] %vm225_vm1, %v3849_v11  ;;  %v3401_v60 = vadd.f32 %v3369_v57, %v3266_v58  ;;  %v3820_v35 = vld [vmem:[#allocation4 + $0x58] sm:$0xff]  ;;  %v10408_v17 = vpop.f32.mrb[110].mxu1 }
 0x1ef   : > { %3434 = vst.msk [vmem:[#allocation4 + $0x78] sm:$0xff] %vm225_vm1, %v3402_v56  ;;  %v3852_v61 = vadd.f32 %v10402_v9, %v3820_v35  ;;  %v3819_v32 = vld [vmem:[#allocation4 + $0x50] sm:$0xff]  ;;  %v3720_v8 = vpop.f32.mrb[111].mxu1 }
 0x1f0   : > { %3433 = vst.msk [vmem:[#allocation4 + $0x70] sm:$0xff] %vm225_vm1, %v3401_v60  ;;  %v3851_v49 = vadd.f32 %v3819_v32, %v3700_v14  ;;  %v10361_v15 = vpop.f32.mrb[112].mxu0  ;;  %v3382_v32 = vld [vmem:[#allocation4 + $0xd8] sm:$0xff] }
 0x1f1   : > { %3884 = vst.msk [vmem:[#allocation4 + $0x58] sm:$0xff] %vm225_vm1, %v3852_v61  ;;  %v3404_v16 = vadd.f32 %v10361_v15, %v3372_v38  ;;  %v3276_v18 = vpop.f32.mrb[113].mxu0  ;;  %v3381_v15 = vld [vmem:[#allocation4 + $0xd0] sm:$0xff] }
 0x1f2   : > { %3883 = vst.msk [vmem:[#allocation4 + $0x50] sm:$0xff] %vm225_vm1, %v3851_v49  ;;  %v3403_v46 = vadd.f32 %v3371_v37, %v3276_v18  ;;  %v3822_v55 = vld [vmem:[#allocation4 + $0x68] sm:$0xff]  ;;  %v10411_v50 = vpop.f32.mrb[112].mxu1 }
 0x1f3   : > { %3436 = vst.msk [vmem:[#allocation4 + $0x88] sm:$0xff] %vm225_vm1, %v3404_v16  ;;  %v3854_v41 = vadd.f32 %v10405_v52, %v3822_v55  ;;  %v3821_v33 = vld [vmem:[#allocation4 + $0x60] sm:$0xff]  ;;  %v3730_v53 = vpop.f32.mrb[113].mxu1 }
 0x1f4   : > { %3435 = vst.msk [vmem:[#allocation4 + $0x80] sm:$0xff] %vm225_vm1, %v3403_v46  ;;  %v3853_v36 = vadd.f32 %v3821_v33, %v3710_v10  ;;  %v10364_v63 = vpop.f32.mrb[114].mxu0  ;;  %v3384_v33 = vld [vmem:[#allocation4 + $0xe8] sm:$0xff] }
 0x1f5   : > { %3886 = vst.msk [vmem:[#allocation4 + $0x68] sm:$0xff] %vm225_vm1, %v3854_v41  ;;  %v3406_v21 = vadd.f32 %v10364_v63, %v3374_v42  ;;  %v3286_v39 = vpop.f32.mrb[115].mxu0  ;;  %v3383_v63 = vld [vmem:[#allocation4 + $0xe0] sm:$0xff] }
 0x1f6   : > { %3885 = vst.msk [vmem:[#allocation4 + $0x60] sm:$0xff] %vm225_vm1, %v3853_v36  ;;  %v3405_v40 = vadd.f32 %v3373_v22, %v3286_v39  ;;  %v3824_v45 = vld [vmem:[#allocation4 + $0x78] sm:$0xff]  ;;  %v10414_v43 = vpop.f32.mrb[114].mxu1 }
 0x1f7   : > { %3438 = vst.msk [vmem:[#allocation4 + $0x98] sm:$0xff] %vm225_vm1, %v3406_v21  ;;  %v3856_v44 = vadd.f32 %v10408_v17, %v3824_v45  ;;  %v3823_v47 = vld [vmem:[#allocation4 + $0x70] sm:$0xff]  ;;  %v3740_v31 = vpop.f32.mrb[115].mxu1 }
 0x1f8   : > { %3437 = vst.msk [vmem:[#allocation4 + $0x90] sm:$0xff] %vm225_vm1, %v3405_v40  ;;  %v3855_v0 = vadd.f32 %v3823_v47, %v3720_v8  ;;  %v10367_v51 = vpop.f32.mrb[116].mxu0  ;;  %v3386_v47 = vld [vmem:[#allocation4 + $0xf8] sm:$0xff] }
 0x1f9   : > { %3888 = vst.msk [vmem:[#allocation4 + $0x78] sm:$0xff] %vm225_vm1, %v3856_v44  ;;  %v3408_v25 = vadd.f32 %v10367_v51, %v3376_v3  ;;  %v3296_v59 = vpop.f32.mrb[117].mxu0  ;;  %v3385_v51 = vld [vmem:[#allocation4 + $0xf0] sm:$0xff] }
 0x1fa   : > { %3887 = vst.msk [vmem:[#allocation4 + $0x70] sm:$0xff] %vm225_vm1, %v3855_v0  ;;  %v3407_v62 = vadd.f32 %v3375_v26, %v3296_v59  ;;  %v3826_v12 = vld [vmem:[#allocation4 + $0x88] sm:$0xff]  ;;  %v10417_v4 = vpop.f32.mrb[116].mxu1 }
 0x1fb   : > { %3440 = vst.msk [vmem:[#allocation4 + $0xa8] sm:$0xff] %vm225_vm1, %v3408_v25  ;;  %v3858_v1 = vadd.f32 %v10411_v50, %v3826_v12  ;;  %v3825_v7 = vld [vmem:[#allocation4 + $0x80] sm:$0xff]  ;;  %v3750_v2 = vpop.f32.mrb[117].mxu1 }
 0x1fc   : > { %3439 = vst.msk [vmem:[#allocation4 + $0xa0] sm:$0xff] %vm225_vm1, %v3407_v62  ;;  %v3857_v9 = vadd.f32 %v3825_v7, %v3730_v53  ;;  %v10370_v13 = vpop.f32.mrb[118].mxu0  ;;  %v4264_v7 = vld [vmem:[#allocation4 + $0x8] sm:$0xff] }
 0x1fd   : > { %3890 = vst.msk [vmem:[#allocation4 + $0x88] sm:$0xff] %vm225_vm1, %v3858_v1  ;;  %v3410_v14 = vadd.f32 %v10370_v13, %v3378_v29  ;;  %v3306_v30 = vpop.f32.mrb[119].mxu0  ;;  %v4263_v13 = vld [vmem:[#allocation4] sm:$0xff] }
 0x1fe   : > { %3889 = vst.msk [vmem:[#allocation4 + $0x80] sm:$0xff] %vm225_vm1, %v3857_v9  ;;  %v3409_v5 = vadd.f32 %v3377_v19, %v3306_v30  ;;  %v3828_v6 = vld [vmem:[#allocation4 + $0x98] sm:$0xff]  ;;  %v10420_v20 = vpop.f32.mrb[118].mxu1 }
 0x1ff   : > { %3442 = vst.msk [vmem:[#allocation4 + $0xb8] sm:$0xff] %vm225_vm1, %v3410_v14  ;;  %v3860_v23 = vadd.f32 %v10414_v43, %v3828_v6  ;;  %v3827_v24 = vld [vmem:[#allocation4 + $0x90] sm:$0xff]  ;;  %v3760_v27 = vpop.f32.mrb[119].mxu1 }
 0x200   : > { %3441 = vst.msk [vmem:[#allocation4 + $0xb0] sm:$0xff] %vm225_vm1, %v3409_v5  ;;  %v3859_v52 = vadd.f32 %v3827_v24, %v3740_v31  ;;  %v10373_v34 = vpop.f32.mrb[120].mxu0 }
 0x201   : > { %3892 = vst.msk [vmem:[#allocation4 + $0x98] sm:$0xff] %vm225_vm1, %v3860_v23  ;;  %v3412_v10 = vadd.f32 %v10373_v34, %v3380_v28  ;;  %v3316_v11 = vpop.f32.mrb[121].mxu0 }
 0x202   : > { %3891 = vst.msk [vmem:[#allocation4 + $0x90] sm:$0xff] %vm225_vm1, %v3859_v52  ;;  %v3411_v54 = vadd.f32 %v3379_v48, %v3316_v11  ;;  %v3830_v56 = vld [vmem:[#allocation4 + $0xa8] sm:$0xff]  ;;  %v10423_v58 = vpop.f32.mrb[120].mxu1 }
 0x203   : > { %3444 = vst.msk [vmem:[#allocation4 + $0xc8] sm:$0xff] %vm225_vm1, %v3412_v10  ;;  %v3862_v57 = vadd.f32 %v10417_v4, %v3830_v56  ;;  %v3829_v60 = vld [vmem:[#allocation4 + $0xa0] sm:$0xff]  ;;  %v3770_v35 = vpop.f32.mrb[121].mxu1 }
 0x204   : > { %3443 = vst.msk [vmem:[#allocation4 + $0xc0] sm:$0xff] %vm225_vm1, %v3411_v54  ;;  %v3861_v17 = vadd.f32 %v3829_v60, %v3750_v2  ;;  %v10376_v61 = vpop.f32.mrb[122].mxu0  ;;  %v4268_v54 = vld [vmem:[#allocation4 + $0x28] sm:$0xff]  ;;  %v12326_v56 = vld [vmem:[%s13599_s2] ss:$0 sm:$0xff] }
 0x205   : > { %3894 = vst.msk [vmem:[#allocation4 + $0xa8] sm:$0xff] %vm225_vm1, %v3862_v57  ;;  %v3414_v8 = vadd.f32 %v10376_v61, %v3382_v32  ;;  %v3326_v49 = vpop.f32.mrb[123].mxu0  ;;  %v4267_v60 = vld [vmem:[#allocation4 + $0x20] sm:$0xff]  ;;  %v12333_v61 = vld [vmem:[%s13600_s3 + $0x14] sm:$0xf] }
 0x206   : > { %3893 = vst.msk [vmem:[#allocation4 + $0xa0] sm:$0xff] %vm225_vm1, %v3861_v17  ;;  %v3413_v38 = vadd.f32 %v3381_v15, %v3326_v49  ;;  %v3832_v16 = vld [vmem:[#allocation4 + $0xb8] sm:$0xff]  ;;  %v10426_v18 = vpop.f32.mrb[122].mxu1  ;;  %10733 = vmatprep.subr.msk.mxu0 %vm465_vm0, %v12333_v61 }
 0x207   : > { %3446 = vst.msk [vmem:[#allocation4 + $0xd8] sm:$0xff] %vm225_vm1, %v3414_v8  ;;  %v3864_v37 = vadd.f32 %v10420_v20, %v3832_v16  ;;  %v3831_v46 = vld [vmem:[#allocation4 + $0xb0] sm:$0xff]  ;;  %v3780_v55 = vpop.f32.mrb[123].mxu1  ;;  %v4266_v20 = vld [vmem:[#allocation4 + $0x18] sm:$0xff] }
 0x208   : > { %3445 = vst.msk [vmem:[#allocation4 + $0xd0] sm:$0xff] %vm225_vm1, %v3413_v38  ;;  %v3863_v50 = vadd.f32 %v3831_v46, %v3760_v27  ;;  %v10379_v41 = vpop.f32.mrb[124].mxu0  ;;  %v4265_v27 = vld [vmem:[#allocation4 + $0x10] sm:$0xff]  ;;  %v4270_v15 = vld [vmem:[#allocation4 + $0x38] sm:$0xff] }
 0x209   : > { %3896 = vst.msk [vmem:[#allocation4 + $0xb8] sm:$0xff] %vm225_vm1, %v3864_v37  ;;  %v3416_v53 = vadd.f32 %v10379_v41, %v3384_v33  ;;  %v3336_v36 = vpop.f32.mrb[125].mxu0  ;;  %v4269_v37 = vld [vmem:[#allocation4 + $0x30] sm:$0xff] }
 0x20a   : > { %3895 = vst.msk [vmem:[#allocation4 + $0xb0] sm:$0xff] %vm225_vm1, %v3863_v50  ;;  %v3415_v42 = vadd.f32 %v3383_v63, %v3336_v36  ;;  %v3834_v21 = vld [vmem:[#allocation4 + $0xc8] sm:$0xff]  ;;  %v10429_v39 = vpop.f32.mrb[124].mxu1 }
 0x20b   : > { %3448 = vst.msk [vmem:[#allocation4 + $0xe8] sm:$0xff] %vm225_vm1, %v3416_v53  ;;  %v3866_v22 = vadd.f32 %v10423_v58, %v3834_v21  ;;  %v3833_v40 = vld [vmem:[#allocation4 + $0xc0] sm:$0xff]  ;;  %v3790_v45 = vpop.f32.mrb[125].mxu1  ;;  %v4272_v63 = vld [vmem:[#allocation4 + $0x48] sm:$0xff] }
 0x20c   : > { %3447 = vst.msk [vmem:[#allocation4 + $0xe0] sm:$0xff] %vm225_vm1, %v3415_v42  ;;  %v3865_v43 = vadd.f32 %v3833_v40, %v3770_v35  ;;  %v10382_v44 = vpop.f32.mrb[126].mxu0 }
 0x20d   : > { %3898 = vst.msk [vmem:[#allocation4 + $0xc8] sm:$0xff] %vm225_vm1, %v3866_v22  ;;  %v3418_v31 = vadd.f32 %v10382_v44, %v3386_v47  ;;  %v3346_v0 = vpop.f32.mrb[127].mxu0  ;;  %v4271_v22 = vld [vmem:[#allocation4 + $0x40] sm:$0xff] }
 0x20e   : > { %3897 = vst.msk [vmem:[#allocation4 + $0xc0] sm:$0xff] %vm225_vm1, %v3865_v43  ;;  %v3417_v3 = vadd.f32 %v3385_v51, %v3346_v0  ;;  %v3836_v25 = vld [vmem:[#allocation4 + $0xd8] sm:$0xff]  ;;  %v10432_v59 = vpop.f32.mrb[126].mxu1 }
 0x20f   : > { %3450 = vst.msk [vmem:[#allocation4 + $0xf8] sm:$0xff] %vm225_vm1, %v3418_v31  ;;  %v3868_v26 = vadd.f32 %v10426_v18, %v3836_v25  ;;  %v3835_v62 = vld [vmem:[#allocation4 + $0xd0] sm:$0xff]  ;;  %v3800_v12 = vpop.f32.mrb[127].mxu1  ;;  %v4274_v51 = vld [vmem:[#allocation4 + $0x58] sm:$0xff] }
 0x210   : > { %3449 = vst.msk [vmem:[#allocation4 + $0xf0] sm:$0xff] %vm225_vm1, %v3417_v3  ;;  %v3867_v4 = vadd.f32 %v3835_v62, %v3780_v55  ;;  %v10437_v1 = vpop.f32.mrb[128].mxu0 }
 0x211   : > { %3900 = vst.msk [vmem:[#allocation4 + $0xd8] sm:$0xff] %vm225_vm1, %v3868_v26  ;;  %v4296_v2 = vadd.f32 %v10437_v1, %v4264_v7  ;;  %v4104_v9 = vpop.f32.mrb[129].mxu0  ;;  %v4273_v26 = vld [vmem:[#allocation4 + $0x50] sm:$0xff] }
 0x212   : > { %3899 = vst.msk [vmem:[#allocation4 + $0xd0] sm:$0xff] %vm225_vm1, %v3867_v4  ;;  %v4295_v29 = vadd.f32 %v4263_v13, %v4104_v9  ;;  %v3838_v14 = vld [vmem:[#allocation4 + $0xe8] sm:$0xff] }
 0x213   : > { %4328 = vst.msk [vmem:[#allocation4 + $0x8] sm:$0xff] %vm225_vm1, %v4296_v2  ;;  %v3870_v30 = vadd.f32 %v10429_v39, %v3838_v14  ;;  %v3837_v19 = vld [vmem:[#allocation4 + $0xe0] sm:$0xff]  ;;  %v4276_v14 = vld [vmem:[#allocation4 + $0x68] sm:$0xff] }
 0x214   : > { %4327 = vst.msk [vmem:[#allocation4] sm:$0xff] %vm225_vm1, %v4295_v29  ;;  %v3869_v5 = vadd.f32 %v3837_v19, %v3790_v45  ;;  %v10440_v6 = vpop.f32.mrb[130].mxu0 }
 0x215   : > { %3902 = vst.msk [vmem:[#allocation4 + $0xe8] sm:$0xff] %vm225_vm1, %v3870_v30  ;;  %v4298_v23 = vadd.f32 %v10440_v6, %v4266_v20  ;;  %v4114_v24 = vpop.f32.mrb[131].mxu0 }
 0x216   : > { %3901 = vst.msk [vmem:[#allocation4 + $0xe0] sm:$0xff] %vm225_vm1, %v3869_v5  ;;  %v4297_v52 = vadd.f32 %v4265_v27, %v4114_v24  ;;  %v3840_v34 = vld [vmem:[#allocation4 + $0xf8] sm:$0xff] }
 0x217   : > { %4330 = vst.msk [vmem:[#allocation4 + $0x18] sm:$0xff] %vm225_vm1, %v4298_v23  ;;  %v3872_v28 = vadd.f32 %v10432_v59, %v3840_v34  ;;  %v3839_v10 = vld [vmem:[#allocation4 + $0xf0] sm:$0xff]  ;;  %v4275_v23 = vld [vmem:[#allocation4 + $0x60] sm:$0xff] }
 0x218   : > { %4329 = vst.msk [vmem:[#allocation4 + $0x10] sm:$0xff] %vm225_vm1, %v4297_v52  ;;  %v3871_v11 = vadd.f32 %v3839_v10, %v3800_v12  ;;  %v10443_v48 = vpop.f32.mrb[132].mxu0 }
 0x219   : > { %3904 = vst.msk [vmem:[#allocation4 + $0xf8] sm:$0xff] %vm225_vm1, %v3872_v28  ;;  %v4300_v58 = vadd.f32 %v10443_v48, %v4268_v54  ;;  %v4124_v57 = vpop.f32.mrb[133].mxu0 }
 0x21a   : > { %v4360_v35 = vld [vmem:[#allocation4 + $0x8] sm:$0xff]  ;;  %3903 = vst.msk [vmem:[#allocation4 + $0xf0] sm:$0xff] %vm225_vm1, %v3871_v11  ;;  %v4299_v17 = vadd.f32 %v4267_v60, %v4124_v57 }
 0x21b   : > { %v4359_v32 = vld [vmem:[#allocation4] sm:$0xff]  ;;  %4332 = vst.msk [vmem:[#allocation4 + $0x28] sm:$0xff] %vm225_vm1, %v4300_v58  ;;  %v4399_v8 = vadd.f32 %v12326_v56, %v4360_v35  ;;  %v4278_v58 = vld [vmem:[#allocation4 + $0x78] sm:$0xff] }
 0x21c   : > { %4331 = vst.msk [vmem:[#allocation4 + $0x20] sm:$0xff] %vm225_vm1, %v4299_v17  ;;  %v10446_v49 = vpop.f32.mrb[134].mxu0  ;;  %v4398_v38 = vadd.f32 %v12326_v56, %v4359_v32 }
 0x21d   : > { %v4302_v16 = vadd.f32 %v10446_v49, %v4270_v15  ;;  %v4134_v18 = vpop.f32.mrb[135].mxu0  ;;  %v4431_v46 = vmax.f32 %v4399_v8, 0.0  ;;  %v4277_v8 = vld [vmem:[#allocation4 + $0x70] sm:$0xff] }
 0x21e   : > { %v4362_v55 = vld [vmem:[#allocation4 + $0x18] sm:$0xff]  ;;  %v4301_v50 = vadd.f32 %v4269_v37, %v4134_v18  ;;  %v4430_v41 = vmax.f32 %v4398_v38, 0.0 }
 0x21f   : > { %v4361_v33 = vld [vmem:[#allocation4 + $0x10] sm:$0xff]  ;;  %4334 = vst.msk [vmem:[#allocation4 + $0x38] sm:$0xff] %vm225_vm1, %v4302_v16  ;;  %4507 = vst.msk [vmem:[#allocation3 + $0x21] sm:$0xff] %vm225_vm1, %v4431_v46  ;;  %v4401_v53 = vadd.f32 %v12326_v56, %v4362_v55 }
 0x220   : > { %4333 = vst.msk [vmem:[#allocation4 + $0x30] sm:$0xff] %vm225_vm1, %v4301_v50  ;;  %v10449_v36 = vpop.f32.mrb[136].mxu0  ;;  %4506 = vst.msk [vmem:[#allocation3 + $0x19] sm:$0xff] %vm225_vm1, %v4430_v41  ;;  %v4400_v42 = vadd.f32 %v12326_v56, %v4361_v33  ;;  %v4280_v41 = vld [vmem:[#allocation4 + $0x88] sm:$0xff] }
 0x221   : > { %v4304_v21 = vadd.f32 %v10449_v36, %v4272_v63  ;;  %v4144_v39 = vpop.f32.mrb[137].mxu0  ;;  %v4433_v40 = vmax.f32 %v4401_v53, 0.0 }
 0x222   : > { %v4364_v45 = vld [vmem:[#allocation4 + $0x28] sm:$0xff]  ;;  %v4303_v43 = vadd.f32 %v4271_v22, %v4144_v39  ;;  %v4432_v44 = vmax.f32 %v4400_v42, 0.0 }
 0x223   : > { %v4363_v47 = vld [vmem:[#allocation4 + $0x20] sm:$0xff]  ;;  %4336 = vst.msk [vmem:[#allocation4 + $0x48] sm:$0xff] %vm225_vm1, %v4304_v21  ;;  %4509 = vst.msk [vmem:[#allocation3 + $0x39] sm:$0xff] %vm225_vm1, %v4433_v40  ;;  %v4403_v31 = vadd.f32 %v12326_v56, %v4364_v45 }
 0x224   : > { %4335 = vst.msk [vmem:[#allocation4 + $0x40] sm:$0xff] %vm225_vm1, %v4303_v43  ;;  %v10452_v0 = vpop.f32.mrb[138].mxu0  ;;  %4508 = vst.msk [vmem:[#allocation3 + $0x31] sm:$0xff] %vm225_vm1, %v4432_v44  ;;  %v4402_v3 = vadd.f32 %v12326_v56, %v4363_v47  ;;  %v4279_v21 = vld [vmem:[#allocation4 + $0x80] sm:$0xff] }
 0x225   : > { %v4306_v25 = vadd.f32 %v10452_v0, %v4274_v51  ;;  %v4154_v59 = vpop.f32.mrb[139].mxu0  ;;  %v4435_v62 = vmax.f32 %v4403_v31, 0.0  ;;  %v4282_v51 = vld [vmem:[#allocation4 + $0x98] sm:$0xff] }
 0x226   : > { %v4366_v12 = vld [vmem:[#allocation4 + $0x38] sm:$0xff]  ;;  %v4305_v4 = vadd.f32 %v4273_v26, %v4154_v59  ;;  %v4434_v1 = vmax.f32 %v4402_v3, 0.0 }
 0x227   : > { %v4365_v7 = vld [vmem:[#allocation4 + $0x30] sm:$0xff]  ;;  %4338 = vst.msk [vmem:[#allocation4 + $0x58] sm:$0xff] %vm225_vm1, %v4306_v25  ;;  %v12354_v2 = vld [vmem:[#allocation3 + $0x18] sm:$0xff]  ;;  %4511 = vst.msk [vmem:[#allocation3 + $0x51] sm:$0xff] %vm225_vm1, %v4435_v62  ;;  %v4405_v13 = vadd.f32 %v12326_v56, %v4366_v12 }
 0x228   : > { %v12356_v9 = vld [vmem:[#allocation3 + $0x19] sm:$0xff]  ;;  %4337 = vst.msk [vmem:[#allocation4 + $0x50] sm:$0xff] %vm225_vm1, %v4305_v4  ;;  %v10455_v29 = vpop.f32.mrb[140].mxu0  ;;  %10488 = vmatprep.mubr.msk.f32.mxu1 %vm225_vm1, %v12354_v2  ;;  %v12367_v19 = vld [vmem:[#allocation3 + $0x21] sm:$0xff]  ;;  %4510 = vst.msk [vmem:[#allocation3 + $0x49] sm:$0xff] %vm225_vm1, %v4434_v1  ;;  %v4404_v5 = vadd.f32 %v12326_v56, %v4365_v7 }
 0x229   : > { %10538 = vmatprep.mubr.msk.f32.mxu0 %vm225_vm1, %v12356_v9  ;;  %v12365_v30 = vld [vmem:[#allocation3 + $0x20] sm:$0xff]  ;;  %v4308_v6 = vadd.f32 %v10455_v29, %v4276_v14  ;;  %v4164_v20 = vpop.f32.mrb[141].mxu0  ;;  %v4437_v24 = vmax.f32 %v4405_v13, 0.0 }
 0x22a   : > { %10489 = vmatmul.mubr.msk.f32.gmra.mrb[130].mxu1 %vm225_vm1, %v12365_v30  ;;  %10539 = vmatmul.mubr.msk.f32.gmra.mrb[162].mxu0 %vm225_vm1, %v12367_v19  ;;  %v4368_v27 = vld [vmem:[#allocation4 + $0x48] sm:$0xff]  ;;  %v4307_v52 = vadd.f32 %v4275_v23, %v4164_v20  ;;  %v4436_v34 = vmax.f32 %v4404_v5, 0.0  ;;  %v4281_v12 = vld [vmem:[#allocation4 + $0x90] sm:$0xff] }
 0x22b   : > { %v4367_v28 = vld [vmem:[#allocation4 + $0x40] sm:$0xff]  ;;  %4340 = vst.msk [vmem:[#allocation4 + $0x68] sm:$0xff] %vm225_vm1, %v4308_v6  ;;  %4513 = vst.msk [vmem:[#allocation3 + $0x69] sm:$0xff] %vm225_vm1, %v4437_v24  ;;  %v4407_v48 = vadd.f32 %v12326_v56, %v4368_v27  ;;  %v12387_v57 = vld [vmem:[#allocation3 + $0x38] sm:$0xff] }
 0x22c   : > { %v12376_v10 = vld [vmem:[#allocation3 + $0x30] sm:$0xff]  ;;  %4339 = vst.msk [vmem:[#allocation4 + $0x60] sm:$0xff] %vm225_vm1, %v4307_v52  ;;  %v10458_v54 = vpop.f32.mrb[142].mxu0  ;;  %v12389_v60 = vld [vmem:[#allocation3 + $0x39] sm:$0xff]  ;;  %4512 = vst.msk [vmem:[#allocation3 + $0x61] sm:$0xff] %vm225_vm1, %v4436_v34  ;;  %v4406_v35 = vadd.f32 %v12326_v56, %v4367_v28 }
 0x22d   : > { %v12378_v11 = vld [vmem:[#allocation3 + $0x31] sm:$0xff]  ;;  %10491 = vmatprep.mubr.msk.f32.mxu1 %vm225_vm1, %v12376_v10  ;;  %v4310_v17 = vadd.f32 %v10458_v54, %v4278_v58  ;;  %v4174_v32 = vpop.f32.mrb[143].mxu0  ;;  %v4439_v49 = vmax.f32 %v4407_v48, 0.0 }
 0x22e   : > { %10541 = vmatprep.mubr.msk.f32.mxu0 %vm225_vm1, %v12378_v11  ;;  %10492 = vmatmul.mubr.msk.f32.gmra.mrb[132].mxu1 %vm225_vm1, %v12387_v57  ;;  %v4370_v15 = vld [vmem:[#allocation4 + $0x58] sm:$0xff]  ;;  %v4309_v38 = vadd.f32 %v4277_v8, %v4174_v32  ;;  %v4438_v16 = vmax.f32 %v4406_v35, 0.0  ;;  %v12411_v53 = vld [vmem:[#allocation3 + $0x51] sm:$0xff] }
 0x22f   : > { %10542 = vmatmul.mubr.msk.f32.gmra.mrb[164].mxu0 %vm225_vm1, %v12389_v60  ;;  %v4369_v18 = vld [vmem:[#allocation4 + $0x50] sm:$0xff]  ;;  %4342 = vst.msk [vmem:[#allocation4 + $0x78] sm:$0xff] %vm225_vm1, %v4310_v17  ;;  %v12398_v37 = vld [vmem:[#allocation3 + $0x48] sm:$0xff]  ;;  %4515 = vst.msk [vmem:[#allocation3 + $0x81] sm:$0xff] %vm225_vm1, %v4439_v49  ;;  %v4409_v55 = vadd.f32 %v12326_v56, %v4370_v15 }
 0x230   : > { %v12400_v46 = vld [vmem:[#allocation3 + $0x49] sm:$0xff]  ;;  %4341 = vst.msk [vmem:[#allocation4 + $0x70] sm:$0xff] %vm225_vm1, %v4309_v38  ;;  %v10461_v50 = vpop.f32.mrb[144].mxu0  ;;  %10494 = vmatprep.mubr.msk.f32.mxu1 %vm225_vm1, %v12398_v37  ;;  %4514 = vst.msk [vmem:[#allocation3 + $0x79] sm:$0xff] %vm225_vm1, %v4438_v16  ;;  %v4408_v36 = vadd.f32 %v12326_v56, %v4369_v18  ;;  %v4284_v23 = vld [vmem:[#allocation4 + $0xa8] sm:$0xff] }
 0x231   : > { %10544 = vmatprep.mubr.msk.f32.mxu0 %vm225_vm1, %v12400_v46  ;;  %v12409_v33 = vld [vmem:[#allocation3 + $0x50] sm:$0xff]  ;;  %v4312_v63 = vadd.f32 %v10461_v50, %v4280_v41  ;;  %v4184_v42 = vpop.f32.mrb[145].mxu0  ;;  %v4441_v39 = vmax.f32 %v4409_v55, 0.0  ;;  %v4286_v16 = vld [vmem:[#allocation4 + $0xb8] sm:$0xff] }
 0x232   : > { %10495 = vmatmul.mubr.msk.f32.gmra.mrb[134].mxu1 %vm225_vm1, %v12409_v33  ;;  %v4372_v22 = vld [vmem:[#allocation4 + $0x68] sm:$0xff]  ;;  %v4311_v40 = vadd.f32 %v4279_v21, %v4184_v42  ;;  %v4440_v45 = vmax.f32 %v4408_v36, 0.0  ;;  %v12433_v25 = vld [vmem:[#allocation3 + $0x69] sm:$0xff] }
 0x233   : > { %10545 = vmatmul.mubr.msk.f32.gmra.mrb[166].mxu0 %vm225_vm1, %v12411_v53  ;;  %v4371_v43 = vld [vmem:[#allocation4 + $0x60] sm:$0xff]  ;;  %4344 = vst.msk [vmem:[#allocation4 + $0x88] sm:$0xff] %vm225_vm1, %v4312_v63  ;;  %v12420_v44 = vld [vmem:[#allocation3 + $0x60] sm:$0xff]  ;;  %4517 = vst.msk [vmem:[#allocation3 + $0x99] sm:$0xff] %vm225_vm1, %v4441_v39  ;;  %v4411_v31 = vadd.f32 %v12326_v56, %v4372_v22 }
 0x234   : > { %v12422_v47 = vld [vmem:[#allocation3 + $0x61] sm:$0xff]  ;;  %4343 = vst.msk [vmem:[#allocation4 + $0x80] sm:$0xff] %vm225_vm1, %v4311_v40  ;;  %v10464_v0 = vpop.f32.mrb[146].mxu0  ;;  %10497 = vmatprep.mubr.msk.f32.mxu1 %vm225_vm1, %v12420_v44  ;;  %4516 = vst.msk [vmem:[#allocation3 + $0x91] sm:$0xff] %vm225_vm1, %v4440_v45  ;;  %v4410_v59 = vadd.f32 %v12326_v56, %v4371_v43  ;;  %v4283_v48 = vld [vmem:[#allocation4 + $0xa0] sm:$0xff] }
 0x235   : > { %10547 = vmatprep.mubr.msk.f32.mxu0 %vm225_vm1, %v12422_v47  ;;  %v12431_v3 = vld [vmem:[#allocation3 + $0x68] sm:$0xff]  ;;  %v4314_v26 = vadd.f32 %v10464_v0, %v4282_v51  ;;  %v4194_v62 = vpop.f32.mrb[147].mxu0  ;;  %v4443_v4 = vmax.f32 %v4411_v31, 0.0  ;;  %v4285_v63 = vld [vmem:[#allocation4 + $0xb0] sm:$0xff]  ;;  %v4288_v51 = vld [vmem:[#allocation4 + $0xc8] sm:$0xff] }
 0x236   : > { %10498 = vmatmul.mubr.msk.f32.gmra.mrb[136].mxu1 %vm225_vm1, %v12431_v3  ;;  %v4374_v1 = vld [vmem:[#allocation4 + $0x78] sm:$0xff]  ;;  %v4313_v7 = vadd.f32 %v4281_v12, %v4194_v62  ;;  %v4442_v13 = vmax.f32 %v4410_v59, 0.0 }
 0x237   : > { %10548 = vmatmul.mubr.msk.f32.gmra.mrb[168].mxu0 %vm225_vm1, %v12433_v25  ;;  %v4373_v29 = vld [vmem:[#allocation4 + $0x70] sm:$0xff]  ;;  %4346 = vst.msk [vmem:[#allocation4 + $0x98] sm:$0xff] %vm225_vm1, %v4314_v26  ;;  %v12442_v14 = vld [vmem:[#allocation3 + $0x78] sm:$0xff]  ;;  %4519 = vst.msk [vmem:[#allocation3 + $0xb1] sm:$0xff] %vm225_vm1, %v4443_v4  ;;  %v4413_v6 = vadd.f32 %v12326_v56, %v4374_v1 }
 0x238   : > { %13722 = vst [vmem:[#allocation29_spill] sm:$0xff] %v12442_v14  ;;  %v12444_v5 = vld [vmem:[#allocation3 + $0x79] sm:$0xff]  ;;  %4345 = vst.msk [vmem:[#allocation4 + $0x90] sm:$0xff] %vm225_vm1, %v4313_v7  ;;  %v10467_v20 = vpop.f32.mrb[148].mxu0  ;;  %10500 = vmatprep.mubr.msk.f32.mxu1 %vm225_vm1, %v12442_v14  ;;  %v12455_v27 = vld [vmem:[#allocation3 + $0x81] sm:$0xff]  ;;  %v4412_v52 = vadd.f32 %v12326_v56, %v4373_v29 }
 0x239   : > { %10550 = vmatprep.mubr.msk.f32.mxu0 %vm225_vm1, %v12444_v5  ;;  %v12453_v24 = vld [vmem:[#allocation3 + $0x80] sm:$0xff]  ;;  %4518 = vst.msk [vmem:[#allocation3 + $0xa9] sm:$0xff] %vm225_vm1, %v4442_v13  ;;  %v4316_v34 = vadd.f32 %v10467_v20, %v4284_v23  ;;  %v4204_v28 = vpop.f32.mrb[149].mxu0  ;;  %v4445_v54 = vmax.f32 %v4413_v6, 0.0  ;;  %v4287_v1 = vld [vmem:[#allocation4 + $0xc0] sm:$0xff] }
 0x23a   : > { %13723 = vst [vmem:[#allocation31_spill] sm:$0xff] %v12453_v24  ;;  %10501 = vmatmul.mubr.msk.f32.gmra.mrb[138].mxu1 %vm225_vm1, %v12453_v24  ;;  %v4376_v58 = vld [vmem:[#allocation4 + $0x88] sm:$0xff]  ;;  %v4315_v35 = vadd.f32 %v4283_v48, %v4204_v28  ;;  %v4444_v17 = vmax.f32 %v4412_v52, 0.0  ;;  %v4290_v48 = vld [vmem:[#allocation4 + $0xd8] sm:$0xff] }
 0x23b   : > { %10551 = vmatmul.mubr.msk.f32.gmra.mrb[170].mxu0 %vm225_vm1, %v12455_v27  ;;  %v4375_v32 = vld [vmem:[#allocation4 + $0x80] sm:$0xff]  ;;  %4348 = vst.msk [vmem:[#allocation4 + $0xa8] sm:$0xff] %vm225_vm1, %v4316_v34  ;;  %4521 = vst.msk [vmem:[#allocation3 + $0xc9] sm:$0xff] %vm225_vm1, %v4445_v54  ;;  %v4415_v15 = vadd.f32 %v12326_v56, %v4376_v58  ;;  %v12475_v18 = vld [vmem:[#allocation3 + $0x98] sm:$0xff] }
 0x23c   : > { %v12464_v8 = vld [vmem:[#allocation3 + $0x90] sm:$0xff]  ;;  %4347 = vst.msk [vmem:[#allocation4 + $0xa0] sm:$0xff] %vm225_vm1, %v4315_v35  ;;  %v10470_v38 = vpop.f32.mrb[150].mxu0  ;;  %13725 = vst [vmem:[#allocation5_spill] sm:$0xff] %v12475_v18  ;;  %v12477_v55 = vld [vmem:[#allocation3 + $0x99] sm:$0xff]  ;;  %v4414_v50 = vadd.f32 %v12326_v56, %v4375_v32 }
 0x23d   : > { %13724 = vst [vmem:[#allocation33_spill] sm:$0xff] %v12464_v8  ;;  %v12466_v49 = vld [vmem:[#allocation3 + $0x91] sm:$0xff]  ;;  %10503 = vmatprep.mubr.msk.f32.mxu1 %vm225_vm1, %v12464_v8  ;;  %4520 = vst.msk [vmem:[#allocation3 + $0xc1] sm:$0xff] %vm225_vm1, %v4444_v17  ;;  %v4318_v41 = vadd.f32 %v10470_v38, %v4286_v16  ;;  %v4214_v36 = vpop.f32.mrb[151].mxu0  ;;  %v4447_v42 = vmax.f32 %v4415_v15, 0.0  ;;  %v4289_v15 = vld [vmem:[#allocation4 + $0xd0] sm:$0xff] }
 0x23e   : > { %10553 = vmatprep.mubr.msk.f32.mxu0 %vm225_vm1, %v12466_v49  ;;  %10504 = vmatmul.mubr.msk.f32.gmra.mrb[140].mxu1 %vm225_vm1, %v12475_v18  ;;  %v4378_v21 = vld [vmem:[#allocation4 + $0x98] sm:$0xff]  ;;  %v4317_v39 = vadd.f32 %v4285_v63, %v4214_v36  ;;  %v4446_v22 = vmax.f32 %v4414_v50, 0.0  ;;  %v12499_v26 = vld [vmem:[#allocation3 + $0xb1] sm:$0xff] }
 0x23f   : > { %10554 = vmatmul.mubr.msk.f32.gmra.mrb[172].mxu0 %vm225_vm1, %v12477_v55  ;;  %v4377_v40 = vld [vmem:[#allocation4 + $0x90] sm:$0xff]  ;;  %4350 = vst.msk [vmem:[#allocation4 + $0xb8] sm:$0xff] %vm225_vm1, %v4318_v41  ;;  %4523 = vst.msk [vmem:[#allocation3 + $0xe1] sm:$0xff] %vm225_vm1, %v4447_v42  ;;  %v4417_v31 = vadd.f32 %v12326_v56, %v4378_v21 }
 0x240   : > { %v12486_v45 = vld [vmem:[#allocation3 + $0xa8] sm:$0xff]  ;;  %4349 = vst.msk [vmem:[#allocation4 + $0xb0] sm:$0xff] %vm225_vm1, %v4317_v39  ;;  %v10473_v0 = vpop.f32.mrb[152].mxu0  ;;  %v12497_v59 = vld [vmem:[#allocation3 + $0xb0] sm:$0xff]  ;;  %4522 = vst.msk [vmem:[#allocation3 + $0xd9] sm:$0xff] %vm225_vm1, %v4446_v22  ;;  %v4416_v62 = vadd.f32 %v12326_v56, %v4377_v40 }
 0x241   : > { %13726 = vst [vmem:[#allocation6_spill] sm:$0xff] %v12486_v45  ;;  %v12488_v43 = vld [vmem:[#allocation3 + $0xa9] sm:$0xff]  ;;  %10506 = vmatprep.mubr.msk.f32.mxu1 %vm225_vm1, %v12486_v45  ;;  %13727 = vst [vmem:[#allocation7_spill] sm:$0xff] %v12497_v59  ;;  %v4320_v12 = vadd.f32 %v10473_v0, %v4288_v51  ;;  %v4224_v4 = vpop.f32.mrb[153].mxu0  ;;  %v4449_v7 = vmax.f32 %v4417_v31, 0.0  ;;  %v4292_v22 = vld [vmem:[#allocation4 + $0xe8] sm:$0xff] }
 0x242   : > { %10556 = vmatprep.mubr.msk.f32.mxu0 %vm225_vm1, %v12488_v43  ;;  %10507 = vmatmul.mubr.msk.f32.gmra.mrb[142].mxu1 %vm225_vm1, %v12497_v59  ;;  %v4380_v13 = vld [vmem:[#allocation4 + $0xa8] sm:$0xff]  ;;  %v4319_v29 = vadd.f32 %v4287_v1, %v4224_v4  ;;  %v4448_v6 = vmax.f32 %v4416_v62, 0.0  ;;  %v12521_v58 = vld [vmem:[#allocation3 + $0xc9] sm:$0xff] }
 0x243   : > { %10557 = vmatmul.mubr.msk.f32.gmra.mrb[174].mxu0 %vm225_vm1, %v12499_v26  ;;  %v4379_v20 = vld [vmem:[#allocation4 + $0xa0] sm:$0xff]  ;;  %4352 = vst.msk [vmem:[#allocation4 + $0xc8] sm:$0xff] %vm225_vm1, %v4320_v12  ;;  %4525 = vst.msk [vmem:[#allocation3 + $0xf9] sm:$0xff] %vm225_vm1, %v4449_v7  ;;  %v4419_v34 = vadd.f32 %v12326_v56, %v4380_v13 }
 0x244   : > { %v12508_v23 = vld [vmem:[#allocation3 + $0xc0] sm:$0xff]  ;;  %4351 = vst.msk [vmem:[#allocation4 + $0xc0] sm:$0xff] %vm225_vm1, %v4319_v29  ;;  %v10476_v28 = vpop.f32.mrb[154].mxu0  ;;  %v12519_v54 = vld [vmem:[#allocation3 + $0xc8] sm:$0xff]  ;;  %4524 = vst.msk [vmem:[#allocation3 + $0xf1] sm:$0xff] %vm225_vm1, %v4448_v6  ;;  %v4418_v35 = vadd.f32 %v12326_v56, %v4379_v20 }
 0x245   : > { %v12510_v52 = vld [vmem:[#allocation3 + $0xc1] sm:$0xff]  ;;  %10509 = vmatprep.mubr.msk.f32.mxu1 %vm225_vm1, %v12508_v23  ;;  %v4322_v17 = vadd.f32 %v10476_v28, %v4290_v48  ;;  %v4234_v32 = vpop.f32.mrb[155].mxu0  ;;  %v4451_v38 = vmax.f32 %v4419_v34, 0.0  ;;  %v4291_v12 = vld [vmem:[#allocation4 + $0xe0] sm:$0xff] }
 0x246   : > { %10559 = vmatprep.mubr.msk.f32.mxu0 %vm225_vm1, %v12510_v52  ;;  %10510 = vmatmul.mubr.msk.f32.gmra.mrb[144].mxu1 %vm225_vm1, %v12519_v54  ;;  %v4382_v16 = vld [vmem:[#allocation4 + $0xb8] sm:$0xff]  ;;  %v4321_v50 = vadd.f32 %v4289_v15, %v4234_v32  ;;  %v4450_v41 = vmax.f32 %v4418_v35, 0.0 }
 0x247   : > { %10560 = vmatmul.mubr.msk.f32.gmra.mrb[176].mxu0 %vm225_vm1, %v12521_v58  ;;  %v4381_v36 = vld [vmem:[#allocation4 + $0xb0] sm:$0xff]  ;;  %4354 = vst.msk [vmem:[#allocation4 + $0xd8] sm:$0xff] %vm225_vm1, %v4322_v17  ;;  %v12530_v63 = vld [vmem:[#allocation3 + $0xd8] sm:$0xff]  ;;  %4527 = vst.msk [vmem:[#allocation3 + $0x111] sm:$0xff] %vm225_vm1, %v4451_v38  ;;  %v4421_v21 = vadd.f32 %v12326_v56, %v4382_v16 }
 0x248   : > { %v12532_v42 = vld [vmem:[#allocation3 + $0xd9] sm:$0xff]  ;;  %4353 = vst.msk [vmem:[#allocation4 + $0xd0] sm:$0xff] %vm225_vm1, %v4321_v50  ;;  %v10479_v39 = vpop.f32.mrb[156].mxu0  ;;  %10512 = vmatprep.mubr.msk.f32.mxu1 %vm225_vm1, %v12530_v63  ;;  %v12543_v31 = vld [vmem:[#allocation3 + $0xe1] sm:$0xff]  ;;  %4526 = vst.msk [vmem:[#allocation3 + $0x109] sm:$0xff] %vm225_vm1, %v4450_v41  ;;  %v4420_v0 = vadd.f32 %v12326_v56, %v4381_v36 }
 0x249   : > { %10562 = vmatprep.mubr.msk.f32.mxu0 %vm225_vm1, %v12532_v42  ;;  %v12541_v40 = vld [vmem:[#allocation3 + $0xe0] sm:$0xff]  ;;  %v4324_v51 = vadd.f32 %v10479_v39, %v4292_v22  ;;  %v4244_v62 = vpop.f32.mrb[157].mxu0  ;;  %v4453_v4 = vmax.f32 %v4421_v21, 0.0  ;;  %v4294_v48 = vld [vmem:[#allocation4 + $0xf8] sm:$0xff] }
 0x24a   : > { %10513 = vmatmul.mubr.msk.f32.gmra.mrb[146].mxu1 %vm225_vm1, %v12541_v40  ;;  %v4384_v1 = vld [vmem:[#allocation4 + $0xc8] sm:$0xff]  ;;  %v4323_v7 = vadd.f32 %v4291_v12, %v4244_v62  ;;  %v4452_v13 = vmax.f32 %v4420_v0, 0.0  ;;  %v4293_v16 = vld [vmem:[#allocation4 + $0xf0] sm:$0xff] }
 0x24b   : > { %10563 = vmatmul.mubr.msk.f32.gmra.mrb[178].mxu0 %vm225_vm1, %v12543_v31  ;;  %v4383_v29 = vld [vmem:[#allocation4 + $0xc0] sm:$0xff]  ;;  %4356 = vst.msk [vmem:[#allocation4 + $0xe8] sm:$0xff] %vm225_vm1, %v4324_v51  ;;  %4529 = vst.msk [vmem:[#allocation3 + $0x129] sm:$0xff] %vm225_vm1, %v4453_v4  ;;  %v4423_v34 = vadd.f32 %v12326_v56, %v4384_v1  ;;  %v12563_v35 = vld [vmem:[#allocation3 + $0xf8] sm:$0xff] }
 0x24c   : > { %v12552_v6 = vld [vmem:[#allocation3 + $0xf0] sm:$0xff]  ;;  %4355 = vst.msk [vmem:[#allocation4 + $0xe0] sm:$0xff] %vm225_vm1, %v4323_v7  ;;  %v10482_v28 = vpop.f32.mrb[158].mxu0  ;;  %13729 = vst [vmem:[#allocation9_spill] sm:$0xff] %v12563_v35  ;;  %v12565_v17 = vld [vmem:[#allocation3 + $0xf9] sm:$0xff]  ;;  %v4422_v32 = vadd.f32 %v12326_v56, %v4383_v29 }
 0x24d   : > { %13728 = vst [vmem:[#allocation8_spill] sm:$0xff] %v12552_v6  ;;  %v12554_v20 = vld [vmem:[#allocation3 + $0xf1] sm:$0xff]  ;;  %10515 = vmatprep.mubr.msk.f32.mxu1 %vm225_vm1, %v12552_v6  ;;  %4528 = vst.msk [vmem:[#allocation3 + $0x121] sm:$0xff] %vm225_vm1, %v4452_v13  ;;  %v4326_v15 = vadd.f32 %v10482_v28, %v4294_v48  ;;  %v4254_v38 = vpop.f32.mrb[159].mxu0  ;;  %v4455_v50 = vmax.f32 %v4423_v34, 0.0 }
 0x24e   : > { %10565 = vmatprep.mubr.msk.f32.mxu0 %vm225_vm1, %v12554_v20  ;;  %10516 = vmatmul.mubr.msk.f32.gmra.mrb[148].mxu1 %vm225_vm1, %v12563_v35  ;;  %v4386_v41 = vld [vmem:[#allocation4 + $0xd8] sm:$0xff]  ;;  %v4325_v36 = vadd.f32 %v4293_v16, %v4254_v38  ;;  %v4454_v21 = vmax.f32 %v4422_v32, 0.0  ;;  %v12587_v12 = vld [vmem:[#allocation3 + $0x111] sm:$0xff] }
 0x24f   : > { %10566 = vmatmul.mubr.msk.f32.gmra.mrb[180].mxu0 %vm225_vm1, %v12565_v17  ;;  %v4385_v39 = vld [vmem:[#allocation4 + $0xd0] sm:$0xff]  ;;  %4358 = vst.msk [vmem:[#allocation4 + $0xf8] sm:$0xff] %vm225_vm1, %v4326_v15  ;;  %v12574_v22 = vld [vmem:[#allocation3 + $0x108] sm:$0xff]  ;;  %4531 = vst.msk [vmem:[#allocation3 + $0x141] sm:$0xff] %vm225_vm1, %v4455_v50  ;;  %v4425_v51 = vadd.f32 %v12326_v56, %v4386_v41 }
 0x250   : > { %13730 = vst [vmem:[#allocation10_spill] sm:$0xff] %v12574_v22  ;;  %v12576_v0 = vld [vmem:[#allocation3 + $0x109] sm:$0xff]  ;;  %4357 = vst.msk [vmem:[#allocation4 + $0xf0] sm:$0xff] %vm225_vm1, %v4325_v36  ;;  %10518 = vmatprep.mubr.msk.f32.mxu1 %vm225_vm1, %v12574_v22  ;;  %v4424_v4 = vadd.f32 %v12326_v56, %v4385_v39 }
 0x251   : > { %10568 = vmatprep.mubr.msk.f32.mxu0 %vm225_vm1, %v12576_v0  ;;  %v12585_v62 = vld [vmem:[#allocation3 + $0x110] sm:$0xff]  ;;  %4530 = vst.msk [vmem:[#allocation3 + $0x139] sm:$0xff] %vm225_vm1, %v4454_v21  ;;  %v4457_v1 = vmax.f32 %v4425_v51, 0.0 }
 0x252   : > { %13731 = vst [vmem:[#allocation11_spill] sm:$0xff] %v12585_v62  ;;  %10519 = vmatmul.mubr.msk.f32.gmra.mrb[150].mxu1 %vm225_vm1, %v12585_v62  ;;  %v4388_v7 = vld [vmem:[#allocation4 + $0xe8] sm:$0xff]  ;;  %v4456_v13 = vmax.f32 %v4424_v4, 0.0  ;;  %v12607_v15 = vld [vmem:[#allocation3 + $0x129] sm:$0xff] }
 0x253   : > { %10569 = vmatmul.mubr.msk.f32.gmra.mrb[182].mxu0 %vm225_vm1, %v12587_v12  ;;  %v4387_v29 = vld [vmem:[#allocation4 + $0xe0] sm:$0xff]  ;;  %4533 = vst.msk [vmem:[#allocation3 + $0x159] sm:$0xff] %vm225_vm1, %v4457_v1  ;;  %v4427_v48 = vadd.f32 %v12326_v56, %v4388_v7 }
 0x254   : > { %v12595_v34 = vld [vmem:[#allocation3 + $0x120] sm:$0xff]  ;;  %v12605_v32 = vld [vmem:[#allocation3 + $0x128] sm:$0xff]  ;;  %4532 = vst.msk [vmem:[#allocation3 + $0x151] sm:$0xff] %vm225_vm1, %v4456_v13  ;;  %v4426_v38 = vadd.f32 %v12326_v56, %v4387_v29 }
 0x255   : > { %13732 = vst [vmem:[#allocation12_spill] sm:$0xff] %v12595_v34  ;;  %v12597_v28 = vld [vmem:[#allocation3 + $0x121] sm:$0xff]  ;;  %10521 = vmatprep.mubr.msk.f32.mxu1 %vm225_vm1, %v12595_v34  ;;  %13733 = vst [vmem:[#allocation13_spill] sm:$0xff] %v12605_v32  ;;  %v4459_v16 = vmax.f32 %v4427_v48, 0.0 }
 0x256   : > { %10571 = vmatprep.mubr.msk.f32.mxu0 %vm225_vm1, %v12597_v28  ;;  %10522 = vmatmul.mubr.msk.f32.gmra.mrb[152].mxu1 %vm225_vm1, %v12605_v32  ;;  %v4390_v50 = vld [vmem:[#allocation4 + $0xf8] sm:$0xff]  ;;  %v4458_v41 = vmax.f32 %v4426_v38, 0.0 }
 0x257   : > { %10572 = vmatmul.mubr.msk.f32.gmra.mrb[184].mxu0 %vm225_vm1, %v12607_v15  ;;  %v4389_v36 = vld [vmem:[#allocation4 + $0xf0] sm:$0xff]  ;;  %4535 = vst.msk [vmem:[#allocation3 + $0x171] sm:$0xff] %vm225_vm1, %v4459_v16  ;;  %v4429_v51 = vadd.f32 %v12326_v56, %v4390_v50 }
 0x258   : > { %v12615_v21 = vld [vmem:[#allocation3 + $0x138] sm:$0xff]  ;;  %v12625_v4 = vld [vmem:[#allocation3 + $0x140] sm:$0xff]  ;;  %4534 = vst.msk [vmem:[#allocation3 + $0x169] sm:$0xff] %vm225_vm1, %v4458_v41  ;;  %v4428_v7 = vadd.f32 %v12326_v56, %v4389_v36 }
 0x259   : > { %13734 = vst [vmem:[#allocation14_spill] sm:$0xff] %v12615_v21  ;;  %v12617_v39 = vld [vmem:[#allocation3 + $0x139] sm:$0xff]  ;;  %10524 = vmatprep.mubr.msk.f32.mxu1 %vm225_vm1, %v12615_v21  ;;  %13735 = vst [vmem:[#allocation15_spill] sm:$0xff] %v12625_v4  ;;  %v12627_v1 = vld [vmem:[#allocation3 + $0x141] sm:$0xff]  ;;  %v4461_v13 = vmax.f32 %v4429_v51, 0.0 }
 0x25a   : > { %10574 = vmatprep.mubr.msk.f32.mxu0 %vm225_vm1, %v12617_v39  ;;  %13736 = vst [vmem:[#allocation16_spill] sm:$0xff] %v12627_v1  ;;  %10525 = vmatmul.mubr.msk.f32.gmra.mrb[154].mxu1 %vm225_vm1, %v12625_v4  ;;  %v4460_v29 = vmax.f32 %v4428_v7, 0.0  ;;  %v12646_v56 = vld [vmem:[#allocation3 + $0x159] sm:$0xff]  ;;  %v5381_v50 = vld [vmem:[#allocation3 + $0x2] sm:$0xff] }
 0x25b   : > { %10575 = vmatmul.mubr.msk.f32.gmra.mrb[186].mxu0 %vm225_vm1, %v12627_v1  ;;  %v12635_v48 = vld [vmem:[#allocation3 + $0x150] sm:$0xff]  ;;  %v12639_v16 = vld [vmem:[#allocation3 + $0x158] sm:$0xff]  ;;  %4537 = vst.msk [vmem:[#allocation3 + $0x189] sm:$0xff] %vm225_vm1, %v4461_v13  ;;  %13740 = vst [vmem:[#allocation20_spill] sm:$0xff] %v12646_v56 }
 0x25c   : > { %13737 = vst [vmem:[#allocation17_spill] sm:$0xff] %v12635_v48  ;;  %v12637_v38 = vld [vmem:[#allocation3 + $0x151] sm:$0xff]  ;;  %13739 = vst [vmem:[#allocation19_spill] sm:$0xff] %v12639_v16  ;;  %10527 = vmatprep.mubr.msk.f32.mxu1 %vm225_vm1, %v12635_v48 }
 0x25d   : > { %13738 = vst [vmem:[#allocation18_spill] sm:$0xff] %v12637_v38  ;;  %10577 = vmatprep.mubr.msk.f32.mxu0 %vm225_vm1, %v12637_v38  ;;  %4536 = vst.msk [vmem:[#allocation3 + $0x181] sm:$0xff] %vm225_vm1, %v4460_v29  ;;  %v5382_v13 = vld [vmem:[#allocation3 + $0xa] sm:$0xff]  ;;  %v12675_v29 = vld [vmem:[#allocation3 + $0x1a] sm:$0xff] }
 0x25e   : > { %10528 = vmatmul.mubr.msk.f32.gmra.mrb[156].mxu1 %vm225_vm1, %v12639_v16  ;;  %v12663_v7 = vld [vmem:[#allocation3 + $0x171] sm:$0xff] }
 0x25f   : > { %10578 = vmatmul.mubr.msk.f32.gmra.mrb[188].mxu0 %vm225_vm1, %v12646_v56  ;;  %v12653_v41 = vld [vmem:[#allocation3 + $0x168] sm:$0xff]  ;;  %v12657_v51 = vld [vmem:[#allocation3 + $0x170] sm:$0xff]  ;;  %13743 = vst [vmem:[#allocation23_spill] sm:$0xff] %v12663_v7 }
 0x260   : > { %13741 = vst [vmem:[#allocation21_spill] sm:$0xff] %v12653_v41  ;;  %v12655_v36 = vld [vmem:[#allocation3 + $0x169] sm:$0xff]  ;;  %10530 = vmatprep.mubr.msk.f32.mxu1 %vm225_vm1, %v12653_v41  ;;  %v12775_v56 = vld [vmem:[#allocation3 + $0xb2] sm:$0xff] }
 0x261   : > { %13742 = vst [vmem:[#allocation22_spill] sm:$0xff] %v12655_v36  ;;  %10580 = vmatprep.mubr.msk.f32.mxu0 %vm225_vm1, %v12655_v36  ;;  %v12680_v36 = vld [vmem:[%s13600_s3 + $0x18] sm:$0xf] }
 0x262   : > { %10531 = vmatmul.mubr.msk.f32.gmra.mrb[158].mxu1 %vm225_vm1, %v12657_v51 }
 0x263   : > { %10581 = vmatmul.mubr.msk.f32.gmra.mrb[190].mxu0 %vm225_vm1, %v12663_v7  ;;  %10585 = vmatprep.mubr.msk.f32.mxu1 %vm225_vm1, %v5381_v50  ;;  %v12685_v7 = vld [vmem:[%s13600_s3 + $0x1c] sm:$0xf]  ;;  %v12707_v50 = vld [vmem:[#allocation3 + $0x32] sm:$0xff] }
 0x264   : > { %10635 = vmatprep.mubr.msk.f32.mxu0 %vm225_vm1, %v12354_v2  ;;  %v10942_v2 = vld [vmem:[%s13600_s3 + $0x10] sm:$0xf] }
 0x266   : > { %10586 = vmatmul.mubr.msk.f32.vlgmr.msra.gmra.mrb[160].mxu1 %vm225_vm1, %v5382_v13  ;;  %v12749_v13 = vld [vmem:[#allocation3 + $0x82] sm:$0xff] }
 0x267   : > { %10636 = vmatmul.mubr.msk.f32.vlgmr.msra.gmra.mrb[192].mxu0 %vm225_vm1, %v12365_v30  ;;  %10684 = vmatpush3.msk.msra.mxu1 %vm465_vm0, %v10942_v2  ;;  %v12697_v30 = vld [vmem:[#allocation3 + $0x22] sm:$0xff] }
 0x268   : > { %10588 = vmatprep.mubr.msk.f32.mxu1 %vm225_vm1, %v12675_v29  ;;  %10638 = vmatprep.mubr.msk.f32.mxu0 %vm225_vm1, %v12376_v10  ;;  %v12719_v10 = vld [vmem:[#allocation3 + $0x4a] sm:$0xff] }
 0x269   : > { %10734 = vmatpush3.msk.msra.mxu0 %vm465_vm0, %v12333_v61  ;;  %10783 = vmatprep.subr.msk.mxu1 %vm465_vm0, %v12680_v36  ;;  %v12713_v61 = vld [vmem:[#allocation3 + $0x3a] sm:$0xff] }
 0x26a   : > { %10833 = vmatprep.subr.msk.mxu0 %vm465_vm0, %v12685_v7  ;;  %10589 = vmatmul.mubr.msk.f32.gmra.mrb[162].mxu1 %vm225_vm1, %v12697_v30 }
 0x26b   : > { %10639 = vmatmul.mubr.msk.f32.gmra.mrb[194].mxu0 %vm225_vm1, %v12387_v57  ;;  %10591 = vmatprep.mubr.msk.f32.mxu1 %vm225_vm1, %v12707_v50  ;;  %v12725_v57 = vld [vmem:[#allocation3 + $0x52] sm:$0xff] }
 0x26c   : > { %10641 = vmatprep.mubr.msk.f32.mxu0 %vm225_vm1, %v12398_v37  ;;  %v12731_v37 = vld [vmem:[#allocation3 + $0x62] sm:$0xff] }
 0x26e   : > { %10592 = vmatmul.mubr.msk.f32.gmra.mrb[164].mxu1 %vm225_vm1, %v12713_v61 }
 0x26f   : > { %10642 = vmatmul.mubr.msk.f32.gmra.mrb[196].mxu0 %vm225_vm1, %v12409_v33  ;;  %10594 = vmatprep.mubr.msk.f32.mxu1 %vm225_vm1, %v12719_v10  ;;  %v12737_v33 = vld [vmem:[#allocation3 + $0x6a] sm:$0xff] }
 0x270   : > { %10644 = vmatprep.mubr.msk.f32.mxu0 %vm225_vm1, %v12420_v44  ;;  %v12743_v44 = vld [vmem:[#allocation3 + $0x7a] sm:$0xff] }
 0x272   : > { %10595 = vmatmul.mubr.msk.f32.gmra.mrb[166].mxu1 %vm225_vm1, %v12725_v57 }
 0x273   : > { %10645 = vmatmul.mubr.msk.f32.gmra.mrb[198].mxu0 %vm225_vm1, %v12431_v3  ;;  %10597 = vmatprep.mubr.msk.f32.mxu1 %vm225_vm1, %v12731_v37  ;;  %v10487_v3 = vpop.f32.mrb[128].mxu1 }
 0x274   : > { %10647 = vmatprep.mubr.msk.f32.mxu0 %vm225_vm1, %v12442_v14  ;;  %4896 = vst.msk [vmem:[#allocation4 + $0x8] sm:$0xff] %vm225_vm1, %v10487_v3  ;;  %v4736_v2 = vpop.f32.mrb[129].mxu1  ;;  %v10537_v14 = vpop.f32.mrb[160].mxu0  ;;  %v12763_v3 = vld [vmem:[#allocation3 + $0x9a] sm:$0xff] }
 0x275   : > { %4895 = vst.msk [vmem:[#allocation4] sm:$0xff] %vm225_vm1, %v4736_v2 }
 0x276   : > { %10598 = vmatmul.mubr.msk.f32.gmra.mrb[168].mxu1 %vm225_vm1, %v12737_v33 }
 0x277   : > { %10648 = vmatmul.mubr.msk.f32.gmra.mrb[200].mxu0 %vm225_vm1, %v12453_v24  ;;  %10600 = vmatprep.mubr.msk.f32.mxu1 %vm225_vm1, %v12743_v44  ;;  %v12756_v24 = vld [vmem:[#allocation3 + $0x92] sm:$0xff] }
 0x278   : > { %10650 = vmatprep.mubr.msk.f32.mxu0 %vm225_vm1, %v12464_v8  ;;  %v5126_v8 = vpop.f32.mrb[161].mxu0 }
 0x27a   : > { %10601 = vmatmul.mubr.msk.f32.gmra.mrb[170].mxu1 %vm225_vm1, %v12749_v13 }
 0x27b   : > { %10651 = vmatmul.mubr.msk.f32.gmra.mrb[202].mxu0 %vm225_vm1, %v12475_v18  ;;  %10603 = vmatprep.mubr.msk.f32.mxu1 %vm225_vm1, %v12756_v24  ;;  %v12769_v18 = vld [vmem:[#allocation3 + $0xaa] sm:$0xff]  ;;  %v5286_v2 = vld [vmem:[#allocation4 + $0x8] sm:$0xff] }
 0x27c   : > { %10653 = vmatprep.mubr.msk.f32.mxu0 %vm225_vm1, %v12486_v45  ;;  %v5318_v45 = vadd.f32 %v10537_v14, %v5286_v2  ;;  %v5285_v38 = vld [vmem:[#allocation4] sm:$0xff]  ;;  %v12795_v2 = vld [vmem:[#allocation3 + $0xda] sm:$0xff] }
 0x27d   : > { %v5317_v1 = vadd.f32 %v5285_v38, %v5126_v8  ;;  %v12789_v14 = vld [vmem:[#allocation3 + $0xca] sm:$0xff]  ;;  %v12801_v8 = vld [vmem:[#allocation3 + $0xe2] sm:$0xff] }
 0x27e   : > { %10604 = vmatmul.mubr.msk.f32.gmra.mrb[172].mxu1 %vm225_vm1, %v12763_v3  ;;  %5350 = vst.msk [vmem:[#allocation4 + $0x8] sm:$0xff] %vm225_vm1, %v5318_v45  ;;  %v12807_v45 = vld [vmem:[#allocation3 + $0xf2] sm:$0xff]  ;;  %v12819_v38 = vld [vmem:[#allocation3 + $0x10a] sm:$0xff] }
 0x27f   : > { %10654 = vmatmul.mubr.msk.f32.gmra.mrb[204].mxu0 %vm225_vm1, %v12497_v59  ;;  %10606 = vmatprep.mubr.msk.f32.mxu1 %vm225_vm1, %v12769_v18  ;;  %v12781_v59 = vld [vmem:[#allocation3 + $0xc2] sm:$0xff]  ;;  %5349 = vst.msk [vmem:[#allocation4] sm:$0xff] %vm225_vm1, %v5317_v1  ;;  %v12813_v1 = vld [vmem:[#allocation3 + $0xfa] sm:$0xff] }
 0x280   : > { %10656 = vmatprep.mubr.msk.f32.mxu0 %vm225_vm1, %v12508_v23 }
 0x282   : > { %10607 = vmatmul.mubr.msk.f32.gmra.mrb[174].mxu1 %vm225_vm1, %v12775_v56 }
 0x283   : > { %10657 = vmatmul.mubr.msk.f32.gmra.mrb[206].mxu0 %vm225_vm1, %v12519_v54  ;;  %10609 = vmatprep.mubr.msk.f32.mxu1 %vm225_vm1, %v12781_v59 }
 0x284   : > { %10659 = vmatprep.mubr.msk.f32.mxu0 %vm225_vm1, %v12530_v63 }
 0x286   : > { %10610 = vmatmul.mubr.msk.f32.gmra.mrb[176].mxu1 %vm225_vm1, %v12789_v14 }
 0x287   : > { %10660 = vmatmul.mubr.msk.f32.gmra.mrb[208].mxu0 %vm225_vm1, %v12541_v40  ;;  %10612 = vmatprep.mubr.msk.f32.mxu1 %vm225_vm1, %v12795_v2 }
 0x288   : > { %10662 = vmatprep.mubr.msk.f32.mxu0 %vm225_vm1, %v12552_v6  ;;  %v12869_v6 = vld [vmem:[#allocation3 + $0x180] sm:$0xff] }
 0x289   : > { %13744 = vst [vmem:[#allocation24_spill] sm:$0xff] %v12869_v6 }
 0x28a   : > { %10613 = vmatmul.mubr.msk.f32.gmra.mrb[178].mxu1 %vm225_vm1, %v12801_v8 }
 0x28b   : > { %10663 = vmatmul.mubr.msk.f32.gmra.mrb[210].mxu0 %vm225_vm1, %v12563_v35  ;;  %10615 = vmatprep.mubr.msk.f32.mxu1 %vm225_vm1, %v12807_v45  ;;  %v12825_v35 = vld [vmem:[#allocation3 + $0x112] sm:$0xff] }
 0x28c   : > { %10665 = vmatprep.mubr.msk.f32.mxu0 %vm225_vm1, %v12574_v22  ;;  %v12831_v22 = vld [vmem:[#allocation3 + $0x122] sm:$0xff] }
 0x28e   : > { %10616 = vmatmul.mubr.msk.f32.gmra.mrb[180].mxu1 %vm225_vm1, %v12813_v1 }
 0x28f   : > { %10666 = vmatmul.mubr.msk.f32.gmra.mrb[212].mxu0 %vm225_vm1, %v12585_v62  ;;  %10618 = vmatprep.mubr.msk.f32.mxu1 %vm225_vm1, %v12819_v38  ;;  %v12837_v62 = vld [vmem:[#allocation3 + $0x12a] sm:$0xff] }
 0x290   : > { %10668 = vmatprep.mubr.msk.f32.mxu0 %vm225_vm1, %v12595_v34  ;;  %v12843_v34 = vld [vmem:[#allocation3 + $0x13a] sm:$0xff] }
 0x292   : > { %10619 = vmatmul.mubr.msk.f32.gmra.mrb[182].mxu1 %vm225_vm1, %v12825_v35 }
 0x293   : > { %10669 = vmatmul.mubr.msk.f32.gmra.mrb[214].mxu0 %vm225_vm1, %v12605_v32  ;;  %10621 = vmatprep.mubr.msk.f32.mxu1 %vm225_vm1, %v12831_v22  ;;  %v12849_v32 = vld [vmem:[#allocation3 + $0x142] sm:$0xff] }
 0x294   : > { %10671 = vmatprep.mubr.msk.f32.mxu0 %vm225_vm1, %v12615_v21  ;;  %v12855_v21 = vld [vmem:[#allocation3 + $0x152] sm:$0xff] }
 0x296   : > { %10622 = vmatmul.mubr.msk.f32.gmra.mrb[184].mxu1 %vm225_vm1, %v12837_v62 }
 0x297   : > { %10672 = vmatmul.mubr.msk.f32.gmra.mrb[216].mxu0 %vm225_vm1, %v12625_v4  ;;  %10624 = vmatprep.mubr.msk.f32.mxu1 %vm225_vm1, %v12843_v34  ;;  %v12861_v4 = vld [vmem:[#allocation3 + $0x15a] sm:$0xff] }
 0x298   : > { %10674 = vmatprep.mubr.msk.f32.mxu0 %vm225_vm1, %v12635_v48  ;;  %v12867_v48 = vld [vmem:[#allocation3 + $0x16a] sm:$0xff] }
 0x29a   : > { %10625 = vmatmul.mubr.msk.f32.gmra.mrb[186].mxu1 %vm225_vm1, %v12849_v32 }
 0x29b   : > { %10675 = vmatmul.mubr.msk.f32.gmra.mrb[218].mxu0 %vm225_vm1, %v12639_v16  ;;  %10627 = vmatprep.mubr.msk.f32.mxu1 %vm225_vm1, %v12855_v21  ;;  %v12875_v16 = vld [vmem:[#allocation3 + $0x172] sm:$0xff] }
 0x29c   : > { %10677 = vmatprep.mubr.msk.f32.mxu0 %vm225_vm1, %v12653_v41  ;;  %v12877_v41 = vld [vmem:[#allocation3 + $0x188] sm:$0xff] }
 0x29e   : > { %10628 = vmatmul.mubr.msk.f32.gmra.mrb[188].mxu1 %vm225_vm1, %v12861_v4 }
 0x29f   : > { %10678 = vmatmul.mubr.msk.f32.gmra.mrb[220].mxu0 %vm225_vm1, %v12657_v51  ;;  %10630 = vmatprep.mubr.msk.f32.mxu1 %vm225_vm1, %v12867_v48 }
 0x2a0   : > { %10680 = vmatprep.mubr.msk.f32.mxu0 %vm225_vm1, %v12869_v6  ;;  %v12894_v6 = vld [vmem:[%s13600_s3 + $0x20] sm:$0xf] }
 0x2a2   : > { %10631 = vmatmul.mubr.msk.f32.gmra.mrb[190].mxu1 %vm225_vm1, %v12875_v16 }
 0x2a3   : > { %10681 = vmatmul.mubr.msk.f32.gmra.mrb[222].mxu0 %vm225_vm1, %v12877_v41  ;;  %10685 = vmatprep.mubr.msk.f32.mxu1 %vm225_vm1, %v12356_v9  ;;  %v13745_v9 = vld [vmem:[#allocation16_spill] sm:$0xff] }
 0x2a4   : > { %10735 = vmatprep.mubr.msk.f32.mxu0 %vm225_vm1, %v12675_v29  ;;  %v13753_v29 = vld [vmem:[#allocation5_spill] sm:$0xff] }
 0x2a6   : > { %10686 = vmatmul.mubr.msk.f32.vlgmr.msra.gmra.mrb[192].mxu1 %vm225_vm1, %v12367_v19  ;;  %v13746_v19 = vld [vmem:[#allocation18_spill] sm:$0xff] }
 0x2a7   : > { %10736 = vmatmul.mubr.msk.f32.vlgmr.msra.gmra.mrb[224].mxu0 %vm225_vm1, %v12697_v30  ;;  %10784 = vmatpush3.msk.msra.mxu1 %vm465_vm0, %v12680_v36  ;;  %v13751_v36 = vld [vmem:[#allocation31_spill] sm:$0xff]  ;;  %v13754_v30 = vld [vmem:[#allocation6_spill] sm:$0xff] }
 0x2a8   : > { %10688 = vmatprep.mubr.msk.f32.mxu1 %vm225_vm1, %v12378_v11  ;;  %10738 = vmatprep.mubr.msk.f32.mxu0 %vm225_vm1, %v12707_v50  ;;  %v13747_v11 = vld [vmem:[#allocation20_spill] sm:$0xff] }
 0x2a9   : > { %10834 = vmatpush3.msk.msra.mxu0 %vm465_vm0, %v12685_v7  ;;  %10883 = vmatprep.subr.msk.mxu1 %vm465_vm0, %v12894_v6  ;;  %v13752_v7 = vld [vmem:[#allocation33_spill] sm:$0xff] }
 0x2aa   : > { %10689 = vmatmul.mubr.msk.f32.gmra.mrb[194].mxu1 %vm225_vm1, %v12389_v60  ;;  %v13748_v60 = vld [vmem:[#allocation22_spill] sm:$0xff] }
 0x2ab   : > { %10739 = vmatmul.mubr.msk.f32.gmra.mrb[226].mxu0 %vm225_vm1, %v12713_v61  ;;  %10691 = vmatprep.mubr.msk.f32.mxu1 %vm225_vm1, %v12400_v46  ;;  %v13749_v46 = vld [vmem:[#allocation23_spill] sm:$0xff] }
 0x2ac   : > { %10741 = vmatprep.mubr.msk.f32.mxu0 %vm225_vm1, %v12719_v10 }
 0x2ae   : > { %10692 = vmatmul.mubr.msk.f32.gmra.mrb[196].mxu1 %vm225_vm1, %v12411_v53  ;;  %v13014_v53 = vld [vmem:[#allocation3 + $0x181] sm:$0xff] }
 0x2af   : > { %10742 = vmatmul.mubr.msk.f32.gmra.mrb[228].mxu0 %vm225_vm1, %v12725_v57  ;;  %10694 = vmatprep.mubr.msk.f32.mxu1 %vm225_vm1, %v12422_v47  ;;  %v6773_v47 = vld [vmem:[#allocation3 + $0x182] sm:$0xff] }
 0x2b0   : > { %10744 = vmatprep.mubr.msk.f32.mxu0 %vm225_vm1, %v12731_v37  ;;  %v13757_v37 = vld [vmem:[#allocation9_spill] sm:$0xff] }
 0x2b2   : > { %10695 = vmatmul.mubr.msk.f32.gmra.mrb[198].mxu1 %vm225_vm1, %v12433_v25  ;;  %v13019_v25 = vld [vmem:[#allocation3 + $0x189] sm:$0xff] }
 0x2b3   : > { %10745 = vmatmul.mubr.msk.f32.gmra.mrb[230].mxu0 %vm225_vm1, %v12737_v33  ;;  %10697 = vmatprep.mubr.msk.f32.mxu1 %vm225_vm1, %v12444_v5  ;;  %v13758_v33 = vld [vmem:[#allocation10_spill] sm:$0xff] }
 0x2b4   : > { %10747 = vmatprep.mubr.msk.f32.mxu0 %vm225_vm1, %v12743_v44 }
 0x2b6   : > { %10698 = vmatmul.mubr.msk.f32.gmra.mrb[200].mxu1 %vm225_vm1, %v12455_v27 }
 0x2b7   : > { %10748 = vmatmul.mubr.msk.f32.gmra.mrb[232].mxu0 %vm225_vm1, %v12749_v13  ;;  %10700 = vmatprep.mubr.msk.f32.mxu1 %vm225_vm1, %v12466_v49 }
 0x2b8   : > { %10750 = vmatprep.mubr.msk.f32.mxu0 %vm225_vm1, %v12756_v24  ;;  %v6774_v24 = vld [vmem:[#allocation3 + $0x18a] sm:$0xff] }
 0x2ba   : > { %10701 = vmatmul.mubr.msk.f32.gmra.mrb[202].mxu1 %vm225_vm1, %v12477_v55 }
 0x2bb   : > { %10751 = vmatmul.mubr.msk.f32.gmra.mrb[234].mxu0 %vm225_vm1, %v12763_v3  ;;  %10703 = vmatprep.mubr.msk.f32.mxu1 %vm225_vm1, %v12488_v43 }
 0x2bc   : > { %10753 = vmatprep.mubr.msk.f32.mxu0 %vm225_vm1, %v12769_v18  ;;  %v7198_v18 = vld [vmem:[#allocation3 + $0x30] sm:$0xff] }
 0x2be   : > { %10704 = vmatmul.mubr.msk.f32.gmra.mrb[204].mxu1 %vm225_vm1, %v12499_v26 }
 0x2bf   : > { %10754 = vmatmul.mubr.msk.f32.gmra.mrb[236].mxu0 %vm225_vm1, %v12775_v56  ;;  %10706 = vmatprep.mubr.msk.f32.mxu1 %vm225_vm1, %v12510_v52  ;;  %v7657_v56 = vld [vmem:[#allocation3 + $0x69] sm:$0xff] }
 0x2c0   : > { %10756 = vmatprep.mubr.msk.f32.mxu0 %vm225_vm1, %v12781_v59  ;;  %v7652_v59 = vld [vmem:[#allocation3 + $0x31] sm:$0xff] }
 0x2c2   : > { %10707 = vmatmul.mubr.msk.f32.gmra.mrb[206].mxu1 %vm225_vm1, %v12521_v58 }
 0x2c3   : > { %10757 = vmatmul.mubr.msk.f32.gmra.mrb[238].mxu0 %vm225_vm1, %v12789_v14  ;;  %10709 = vmatprep.mubr.msk.f32.mxu1 %vm225_vm1, %v12532_v42 }
 0x2c4   : > { %10759 = vmatprep.mubr.msk.f32.mxu0 %vm225_vm1, %v12795_v2 }
 0x2c6   : > { %10710 = vmatmul.mubr.msk.f32.gmra.mrb[208].mxu1 %vm225_vm1, %v12543_v31 }
 0x2c7   : > { %10760 = vmatmul.mubr.msk.f32.gmra.mrb[240].mxu0 %vm225_vm1, %v12801_v8  ;;  %10712 = vmatprep.mubr.msk.f32.mxu1 %vm225_vm1, %v12554_v20  ;;  %v13759_v8 = vld [vmem:[#allocation11_spill] sm:$0xff] }
 0x2c8   : > { %10762 = vmatprep.mubr.msk.f32.mxu0 %vm225_vm1, %v12807_v45  ;;  %v13760_v45 = vld [vmem:[#allocation12_spill] sm:$0xff] }
 0x2ca   : > { %10713 = vmatmul.mubr.msk.f32.gmra.mrb[210].mxu1 %vm225_vm1, %v12565_v17 }
 0x2cb   : > { %10763 = vmatmul.mubr.msk.f32.gmra.mrb[242].mxu0 %vm225_vm1, %v12813_v1  ;;  %10715 = vmatprep.mubr.msk.f32.mxu1 %vm225_vm1, %v12576_v0 }
 0x2cc   : > { %10765 = vmatprep.mubr.msk.f32.mxu0 %vm225_vm1, %v12819_v38 }
 0x2ce   : > { %10716 = vmatmul.mubr.msk.f32.gmra.mrb[212].mxu1 %vm225_vm1, %v12587_v12 }
 0x2cf   : > { %10766 = vmatmul.mubr.msk.f32.gmra.mrb[244].mxu0 %vm225_vm1, %v12825_v35  ;;  %10718 = vmatprep.mubr.msk.f32.mxu1 %vm225_vm1, %v12597_v28  ;;  %v7199_v35 = vld [vmem:[#allocation3 + $0x38] sm:$0xff] }
 0x2d0   : > { %10768 = vmatprep.mubr.msk.f32.mxu0 %vm225_vm1, %v12831_v22  ;;  %v7653_v22 = vld [vmem:[#allocation3 + $0x39] sm:$0xff] }
 0x2d2   : > { %10719 = vmatmul.mubr.msk.f32.gmra.mrb[214].mxu1 %vm225_vm1, %v12607_v15 }
 0x2d3   : > { %10769 = vmatmul.mubr.msk.f32.gmra.mrb[246].mxu0 %vm225_vm1, %v12837_v62  ;;  %10721 = vmatprep.mubr.msk.f32.mxu1 %vm225_vm1, %v12617_v39  ;;  %v7200_v62 = vld [vmem:[#allocation3 + $0x48] sm:$0xff] }
 0x2d4   : > { %10771 = vmatprep.mubr.msk.f32.mxu0 %vm225_vm1, %v12843_v34  ;;  %v7654_v34 = vld [vmem:[#allocation3 + $0x49] sm:$0xff] }
 0x2d6   : > { %10722 = vmatmul.mubr.msk.f32.gmra.mrb[216].mxu1 %vm225_vm1, %v13745_v9 }
 0x2d7   : > { %10772 = vmatmul.mubr.msk.f32.gmra.mrb[248].mxu0 %vm225_vm1, %v12849_v32  ;;  %10724 = vmatprep.mubr.msk.f32.mxu1 %vm225_vm1, %v13746_v19  ;;  %v7201_v32 = vld [vmem:[#allocation3 + $0x50] sm:$0xff] }
 0x2d8   : > { %10774 = vmatprep.mubr.msk.f32.mxu0 %vm225_vm1, %v12855_v21  ;;  %v7655_v21 = vld [vmem:[#allocation3 + $0x51] sm:$0xff] }
 0x2da   : > { %10725 = vmatmul.mubr.msk.f32.gmra.mrb[218].mxu1 %vm225_vm1, %v13747_v11 }
 0x2db   : > { %10775 = vmatmul.mubr.msk.f32.gmra.mrb[250].mxu0 %vm225_vm1, %v12861_v4  ;;  %10727 = vmatprep.mubr.msk.f32.mxu1 %vm225_vm1, %v13748_v60  ;;  %v7202_v4 = vld [vmem:[#allocation3 + $0x60] sm:$0xff] }
 0x2dc   : > { %10777 = vmatprep.mubr.msk.f32.mxu0 %vm225_vm1, %v12867_v48  ;;  %v7656_v48 = vld [vmem:[#allocation3 + $0x61] sm:$0xff] }
 0x2de   : > { %10728 = vmatmul.mubr.msk.f32.gmra.mrb[220].mxu1 %vm225_vm1, %v13749_v46 }
 0x2df   : > { %10778 = vmatmul.mubr.msk.f32.gmra.mrb[252].mxu0 %vm225_vm1, %v12875_v16  ;;  %10730 = vmatprep.mubr.msk.f32.mxu1 %vm225_vm1, %v13014_v53  ;;  %v7203_v16 = vld [vmem:[#allocation3 + $0x68] sm:$0xff] }
 0x2e0   : > { %10780 = vmatprep.mubr.msk.f32.mxu0 %vm225_vm1, %v6773_v47 }
 0x2e2   : > { %10731 = vmatmul.mubr.msk.f32.gmra.mrb[222].mxu1 %vm225_vm1, %v13019_v25 }
 0x2e3   : > { %10781 = vmatmul.mubr.msk.f32.gmra.mrb[254].mxu0 %vm225_vm1, %v6774_v24  ;;  %10785 = vmatprep.mubr.msk.f32.mxu1 %vm225_vm1, %v7198_v18 }
 0x2e4   : > { %10835 = vmatprep.mubr.msk.f32.mxu0 %vm225_vm1, %v7652_v59 }
 0x2e6   : > { %10786 = vmatmul.mubr.msk.f32.vlgmr.msra.gmra.mrb[224].mxu1 %vm225_vm1, %v7199_v35  ;;  %v13761_v35 = vld [vmem:[#allocation13_spill] sm:$0xff] }
 0x2e7   : > { %10836 = vmatmul.mubr.msk.f32.vlgmr.msra.gmra.mrb[0].mxu0 %vm225_vm1, %v7653_v22  ;;  %10884 = vmatpush3.msk.msra.mxu1 %vm465_vm0, %v12894_v6  ;;  %v13750_v6 = vld [vmem:[#allocation29_spill] sm:$0xff]  ;;  %v13762_v22 = vld [vmem:[#allocation14_spill] sm:$0xff] }
 0x2e8   : > { %10788 = vmatprep.mubr.msk.f32.mxu1 %vm225_vm1, %v7200_v62  ;;  %10838 = vmatprep.mubr.msk.f32.mxu0 %vm225_vm1, %v7654_v34 }
 0x2ea   : > { %10789 = vmatmul.mubr.msk.f32.gmra.mrb[226].mxu1 %vm225_vm1, %v7201_v32 }
 0x2eb   : > { %10839 = vmatmul.mubr.msk.f32.gmra.mrb[2].mxu0 %vm225_vm1, %v7655_v21  ;;  %10791 = vmatprep.mubr.msk.f32.mxu1 %vm225_vm1, %v7202_v4 }
 0x2ec   : > { %10841 = vmatprep.mubr.msk.f32.mxu0 %vm225_vm1, %v7656_v48 }
 0x2ee   : > { %10792 = vmatmul.mubr.msk.f32.gmra.mrb[228].mxu1 %vm225_vm1, %v7203_v16  ;;  %v13763_v16 = vld [vmem:[#allocation15_spill] sm:$0xff] }
 0x2ef   : > { %10842 = vmatmul.mubr.msk.f32.gmra.mrb[4].mxu0 %vm225_vm1, %v7657_v56  ;;  %10794 = vmatprep.mubr.msk.f32.mxu1 %vm225_vm1, %v13750_v6  ;;  %v13764_v56 = vld [vmem:[#allocation17_spill] sm:$0xff] }
 0x2f0   : > { %10844 = vmatprep.mubr.msk.f32.mxu0 %vm225_vm1, %v12444_v5  ;;  %v13755_v5 = vld [vmem:[#allocation7_spill] sm:$0xff] }
 0x2f2   : > { %10795 = vmatmul.mubr.msk.f32.gmra.mrb[230].mxu1 %vm225_vm1, %v13751_v36 }
 0x2f3   : > { %10845 = vmatmul.mubr.msk.f32.gmra.mrb[6].mxu0 %vm225_vm1, %v12455_v27  ;;  %10797 = vmatprep.mubr.msk.f32.mxu1 %vm225_vm1, %v13752_v7 }
 0x2f4   : > { %10847 = vmatprep.mubr.msk.f32.mxu0 %vm225_vm1, %v12466_v49 }
 0x2f6   : > { %10798 = vmatmul.mubr.msk.f32.gmra.mrb[232].mxu1 %vm225_vm1, %v13753_v29 }
 0x2f7   : > { %10848 = vmatmul.mubr.msk.f32.gmra.mrb[8].mxu0 %vm225_vm1, %v12477_v55  ;;  %10800 = vmatprep.mubr.msk.f32.mxu1 %vm225_vm1, %v13754_v30 }
 0x2f8   : > { %10850 = vmatprep.mubr.msk.f32.mxu0 %vm225_vm1, %v12488_v43 }
 0x2fa   : > { %10801 = vmatmul.mubr.msk.f32.gmra.mrb[234].mxu1 %vm225_vm1, %v13755_v5 }
 0x2fb   : > { %10851 = vmatmul.mubr.msk.f32.gmra.mrb[10].mxu0 %vm225_vm1, %v12499_v26  ;;  %10803 = vmatprep.mubr.msk.f32.mxu1 %vm225_vm1, %v12508_v23 }
 0x2fc   : > { %10853 = vmatprep.mubr.msk.f32.mxu0 %vm225_vm1, %v12510_v52 }
 0x2fd   : > { %v10490_v27 = vpop.f32.mrb[130].mxu1  ;;  %v10540_v49 = vpop.f32.mrb[162].mxu0 }
 0x2fe   : > { %4898 = vst.msk [vmem:[#allocation4 + $0x18] sm:$0xff] %vm225_vm1, %v10490_v27  ;;  %v4746_v55 = vpop.f32.mrb[131].mxu1  ;;  %v5136_v50 = vpop.f32.mrb[163].mxu0  ;;  %10804 = vmatmul.mubr.msk.f32.gmra.mrb[236].mxu1 %vm225_vm1, %v12519_v54  ;;  %v13756_v54 = vld [vmem:[#allocation8_spill] sm:$0xff]  ;;  %v13765_v27 = vld [vmem:[#allocation19_spill] sm:$0xff] }
 0x2ff   : > { %10854 = vmatmul.mubr.msk.f32.gmra.mrb[12].mxu0 %vm225_vm1, %v12521_v58  ;;  %4897 = vst.msk [vmem:[#allocation4 + $0x10] sm:$0xff] %vm225_vm1, %v4746_v55  ;;  %10806 = vmatprep.mubr.msk.f32.mxu1 %vm225_vm1, %v12530_v63 }
 0x300   : > { %10856 = vmatprep.mubr.msk.f32.mxu0 %vm225_vm1, %v12532_v42 }
 0x301   : > { %v10493_v43 = vpop.f32.mrb[132].mxu1 }
 0x302   : > { %v10543_v26 = vpop.f32.mrb[164].mxu0  ;;  %4900 = vst.msk [vmem:[#allocation4 + $0x28] sm:$0xff] %vm225_vm1, %v10493_v43  ;;  %v4756_v23 = vpop.f32.mrb[133].mxu1  ;;  %10807 = vmatmul.mubr.msk.f32.gmra.mrb[238].mxu1 %vm225_vm1, %v12541_v40 }
 0x303   : > { %v5146_v52 = vpop.f32.mrb[165].mxu0  ;;  %10857 = vmatmul.mubr.msk.f32.gmra.mrb[14].mxu0 %vm225_vm1, %v12543_v31  ;;  %4899 = vst.msk [vmem:[#allocation4 + $0x20] sm:$0xff] %vm225_vm1, %v4756_v23  ;;  %10809 = vmatprep.mubr.msk.f32.mxu1 %vm225_vm1, %v13756_v54  ;;  %v13767_v54 = vld [vmem:[#allocation24_spill] sm:$0xff] }
 0x304   : > { %10859 = vmatprep.mubr.msk.f32.mxu0 %vm225_vm1, %v12554_v20 }
 0x305   : > { %v5288_v58 = vld [vmem:[#allocation4 + $0x18] sm:$0xff]  ;;  %v10496_v63 = vpop.f32.mrb[134].mxu1 }
 0x306   : > { %v10546_v42 = vpop.f32.mrb[166].mxu0  ;;  %v5320_v61 = vadd.f32 %v10540_v49, %v5288_v58  ;;  %v5287_v10 = vld [vmem:[#allocation4 + $0x10] sm:$0xff]  ;;  %4902 = vst.msk [vmem:[#allocation4 + $0x38] sm:$0xff] %vm225_vm1, %v10496_v63  ;;  %v4766_v57 = vpop.f32.mrb[135].mxu1  ;;  %10810 = vmatmul.mubr.msk.f32.gmra.mrb[240].mxu1 %vm225_vm1, %v13757_v37  ;;  %v13766_v49 = vld [vmem:[#allocation21_spill] sm:$0xff]  ;;  %v7228_v58 = vld [vmem:[#allocation3 + $0x198] sm:$0xff] }
 0x307   : > { %v5156_v40 = vpop.f32.mrb[167].mxu0  ;;  %10860 = vmatmul.mubr.msk.f32.gmra.mrb[16].mxu0 %vm225_vm1, %v12565_v17  ;;  %v5319_v31 = vadd.f32 %v5287_v10, %v5136_v50  ;;  %4901 = vst.msk [vmem:[#allocation4 + $0x30] sm:$0xff] %vm225_vm1, %v4766_v57  ;;  %10812 = vmatprep.mubr.msk.f32.mxu1 %vm225_vm1, %v13758_v33  ;;  %v7682_v63 = vld [vmem:[#allocation3 + $0x199] sm:$0xff] }
 0x308   : > { %10862 = vmatprep.mubr.msk.f32.mxu0 %vm225_vm1, %v12576_v0  ;;  %5352 = vst.msk [vmem:[#allocation4 + $0x18] sm:$0xff] %vm225_vm1, %v5320_v61  ;;  %v7229_v37 = vld [vmem:[#allocation3 + $0x1a0] sm:$0xff] }
 0x309   : > { %5351 = vst.msk [vmem:[#allocation4 + $0x10] sm:$0xff] %vm225_vm1, %v5319_v31  ;;  %v5290_v20 = vld [vmem:[#allocation4 + $0x28] sm:$0xff]  ;;  %v10499_v44 = vpop.f32.mrb[136].mxu1  ;;  %v7683_v31 = vld [vmem:[#allocation3 + $0x1a1] sm:$0xff] }
 0x30a   : > { %v10549_v13 = vpop.f32.mrb[168].mxu0  ;;  %v5322_v3 = vadd.f32 %v10543_v26, %v5290_v20  ;;  %v5289_v14 = vld [vmem:[#allocation4 + $0x20] sm:$0xff]  ;;  %4904 = vst.msk [vmem:[#allocation4 + $0x48] sm:$0xff] %vm225_vm1, %v10499_v44  ;;  %v4776_v17 = vpop.f32.mrb[137].mxu1  ;;  %10813 = vmatmul.mubr.msk.f32.gmra.mrb[242].mxu1 %vm225_vm1, %v13759_v8 }
 0x30b   : > { %v5166_v2 = vpop.f32.mrb[169].mxu0  ;;  %10863 = vmatmul.mubr.msk.f32.gmra.mrb[18].mxu0 %vm225_vm1, %v12587_v12  ;;  %v5321_v0 = vadd.f32 %v5289_v14, %v5146_v52  ;;  %4903 = vst.msk [vmem:[#allocation4 + $0x40] sm:$0xff] %vm225_vm1, %v4776_v17  ;;  %10815 = vmatprep.mubr.msk.f32.mxu1 %vm225_vm1, %v13760_v45  ;;  %v8106_v14 = vld [vmem:[#allocation3 + $0x32] sm:$0xff]  ;;  %v8107_v45 = vld [vmem:[#allocation3 + $0x3a] sm:$0xff] }
 0x30c   : > { %10865 = vmatprep.mubr.msk.f32.mxu0 %vm225_vm1, %v12597_v28  ;;  %5354 = vst.msk [vmem:[#allocation4 + $0x28] sm:$0xff] %vm225_vm1, %v5322_v3 }
 0x30d   : > { %5353 = vst.msk [vmem:[#allocation4 + $0x20] sm:$0xff] %vm225_vm1, %v5321_v0  ;;  %v5292_v1 = vld [vmem:[#allocation4 + $0x38] sm:$0xff]  ;;  %v10502_v38 = vpop.f32.mrb[138].mxu1 }
 0x30e   : > { %v10552_v47 = vpop.f32.mrb[170].mxu0  ;;  %v5324_v24 = vadd.f32 %v10546_v42, %v5292_v1  ;;  %v5291_v18 = vld [vmem:[#allocation4 + $0x30] sm:$0xff]  ;;  %4906 = vst.msk [vmem:[#allocation4 + $0x58] sm:$0xff] %vm225_vm1, %v10502_v38  ;;  %v4786_v12 = vpop.f32.mrb[139].mxu1  ;;  %10816 = vmatmul.mubr.msk.f32.gmra.mrb[244].mxu1 %vm225_vm1, %v13761_v35 }
 0x30f   : > { %v5176_v59 = vpop.f32.mrb[171].mxu0  ;;  %10866 = vmatmul.mubr.msk.f32.gmra.mrb[20].mxu0 %vm225_vm1, %v12607_v15  ;;  %v5323_v28 = vadd.f32 %v5291_v18, %v5156_v40  ;;  %4905 = vst.msk [vmem:[#allocation4 + $0x50] sm:$0xff] %vm225_vm1, %v4786_v12  ;;  %10818 = vmatprep.mubr.msk.f32.mxu1 %vm225_vm1, %v13762_v22  ;;  %v8108_v18 = vld [vmem:[#allocation3 + $0x4a] sm:$0xff]  ;;  %v8109_v22 = vld [vmem:[#allocation3 + $0x52] sm:$0xff] }
 0x310   : > { %10868 = vmatprep.mubr.msk.f32.mxu0 %vm225_vm1, %v12617_v39  ;;  %5356 = vst.msk [vmem:[#allocation4 + $0x38] sm:$0xff] %vm225_vm1, %v5324_v24 }
 0x311   : > { %5355 = vst.msk [vmem:[#allocation4 + $0x30] sm:$0xff] %vm225_vm1, %v5323_v28  ;;  %v5294_v62 = vld [vmem:[#allocation4 + $0x48] sm:$0xff]  ;;  %v10505_v34 = vpop.f32.mrb[140].mxu1 }
 0x312   : > { %v10555_v32 = vpop.f32.mrb[172].mxu0  ;;  %v5326_v21 = vadd.f32 %v10549_v13, %v5294_v62  ;;  %v5293_v4 = vld [vmem:[#allocation4 + $0x40] sm:$0xff]  ;;  %4908 = vst.msk [vmem:[#allocation4 + $0x68] sm:$0xff] %vm225_vm1, %v10505_v34  ;;  %v4796_v15 = vpop.f32.mrb[141].mxu1  ;;  %10819 = vmatmul.mubr.msk.f32.gmra.mrb[246].mxu1 %vm225_vm1, %v13763_v16 }
 0x313   : > { %v5186_v48 = vpop.f32.mrb[173].mxu0  ;;  %10869 = vmatmul.mubr.msk.f32.gmra.mrb[22].mxu0 %vm225_vm1, %v13745_v9  ;;  %v5325_v39 = vadd.f32 %v5293_v4, %v5166_v2  ;;  %4907 = vst.msk [vmem:[#allocation4 + $0x60] sm:$0xff] %vm225_vm1, %v4796_v15  ;;  %10821 = vmatprep.mubr.msk.f32.mxu1 %vm225_vm1, %v13764_v56  ;;  %v8110_v4 = vld [vmem:[#allocation3 + $0x62] sm:$0xff]  ;;  %v8111_v56 = vld [vmem:[#allocation3 + $0x6a] sm:$0xff] }
 0x314   : > { %10871 = vmatprep.mubr.msk.f32.mxu0 %vm225_vm1, %v13746_v19  ;;  %5358 = vst.msk [vmem:[#allocation4 + $0x48] sm:$0xff] %vm225_vm1, %v5326_v21 }
 0x315   : > { %5357 = vst.msk [vmem:[#allocation4 + $0x40] sm:$0xff] %vm225_vm1, %v5325_v39  ;;  %v5296_v6 = vld [vmem:[#allocation4 + $0x58] sm:$0xff]  ;;  %v10508_v36 = vpop.f32.mrb[142].mxu1 }
 0x316   : > { %v10558_v7 = vpop.f32.mrb[174].mxu0  ;;  %v5328_v29 = vadd.f32 %v10552_v47, %v5296_v6  ;;  %v5295_v30 = vld [vmem:[#allocation4 + $0x50] sm:$0xff]  ;;  %4910 = vst.msk [vmem:[#allocation4 + $0x78] sm:$0xff] %vm225_vm1, %v10508_v36  ;;  %v4806_v9 = vpop.f32.mrb[143].mxu1  ;;  %10822 = vmatmul.mubr.msk.f32.gmra.mrb[248].mxu1 %vm225_vm1, %v13765_v27 }
 0x317   : > { %v5196_v5 = vpop.f32.mrb[175].mxu0  ;;  %10872 = vmatmul.mubr.msk.f32.gmra.mrb[24].mxu0 %vm225_vm1, %v13747_v11  ;;  %v5327_v19 = vadd.f32 %v5295_v30, %v5176_v59  ;;  %4909 = vst.msk [vmem:[#allocation4 + $0x70] sm:$0xff] %vm225_vm1, %v4806_v9  ;;  %10824 = vmatprep.mubr.msk.f32.mxu1 %vm225_vm1, %v13766_v49  ;;  %v8112_v30 = vld [vmem:[#allocation3 + $0x7a] sm:$0xff]  ;;  %v8113_v49 = vld [vmem:[#allocation3 + $0x82] sm:$0xff] }
 0x318   : > { %10874 = vmatprep.mubr.msk.f32.mxu0 %vm225_vm1, %v13748_v60  ;;  %5360 = vst.msk [vmem:[#allocation4 + $0x58] sm:$0xff] %vm225_vm1, %v5328_v29 }
 0x319   : > { %5359 = vst.msk [vmem:[#allocation4 + $0x50] sm:$0xff] %vm225_vm1, %v5327_v19  ;;  %v5298_v55 = vld [vmem:[#allocation4 + $0x68] sm:$0xff]  ;;  %v10511_v50 = vpop.f32.mrb[144].mxu1 }
 0x31a   : > { %v10561_v43 = vpop.f32.mrb[176].mxu0  ;;  %v5330_v26 = vadd.f32 %v10555_v32, %v5298_v55  ;;  %v5297_v23 = vld [vmem:[#allocation4 + $0x60] sm:$0xff]  ;;  %4912 = vst.msk [vmem:[#allocation4 + $0x88] sm:$0xff] %vm225_vm1, %v10511_v50  ;;  %v4816_v11 = vpop.f32.mrb[145].mxu1  ;;  %10825 = vmatmul.mubr.msk.f32.gmra.mrb[250].mxu1 %vm225_vm1, %v12657_v51 }
 0x31b   : > { %v5206_v52 = vpop.f32.mrb[177].mxu0  ;;  %10875 = vmatmul.mubr.msk.f32.gmra.mrb[26].mxu0 %vm225_vm1, %v13749_v46  ;;  %v5329_v60 = vadd.f32 %v5297_v23, %v5186_v48  ;;  %4911 = vst.msk [vmem:[#allocation4 + $0x80] sm:$0xff] %vm225_vm1, %v4816_v11  ;;  %10827 = vmatprep.mubr.msk.f32.mxu1 %vm225_vm1, %v13767_v54  ;;  %v8114_v23 = vld [vmem:[#allocation3 + $0x92] sm:$0xff] }
 0x31c   : > { %10877 = vmatprep.mubr.msk.f32.mxu0 %vm225_vm1, %v13014_v53  ;;  %5362 = vst.msk [vmem:[#allocation4 + $0x68] sm:$0xff] %vm225_vm1, %v5330_v26 }
 0x31d   : > { %5361 = vst.msk [vmem:[#allocation4 + $0x60] sm:$0xff] %vm225_vm1, %v5329_v60  ;;  %v5300_v42 = vld [vmem:[#allocation4 + $0x78] sm:$0xff]  ;;  %v10514_v51 = vpop.f32.mrb[146].mxu1 }
 0x31e   : > { %v10564_v61 = vpop.f32.mrb[178].mxu0  ;;  %v5332_v10 = vadd.f32 %v10558_v7, %v5300_v42  ;;  %v5299_v46 = vld [vmem:[#allocation4 + $0x70] sm:$0xff]  ;;  %4914 = vst.msk [vmem:[#allocation4 + $0x98] sm:$0xff] %vm225_vm1, %v10514_v51  ;;  %v4826_v57 = vpop.f32.mrb[147].mxu1  ;;  %10828 = vmatmul.mubr.msk.f32.gmra.mrb[252].mxu1 %vm225_vm1, %v12877_v41 }
 0x31f   : > { %v5216_v40 = vpop.f32.mrb[179].mxu0  ;;  %10878 = vmatmul.mubr.msk.f32.gmra.mrb[28].mxu0 %vm225_vm1, %v13019_v25  ;;  %v5331_v53 = vadd.f32 %v5299_v46, %v5196_v5  ;;  %4913 = vst.msk [vmem:[#allocation4 + $0x90] sm:$0xff] %vm225_vm1, %v4826_v57  ;;  %10830 = vmatprep.mubr.msk.f32.mxu1 %vm225_vm1, %v7228_v58  ;;  %v8115_v58 = vld [vmem:[#allocation3 + $0x9a] sm:$0xff] }
 0x320   : > { %10880 = vmatprep.mubr.msk.f32.mxu0 %vm225_vm1, %v7682_v63  ;;  %5364 = vst.msk [vmem:[#allocation4 + $0x78] sm:$0xff] %vm225_vm1, %v5332_v10  ;;  %v8116_v10 = vld [vmem:[#allocation3 + $0xaa] sm:$0xff] }
 0x321   : > { %5363 = vst.msk [vmem:[#allocation4 + $0x70] sm:$0xff] %vm225_vm1, %v5331_v53  ;;  %v5302_v33 = vld [vmem:[#allocation4 + $0x88] sm:$0xff]  ;;  %v10517_v20 = vpop.f32.mrb[148].mxu1 }
 0x322   : > { %v10567_v44 = vpop.f32.mrb[180].mxu0  ;;  %v5334_v41 = vadd.f32 %v10561_v43, %v5302_v33  ;;  %v5301_v13 = vld [vmem:[#allocation4 + $0x80] sm:$0xff]  ;;  %4916 = vst.msk [vmem:[#allocation4 + $0xa8] sm:$0xff] %vm225_vm1, %v10517_v20  ;;  %v4836_v25 = vpop.f32.mrb[149].mxu1  ;;  %10831 = vmatmul.mubr.msk.f32.gmra.mrb[254].mxu1 %vm225_vm1, %v7229_v37  ;;  %v5740_v53 = vld [vmem:[#allocation4 + $0x8] sm:$0xff] }
 0x323   : > { %v5226_v3 = vpop.f32.mrb[181].mxu0  ;;  %10881 = vmatmul.mubr.msk.f32.gmra.mrb[30].mxu0 %vm225_vm1, %v7683_v31  ;;  %v5333_v17 = vadd.f32 %v5301_v13, %v5206_v52  ;;  %4915 = vst.msk [vmem:[#allocation4 + $0xa0] sm:$0xff] %vm225_vm1, %v4836_v25  ;;  %10885 = vmatprep.mubr.msk.f32.mxu1 %vm225_vm1, %v8106_v14  ;;  %v8117_v31 = vld [vmem:[#allocation3 + $0xb2] sm:$0xff] }
 0x324   : > { %5366 = vst.msk [vmem:[#allocation4 + $0x88] sm:$0xff] %vm225_vm1, %v5334_v41  ;;  %v5739_v13 = vld [vmem:[#allocation4] sm:$0xff] }
 0x325   : > { %5365 = vst.msk [vmem:[#allocation4 + $0x80] sm:$0xff] %vm225_vm1, %v5333_v17  ;;  %v5304_v2 = vld [vmem:[#allocation4 + $0x98] sm:$0xff]  ;;  %v10520_v8 = vpop.f32.mrb[150].mxu1 }
 0x326   : > { %v10570_v0 = vpop.f32.mrb[182].mxu0  ;;  %v5336_v1 = vadd.f32 %v10564_v61, %v5304_v2  ;;  %v5303_v38 = vld [vmem:[#allocation4 + $0x90] sm:$0xff]  ;;  %4918 = vst.msk [vmem:[#allocation4 + $0xb8] sm:$0xff] %vm225_vm1, %v10520_v8  ;;  %v4846_v47 = vpop.f32.mrb[151].mxu1  ;;  %10886 = vmatmul.mubr.msk.f32.vlgmr.msra.gmra.mrb[0].mxu1 %vm225_vm1, %v8107_v45 }
 0x327   : > { %v5236_v24 = vpop.f32.mrb[183].mxu0  ;;  %v5335_v12 = vadd.f32 %v5303_v38, %v5216_v40  ;;  %4917 = vst.msk [vmem:[#allocation4 + $0xb0] sm:$0xff] %vm225_vm1, %v4846_v47  ;;  %10888 = vmatprep.mubr.msk.f32.mxu1 %vm225_vm1, %v8108_v18 }
 0x328   : > { %5368 = vst.msk [vmem:[#allocation4 + $0x98] sm:$0xff] %vm225_vm1, %v5336_v1  ;;  %v8119_v1 = vld [vmem:[#allocation3 + $0xca] sm:$0xff] }
 0x329   : > { %5367 = vst.msk [vmem:[#allocation4 + $0x90] sm:$0xff] %vm225_vm1, %v5335_v12  ;;  %v5306_v59 = vld [vmem:[#allocation4 + $0xa8] sm:$0xff]  ;;  %v10523_v35 = vpop.f32.mrb[152].mxu1  ;;  %v5741_v12 = vld [vmem:[#allocation4 + $0x10] sm:$0xff] }
 0x32a   : > { %v10573_v28 = vpop.f32.mrb[184].mxu0  ;;  %v5338_v62 = vadd.f32 %v10567_v44, %v5306_v59  ;;  %v5305_v34 = vld [vmem:[#allocation4 + $0xa0] sm:$0xff]  ;;  %4920 = vst.msk [vmem:[#allocation4 + $0xc8] sm:$0xff] %vm225_vm1, %v10523_v35  ;;  %v4856_v32 = vpop.f32.mrb[153].mxu1  ;;  %10889 = vmatmul.mubr.msk.f32.gmra.mrb[2].mxu1 %vm225_vm1, %v8109_v22  ;;  %v8120_v35 = vld [vmem:[#allocation3 + $0xda] sm:$0xff] }
 0x32b   : > { %v5246_v21 = vpop.f32.mrb[185].mxu0  ;;  %v5337_v15 = vadd.f32 %v5305_v34, %v5226_v3  ;;  %4919 = vst.msk [vmem:[#allocation4 + $0xc0] sm:$0xff] %vm225_vm1, %v4856_v32  ;;  %10891 = vmatprep.mubr.msk.f32.mxu1 %vm225_vm1, %v8110_v4  ;;  %v8118_v3 = vld [vmem:[#allocation3 + $0xc2] sm:$0xff]  ;;  %v5744_v34 = vld [vmem:[#allocation4 + $0x28] sm:$0xff] }
 0x32c   : > { %5370 = vst.msk [vmem:[#allocation4 + $0xa8] sm:$0xff] %vm225_vm1, %v5338_v62 }
 0x32d   : > { %5369 = vst.msk [vmem:[#allocation4 + $0xa0] sm:$0xff] %vm225_vm1, %v5337_v15  ;;  %v5308_v48 = vld [vmem:[#allocation4 + $0xb8] sm:$0xff]  ;;  %v10526_v16 = vpop.f32.mrb[154].mxu1 }
 0x32e   : > { %v10576_v39 = vpop.f32.mrb[186].mxu0  ;;  %v5340_v6 = vadd.f32 %v10570_v0, %v5308_v48  ;;  %v5307_v36 = vld [vmem:[#allocation4 + $0xb0] sm:$0xff]  ;;  %4922 = vst.msk [vmem:[#allocation4 + $0xd8] sm:$0xff] %vm225_vm1, %v10526_v16  ;;  %v4866_v7 = vpop.f32.mrb[155].mxu1  ;;  %10892 = vmatmul.mubr.msk.f32.gmra.mrb[4].mxu1 %vm225_vm1, %v8111_v56  ;;  %v5742_v0 = vld [vmem:[#allocation4 + $0x18] sm:$0xff]  ;;  %v5743_v48 = vld [vmem:[#allocation4 + $0x20] sm:$0xff] }
 0x32f   : > { %v5256_v29 = vpop.f32.mrb[187].mxu0  ;;  %v5339_v9 = vadd.f32 %v5307_v36, %v5236_v24  ;;  %4921 = vst.msk [vmem:[#allocation4 + $0xd0] sm:$0xff] %vm225_vm1, %v4866_v7  ;;  %10894 = vmatprep.mubr.msk.f32.mxu1 %vm225_vm1, %v8112_v30 }
 0x330   : > { %5372 = vst.msk [vmem:[#allocation4 + $0xb8] sm:$0xff] %vm225_vm1, %v5340_v6 }
 0x331   : > { %5371 = vst.msk [vmem:[#allocation4 + $0xb0] sm:$0xff] %vm225_vm1, %v5339_v9  ;;  %v5310_v5 = vld [vmem:[#allocation4 + $0xc8] sm:$0xff]  ;;  %v10529_v27 = vpop.f32.mrb[156].mxu1  ;;  %v5746_v9 = vld [vmem:[#allocation4 + $0x38] sm:$0xff] }
 0x332   : > { %v10579_v19 = vpop.f32.mrb[188].mxu0  ;;  %v5342_v55 = vadd.f32 %v10573_v28, %v5310_v5  ;;  %v5309_v50 = vld [vmem:[#allocation4 + $0xc0] sm:$0xff]  ;;  %4924 = vst.msk [vmem:[#allocation4 + $0xe8] sm:$0xff] %vm225_vm1, %v10529_v27  ;;  %v4876_v43 = vpop.f32.mrb[157].mxu1  ;;  %10895 = vmatmul.mubr.msk.f32.gmra.mrb[6].mxu1 %vm225_vm1, %v8113_v49  ;;  %v8123_v27 = vld [vmem:[#allocation3 + $0xfa] sm:$0xff] }
 0x333   : > { %v5266_v26 = vpop.f32.mrb[189].mxu0  ;;  %v5341_v11 = vadd.f32 %v5309_v50, %v5246_v21  ;;  %4923 = vst.msk [vmem:[#allocation4 + $0xe0] sm:$0xff] %vm225_vm1, %v4876_v43  ;;  %10897 = vmatprep.mubr.msk.f32.mxu1 %vm225_vm1, %v8114_v23  ;;  %v8121_v21 = vld [vmem:[#allocation3 + $0xe2] sm:$0xff]  ;;  %v8124_v43 = vld [vmem:[#allocation3 + $0x10a] sm:$0xff] }
 0x334   : > { %5374 = vst.msk [vmem:[#allocation4 + $0xc8] sm:$0xff] %vm225_vm1, %v5342_v55  ;;  %v5745_v55 = vld [vmem:[#allocation4 + $0x30] sm:$0xff] }
 0x335   : > { %5373 = vst.msk [vmem:[#allocation4 + $0xc0] sm:$0xff] %vm225_vm1, %v5341_v11  ;;  %v5312_v52 = vld [vmem:[#allocation4 + $0xd8] sm:$0xff]  ;;  %v10532_v60 = vpop.f32.mrb[158].mxu1 }
 0x336   : > { %v10582_v54 = vpop.f32.mrb[190].mxu0  ;;  %v5344_v63 = vadd.f32 %v10576_v39, %v5312_v52  ;;  %v5311_v42 = vld [vmem:[#allocation4 + $0xd0] sm:$0xff]  ;;  %4926 = vst.msk [vmem:[#allocation4 + $0xf8] sm:$0xff] %vm225_vm1, %v10532_v60  ;;  %v4886_v51 = vpop.f32.mrb[159].mxu1  ;;  %10898 = vmatmul.mubr.msk.f32.gmra.mrb[8].mxu1 %vm225_vm1, %v8115_v58  ;;  %v8122_v39 = vld [vmem:[#allocation3 + $0xf2] sm:$0xff] }
 0x337   : > { %v5276_v61 = vpop.f32.mrb[191].mxu0  ;;  %v5343_v46 = vadd.f32 %v5311_v42, %v5256_v29  ;;  %4925 = vst.msk [vmem:[#allocation4 + $0xf0] sm:$0xff] %vm225_vm1, %v4886_v51  ;;  %10900 = vmatprep.mubr.msk.f32.mxu1 %vm225_vm1, %v8116_v10  ;;  %v5748_v58 = vld [vmem:[#allocation4 + $0x48] sm:$0xff]  ;;  %v5747_v10 = vld [vmem:[#allocation4 + $0x40] sm:$0xff] }
 0x338   : > { %5376 = vst.msk [vmem:[#allocation4 + $0xd8] sm:$0xff] %vm225_vm1, %v5344_v63  ;;  %v8125_v42 = vld [vmem:[#allocation3 + $0x112] sm:$0xff] }
 0x339   : > { %5375 = vst.msk [vmem:[#allocation4 + $0xd0] sm:$0xff] %vm225_vm1, %v5343_v46  ;;  %v5314_v57 = vld [vmem:[#allocation4 + $0xe8] sm:$0xff]  ;;  %v10587_v40 = vpop.f32.mrb[160].mxu1 }
 0x33a   : > { %v10637_v37 = vpop.f32.mrb[192].mxu0  ;;  %v5346_v33 = vadd.f32 %v10579_v19, %v5314_v57  ;;  %v5313_v20 = vld [vmem:[#allocation4 + $0xe0] sm:$0xff]  ;;  %v5772_v44 = vadd.f32 %v10587_v40, %v5740_v53  ;;  %v5580_v41 = vpop.f32.mrb[161].mxu1  ;;  %10901 = vmatmul.mubr.msk.f32.gmra.mrb[10].mxu1 %vm225_vm1, %v8117_v31  ;;  %v8126_v57 = vld [vmem:[#allocation3 + $0x122] sm:$0xff] }
 0x33b   : > { %v6034_v25 = vpop.f32.mrb[193].mxu0  ;;  %v5345_v14 = vadd.f32 %v5313_v20, %v5266_v26  ;;  %v5771_v17 = vadd.f32 %v5739_v13, %v5580_v41  ;;  %10903 = vmatprep.mubr.msk.f32.mxu1 %vm225_vm1, %v8118_v3  ;;  %v8127_v13 = vld [vmem:[#allocation3 + $0x12a] sm:$0xff] }
 0x33c   : > { %5378 = vst.msk [vmem:[#allocation4 + $0xe8] sm:$0xff] %vm225_vm1, %v5346_v33  ;;  %5804 = vst.msk [vmem:[#allocation4 + $0x8] sm:$0xff] %vm225_vm1, %v5772_v44  ;;  %v5750_v44 = vld [vmem:[#allocation4 + $0x58] sm:$0xff] }
 0x33d   : > { %5377 = vst.msk [vmem:[#allocation4 + $0xe0] sm:$0xff] %vm225_vm1, %v5345_v14  ;;  %v5316_v2 = vld [vmem:[#allocation4 + $0xf8] sm:$0xff]  ;;  %5803 = vst.msk [vmem:[#allocation4] sm:$0xff] %vm225_vm1, %v5771_v17  ;;  %v10590_v8 = vpop.f32.mrb[162].mxu1  ;;  %v5749_v14 = vld [vmem:[#allocation4 + $0x50] sm:$0xff] }
 0x33e   : > { %v10640_v45 = vpop.f32.mrb[194].mxu0  ;;  %v5348_v38 = vadd.f32 %v10582_v54, %v5316_v2  ;;  %v5315_v47 = vld [vmem:[#allocation4 + $0xf0] sm:$0xff]  ;;  %v5774_v24 = vadd.f32 %v10590_v8, %v5742_v0  ;;  %v5590_v18 = vpop.f32.mrb[163].mxu1  ;;  %10904 = vmatmul.mubr.msk.f32.gmra.mrb[12].mxu1 %vm225_vm1, %v8119_v1 }
 0x33f   : > { %v6044_v59 = vpop.f32.mrb[195].mxu0  ;;  %v5347_v28 = vadd.f32 %v5315_v47, %v5276_v61  ;;  %v5773_v22 = vadd.f32 %v5741_v12, %v5590_v18  ;;  %10906 = vmatprep.mubr.msk.f32.mxu1 %vm225_vm1, %v8120_v35  ;;  %v8128_v2 = vld [vmem:[#allocation3 + $0x13a] sm:$0xff]  ;;  %v8129_v12 = vld [vmem:[#allocation3 + $0x142] sm:$0xff] }
 0x340   : > { %5380 = vst.msk [vmem:[#allocation4 + $0xf8] sm:$0xff] %vm225_vm1, %v5348_v38  ;;  %5806 = vst.msk [vmem:[#allocation4 + $0x18] sm:$0xff] %vm225_vm1, %v5774_v24  ;;  %v5752_v24 = vld [vmem:[#allocation4 + $0x68] sm:$0xff] }
 0x341   : > { %5379 = vst.msk [vmem:[#allocation4 + $0xf0] sm:$0xff] %vm225_vm1, %v5347_v28  ;;  %5805 = vst.msk [vmem:[#allocation4 + $0x10] sm:$0xff] %vm225_vm1, %v5773_v22  ;;  %v10593_v62 = vpop.f32.mrb[164].mxu1  ;;  %v5751_v28 = vld [vmem:[#allocation4 + $0x60] sm:$0xff] }
 0x342   : > { %v10643_v32 = vpop.f32.mrb[196].mxu0  ;;  %v5776_v4 = vadd.f32 %v10593_v62, %v5744_v34  ;;  %v5600_v15 = vpop.f32.mrb[165].mxu1  ;;  %10907 = vmatmul.mubr.msk.f32.gmra.mrb[14].mxu1 %vm225_vm1, %v8121_v21  ;;  %v8130_v62 = vld [vmem:[#allocation3 + $0x152] sm:$0xff] }
 0x343   : > { %v6054_v16 = vpop.f32.mrb[197].mxu0  ;;  %v6194_v56 = vld [vmem:[#allocation4 + $0x8] sm:$0xff]  ;;  %v5775_v6 = vadd.f32 %v5743_v48, %v5600_v15  ;;  %10909 = vmatprep.mubr.msk.f32.mxu1 %vm225_vm1, %v8122_v39 }
 0x344   : > { %v6226_v36 = vadd.f32 %v10637_v37, %v6194_v56  ;;  %v6193_v7 = vld [vmem:[#allocation4] sm:$0xff]  ;;  %5808 = vst.msk [vmem:[#allocation4 + $0x28] sm:$0xff] %vm225_vm1, %v5776_v4  ;;  %v8131_v56 = vld [vmem:[#allocation3 + $0x15a] sm:$0xff] }
 0x345   : > { %v6225_v29 = vadd.f32 %v6193_v7, %v6034_v25  ;;  %5807 = vst.msk [vmem:[#allocation4 + $0x20] sm:$0xff] %vm225_vm1, %v5775_v6  ;;  %v10596_v30 = vpop.f32.mrb[166].mxu1  ;;  %v5753_v7 = vld [vmem:[#allocation4 + $0x70] sm:$0xff] }
 0x346   : > { %v10646_v5 = vpop.f32.mrb[198].mxu0  ;;  %6258 = vst.msk [vmem:[#allocation4 + $0x8] sm:$0xff] %vm225_vm1, %v6226_v36  ;;  %v5778_v19 = vadd.f32 %v10596_v30, %v5746_v9  ;;  %v5610_v49 = vpop.f32.mrb[167].mxu1  ;;  %10910 = vmatmul.mubr.msk.f32.gmra.mrb[16].mxu1 %vm225_vm1, %v8123_v27  ;;  %v8132_v30 = vld [vmem:[#allocation3 + $0x16a] sm:$0xff] }
 0x347   : > { %v6064_v50 = vpop.f32.mrb[199].mxu0  ;;  %6257 = vst.msk [vmem:[#allocation4] sm:$0xff] %vm225_vm1, %v6225_v29  ;;  %v6196_v26 = vld [vmem:[#allocation4 + $0x18] sm:$0xff]  ;;  %v5777_v23 = vadd.f32 %v5745_v55, %v5610_v49  ;;  %10912 = vmatprep.mubr.msk.f32.mxu1 %vm225_vm1, %v8124_v43 }
 0x348   : > { %v6228_v11 = vadd.f32 %v10640_v45, %v6196_v26  ;;  %v6195_v52 = vld [vmem:[#allocation4 + $0x10] sm:$0xff]  ;;  %5810 = vst.msk [vmem:[#allocation4 + $0x38] sm:$0xff] %vm225_vm1, %v5778_v19  ;;  %v8133_v26 = vld [vmem:[#allocation3 + $0x172] sm:$0xff] }
 0x349   : > { %v6227_v60 = vadd.f32 %v6195_v52, %v6044_v59  ;;  %5809 = vst.msk [vmem:[#allocation4 + $0x30] sm:$0xff] %vm225_vm1, %v5777_v23  ;;  %v10599_v54 = vpop.f32.mrb[168].mxu1  ;;  %v5755_v52 = vld [vmem:[#allocation4 + $0x80] sm:$0xff] }
 0x34a   : > { %v10649_v63 = vpop.f32.mrb[200].mxu0  ;;  %6260 = vst.msk [vmem:[#allocation4 + $0x18] sm:$0xff] %vm225_vm1, %v6228_v11  ;;  %v5780_v51 = vadd.f32 %v10599_v54, %v5748_v58  ;;  %v5620_v61 = vpop.f32.mrb[169].mxu1  ;;  %10913 = vmatmul.mubr.msk.f32.gmra.mrb[18].mxu1 %vm225_vm1, %v8125_v42  ;;  %v8134_v54 = vld [vmem:[#allocation3 + $0x182] sm:$0xff] }
 0x34b   : > { %v6074_v46 = vpop.f32.mrb[201].mxu0  ;;  %6259 = vst.msk [vmem:[#allocation4 + $0x10] sm:$0xff] %vm225_vm1, %v6227_v60  ;;  %v6198_v40 = vld [vmem:[#allocation4 + $0x28] sm:$0xff]  ;;  %v5779_v53 = vadd.f32 %v5747_v10, %v5620_v61  ;;  %10915 = vmatprep.mubr.msk.f32.mxu1 %vm225_vm1, %v8126_v57  ;;  %v5758_v57 = vld [vmem:[#allocation4 + $0x98] sm:$0xff] }
 0x34c   : > { %v6230_v37 = vadd.f32 %v10643_v32, %v6198_v40  ;;  %v6197_v31 = vld [vmem:[#allocation4 + $0x20] sm:$0xff]  ;;  %5812 = vst.msk [vmem:[#allocation4 + $0x48] sm:$0xff] %vm225_vm1, %v5780_v51  ;;  %v8136_v61 = vld [vmem:[#allocation3 + $0x19a] sm:$0xff] }
 0x34d   : > { %v6229_v33 = vadd.f32 %v6197_v31, %v6054_v16  ;;  %5811 = vst.msk [vmem:[#allocation4 + $0x40] sm:$0xff] %vm225_vm1, %v5779_v53  ;;  %v10602_v20 = vpop.f32.mrb[170].mxu1  ;;  %v5754_v16 = vld [vmem:[#allocation4 + $0x78] sm:$0xff] }
 0x34e   : > { %v10652_v41 = vpop.f32.mrb[202].mxu0  ;;  %6262 = vst.msk [vmem:[#allocation4 + $0x28] sm:$0xff] %vm225_vm1, %v6230_v37  ;;  %v5782_v25 = vadd.f32 %v10602_v20, %v5750_v44  ;;  %v5630_v3 = vpop.f32.mrb[171].mxu1  ;;  %10916 = vmatmul.mubr.msk.f32.gmra.mrb[20].mxu1 %vm225_vm1, %v8127_v13  ;;  %v8135_v53 = vld [vmem:[#allocation3 + $0x18a] sm:$0xff]  ;;  %v8137_v13 = vld [vmem:[#allocation3 + $0x1a2] sm:$0xff] }
 0x34f   : > { %v6084_v17 = vpop.f32.mrb[203].mxu0  ;;  %6261 = vst.msk [vmem:[#allocation4 + $0x20] sm:$0xff] %vm225_vm1, %v6229_v33  ;;  %v6200_v8 = vld [vmem:[#allocation4 + $0x38] sm:$0xff]  ;;  %v5781_v0 = vadd.f32 %v5749_v14, %v5630_v3  ;;  %10918 = vmatprep.mubr.msk.f32.mxu1 %vm225_vm1, %v8128_v2  ;;  %v5757_v33 = vld [vmem:[#allocation4 + $0x90] sm:$0xff]  ;;  %v5760_v2 = vld [vmem:[#allocation4 + $0xa8] sm:$0xff] }
 0x350   : > { %v6232_v45 = vadd.f32 %v10646_v5, %v6200_v8  ;;  %v6199_v1 = vld [vmem:[#allocation4 + $0x30] sm:$0xff]  ;;  %5814 = vst.msk [vmem:[#allocation4 + $0x58] sm:$0xff] %vm225_vm1, %v5782_v25 }
 0x351   : > { %v6231_v38 = vadd.f32 %v6199_v1, %v6064_v50  ;;  %5813 = vst.msk [vmem:[#allocation4 + $0x50] sm:$0xff] %vm225_vm1, %v5781_v0  ;;  %v10605_v47 = vpop.f32.mrb[172].mxu1  ;;  %v5756_v50 = vld [vmem:[#allocation4 + $0x88] sm:$0xff]  ;;  %v5759_v1 = vld [vmem:[#allocation4 + $0xa0] sm:$0xff] }
 0x352   : > { %v10655_v18 = vpop.f32.mrb[204].mxu0  ;;  %6264 = vst.msk [vmem:[#allocation4 + $0x38] sm:$0xff] %vm225_vm1, %v6232_v45  ;;  %v5784_v59 = vadd.f32 %v10605_v47, %v5752_v24  ;;  %v5640_v35 = vpop.f32.mrb[173].mxu1  ;;  %10919 = vmatmul.mubr.msk.f32.gmra.mrb[22].mxu1 %vm225_vm1, %v8129_v12 }
 0x353   : > { %v6094_v22 = vpop.f32.mrb[205].mxu0  ;;  %6263 = vst.msk [vmem:[#allocation4 + $0x30] sm:$0xff] %vm225_vm1, %v6231_v38  ;;  %v6202_v34 = vld [vmem:[#allocation4 + $0x48] sm:$0xff]  ;;  %v5783_v32 = vadd.f32 %v5751_v28, %v5640_v35  ;;  %10921 = vmatprep.mubr.msk.f32.mxu1 %vm225_vm1, %v8130_v62  ;;  %v5762_v28 = vld [vmem:[#allocation4 + $0xb8] sm:$0xff] }
 0x354   : > { %v6234_v21 = vadd.f32 %v10649_v63, %v6202_v34  ;;  %v6201_v4 = vld [vmem:[#allocation4 + $0x40] sm:$0xff]  ;;  %5816 = vst.msk [vmem:[#allocation4 + $0x68] sm:$0xff] %vm225_vm1, %v5784_v59 }
 0x355   : > { %v6233_v15 = vadd.f32 %v6201_v4, %v6074_v46  ;;  %5815 = vst.msk [vmem:[#allocation4 + $0x60] sm:$0xff] %vm225_vm1, %v5783_v32  ;;  %v10608_v48 = vpop.f32.mrb[174].mxu1  ;;  %v5761_v32 = vld [vmem:[#allocation4 + $0xb0] sm:$0xff] }
 0x356   : > { %v10658_v39 = vpop.f32.mrb[206].mxu0  ;;  %6266 = vst.msk [vmem:[#allocation4 + $0x48] sm:$0xff] %vm225_vm1, %v6234_v21  ;;  %v5786_v6 = vadd.f32 %v10608_v48, %v5754_v16  ;;  %v5650_v36 = vpop.f32.mrb[175].mxu1  ;;  %10922 = vmatmul.mubr.msk.f32.gmra.mrb[24].mxu1 %vm225_vm1, %v8131_v56 }
 0x357   : > { %v6104_v29 = vpop.f32.mrb[207].mxu0  ;;  %6265 = vst.msk [vmem:[#allocation4 + $0x40] sm:$0xff] %vm225_vm1, %v6233_v15  ;;  %v6204_v9 = vld [vmem:[#allocation4 + $0x58] sm:$0xff]  ;;  %v5785_v5 = vadd.f32 %v5753_v7, %v5650_v36  ;;  %10924 = vmatprep.mubr.msk.f32.mxu1 %vm225_vm1, %v8132_v30  ;;  %v5763_v30 = vld [vmem:[#allocation4 + $0xc0] sm:$0xff] }
 0x358   : > { %v6236_v27 = vadd.f32 %v10652_v41, %v6204_v9  ;;  %v6203_v19 = vld [vmem:[#allocation4 + $0x50] sm:$0xff]  ;;  %5818 = vst.msk [vmem:[#allocation4 + $0x78] sm:$0xff] %vm225_vm1, %v5786_v6  ;;  %v5764_v6 = vld [vmem:[#allocation4 + $0xc8] sm:$0xff] }
 0x359   : > { %v6235_v49 = vadd.f32 %v6203_v19, %v6084_v17  ;;  %5817 = vst.msk [vmem:[#allocation4 + $0x70] sm:$0xff] %vm225_vm1, %v5785_v5  ;;  %v10611_v55 = vpop.f32.mrb[176].mxu1 }
 0x35a   : > { %v10661_v43 = vpop.f32.mrb[208].mxu0  ;;  %6268 = vst.msk [vmem:[#allocation4 + $0x58] sm:$0xff] %vm225_vm1, %v6236_v27  ;;  %v5788_v23 = vadd.f32 %v10611_v55, %v5756_v50  ;;  %v5660_v11 = vpop.f32.mrb[177].mxu1  ;;  %10925 = vmatmul.mubr.msk.f32.gmra.mrb[26].mxu1 %vm225_vm1, %v8133_v26 }
 0x35b   : > { %v6114_v60 = vpop.f32.mrb[209].mxu0  ;;  %6267 = vst.msk [vmem:[#allocation4 + $0x50] sm:$0xff] %vm225_vm1, %v6235_v49  ;;  %v6206_v58 = vld [vmem:[#allocation4 + $0x68] sm:$0xff]  ;;  %v5787_v63 = vadd.f32 %v5755_v52, %v5660_v11  ;;  %10927 = vmatprep.mubr.msk.f32.mxu1 %vm225_vm1, %v8134_v54  ;;  %v5765_v52 = vld [vmem:[#allocation4 + $0xd0] sm:$0xff] }
 0x35c   : > { %v6238_v42 = vadd.f32 %v10655_v18, %v6206_v58  ;;  %v6205_v51 = vld [vmem:[#allocation4 + $0x60] sm:$0xff]  ;;  %5820 = vst.msk [vmem:[#allocation4 + $0x88] sm:$0xff] %vm225_vm1, %v5788_v23 }
 0x35d   : > { %v6237_v10 = vadd.f32 %v6205_v51, %v6094_v22  ;;  %5819 = vst.msk [vmem:[#allocation4 + $0x80] sm:$0xff] %vm225_vm1, %v5787_v63  ;;  %v10614_v46 = vpop.f32.mrb[178].mxu1 }
 0x35e   : > { %v10664_v40 = vpop.f32.mrb[210].mxu0  ;;  %6270 = vst.msk [vmem:[#allocation4 + $0x68] sm:$0xff] %vm225_vm1, %v6238_v42  ;;  %v5790_v37 = vadd.f32 %v10614_v46, %v5758_v57  ;;  %v5670_v31 = vpop.f32.mrb[179].mxu1  ;;  %10928 = vmatmul.mubr.msk.f32.gmra.mrb[28].mxu1 %vm225_vm1, %v8135_v53  ;;  %v5767_v53 = vld [vmem:[#allocation4 + $0xe0] sm:$0xff] }
 0x35f   : > { %v6124_v20 = vpop.f32.mrb[211].mxu0  ;;  %6269 = vst.msk [vmem:[#allocation4 + $0x60] sm:$0xff] %vm225_vm1, %v6237_v10  ;;  %v6208_v44 = vld [vmem:[#allocation4 + $0x78] sm:$0xff]  ;;  %v5789_v41 = vadd.f32 %v5757_v33, %v5670_v31  ;;  %10930 = vmatprep.mubr.msk.f32.mxu1 %vm225_vm1, %v8136_v61  ;;  %v5768_v10 = vld [vmem:[#allocation4 + $0xe8] sm:$0xff] }
 0x360   : > { %v6240_v25 = vadd.f32 %v10658_v39, %v6208_v44  ;;  %v6207_v3 = vld [vmem:[#allocation4 + $0x70] sm:$0xff]  ;;  %5822 = vst.msk [vmem:[#allocation4 + $0x98] sm:$0xff] %vm225_vm1, %v5790_v37 }
 0x361   : > { %v6239_v14 = vadd.f32 %v6207_v3, %v6104_v29  ;;  %5821 = vst.msk [vmem:[#allocation4 + $0x90] sm:$0xff] %vm225_vm1, %v5789_v41  ;;  %v10617_v17 = vpop.f32.mrb[180].mxu1 }
 0x362   : > { %v10667_v8 = vpop.f32.mrb[212].mxu0  ;;  %6272 = vst.msk [vmem:[#allocation4 + $0x78] sm:$0xff] %vm225_vm1, %v6240_v25  ;;  %v5792_v0 = vadd.f32 %v10617_v17, %v5760_v2  ;;  %v5680_v45 = vpop.f32.mrb[181].mxu1  ;;  %10931 = vmatmul.mubr.msk.f32.gmra.mrb[30].mxu1 %vm225_vm1, %v8137_v13  ;;  %v5770_v25 = vld [vmem:[#allocation4 + $0xf8] sm:$0xff]  ;;  %v5769_v2 = vld [vmem:[#allocation4 + $0xf0] sm:$0xff] }
 0x363   : > { %v6134_v38 = vpop.f32.mrb[213].mxu0  ;;  %6271 = vst.msk [vmem:[#allocation4 + $0x70] sm:$0xff] %vm225_vm1, %v6239_v14  ;;  %v6210_v47 = vld [vmem:[#allocation4 + $0x88] sm:$0xff]  ;;  %v5791_v24 = vadd.f32 %v5759_v1, %v5680_v45 }
 0x364   : > { %v6242_v18 = vadd.f32 %v10661_v43, %v6210_v47  ;;  %v6209_v12 = vld [vmem:[#allocation4 + $0x80] sm:$0xff]  ;;  %5824 = vst.msk [vmem:[#allocation4 + $0xa8] sm:$0xff] %vm225_vm1, %v5792_v0  ;;  %v5766_v43 = vld [vmem:[#allocation4 + $0xd8] sm:$0xff] }
 0x365   : > { %v6241_v59 = vadd.f32 %v6209_v12, %v6114_v60  ;;  %5823 = vst.msk [vmem:[#allocation4 + $0xa0] sm:$0xff] %vm225_vm1, %v5791_v24  ;;  %v10620_v35 = vpop.f32.mrb[182].mxu1 }
 0x366   : > { %v10670_v22 = vpop.f32.mrb[214].mxu0  ;;  %6274 = vst.msk [vmem:[#allocation4 + $0x88] sm:$0xff] %vm225_vm1, %v6242_v18  ;;  %v5794_v62 = vadd.f32 %v10620_v35, %v5762_v28  ;;  %v5690_v34 = vpop.f32.mrb[183].mxu1  ;;  %v6648_v18 = vld [vmem:[#allocation4 + $0x8] sm:$0xff]  ;;  %v6647_v28 = vld [vmem:[#allocation4] sm:$0xff] }
 0x367   : > { %v6144_v21 = vpop.f32.mrb[215].mxu0  ;;  %6273 = vst.msk [vmem:[#allocation4 + $0x80] sm:$0xff] %vm225_vm1, %v6241_v59  ;;  %v6212_v4 = vld [vmem:[#allocation4 + $0x98] sm:$0xff]  ;;  %v5793_v15 = vadd.f32 %v5761_v32, %v5690_v34 }
 0x368   : > { %v6244_v48 = vadd.f32 %v10664_v40, %v6212_v4  ;;  %v6211_v16 = vld [vmem:[#allocation4 + $0x90] sm:$0xff]  ;;  %5826 = vst.msk [vmem:[#allocation4 + $0xb8] sm:$0xff] %vm225_vm1, %v5794_v62 }
 0x369   : > { %v6243_v39 = vadd.f32 %v6211_v16, %v6124_v20  ;;  %5825 = vst.msk [vmem:[#allocation4 + $0xb0] sm:$0xff] %vm225_vm1, %v5793_v15  ;;  %v10623_v56 = vpop.f32.mrb[184].mxu1 }
 0x36a   : > { %v10673_v36 = vpop.f32.mrb[216].mxu0  ;;  %6276 = vst.msk [vmem:[#allocation4 + $0x98] sm:$0xff] %vm225_vm1, %v6244_v48  ;;  %v5796_v7 = vadd.f32 %v10623_v56, %v5764_v6  ;;  %v5700_v29 = vpop.f32.mrb[185].mxu1  ;;  %v6650_v48 = vld [vmem:[#allocation4 + $0x18] sm:$0xff]  ;;  %v6649_v6 = vld [vmem:[#allocation4 + $0x10] sm:$0xff] }
 0x36b   : > { %v6154_v9 = vpop.f32.mrb[217].mxu0  ;;  %6275 = vst.msk [vmem:[#allocation4 + $0x90] sm:$0xff] %vm225_vm1, %v6243_v39  ;;  %v6214_v5 = vld [vmem:[#allocation4 + $0xa8] sm:$0xff]  ;;  %v5795_v27 = vadd.f32 %v5763_v30, %v5700_v29 }
 0x36c   : > { %v6246_v19 = vadd.f32 %v10667_v8, %v6214_v5  ;;  %v6213_v49 = vld [vmem:[#allocation4 + $0xa0] sm:$0xff]  ;;  %5828 = vst.msk [vmem:[#allocation4 + $0xc8] sm:$0xff] %vm225_vm1, %v5796_v7 }
 0x36d   : > { %v6245_v55 = vadd.f32 %v6213_v49, %v6134_v38  ;;  %5827 = vst.msk [vmem:[#allocation4 + $0xc0] sm:$0xff] %vm225_vm1, %v5795_v27  ;;  %v10626_v50 = vpop.f32.mrb[186].mxu1 }
 0x36e   : > { %v10676_v26 = vpop.f32.mrb[218].mxu0  ;;  %6278 = vst.msk [vmem:[#allocation4 + $0xa8] sm:$0xff] %vm225_vm1, %v6246_v19  ;;  %v5798_v23 = vadd.f32 %v10626_v50, %v5766_v43  ;;  %v5710_v11 = vpop.f32.mrb[187].mxu1  ;;  %v6652_v19 = vld [vmem:[#allocation4 + $0x28] sm:$0xff]  ;;  %v6651_v43 = vld [vmem:[#allocation4 + $0x20] sm:$0xff] }
 0x36f   : > { %v6164_v60 = vpop.f32.mrb[219].mxu0  ;;  %6277 = vst.msk [vmem:[#allocation4 + $0xa0] sm:$0xff] %vm225_vm1, %v6245_v55  ;;  %v6216_v54 = vld [vmem:[#allocation4 + $0xb8] sm:$0xff]  ;;  %v5797_v58 = vadd.f32 %v5765_v52, %v5710_v11 }
 0x370   : > { %v6248_v63 = vadd.f32 %v10670_v22, %v6216_v54  ;;  %v6215_v42 = vld [vmem:[#allocation4 + $0xb0] sm:$0xff]  ;;  %5830 = vst.msk [vmem:[#allocation4 + $0xd8] sm:$0xff] %vm225_vm1, %v5798_v23 }
 0x371   : > { %v6247_v51 = vadd.f32 %v6215_v42, %v6144_v21  ;;  %5829 = vst.msk [vmem:[#allocation4 + $0xd0] sm:$0xff] %vm225_vm1, %v5797_v58  ;;  %v10629_v61 = vpop.f32.mrb[188].mxu1 }
 0x372   : > { %v10679_v46 = vpop.f32.mrb[220].mxu0  ;;  %6280 = vst.msk [vmem:[#allocation4 + $0xb8] sm:$0xff] %vm225_vm1, %v6248_v63  ;;  %v5800_v57 = vadd.f32 %v10629_v61, %v5768_v10  ;;  %v5720_v40 = vpop.f32.mrb[189].mxu1  ;;  %v6654_v63 = vld [vmem:[#allocation4 + $0x38] sm:$0xff]  ;;  %v6653_v10 = vld [vmem:[#allocation4 + $0x30] sm:$0xff] }
 0x373   : > { %v6174_v37 = vpop.f32.mrb[221].mxu0  ;;  %6279 = vst.msk [vmem:[#allocation4 + $0xb0] sm:$0xff] %vm225_vm1, %v6247_v51  ;;  %v6218_v31 = vld [vmem:[#allocation4 + $0xc8] sm:$0xff]  ;;  %v5799_v33 = vadd.f32 %v5767_v53, %v5720_v40 }
 0x374   : > { %v6250_v20 = vadd.f32 %v10673_v36, %v6218_v31  ;;  %v6217_v44 = vld [vmem:[#allocation4 + $0xc0] sm:$0xff]  ;;  %5832 = vst.msk [vmem:[#allocation4 + $0xe8] sm:$0xff] %vm225_vm1, %v5800_v57 }
 0x375   : > { %v6249_v41 = vadd.f32 %v6217_v44, %v6154_v9  ;;  %5831 = vst.msk [vmem:[#allocation4 + $0xe0] sm:$0xff] %vm225_vm1, %v5799_v33  ;;  %v10632_v13 = vpop.f32.mrb[190].mxu1 }
 0x376   : > { %v10682_v3 = vpop.f32.mrb[222].mxu0  ;;  %6282 = vst.msk [vmem:[#allocation4 + $0xc8] sm:$0xff] %vm225_vm1, %v6250_v20  ;;  %v5802_v14 = vadd.f32 %v10632_v13, %v5770_v25  ;;  %v5730_v17 = vpop.f32.mrb[191].mxu1  ;;  %v6656_v20 = vld [vmem:[#allocation4 + $0x48] sm:$0xff]  ;;  %v6655_v25 = vld [vmem:[#allocation4 + $0x40] sm:$0xff] }
 0x377   : > { %v6184_v8 = vpop.f32.mrb[223].mxu0  ;;  %6281 = vst.msk [vmem:[#allocation4 + $0xc0] sm:$0xff] %vm225_vm1, %v6249_v41  ;;  %v6220_v0 = vld [vmem:[#allocation4 + $0xd8] sm:$0xff]  ;;  %v5801_v45 = vadd.f32 %v5769_v2, %v5730_v17 }
 0x378   : > { %v6252_v1 = vadd.f32 %v10676_v26, %v6220_v0  ;;  %v6219_v38 = vld [vmem:[#allocation4 + $0xd0] sm:$0xff]  ;;  %5834 = vst.msk [vmem:[#allocation4 + $0xf8] sm:$0xff] %vm225_vm1, %v5802_v14 }
 0x379   : > { %v6251_v47 = vadd.f32 %v6219_v38, %v6164_v60  ;;  %5833 = vst.msk [vmem:[#allocation4 + $0xf0] sm:$0xff] %vm225_vm1, %v5801_v45  ;;  %v10687_v24 = vpop.f32.mrb[192].mxu1 }
 0x37a   : > { %v10737_v12 = vpop.f32.mrb[224].mxu0  ;;  %6284 = vst.msk [vmem:[#allocation4 + $0xd8] sm:$0xff] %vm225_vm1, %v6252_v1  ;;  %v6680_v59 = vadd.f32 %v10687_v24, %v6648_v18  ;;  %v6488_v35 = vpop.f32.mrb[193].mxu1  ;;  %v6658_v1 = vld [vmem:[#allocation4 + $0x58] sm:$0xff]  ;;  %v6657_v18 = vld [vmem:[#allocation4 + $0x50] sm:$0xff] }
 0x37b   : > { %v6942_v22 = vpop.f32.mrb[225].mxu0  ;;  %6283 = vst.msk [vmem:[#allocation4 + $0xd0] sm:$0xff] %vm225_vm1, %v6251_v47  ;;  %v6222_v62 = vld [vmem:[#allocation4 + $0xe8] sm:$0xff]  ;;  %v6679_v34 = vadd.f32 %v6647_v28, %v6488_v35 }
 0x37c   : > { %v6254_v32 = vadd.f32 %v10679_v46, %v6222_v62  ;;  %v6221_v21 = vld [vmem:[#allocation4 + $0xe0] sm:$0xff]  ;;  %6712 = vst.msk [vmem:[#allocation4 + $0x8] sm:$0xff] %vm225_vm1, %v6680_v59 }
 0x37d   : > { %v6253_v4 = vadd.f32 %v6221_v21, %v6174_v37  ;;  %6711 = vst.msk [vmem:[#allocation4] sm:$0xff] %vm225_vm1, %v6679_v34  ;;  %v10690_v15 = vpop.f32.mrb[194].mxu1 }
 0x37e   : > { %v10740_v16 = vpop.f32.mrb[226].mxu0  ;;  %6286 = vst.msk [vmem:[#allocation4 + $0xe8] sm:$0xff] %vm225_vm1, %v6254_v32  ;;  %v6682_v39 = vadd.f32 %v10690_v15, %v6650_v48  ;;  %v6498_v56 = vpop.f32.mrb[195].mxu1  ;;  %v6660_v32 = vld [vmem:[#allocation4 + $0x68] sm:$0xff]  ;;  %v6659_v48 = vld [vmem:[#allocation4 + $0x60] sm:$0xff] }
 0x37f   : > { %v6952_v36 = vpop.f32.mrb[227].mxu0  ;;  %6285 = vst.msk [vmem:[#allocation4 + $0xe0] sm:$0xff] %vm225_vm1, %v6253_v4  ;;  %v6224_v7 = vld [vmem:[#allocation4 + $0xf8] sm:$0xff]  ;;  %v6681_v29 = vadd.f32 %v6649_v6, %v6498_v56 }
 0x380   : > { %v6256_v30 = vadd.f32 %v10682_v3, %v6224_v7  ;;  %v6223_v9 = vld [vmem:[#allocation4 + $0xf0] sm:$0xff]  ;;  %6714 = vst.msk [vmem:[#allocation4 + $0x18] sm:$0xff] %vm225_vm1, %v6682_v39 }
 0x381   : > { %v6255_v5 = vadd.f32 %v6223_v9, %v6184_v8  ;;  %6713 = vst.msk [vmem:[#allocation4 + $0x10] sm:$0xff] %vm225_vm1, %v6681_v29  ;;  %v10693_v27 = vpop.f32.mrb[196].mxu1 }
 0x382   : > { %v10743_v49 = vpop.f32.mrb[228].mxu0  ;;  %6288 = vst.msk [vmem:[#allocation4 + $0xf8] sm:$0xff] %vm225_vm1, %v6256_v30  ;;  %v6684_v55 = vadd.f32 %v10693_v27, %v6652_v19  ;;  %v6508_v50 = vpop.f32.mrb[197].mxu1  ;;  %v6662_v30 = vld [vmem:[#allocation4 + $0x78] sm:$0xff]  ;;  %v6661_v19 = vld [vmem:[#allocation4 + $0x70] sm:$0xff] }
 0x383   : > { %v6962_v26 = vpop.f32.mrb[229].mxu0  ;;  %6287 = vst.msk [vmem:[#allocation4 + $0xf0] sm:$0xff] %vm225_vm1, %v6255_v5  ;;  %v7102_v23 = vld [vmem:[#allocation4 + $0x8] sm:$0xff]  ;;  %v6683_v11 = vadd.f32 %v6651_v43, %v6508_v50 }
 0x384   : > { %v7134_v52 = vadd.f32 %v10737_v12, %v7102_v23  ;;  %v7101_v60 = vld [vmem:[#allocation4] sm:$0xff]  ;;  %6716 = vst.msk [vmem:[#allocation4 + $0x28] sm:$0xff] %vm225_vm1, %v6684_v55 }
 0x385   : > { %v7133_v54 = vadd.f32 %v7101_v60, %v6942_v22  ;;  %6715 = vst.msk [vmem:[#allocation4 + $0x20] sm:$0xff] %vm225_vm1, %v6683_v11  ;;  %v10696_v58 = vpop.f32.mrb[198].mxu1 }
 0x386   : > { %v10746_v42 = vpop.f32.mrb[230].mxu0  ;;  %7166 = vst.msk [vmem:[#allocation4 + $0x8] sm:$0xff] %vm225_vm1, %v7134_v52  ;;  %v6686_v51 = vadd.f32 %v10696_v58, %v6654_v63  ;;  %v6518_v61 = vpop.f32.mrb[199].mxu1  ;;  %v6664_v52 = vld [vmem:[#allocation4 + $0x88] sm:$0xff]  ;;  %v6663_v63 = vld [vmem:[#allocation4 + $0x80] sm:$0xff] }
 0x387   : > { %v6972_v46 = vpop.f32.mrb[231].mxu0  ;;  %7165 = vst.msk [vmem:[#allocation4] sm:$0xff] %vm225_vm1, %v7133_v54  ;;  %v7104_v57 = vld [vmem:[#allocation4 + $0x18] sm:$0xff]  ;;  %v6685_v40 = vadd.f32 %v6653_v10, %v6518_v61 }
 0x388   : > { %v7136_v53 = vadd.f32 %v10740_v16, %v7104_v57  ;;  %v7103_v37 = vld [vmem:[#allocation4 + $0x10] sm:$0xff]  ;;  %6718 = vst.msk [vmem:[#allocation4 + $0x38] sm:$0xff] %vm225_vm1, %v6686_v51 }
 0x389   : > { %v7135_v31 = vadd.f32 %v7103_v37, %v6952_v36  ;;  %6717 = vst.msk [vmem:[#allocation4 + $0x30] sm:$0xff] %vm225_vm1, %v6685_v40  ;;  %v10699_v33 = vpop.f32.mrb[200].mxu1 }
 0x38a   : > { %v10749_v44 = vpop.f32.mrb[232].mxu0  ;;  %7168 = vst.msk [vmem:[#allocation4 + $0x18] sm:$0xff] %vm225_vm1, %v7136_v53  ;;  %v6688_v41 = vadd.f32 %v10699_v33, %v6656_v20  ;;  %v6528_v13 = vpop.f32.mrb[201].mxu1  ;;  %v6666_v53 = vld [vmem:[#allocation4 + $0x98] sm:$0xff]  ;;  %v6665_v20 = vld [vmem:[#allocation4 + $0x90] sm:$0xff] }
 0x38b   : > { %v6982_v3 = vpop.f32.mrb[233].mxu0  ;;  %7167 = vst.msk [vmem:[#allocation4 + $0x10] sm:$0xff] %vm225_vm1, %v7135_v31  ;;  %v7106_v14 = vld [vmem:[#allocation4 + $0x28] sm:$0xff]  ;;  %v6687_v17 = vadd.f32 %v6655_v25, %v6528_v13 }
 0x38c   : > { %v7138_v2 = vadd.f32 %v10743_v49, %v7106_v14  ;;  %v7105_v8 = vld [vmem:[#allocation4 + $0x20] sm:$0xff]  ;;  %6720 = vst.msk [vmem:[#allocation4 + $0x48] sm:$0xff] %vm225_vm1, %v6688_v41 }
 0x38d   : > { %v7137_v0 = vadd.f32 %v7105_v8, %v6962_v26  ;;  %6719 = vst.msk [vmem:[#allocation4 + $0x40] sm:$0xff] %vm225_vm1, %v6687_v17  ;;  %v10702_v45 = vpop.f32.mrb[202].mxu1 }
 0x38e   : > { %v10752_v38 = vpop.f32.mrb[234].mxu0  ;;  %7170 = vst.msk [vmem:[#allocation4 + $0x28] sm:$0xff] %vm225_vm1, %v7138_v2  ;;  %v6690_v47 = vadd.f32 %v10702_v45, %v6658_v1  ;;  %v6538_v24 = vpop.f32.mrb[203].mxu1  ;;  %v6668_v2 = vld [vmem:[#allocation4 + $0xa8] sm:$0xff]  ;;  %v6667_v1 = vld [vmem:[#allocation4 + $0xa0] sm:$0xff] }
 0x38f   : > { %v6992_v12 = vpop.f32.mrb[235].mxu0  ;;  %7169 = vst.msk [vmem:[#allocation4 + $0x20] sm:$0xff] %vm225_vm1, %v7137_v0  ;;  %v7108_v59 = vld [vmem:[#allocation4 + $0x38] sm:$0xff]  ;;  %v6689_v35 = vadd.f32 %v6657_v18, %v6538_v24 }
 0x390   : > { %v7140_v28 = vadd.f32 %v10746_v42, %v7108_v59  ;;  %v7107_v22 = vld [vmem:[#allocation4 + $0x30] sm:$0xff]  ;;  %6722 = vst.msk [vmem:[#allocation4 + $0x58] sm:$0xff] %vm225_vm1, %v6690_v47 }
 0x391   : > { %v7139_v62 = vadd.f32 %v7107_v22, %v6972_v46  ;;  %6721 = vst.msk [vmem:[#allocation4 + $0x50] sm:$0xff] %vm225_vm1, %v6689_v35  ;;  %v10705_v34 = vpop.f32.mrb[204].mxu1 }
 0x392   : > { %v10755_v21 = vpop.f32.mrb[236].mxu0  ;;  %7172 = vst.msk [vmem:[#allocation4 + $0x38] sm:$0xff] %vm225_vm1, %v7140_v28  ;;  %v6692_v4 = vadd.f32 %v10705_v34, %v6660_v32  ;;  %v6548_v15 = vpop.f32.mrb[205].mxu1  ;;  %v6670_v28 = vld [vmem:[#allocation4 + $0xb8] sm:$0xff]  ;;  %v6669_v32 = vld [vmem:[#allocation4 + $0xb0] sm:$0xff] }
 0x393   : > { %v7002_v16 = vpop.f32.mrb[237].mxu0  ;;  %7171 = vst.msk [vmem:[#allocation4 + $0x30] sm:$0xff] %vm225_vm1, %v7139_v62  ;;  %v7110_v39 = vld [vmem:[#allocation4 + $0x48] sm:$0xff]  ;;  %v6691_v56 = vadd.f32 %v6659_v48, %v6548_v15 }
 0x394   : > { %v7142_v6 = vadd.f32 %v10749_v44, %v7110_v39  ;;  %v7109_v36 = vld [vmem:[#allocation4 + $0x40] sm:$0xff]  ;;  %6724 = vst.msk [vmem:[#allocation4 + $0x68] sm:$0xff] %vm225_vm1, %v6692_v4 }
 0x395   : > { %v7141_v7 = vadd.f32 %v7109_v36, %v6982_v3  ;;  %6723 = vst.msk [vmem:[#allocation4 + $0x60] sm:$0xff] %vm225_vm1, %v6691_v56  ;;  %v10708_v29 = vpop.f32.mrb[206].mxu1 }
 0x396   : > { %v10758_v9 = vpop.f32.mrb[238].mxu0  ;;  %7174 = vst.msk [vmem:[#allocation4 + $0x48] sm:$0xff] %vm225_vm1, %v7142_v6  ;;  %v6694_v5 = vadd.f32 %v10708_v29, %v6662_v30  ;;  %v6558_v27 = vpop.f32.mrb[207].mxu1  ;;  %v6672_v6 = vld [vmem:[#allocation4 + $0xc8] sm:$0xff]  ;;  %v6671_v30 = vld [vmem:[#allocation4 + $0xc0] sm:$0xff] }
 0x397   : > { %v7012_v49 = vpop.f32.mrb[239].mxu0  ;;  %7173 = vst.msk [vmem:[#allocation4 + $0x40] sm:$0xff] %vm225_vm1, %v7141_v7  ;;  %v7112_v55 = vld [vmem:[#allocation4 + $0x58] sm:$0xff]  ;;  %v6693_v50 = vadd.f32 %v6661_v19, %v6558_v27 }
 0x398   : > { %v7144_v43 = vadd.f32 %v10752_v38, %v7112_v55  ;;  %v7111_v26 = vld [vmem:[#allocation4 + $0x50] sm:$0xff]  ;;  %6726 = vst.msk [vmem:[#allocation4 + $0x78] sm:$0xff] %vm225_vm1, %v6694_v5 }
 0x399   : > { %v7143_v23 = vadd.f32 %v7111_v26, %v6992_v12  ;;  %6725 = vst.msk [vmem:[#allocation4 + $0x70] sm:$0xff] %vm225_vm1, %v6693_v50  ;;  %v10711_v11 = vpop.f32.mrb[208].mxu1 }
 0x39a   : > { %v10761_v60 = vpop.f32.mrb[240].mxu0  ;;  %7176 = vst.msk [vmem:[#allocation4 + $0x58] sm:$0xff] %vm225_vm1, %v7144_v43  ;;  %v6696_v54 = vadd.f32 %v10711_v11, %v6664_v52  ;;  %v6568_v58 = vpop.f32.mrb[209].mxu1  ;;  %v6674_v43 = vld [vmem:[#allocation4 + $0xd8] sm:$0xff]  ;;  %v6673_v52 = vld [vmem:[#allocation4 + $0xd0] sm:$0xff] }
 0x39b   : > { %v7022_v42 = vpop.f32.mrb[241].mxu0  ;;  %7175 = vst.msk [vmem:[#allocation4 + $0x50] sm:$0xff] %vm225_vm1, %v7143_v23  ;;  %v7114_v51 = vld [vmem:[#allocation4 + $0x68] sm:$0xff]  ;;  %v6695_v61 = vadd.f32 %v6663_v63, %v6568_v58 }
 0x39c   : > { %v7146_v10 = vadd.f32 %v10755_v21, %v7114_v51  ;;  %v7113_v46 = vld [vmem:[#allocation4 + $0x60] sm:$0xff]  ;;  %6728 = vst.msk [vmem:[#allocation4 + $0x88] sm:$0xff] %vm225_vm1, %v6696_v54 }
 0x39d   : > { %v7145_v57 = vadd.f32 %v7113_v46, %v7002_v16  ;;  %6727 = vst.msk [vmem:[#allocation4 + $0x80] sm:$0xff] %vm225_vm1, %v6695_v61  ;;  %v10714_v40 = vpop.f32.mrb[210].mxu1 }
 0x39e   : > { %v10764_v37 = vpop.f32.mrb[242].mxu0  ;;  %7178 = vst.msk [vmem:[#allocation4 + $0x68] sm:$0xff] %vm225_vm1, %v7146_v10  ;;  %v6698_v31 = vadd.f32 %v10714_v40, %v6666_v53  ;;  %v6578_v33 = vpop.f32.mrb[211].mxu1  ;;  %v6676_v10 = vld [vmem:[#allocation4 + $0xe8] sm:$0xff]  ;;  %v6675_v53 = vld [vmem:[#allocation4 + $0xe0] sm:$0xff] }
 0x39f   : > { %v7032_v44 = vpop.f32.mrb[243].mxu0  ;;  %7177 = vst.msk [vmem:[#allocation4 + $0x60] sm:$0xff] %vm225_vm1, %v7145_v57  ;;  %v7116_v41 = vld [vmem:[#allocation4 + $0x78] sm:$0xff]  ;;  %v6697_v13 = vadd.f32 %v6665_v20, %v6578_v33 }
 0x3a0   : > { %v7148_v25 = vadd.f32 %v10758_v9, %v7116_v41  ;;  %v7115_v3 = vld [vmem:[#allocation4 + $0x70] sm:$0xff]  ;;  %6730 = vst.msk [vmem:[#allocation4 + $0x98] sm:$0xff] %vm225_vm1, %v6698_v31 }
 0x3a1   : > { %v7147_v14 = vadd.f32 %v7115_v3, %v7012_v49  ;;  %6729 = vst.msk [vmem:[#allocation4 + $0x90] sm:$0xff] %vm225_vm1, %v6697_v13  ;;  %v10717_v17 = vpop.f32.mrb[212].mxu1 }
 0x3a2   : > { %v10767_v8 = vpop.f32.mrb[244].mxu0  ;;  %7180 = vst.msk [vmem:[#allocation4 + $0x78] sm:$0xff] %vm225_vm1, %v7148_v25  ;;  %v6700_v0 = vadd.f32 %v10717_v17, %v6668_v2  ;;  %v6588_v45 = vpop.f32.mrb[213].mxu1  ;;  %v6678_v25 = vld [vmem:[#allocation4 + $0xf8] sm:$0xff]  ;;  %v6677_v2 = vld [vmem:[#allocation4 + $0xf0] sm:$0xff] }
 0x3a3   : > { %v7042_v38 = vpop.f32.mrb[245].mxu0  ;;  %7179 = vst.msk [vmem:[#allocation4 + $0x70] sm:$0xff] %vm225_vm1, %v7147_v14  ;;  %v7118_v47 = vld [vmem:[#allocation4 + $0x88] sm:$0xff]  ;;  %v6699_v24 = vadd.f32 %v6667_v1, %v6588_v45 }
 0x3a4   : > { %v7150_v18 = vadd.f32 %v10761_v60, %v7118_v47  ;;  %v7117_v12 = vld [vmem:[#allocation4 + $0x80] sm:$0xff]  ;;  %6732 = vst.msk [vmem:[#allocation4 + $0xa8] sm:$0xff] %vm225_vm1, %v6700_v0 }
 0x3a5   : > { %v7149_v59 = vadd.f32 %v7117_v12, %v7022_v42  ;;  %6731 = vst.msk [vmem:[#allocation4 + $0xa0] sm:$0xff] %vm225_vm1, %v6699_v24  ;;  %v10720_v35 = vpop.f32.mrb[214].mxu1 }
 0x3a6   : > { %v10770_v22 = vpop.f32.mrb[246].mxu0  ;;  %7182 = vst.msk [vmem:[#allocation4 + $0x88] sm:$0xff] %vm225_vm1, %v7150_v18  ;;  %v6702_v62 = vadd.f32 %v10720_v35, %v6670_v28  ;;  %v6598_v34 = vpop.f32.mrb[215].mxu1  ;;  %v7557_v18 = vld [vmem:[#allocation4 + $0x8] sm:$0xff]  ;;  %v7556_v28 = vld [vmem:[#allocation4] sm:$0xff] }
 0x3a7   : > { %v7052_v21 = vpop.f32.mrb[247].mxu0  ;;  %7181 = vst.msk [vmem:[#allocation4 + $0x80] sm:$0xff] %vm225_vm1, %v7149_v59  ;;  %v7120_v4 = vld [vmem:[#allocation4 + $0x98] sm:$0xff]  ;;  %v6701_v15 = vadd.f32 %v6669_v32, %v6598_v34 }
 0x3a8   : > { %v7152_v48 = vadd.f32 %v10764_v37, %v7120_v4  ;;  %v7119_v16 = vld [vmem:[#allocation4 + $0x90] sm:$0xff]  ;;  %6734 = vst.msk [vmem:[#allocation4 + $0xb8] sm:$0xff] %vm225_vm1, %v6702_v62 }
 0x3a9   : > { %v7151_v39 = vadd.f32 %v7119_v16, %v7032_v44  ;;  %6733 = vst.msk [vmem:[#allocation4 + $0xb0] sm:$0xff] %vm225_vm1, %v6701_v15  ;;  %v10723_v56 = vpop.f32.mrb[216].mxu1 }
 0x3aa   : > { %v10773_v36 = vpop.f32.mrb[248].mxu0  ;;  %7184 = vst.msk [vmem:[#allocation4 + $0x98] sm:$0xff] %vm225_vm1, %v7152_v48  ;;  %v6704_v7 = vadd.f32 %v10723_v56, %v6672_v6  ;;  %v6608_v29 = vpop.f32.mrb[217].mxu1  ;;  %v7559_v48 = vld [vmem:[#allocation4 + $0x18] sm:$0xff]  ;;  %v7558_v6 = vld [vmem:[#allocation4 + $0x10] sm:$0xff] }
 0x3ab   : > { %v7062_v9 = vpop.f32.mrb[249].mxu0  ;;  %7183 = vst.msk [vmem:[#allocation4 + $0x90] sm:$0xff] %vm225_vm1, %v7151_v39  ;;  %v7122_v5 = vld [vmem:[#allocation4 + $0xa8] sm:$0xff]  ;;  %v6703_v27 = vadd.f32 %v6671_v30, %v6608_v29 }
 0x3ac   : > { %v7154_v19 = vadd.f32 %v10767_v8, %v7122_v5  ;;  %v7121_v49 = vld [vmem:[#allocation4 + $0xa0] sm:$0xff]  ;;  %6736 = vst.msk [vmem:[#allocation4 + $0xc8] sm:$0xff] %vm225_vm1, %v6704_v7 }
 0x3ad   : > { %v7153_v55 = vadd.f32 %v7121_v49, %v7042_v38  ;;  %6735 = vst.msk [vmem:[#allocation4 + $0xc0] sm:$0xff] %vm225_vm1, %v6703_v27  ;;  %v10726_v50 = vpop.f32.mrb[218].mxu1 }
 0x3ae   : > { %v10776_v26 = vpop.f32.mrb[250].mxu0  ;;  %7186 = vst.msk [vmem:[#allocation4 + $0xa8] sm:$0xff] %vm225_vm1, %v7154_v19  ;;  %v6706_v23 = vadd.f32 %v10726_v50, %v6674_v43  ;;  %v6618_v11 = vpop.f32.mrb[219].mxu1  ;;  %v7561_v19 = vld [vmem:[#allocation4 + $0x28] sm:$0xff]  ;;  %v7560_v43 = vld [vmem:[#allocation4 + $0x20] sm:$0xff] }
 0x3af   : > { %v7072_v60 = vpop.f32.mrb[251].mxu0  ;;  %7185 = vst.msk [vmem:[#allocation4 + $0xa0] sm:$0xff] %vm225_vm1, %v7153_v55  ;;  %v7124_v54 = vld [vmem:[#allocation4 + $0xb8] sm:$0xff]  ;;  %v6705_v58 = vadd.f32 %v6673_v52, %v6618_v11 }
 0x3b0   : > { %v7156_v63 = vadd.f32 %v10770_v22, %v7124_v54  ;;  %v7123_v42 = vld [vmem:[#allocation4 + $0xb0] sm:$0xff]  ;;  %6738 = vst.msk [vmem:[#allocation4 + $0xd8] sm:$0xff] %vm225_vm1, %v6706_v23 }
 0x3b1   : > { %v7155_v51 = vadd.f32 %v7123_v42, %v7052_v21  ;;  %6737 = vst.msk [vmem:[#allocation4 + $0xd0] sm:$0xff] %vm225_vm1, %v6705_v58  ;;  %v10729_v61 = vpop.f32.mrb[220].mxu1 }
 0x3b2   : > { %v10779_v46 = vpop.f32.mrb[252].mxu0  ;;  %7188 = vst.msk [vmem:[#allocation4 + $0xb8] sm:$0xff] %vm225_vm1, %v7156_v63  ;;  %v6708_v57 = vadd.f32 %v10729_v61, %v6676_v10  ;;  %v6628_v40 = vpop.f32.mrb[221].mxu1  ;;  %v7563_v63 = vld [vmem:[#allocation4 + $0x38] sm:$0xff]  ;;  %v7562_v10 = vld [vmem:[#allocation4 + $0x30] sm:$0xff] }
 0x3b3   : > { %v7082_v37 = vpop.f32.mrb[253].mxu0  ;;  %7187 = vst.msk [vmem:[#allocation4 + $0xb0] sm:$0xff] %vm225_vm1, %v7155_v51  ;;  %v7126_v31 = vld [vmem:[#allocation4 + $0xc8] sm:$0xff]  ;;  %v6707_v33 = vadd.f32 %v6675_v53, %v6628_v40 }
 0x3b4   : > { %v7158_v20 = vadd.f32 %v10773_v36, %v7126_v31  ;;  %v7125_v44 = vld [vmem:[#allocation4 + $0xc0] sm:$0xff]  ;;  %6740 = vst.msk [vmem:[#allocation4 + $0xe8] sm:$0xff] %vm225_vm1, %v6708_v57 }
 0x3b5   : > { %v7157_v41 = vadd.f32 %v7125_v44, %v7062_v9  ;;  %6739 = vst.msk [vmem:[#allocation4 + $0xe0] sm:$0xff] %vm225_vm1, %v6707_v33  ;;  %v10732_v13 = vpop.f32.mrb[222].mxu1 }
 0x3b6   : > { %v10782_v3 = vpop.f32.mrb[254].mxu0  ;;  %7190 = vst.msk [vmem:[#allocation4 + $0xc8] sm:$0xff] %vm225_vm1, %v7158_v20  ;;  %v6710_v14 = vadd.f32 %v10732_v13, %v6678_v25  ;;  %v6638_v17 = vpop.f32.mrb[223].mxu1  ;;  %v7565_v20 = vld [vmem:[#allocation4 + $0x48] sm:$0xff]  ;;  %v7564_v25 = vld [vmem:[#allocation4 + $0x40] sm:$0xff] }
 0x3b7   : > { %v7092_v8 = vpop.f32.mrb[255].mxu0  ;;  %7189 = vst.msk [vmem:[#allocation4 + $0xc0] sm:$0xff] %vm225_vm1, %v7157_v41  ;;  %v7128_v0 = vld [vmem:[#allocation4 + $0xd8] sm:$0xff]  ;;  %v6709_v45 = vadd.f32 %v6677_v2, %v6638_v17 }
 0x3b8   : > { %v7160_v1 = vadd.f32 %v10776_v26, %v7128_v0  ;;  %v7127_v38 = vld [vmem:[#allocation4 + $0xd0] sm:$0xff]  ;;  %6742 = vst.msk [vmem:[#allocation4 + $0xf8] sm:$0xff] %vm225_vm1, %v6710_v14 }
 0x3b9   : > { %v7159_v47 = vadd.f32 %v7127_v38, %v7072_v60  ;;  %6741 = vst.msk [vmem:[#allocation4 + $0xf0] sm:$0xff] %vm225_vm1, %v6709_v45  ;;  %v10787_v24 = vpop.f32.mrb[224].mxu1 }
 0x3ba   : > { %v10837_v12 = vpop.f32.mrb[0].mxu0  ;;  %7192 = vst.msk [vmem:[#allocation4 + $0xd8] sm:$0xff] %vm225_vm1, %v7160_v1  ;;  %v7589_v59 = vadd.f32 %v10787_v24, %v7557_v18  ;;  %v7397_v35 = vpop.f32.mrb[225].mxu1  ;;  %v7567_v1 = vld [vmem:[#allocation4 + $0x58] sm:$0xff]  ;;  %v7566_v18 = vld [vmem:[#allocation4 + $0x50] sm:$0xff] }
 0x3bb   : > { %v7851_v22 = vpop.f32.mrb[1].mxu0  ;;  %7191 = vst.msk [vmem:[#allocation4 + $0xd0] sm:$0xff] %vm225_vm1, %v7159_v47  ;;  %v7130_v62 = vld [vmem:[#allocation4 + $0xe8] sm:$0xff]  ;;  %v7588_v34 = vadd.f32 %v7556_v28, %v7397_v35 }
 0x3bc   : > { %v7162_v32 = vadd.f32 %v10779_v46, %v7130_v62  ;;  %v7129_v21 = vld [vmem:[#allocation4 + $0xe0] sm:$0xff]  ;;  %7621 = vst.msk [vmem:[#allocation4 + $0x8] sm:$0xff] %vm225_vm1, %v7589_v59 }
 0x3bd   : > { %v7161_v4 = vadd.f32 %v7129_v21, %v7082_v37  ;;  %7620 = vst.msk [vmem:[#allocation4] sm:$0xff] %vm225_vm1, %v7588_v34  ;;  %v10790_v15 = vpop.f32.mrb[226].mxu1 }
 0x3be   : > { %v10840_v16 = vpop.f32.mrb[2].mxu0  ;;  %7194 = vst.msk [vmem:[#allocation4 + $0xe8] sm:$0xff] %vm225_vm1, %v7162_v32  ;;  %v7591_v39 = vadd.f32 %v10790_v15, %v7559_v48  ;;  %v7407_v56 = vpop.f32.mrb[227].mxu1  ;;  %v7569_v32 = vld [vmem:[#allocation4 + $0x68] sm:$0xff]  ;;  %v7568_v48 = vld [vmem:[#allocation4 + $0x60] sm:$0xff] }
 0x3bf   : > { %v7861_v36 = vpop.f32.mrb[3].mxu0  ;;  %7193 = vst.msk [vmem:[#allocation4 + $0xe0] sm:$0xff] %vm225_vm1, %v7161_v4  ;;  %v7132_v7 = vld [vmem:[#allocation4 + $0xf8] sm:$0xff]  ;;  %v7590_v29 = vadd.f32 %v7558_v6, %v7407_v56 }
 0x3c0   : > { %v7164_v30 = vadd.f32 %v10782_v3, %v7132_v7  ;;  %v7131_v9 = vld [vmem:[#allocation4 + $0xf0] sm:$0xff]  ;;  %7623 = vst.msk [vmem:[#allocation4 + $0x18] sm:$0xff] %vm225_vm1, %v7591_v39 }
 0x3c1   : > { %v7163_v5 = vadd.f32 %v7131_v9, %v7092_v8  ;;  %7622 = vst.msk [vmem:[#allocation4 + $0x10] sm:$0xff] %vm225_vm1, %v7590_v29  ;;  %v10793_v27 = vpop.f32.mrb[228].mxu1 }
 0x3c2   : > { %v10843_v49 = vpop.f32.mrb[4].mxu0  ;;  %7196 = vst.msk [vmem:[#allocation4 + $0xf8] sm:$0xff] %vm225_vm1, %v7164_v30  ;;  %v7593_v55 = vadd.f32 %v10793_v27, %v7561_v19  ;;  %v7417_v50 = vpop.f32.mrb[229].mxu1  ;;  %v7571_v30 = vld [vmem:[#allocation4 + $0x78] sm:$0xff]  ;;  %v7570_v19 = vld [vmem:[#allocation4 + $0x70] sm:$0xff] }
 0x3c3   : > { %v7871_v26 = vpop.f32.mrb[5].mxu0  ;;  %7195 = vst.msk [vmem:[#allocation4 + $0xf0] sm:$0xff] %vm225_vm1, %v7163_v5  ;;  %v8011_v23 = vld [vmem:[#allocation4 + $0x8] sm:$0xff]  ;;  %v7592_v11 = vadd.f32 %v7560_v43, %v7417_v50 }
 0x3c4   : > { %v8043_v52 = vadd.f32 %v10837_v12, %v8011_v23  ;;  %v8010_v60 = vld [vmem:[#allocation4] sm:$0xff]  ;;  %7625 = vst.msk [vmem:[#allocation4 + $0x28] sm:$0xff] %vm225_vm1, %v7593_v55 }
 0x3c5   : > { %v8042_v54 = vadd.f32 %v8010_v60, %v7851_v22  ;;  %7624 = vst.msk [vmem:[#allocation4 + $0x20] sm:$0xff] %vm225_vm1, %v7592_v11  ;;  %v10796_v58 = vpop.f32.mrb[230].mxu1 }
 0x3c6   : > { %v10846_v42 = vpop.f32.mrb[6].mxu0  ;;  %8075 = vst.msk [vmem:[#allocation4 + $0x8] sm:$0xff] %vm225_vm1, %v8043_v52  ;;  %v7595_v51 = vadd.f32 %v10796_v58, %v7563_v63  ;;  %v7427_v61 = vpop.f32.mrb[231].mxu1  ;;  %v7573_v52 = vld [vmem:[#allocation4 + $0x88] sm:$0xff]  ;;  %v7572_v63 = vld [vmem:[#allocation4 + $0x80] sm:$0xff] }
 0x3c7   : > { %v7881_v46 = vpop.f32.mrb[7].mxu0  ;;  %8074 = vst.msk [vmem:[#allocation4] sm:$0xff] %vm225_vm1, %v8042_v54  ;;  %v8013_v57 = vld [vmem:[#allocation4 + $0x18] sm:$0xff]  ;;  %v7594_v40 = vadd.f32 %v7562_v10, %v7427_v61 }
 0x3c8   : > { %v8045_v53 = vadd.f32 %v10840_v16, %v8013_v57  ;;  %v8012_v37 = vld [vmem:[#allocation4 + $0x10] sm:$0xff]  ;;  %7627 = vst.msk [vmem:[#allocation4 + $0x38] sm:$0xff] %vm225_vm1, %v7595_v51 }
 0x3c9   : > { %v8044_v31 = vadd.f32 %v8012_v37, %v7861_v36  ;;  %7626 = vst.msk [vmem:[#allocation4 + $0x30] sm:$0xff] %vm225_vm1, %v7594_v40  ;;  %v10799_v33 = vpop.f32.mrb[232].mxu1 }
 0x3ca   : > { %v10849_v44 = vpop.f32.mrb[8].mxu0  ;;  %8077 = vst.msk [vmem:[#allocation4 + $0x18] sm:$0xff] %vm225_vm1, %v8045_v53  ;;  %v7597_v41 = vadd.f32 %v10799_v33, %v7565_v20  ;;  %v7437_v13 = vpop.f32.mrb[233].mxu1  ;;  %v7575_v53 = vld [vmem:[#allocation4 + $0x98] sm:$0xff]  ;;  %v7574_v20 = vld [vmem:[#allocation4 + $0x90] sm:$0xff] }
 0x3cb   : > { %v7891_v3 = vpop.f32.mrb[9].mxu0  ;;  %8076 = vst.msk [vmem:[#allocation4 + $0x10] sm:$0xff] %vm225_vm1, %v8044_v31  ;;  %v8015_v14 = vld [vmem:[#allocation4 + $0x28] sm:$0xff]  ;;  %v7596_v17 = vadd.f32 %v7564_v25, %v7437_v13 }
 0x3cc   : > { %v8047_v2 = vadd.f32 %v10843_v49, %v8015_v14  ;;  %v8014_v8 = vld [vmem:[#allocation4 + $0x20] sm:$0xff]  ;;  %7629 = vst.msk [vmem:[#allocation4 + $0x48] sm:$0xff] %vm225_vm1, %v7597_v41 }
 0x3cd   : > { %v8046_v0 = vadd.f32 %v8014_v8, %v7871_v26  ;;  %7628 = vst.msk [vmem:[#allocation4 + $0x40] sm:$0xff] %vm225_vm1, %v7596_v17  ;;  %v10802_v45 = vpop.f32.mrb[234].mxu1 }
 0x3ce   : > { %v10852_v38 = vpop.f32.mrb[10].mxu0  ;;  %8079 = vst.msk [vmem:[#allocation4 + $0x28] sm:$0xff] %vm225_vm1, %v8047_v2  ;;  %v7599_v47 = vadd.f32 %v10802_v45, %v7567_v1  ;;  %v7447_v24 = vpop.f32.mrb[235].mxu1  ;;  %v7577_v2 = vld [vmem:[#allocation4 + $0xa8] sm:$0xff]  ;;  %v7576_v1 = vld [vmem:[#allocation4 + $0xa0] sm:$0xff] }
 0x3cf   : > { %v7901_v12 = vpop.f32.mrb[11].mxu0  ;;  %8078 = vst.msk [vmem:[#allocation4 + $0x20] sm:$0xff] %vm225_vm1, %v8046_v0  ;;  %v8017_v59 = vld [vmem:[#allocation4 + $0x38] sm:$0xff]  ;;  %v7598_v35 = vadd.f32 %v7566_v18, %v7447_v24 }
 0x3d0   : > { %v8049_v28 = vadd.f32 %v10846_v42, %v8017_v59  ;;  %v8016_v22 = vld [vmem:[#allocation4 + $0x30] sm:$0xff]  ;;  %7631 = vst.msk [vmem:[#allocation4 + $0x58] sm:$0xff] %vm225_vm1, %v7599_v47 }
 0x3d1   : > { %v8048_v62 = vadd.f32 %v8016_v22, %v7881_v46  ;;  %7630 = vst.msk [vmem:[#allocation4 + $0x50] sm:$0xff] %vm225_vm1, %v7598_v35  ;;  %v10805_v34 = vpop.f32.mrb[236].mxu1 }
 0x3d2   : > { %v10855_v21 = vpop.f32.mrb[12].mxu0  ;;  %8081 = vst.msk [vmem:[#allocation4 + $0x38] sm:$0xff] %vm225_vm1, %v8049_v28  ;;  %v7601_v4 = vadd.f32 %v10805_v34, %v7569_v32  ;;  %v7457_v15 = vpop.f32.mrb[237].mxu1  ;;  %v7579_v28 = vld [vmem:[#allocation4 + $0xb8] sm:$0xff]  ;;  %v7578_v32 = vld [vmem:[#allocation4 + $0xb0] sm:$0xff] }
 0x3d3   : > { %v7911_v16 = vpop.f32.mrb[13].mxu0  ;;  %8080 = vst.msk [vmem:[#allocation4 + $0x30] sm:$0xff] %vm225_vm1, %v8048_v62  ;;  %v8019_v39 = vld [vmem:[#allocation4 + $0x48] sm:$0xff]  ;;  %v7600_v56 = vadd.f32 %v7568_v48, %v7457_v15 }
 0x3d4   : > { %v8051_v6 = vadd.f32 %v10849_v44, %v8019_v39  ;;  %v8018_v36 = vld [vmem:[#allocation4 + $0x40] sm:$0xff]  ;;  %7633 = vst.msk [vmem:[#allocation4 + $0x68] sm:$0xff] %vm225_vm1, %v7601_v4 }
 0x3d5   : > { %v8050_v7 = vadd.f32 %v8018_v36, %v7891_v3  ;;  %7632 = vst.msk [vmem:[#allocation4 + $0x60] sm:$0xff] %vm225_vm1, %v7600_v56  ;;  %v10808_v29 = vpop.f32.mrb[238].mxu1 }
 0x3d6   : > { %v10858_v9 = vpop.f32.mrb[14].mxu0  ;;  %8083 = vst.msk [vmem:[#allocation4 + $0x48] sm:$0xff] %vm225_vm1, %v8051_v6  ;;  %v7603_v5 = vadd.f32 %v10808_v29, %v7571_v30  ;;  %v7467_v27 = vpop.f32.mrb[239].mxu1  ;;  %v7581_v6 = vld [vmem:[#allocation4 + $0xc8] sm:$0xff]  ;;  %v7580_v30 = vld [vmem:[#allocation4 + $0xc0] sm:$0xff] }
 0x3d7   : > { %v7921_v49 = vpop.f32.mrb[15].mxu0  ;;  %8082 = vst.msk [vmem:[#allocation4 + $0x40] sm:$0xff] %vm225_vm1, %v8050_v7  ;;  %v8021_v55 = vld [vmem:[#allocation4 + $0x58] sm:$0xff]  ;;  %v7602_v50 = vadd.f32 %v7570_v19, %v7467_v27 }
 0x3d8   : > { %v8053_v43 = vadd.f32 %v10852_v38, %v8021_v55  ;;  %v8020_v26 = vld [vmem:[#allocation4 + $0x50] sm:$0xff]  ;;  %7635 = vst.msk [vmem:[#allocation4 + $0x78] sm:$0xff] %vm225_vm1, %v7603_v5 }
 0x3d9   : > { %v8052_v23 = vadd.f32 %v8020_v26, %v7901_v12  ;;  %7634 = vst.msk [vmem:[#allocation4 + $0x70] sm:$0xff] %vm225_vm1, %v7602_v50  ;;  %v10811_v11 = vpop.f32.mrb[240].mxu1 }
 0x3da   : > { %v10861_v60 = vpop.f32.mrb[16].mxu0  ;;  %8085 = vst.msk [vmem:[#allocation4 + $0x58] sm:$0xff] %vm225_vm1, %v8053_v43  ;;  %v7605_v54 = vadd.f32 %v10811_v11, %v7573_v52  ;;  %v7477_v58 = vpop.f32.mrb[241].mxu1  ;;  %v7583_v43 = vld [vmem:[#allocation4 + $0xd8] sm:$0xff]  ;;  %v7582_v52 = vld [vmem:[#allocation4 + $0xd0] sm:$0xff] }
 0x3db   : > { %v7931_v42 = vpop.f32.mrb[17].mxu0  ;;  %8084 = vst.msk [vmem:[#allocation4 + $0x50] sm:$0xff] %vm225_vm1, %v8052_v23  ;;  %v8023_v51 = vld [vmem:[#allocation4 + $0x68] sm:$0xff]  ;;  %v7604_v61 = vadd.f32 %v7572_v63, %v7477_v58 }
 0x3dc   : > { %v8055_v10 = vadd.f32 %v10855_v21, %v8023_v51  ;;  %v8022_v46 = vld [vmem:[#allocation4 + $0x60] sm:$0xff]  ;;  %7637 = vst.msk [vmem:[#allocation4 + $0x88] sm:$0xff] %vm225_vm1, %v7605_v54 }
 0x3dd   : > { %v8054_v57 = vadd.f32 %v8022_v46, %v7911_v16  ;;  %7636 = vst.msk [vmem:[#allocation4 + $0x80] sm:$0xff] %vm225_vm1, %v7604_v61  ;;  %v10814_v40 = vpop.f32.mrb[242].mxu1 }
 0x3de   : > { %v10864_v37 = vpop.f32.mrb[18].mxu0  ;;  %8087 = vst.msk [vmem:[#allocation4 + $0x68] sm:$0xff] %vm225_vm1, %v8055_v10  ;;  %v7607_v31 = vadd.f32 %v10814_v40, %v7575_v53  ;;  %v7487_v33 = vpop.f32.mrb[243].mxu1  ;;  %v7585_v10 = vld [vmem:[#allocation4 + $0xe8] sm:$0xff]  ;;  %v7584_v53 = vld [vmem:[#allocation4 + $0xe0] sm:$0xff] }
 0x3df   : > { %v7941_v44 = vpop.f32.mrb[19].mxu0  ;;  %8086 = vst.msk [vmem:[#allocation4 + $0x60] sm:$0xff] %vm225_vm1, %v8054_v57  ;;  %v8025_v41 = vld [vmem:[#allocation4 + $0x78] sm:$0xff]  ;;  %v7606_v13 = vadd.f32 %v7574_v20, %v7487_v33 }
 0x3e0   : > { %v8057_v25 = vadd.f32 %v10858_v9, %v8025_v41  ;;  %v8024_v3 = vld [vmem:[#allocation4 + $0x70] sm:$0xff]  ;;  %7639 = vst.msk [vmem:[#allocation4 + $0x98] sm:$0xff] %vm225_vm1, %v7607_v31 }
 0x3e1   : > { %v8056_v14 = vadd.f32 %v8024_v3, %v7921_v49  ;;  %7638 = vst.msk [vmem:[#allocation4 + $0x90] sm:$0xff] %vm225_vm1, %v7606_v13  ;;  %v10817_v17 = vpop.f32.mrb[244].mxu1 }
 0x3e2   : > { %v10867_v8 = vpop.f32.mrb[20].mxu0  ;;  %8089 = vst.msk [vmem:[#allocation4 + $0x78] sm:$0xff] %vm225_vm1, %v8057_v25  ;;  %v7609_v0 = vadd.f32 %v10817_v17, %v7577_v2  ;;  %v7497_v45 = vpop.f32.mrb[245].mxu1  ;;  %v7587_v25 = vld [vmem:[#allocation4 + $0xf8] sm:$0xff]  ;;  %v7586_v2 = vld [vmem:[#allocation4 + $0xf0] sm:$0xff] }
 0x3e3   : > { %v7951_v38 = vpop.f32.mrb[21].mxu0  ;;  %8088 = vst.msk [vmem:[#allocation4 + $0x70] sm:$0xff] %vm225_vm1, %v8056_v14  ;;  %v8027_v47 = vld [vmem:[#allocation4 + $0x88] sm:$0xff]  ;;  %v7608_v24 = vadd.f32 %v7576_v1, %v7497_v45 }
 0x3e4   : > { %v8059_v18 = vadd.f32 %v10861_v60, %v8027_v47  ;;  %v8026_v12 = vld [vmem:[#allocation4 + $0x80] sm:$0xff]  ;;  %7641 = vst.msk [vmem:[#allocation4 + $0xa8] sm:$0xff] %vm225_vm1, %v7609_v0 }
 0x3e5   : > { %v8058_v59 = vadd.f32 %v8026_v12, %v7931_v42  ;;  %7640 = vst.msk [vmem:[#allocation4 + $0xa0] sm:$0xff] %vm225_vm1, %v7608_v24  ;;  %v10820_v35 = vpop.f32.mrb[246].mxu1 }
 0x3e6   : > { %v10870_v22 = vpop.f32.mrb[22].mxu0  ;;  %8091 = vst.msk [vmem:[#allocation4 + $0x88] sm:$0xff] %vm225_vm1, %v8059_v18  ;;  %v7611_v62 = vadd.f32 %v10820_v35, %v7579_v28  ;;  %v7507_v34 = vpop.f32.mrb[247].mxu1  ;;  %v8465_v18 = vld [vmem:[#allocation4 + $0x8] sm:$0xff]  ;;  %v8464_v35 = vld [vmem:[#allocation4] sm:$0xff] }
 0x3e7   : > { %v7961_v21 = vpop.f32.mrb[23].mxu0  ;;  %8090 = vst.msk [vmem:[#allocation4 + $0x80] sm:$0xff] %vm225_vm1, %v8058_v59  ;;  %v8029_v4 = vld [vmem:[#allocation4 + $0x98] sm:$0xff]  ;;  %v7610_v15 = vadd.f32 %v7578_v32, %v7507_v34 }
 0x3e8   : > { %v8061_v48 = vadd.f32 %v10864_v37, %v8029_v4  ;;  %v8028_v16 = vld [vmem:[#allocation4 + $0x90] sm:$0xff]  ;;  %7643 = vst.msk [vmem:[#allocation4 + $0xb8] sm:$0xff] %vm225_vm1, %v7611_v62  ;;  %v8467_v4 = vld [vmem:[#allocation4 + $0x18] sm:$0xff] }
 0x3e9   : > { %v8060_v39 = vadd.f32 %v8028_v16, %v7941_v44  ;;  %7642 = vst.msk [vmem:[#allocation4 + $0xb0] sm:$0xff] %vm225_vm1, %v7610_v15  ;;  %v10823_v56 = vpop.f32.mrb[248].mxu1  ;;  %v8466_v16 = vld [vmem:[#allocation4 + $0x10] sm:$0xff] }
 0x3ea   : > { %v10873_v36 = vpop.f32.mrb[24].mxu0  ;;  %8093 = vst.msk [vmem:[#allocation4 + $0x98] sm:$0xff] %vm225_vm1, %v8061_v48  ;;  %v7613_v7 = vadd.f32 %v10823_v56, %v7581_v6  ;;  %v7517_v29 = vpop.f32.mrb[249].mxu1 }
 0x3eb   : > { %v7971_v9 = vpop.f32.mrb[25].mxu0  ;;  %8092 = vst.msk [vmem:[#allocation4 + $0x90] sm:$0xff] %vm225_vm1, %v8060_v39  ;;  %v8031_v5 = vld [vmem:[#allocation4 + $0xa8] sm:$0xff]  ;;  %v7612_v27 = vadd.f32 %v7580_v30, %v7517_v29 }
 0x3ec   : > { %v8063_v19 = vadd.f32 %v10867_v8, %v8031_v5  ;;  %v8030_v49 = vld [vmem:[#allocation4 + $0xa0] sm:$0xff]  ;;  %7645 = vst.msk [vmem:[#allocation4 + $0xc8] sm:$0xff] %vm225_vm1, %v7613_v7 }
 0x3ed   : > { %v8062_v55 = vadd.f32 %v8030_v49, %v7951_v38  ;;  %7644 = vst.msk [vmem:[#allocation4 + $0xc0] sm:$0xff] %vm225_vm1, %v7612_v27  ;;  %v10826_v50 = vpop.f32.mrb[250].mxu1  ;;  %v13426_v7 = vld [vmem:[%s13601_s4] ss:$0 sm:$0xff]  ;;  %v8561_v49 = vld [vmem:[%s11194_s7 + $0x8] sm:$0xff] }
 0x3ee   : > { %v10876_v26 = vpop.f32.mrb[26].mxu0  ;;  %8095 = vst.msk [vmem:[#allocation4 + $0xa8] sm:$0xff] %vm225_vm1, %v8063_v19  ;;  %v7615_v23 = vadd.f32 %v10826_v50, %v7583_v43  ;;  %v7527_v11 = vpop.f32.mrb[251].mxu1  ;;  %v8468_v19 = vld [vmem:[#allocation4 + $0x20] sm:$0xff] }
 0x3ef   : > { %v7981_v60 = vpop.f32.mrb[27].mxu0  ;;  %8094 = vst.msk [vmem:[#allocation4 + $0xa0] sm:$0xff] %vm225_vm1, %v8062_v55  ;;  %v8033_v54 = vld [vmem:[#allocation4 + $0xb8] sm:$0xff]  ;;  %v7614_v58 = vadd.f32 %v7582_v52, %v7527_v11 }
 0x3f0   : > { %v8065_v63 = vadd.f32 %v10870_v22, %v8033_v54  ;;  %v8032_v42 = vld [vmem:[#allocation4 + $0xb0] sm:$0xff]  ;;  %7647 = vst.msk [vmem:[#allocation4 + $0xd8] sm:$0xff] %vm225_vm1, %v7615_v23 }
 0x3f1   : > { %v8064_v51 = vadd.f32 %v8032_v42, %v7961_v21  ;;  %7646 = vst.msk [vmem:[#allocation4 + $0xd0] sm:$0xff] %vm225_vm1, %v7614_v58  ;;  %v10829_v61 = vpop.f32.mrb[252].mxu1  ;;  %v8470_v42 = vld [vmem:[#allocation4 + $0x30] sm:$0xff] }
 0x3f2   : > { %v10879_v46 = vpop.f32.mrb[28].mxu0  ;;  %8097 = vst.msk [vmem:[#allocation4 + $0xb8] sm:$0xff] %vm225_vm1, %v8065_v63  ;;  %v7617_v57 = vadd.f32 %v10829_v61, %v7585_v10  ;;  %v7537_v40 = vpop.f32.mrb[253].mxu1  ;;  %v8563_v61 = vld [vmem:[%s11194_s7 + $0x18] sm:$0xff] }
 0x3f3   : > { %v7991_v37 = vpop.f32.mrb[29].mxu0  ;;  %8096 = vst.msk [vmem:[#allocation4 + $0xb0] sm:$0xff] %vm225_vm1, %v8064_v51  ;;  %v8035_v31 = vld [vmem:[#allocation4 + $0xc8] sm:$0xff]  ;;  %v7616_v33 = vadd.f32 %v7584_v53, %v7537_v40  ;;  %v8562_v53 = vld [vmem:[%s11194_s7 + $0x10] sm:$0xff] }
 0x3f4   : > { %v8067_v20 = vadd.f32 %v10873_v36, %v8035_v31  ;;  %v8034_v44 = vld [vmem:[#allocation4 + $0xc0] sm:$0xff]  ;;  %7649 = vst.msk [vmem:[#allocation4 + $0xe8] sm:$0xff] %vm225_vm1, %v7617_v57 }
 0x3f5   : > { %v8066_v41 = vadd.f32 %v8034_v44, %v7971_v9  ;;  %7648 = vst.msk [vmem:[#allocation4 + $0xe0] sm:$0xff] %vm225_vm1, %v7616_v33  ;;  %v10832_v13 = vpop.f32.mrb[254].mxu1  ;;  %v8469_v9 = vld [vmem:[#allocation4 + $0x28] sm:$0xff] }
 0x3f6   : > { %v10882_v3 = vpop.f32.mrb[30].mxu0  ;;  %8099 = vst.msk [vmem:[#allocation4 + $0xc8] sm:$0xff] %vm225_vm1, %v8067_v20  ;;  %v7619_v14 = vadd.f32 %v10832_v13, %v7587_v25  ;;  %v7547_v17 = vpop.f32.mrb[255].mxu1  ;;  %v8473_v44 = vld [vmem:[#allocation4 + $0x48] sm:$0xff] }
 0x3f7   : > { %v8001_v8 = vpop.f32.mrb[31].mxu0  ;;  %8098 = vst.msk [vmem:[#allocation4 + $0xc0] sm:$0xff] %vm225_vm1, %v8066_v41  ;;  %v8037_v0 = vld [vmem:[#allocation4 + $0xd8] sm:$0xff]  ;;  %v7618_v45 = vadd.f32 %v7586_v2, %v7547_v17  ;;  %v8565_v17 = vld [vmem:[%s11194_s7 + $0x28] sm:$0xff] }
 0x3f8   : > { %v8069_v1 = vadd.f32 %v10876_v26, %v8037_v0  ;;  %v8036_v38 = vld [vmem:[#allocation4 + $0xd0] sm:$0xff]  ;;  %7651 = vst.msk [vmem:[#allocation4 + $0xf8] sm:$0xff] %vm225_vm1, %v7619_v14  ;;  %v8560_v26 = vld [vmem:[%s11194_s7] sm:$0xff] }
 0x3f9   : > { %v8068_v47 = vadd.f32 %v8036_v38, %v7981_v60  ;;  %7650 = vst.msk [vmem:[#allocation4 + $0xf0] sm:$0xff] %vm225_vm1, %v7618_v45  ;;  %v10887_v24 = vpop.f32.mrb[0].mxu1  ;;  %v8471_v60 = vld [vmem:[#allocation4 + $0x38] sm:$0xff] }
 0x3fa   : > { %8101 = vst.msk [vmem:[#allocation4 + $0xd8] sm:$0xff] %vm225_vm1, %v8069_v1  ;;  %v8497_v12 = vadd.f32 %v10887_v24, %v8465_v18  ;;  %v8305_v59 = vpop.f32.mrb[1].mxu1  ;;  %v8564_v1 = vld [vmem:[%s11194_s7 + $0x20] sm:$0xff] }
 0x3fb   : > { %8100 = vst.msk [vmem:[#allocation4 + $0xd0] sm:$0xff] %vm225_vm1, %v8068_v47  ;;  %v8039_v28 = vld [vmem:[#allocation4 + $0xe8] sm:$0xff]  ;;  %v8496_v22 = vadd.f32 %v8464_v35, %v8305_v59 }
 0x3fc   : > { %v8071_v62 = vadd.f32 %v10879_v46, %v8039_v28  ;;  %v8038_v34 = vld [vmem:[#allocation4 + $0xe0] sm:$0xff]  ;;  %8529 = vst.msk [vmem:[#allocation4 + $0x8] sm:$0xff] %vm225_vm1, %v8497_v12  ;;  %v8475_v12 = vld [vmem:[#allocation4 + $0x58] sm:$0xff] }
 0x3fd   : > { %v8070_v32 = vadd.f32 %v8038_v34, %v7991_v37  ;;  %8528 = vst.msk [vmem:[#allocation4] sm:$0xff] %vm225_vm1, %v8496_v22  ;;  %v10890_v21 = vpop.f32.mrb[2].mxu1  ;;  %v8474_v22 = vld [vmem:[#allocation4 + $0x50] sm:$0xff]  ;;  %v8567_v34 = vld [vmem:[%s11194_s7 + $0x38] sm:$0xff] }
 0x3fe   : > { %8103 = vst.msk [vmem:[#allocation4 + $0xe8] sm:$0xff] %vm225_vm1, %v8071_v62  ;;  %v8499_v15 = vadd.f32 %v10890_v21, %v8467_v4  ;;  %v8315_v48 = vpop.f32.mrb[3].mxu1 }
 0x3ff   : > { %8102 = vst.msk [vmem:[#allocation4 + $0xe0] sm:$0xff] %vm225_vm1, %v8070_v32  ;;  %v8498_v39 = vadd.f32 %v8466_v16, %v8315_v48  ;;  %v8041_v56 = vld [vmem:[#allocation4 + $0xf8] sm:$0xff]  ;;  %v8566_v48 = vld [vmem:[%s11194_s7 + $0x30] sm:$0xff] }
 0x400   : > { %8531 = vst.msk [vmem:[#allocation4 + $0x18] sm:$0xff] %vm225_vm1, %v8499_v15  ;;  %v8073_v6 = vadd.f32 %v10882_v3, %v8041_v56  ;;  %v8040_v36 = vld [vmem:[#allocation4 + $0xf0] sm:$0xff]  ;;  %v8472_v3 = vld [vmem:[#allocation4 + $0x40] sm:$0xff] }
 0x401   : > { %8530 = vst.msk [vmem:[#allocation4 + $0x10] sm:$0xff] %vm225_vm1, %v8498_v39  ;;  %v8072_v29 = vadd.f32 %v8040_v36, %v8001_v8  ;;  %v10893_v30 = vpop.f32.mrb[4].mxu1  ;;  %v8477_v36 = vld [vmem:[#allocation4 + $0x68] sm:$0xff] }
 0x402   : > { %8105 = vst.msk [vmem:[#allocation4 + $0xf8] sm:$0xff] %vm225_vm1, %v8073_v6  ;;  %v8501_v5 = vadd.f32 %v10893_v30, %v8469_v9  ;;  %v8325_v27 = vpop.f32.mrb[5].mxu1 }
 0x403   : > { %v8593_v55 = vld [vmem:[#allocation4 + $0x8] sm:$0xff]  ;;  %8104 = vst.msk [vmem:[#allocation4 + $0xf0] sm:$0xff] %vm225_vm1, %v8072_v29  ;;  %v8500_v50 = vadd.f32 %v8468_v19, %v8325_v27 }
 0x404   : > { %v8632_v43 = vadd.f32 %v13426_v7, %v8593_v55  ;;  %v8592_v23 = vld [vmem:[#allocation4] sm:$0xff]  ;;  %8533 = vst.msk [vmem:[#allocation4 + $0x28] sm:$0xff] %vm225_vm1, %v8501_v5  ;;  %v8569_v19 = vld [vmem:[%s11194_s7 + $0x48] sm:$0xff] }
 0x405   : > { %v8631_v11 = vadd.f32 %v13426_v7, %v8592_v23  ;;  %8532 = vst.msk [vmem:[#allocation4 + $0x20] sm:$0xff] %vm225_vm1, %v8500_v50  ;;  %v10896_v52 = vpop.f32.mrb[6].mxu1  ;;  %v8476_v5 = vld [vmem:[#allocation4 + $0x60] sm:$0xff] }
 0x406   : > { %v8664_v54 = vadd.f32 %v8632_v43, %v8561_v49  ;;  %v8503_v58 = vadd.f32 %v10896_v52, %v8471_v60  ;;  %v8335_v63 = vpop.f32.mrb[7].mxu1 }
 0x407   : > { %v8663_v51 = vadd.f32 %v8631_v11, %v8560_v26  ;;  %v8595_v10 = vld [vmem:[#allocation4 + $0x18] sm:$0xff]  ;;  %v8502_v46 = vadd.f32 %v8470_v42, %v8335_v63  ;;  %v8568_v26 = vld [vmem:[%s11194_s7 + $0x40] sm:$0xff] }
 0x408   : > { %v8696_v57 = vmax.f32 %v8664_v54, 0.0  ;;  %v8634_v40 = vadd.f32 %v13426_v7, %v8595_v10  ;;  %v8594_v37 = vld [vmem:[#allocation4 + $0x10] sm:$0xff]  ;;  %8535 = vst.msk [vmem:[#allocation4 + $0x38] sm:$0xff] %vm225_vm1, %v8503_v58  ;;  %v8479_v54 = vld [vmem:[#allocation4 + $0x78] sm:$0xff] }
 0x409   : > { %v8695_v31 = vmax.f32 %v8663_v51, 0.0  ;;  %v8633_v33 = vadd.f32 %v13426_v7, %v8594_v37  ;;  %8534 = vst.msk [vmem:[#allocation4 + $0x30] sm:$0xff] %vm225_vm1, %v8502_v46  ;;  %v10899_v20 = vpop.f32.mrb[8].mxu1  ;;  %v8478_v51 = vld [vmem:[#allocation4 + $0x70] sm:$0xff]  ;;  %v8571_v10 = vld [vmem:[%s11194_s7 + $0x58] sm:$0xff] }
 0x40a   : > { %8728 = vst.msk [vmem:[%s13442_s25 + $0x8] sm:$0xff] %vm225_vm1, %v8696_v57  ;;  %v8666_v41 = vadd.f32 %v8634_v40, %v8563_v61  ;;  %v8505_v13 = vadd.f32 %v10899_v20, %v8473_v44  ;;  %v8345_v25 = vpop.f32.mrb[9].mxu1  ;;  %v8570_v37 = vld [vmem:[%s11194_s7 + $0x50] sm:$0xff] }
 0x40b   : > { %8727 = vst.msk [vmem:[%s13442_s25] sm:$0xff] %vm225_vm1, %v8695_v31  ;;  %v8665_v14 = vadd.f32 %v8633_v33, %v8562_v53  ;;  %v8597_v2 = vld [vmem:[#allocation4 + $0x28] sm:$0xff]  ;;  %v8504_v8 = vadd.f32 %v8472_v3, %v8345_v25 }
 0x40c   : > { %v8698_v0 = vmax.f32 %v8666_v41, 0.0  ;;  %v8636_v45 = vadd.f32 %v13426_v7, %v8597_v2  ;;  %v8596_v38 = vld [vmem:[#allocation4 + $0x20] sm:$0xff]  ;;  %8537 = vst.msk [vmem:[#allocation4 + $0x48] sm:$0xff] %vm225_vm1, %v8505_v13  ;;  %v8481_v41 = vld [vmem:[#allocation4 + $0x88] sm:$0xff] }
 0x40d   : > { %v8697_v47 = vmax.f32 %v8665_v14, 0.0  ;;  %v8635_v24 = vadd.f32 %v13426_v7, %v8596_v38  ;;  %8536 = vst.msk [vmem:[#allocation4 + $0x40] sm:$0xff] %vm225_vm1, %v8504_v8  ;;  %v10902_v18 = vpop.f32.mrb[10].mxu1  ;;  %v8480_v14 = vld [vmem:[#allocation4 + $0x80] sm:$0xff]  ;;  %v8573_v2 = vld [vmem:[%s11194_s7 + $0x68] sm:$0xff] }
 0x40e   : > { %8730 = vst.msk [vmem:[%s13442_s25 + $0x18] sm:$0xff] %vm225_vm1, %v8698_v0  ;;  %v8668_v59 = vadd.f32 %v8636_v45, %v8565_v17  ;;  %v8507_v35 = vadd.f32 %v10902_v18, %v8475_v12  ;;  %v8355_v28 = vpop.f32.mrb[11].mxu1  ;;  %v8572_v38 = vld [vmem:[%s11194_s7 + $0x60] sm:$0xff] }
 0x40f   : > { %8729 = vst.msk [vmem:[%s13442_s25 + $0x10] sm:$0xff] %vm225_vm1, %v8697_v47  ;;  %v8667_v62 = vadd.f32 %v8635_v24, %v8564_v1  ;;  %v8599_v32 = vld [vmem:[#allocation4 + $0x38] sm:$0xff]  ;;  %v8506_v21 = vadd.f32 %v8474_v22, %v8355_v28 }
 0x410   : > { %v8700_v4 = vmax.f32 %v8668_v59, 0.0  ;;  %v8638_v15 = vadd.f32 %v13426_v7, %v8599_v32  ;;  %v8598_v16 = vld [vmem:[#allocation4 + $0x30] sm:$0xff]  ;;  %8539 = vst.msk [vmem:[#allocation4 + $0x58] sm:$0xff] %vm225_vm1, %v8507_v35  ;;  %v8483_v59 = vld [vmem:[#allocation4 + $0x98] sm:$0xff] }
 0x411   : > { %v8699_v39 = vmax.f32 %v8667_v62, 0.0  ;;  %v8637_v56 = vadd.f32 %v13426_v7, %v8598_v16  ;;  %8538 = vst.msk [vmem:[#allocation4 + $0x50] sm:$0xff] %vm225_vm1, %v8506_v21  ;;  %v10905_v6 = vpop.f32.mrb[12].mxu1  ;;  %v8482_v62 = vld [vmem:[#allocation4 + $0x90] sm:$0xff]  ;;  %v8575_v32 = vld [vmem:[%s11194_s7 + $0x78] sm:$0xff] }
 0x412   : > { %8732 = vst.msk [vmem:[%s13442_s25 + $0x28] sm:$0xff] %vm225_vm1, %v8700_v4  ;;  %v8670_v29 = vadd.f32 %v8638_v15, %v8567_v34  ;;  %v8509_v30 = vadd.f32 %v10905_v6, %v8477_v36  ;;  %v8365_v9 = vpop.f32.mrb[13].mxu1  ;;  %v8574_v16 = vld [vmem:[%s11194_s7 + $0x70] sm:$0xff] }
 0x413   : > { %8731 = vst.msk [vmem:[%s13442_s25 + $0x20] sm:$0xff] %vm225_vm1, %v8699_v39  ;;  %v8669_v27 = vadd.f32 %v8637_v56, %v8566_v48  ;;  %v8601_v49 = vld [vmem:[#allocation4 + $0x48] sm:$0xff]  ;;  %v8508_v55 = vadd.f32 %v8476_v5, %v8365_v9 }
 0x414   : > { %v8702_v50 = vmax.f32 %v8670_v29, 0.0  ;;  %v8640_v43 = vadd.f32 %v13426_v7, %v8601_v49  ;;  %v8600_v23 = vld [vmem:[#allocation4 + $0x40] sm:$0xff]  ;;  %8541 = vst.msk [vmem:[#allocation4 + $0x68] sm:$0xff] %vm225_vm1, %v8509_v30  ;;  %v8485_v29 = vld [vmem:[#allocation4 + $0xa8] sm:$0xff] }
 0x415   : > { %v8701_v11 = vmax.f32 %v8669_v27, 0.0  ;;  %v8639_v52 = vadd.f32 %v13426_v7, %v8600_v23  ;;  %8540 = vst.msk [vmem:[#allocation4 + $0x60] sm:$0xff] %vm225_vm1, %v8508_v55  ;;  %v10908_v60 = vpop.f32.mrb[14].mxu1  ;;  %v8484_v27 = vld [vmem:[#allocation4 + $0xa0] sm:$0xff]  ;;  %v8577_v49 = vld [vmem:[%s11194_s7 + $0x88] sm:$0xff] }
 0x416   : > { %8734 = vst.msk [vmem:[%s13442_s25 + $0x38] sm:$0xff] %vm225_vm1, %v8702_v50  ;;  %v8672_v58 = vadd.f32 %v8640_v43, %v8569_v19  ;;  %v8511_v63 = vadd.f32 %v10908_v60, %v8479_v54  ;;  %v8375_v42 = vpop.f32.mrb[15].mxu1  ;;  %v8576_v23 = vld [vmem:[%s11194_s7 + $0x80] sm:$0xff] }
 0x417   : > { %8733 = vst.msk [vmem:[%s13442_s25 + $0x30] sm:$0xff] %vm225_vm1, %v8701_v11  ;;  %v8671_v61 = vadd.f32 %v8639_v52, %v8568_v26  ;;  %v8603_v46 = vld [vmem:[#allocation4 + $0x58] sm:$0xff]  ;;  %v8510_v57 = vadd.f32 %v8478_v51, %v8375_v42 }
 0x418   : > { %v8704_v40 = vmax.f32 %v8672_v58, 0.0  ;;  %v8642_v53 = vadd.f32 %v13426_v7, %v8603_v46  ;;  %v8602_v31 = vld [vmem:[#allocation4 + $0x50] sm:$0xff]  ;;  %8543 = vst.msk [vmem:[#allocation4 + $0x78] sm:$0xff] %vm225_vm1, %v8511_v63  ;;  %v8487_v58 = vld [vmem:[#allocation4 + $0xb8] sm:$0xff] }
 0x419   : > { %v8703_v33 = vmax.f32 %v8671_v61, 0.0  ;;  %v8641_v20 = vadd.f32 %v13426_v7, %v8602_v31  ;;  %8542 = vst.msk [vmem:[#allocation4 + $0x70] sm:$0xff] %vm225_vm1, %v8510_v57  ;;  %v10911_v44 = vpop.f32.mrb[16].mxu1  ;;  %v8486_v61 = vld [vmem:[#allocation4 + $0xb0] sm:$0xff]  ;;  %v8579_v46 = vld [vmem:[%s11194_s7 + $0x98] sm:$0xff] }
 0x41a   : > { %8736 = vst.msk [vmem:[%s13442_s25 + $0x48] sm:$0xff] %vm225_vm1, %v8704_v40  ;;  %v8674_v13 = vadd.f32 %v8642_v53, %v8571_v10  ;;  %v8513_v25 = vadd.f32 %v10911_v44, %v8481_v41  ;;  %v8385_v3 = vpop.f32.mrb[17].mxu1  ;;  %v8578_v31 = vld [vmem:[%s11194_s7 + $0x90] sm:$0xff] }
 0x41b   : > { %8735 = vst.msk [vmem:[%s13442_s25 + $0x40] sm:$0xff] %vm225_vm1, %v8703_v33  ;;  %v8673_v17 = vadd.f32 %v8641_v20, %v8570_v37  ;;  %v8605_v8 = vld [vmem:[#allocation4 + $0x68] sm:$0xff]  ;;  %v8512_v0 = vadd.f32 %v8480_v14, %v8385_v3 }
 0x41c   : > { %v8706_v45 = vmax.f32 %v8674_v13, 0.0  ;;  %v8644_v1 = vadd.f32 %v13426_v7, %v8605_v8  ;;  %v8604_v47 = vld [vmem:[#allocation4 + $0x60] sm:$0xff]  ;;  %8545 = vst.msk [vmem:[#allocation4 + $0x88] sm:$0xff] %vm225_vm1, %v8513_v25  ;;  %v8489_v13 = vld [vmem:[#allocation4 + $0xc8] sm:$0xff] }
 0x41d   : > { %v8705_v24 = vmax.f32 %v8673_v17, 0.0  ;;  %v8643_v18 = vadd.f32 %v13426_v7, %v8604_v47  ;;  %8544 = vst.msk [vmem:[#allocation4 + $0x80] sm:$0xff] %vm225_vm1, %v8512_v0  ;;  %v10914_v12 = vpop.f32.mrb[18].mxu1  ;;  %v8488_v17 = vld [vmem:[#allocation4 + $0xc0] sm:$0xff]  ;;  %v8581_v8 = vld [vmem:[%s11194_s7 + $0xa8] sm:$0xff] }
 0x41e   : > { %8738 = vst.msk [vmem:[%s13442_s25 + $0x58] sm:$0xff] %vm225_vm1, %v8706_v45  ;;  %v8676_v35 = vadd.f32 %v8644_v1, %v8573_v2  ;;  %v8515_v28 = vadd.f32 %v10914_v12, %v8483_v59  ;;  %v8395_v22 = vpop.f32.mrb[19].mxu1  ;;  %v8580_v47 = vld [vmem:[%s11194_s7 + $0xa0] sm:$0xff] }
 0x41f   : > { %8737 = vst.msk [vmem:[%s13442_s25 + $0x50] sm:$0xff] %vm225_vm1, %v8705_v24  ;;  %v8675_v34 = vadd.f32 %v8643_v18, %v8572_v38  ;;  %v8607_v21 = vld [vmem:[#allocation4 + $0x78] sm:$0xff]  ;;  %v8514_v4 = vadd.f32 %v8482_v62, %v8395_v22 }
 0x420   : > { %v8708_v15 = vmax.f32 %v8676_v35, 0.0  ;;  %v8646_v48 = vadd.f32 %v13426_v7, %v8607_v21  ;;  %v8606_v39 = vld [vmem:[#allocation4 + $0x70] sm:$0xff]  ;;  %8547 = vst.msk [vmem:[#allocation4 + $0x98] sm:$0xff] %vm225_vm1, %v8515_v28  ;;  %v8491_v35 = vld [vmem:[#allocation4 + $0xd8] sm:$0xff] }
 0x421   : > { %v8707_v56 = vmax.f32 %v8675_v34, 0.0  ;;  %v8645_v6 = vadd.f32 %v13426_v7, %v8606_v39  ;;  %8546 = vst.msk [vmem:[#allocation4 + $0x90] sm:$0xff] %vm225_vm1, %v8514_v4  ;;  %v10917_v36 = vpop.f32.mrb[20].mxu1  ;;  %v8490_v34 = vld [vmem:[#allocation4 + $0xd0] sm:$0xff]  ;;  %v8583_v21 = vld [vmem:[%s11194_s7 + $0xb8] sm:$0xff] }
 0x422   : > { %8740 = vst.msk [vmem:[%s13442_s25 + $0x68] sm:$0xff] %vm225_vm1, %v8708_v15  ;;  %v8678_v30 = vadd.f32 %v8646_v48, %v8575_v32  ;;  %v8517_v9 = vadd.f32 %v10917_v36, %v8485_v29  ;;  %v8405_v5 = vpop.f32.mrb[21].mxu1  ;;  %v8582_v39 = vld [vmem:[%s11194_s7 + $0xb0] sm:$0xff] }
 0x423   : > { %8739 = vst.msk [vmem:[%s13442_s25 + $0x60] sm:$0xff] %vm225_vm1, %v8707_v56  ;;  %v8677_v19 = vadd.f32 %v8645_v6, %v8574_v16  ;;  %v8609_v55 = vld [vmem:[#allocation4 + $0x88] sm:$0xff]  ;;  %v8516_v50 = vadd.f32 %v8484_v27, %v8405_v5 }
 0x424   : > { %v8710_v43 = vmax.f32 %v8678_v30, 0.0  ;;  %v8648_v26 = vadd.f32 %v13426_v7, %v8609_v55  ;;  %v8608_v11 = vld [vmem:[#allocation4 + $0x80] sm:$0xff]  ;;  %8549 = vst.msk [vmem:[#allocation4 + $0xa8] sm:$0xff] %vm225_vm1, %v8517_v9  ;;  %v8493_v30 = vld [vmem:[#allocation4 + $0xe8] sm:$0xff] }
 0x425   : > { %v8709_v52 = vmax.f32 %v8677_v19, 0.0  ;;  %v8647_v60 = vadd.f32 %v13426_v7, %v8608_v11  ;;  %8548 = vst.msk [vmem:[#allocation4 + $0xa0] sm:$0xff] %vm225_vm1, %v8516_v50  ;;  %v10920_v54 = vpop.f32.mrb[22].mxu1  ;;  %v8492_v19 = vld [vmem:[#allocation4 + $0xe0] sm:$0xff]  ;;  %v8585_v55 = vld [vmem:[%s11194_s7 + $0xc8] sm:$0xff] }
 0x426   : > { %8742 = vst.msk [vmem:[%s13442_s25 + $0x78] sm:$0xff] %vm225_vm1, %v8710_v43  ;;  %v8680_v63 = vadd.f32 %v8648_v26, %v8577_v49  ;;  %v8519_v42 = vadd.f32 %v10920_v54, %v8487_v58  ;;  %v8415_v51 = vpop.f32.mrb[23].mxu1  ;;  %v8584_v11 = vld [vmem:[%s11194_s7 + $0xc0] sm:$0xff] }
 0x427   : > { %8741 = vst.msk [vmem:[%s13442_s25 + $0x70] sm:$0xff] %vm225_vm1, %v8709_v52  ;;  %v8679_v10 = vadd.f32 %v8647_v60, %v8576_v23  ;;  %v8611_v57 = vld [vmem:[#allocation4 + $0x98] sm:$0xff]  ;;  %v8518_v40 = vadd.f32 %v8486_v61, %v8415_v51 }
 0x428   : > { %v8712_v53 = vmax.f32 %v8680_v63, 0.0  ;;  %v8650_v37 = vadd.f32 %v13426_v7, %v8611_v57  ;;  %v8610_v33 = vld [vmem:[#allocation4 + $0x90] sm:$0xff]  ;;  %8551 = vst.msk [vmem:[#allocation4 + $0xb8] sm:$0xff] %vm225_vm1, %v8519_v42  ;;  %v8495_v63 = vld [vmem:[#allocation4 + $0xf8] sm:$0xff] }
 0x429   : > { %v8711_v20 = vmax.f32 %v8679_v10, 0.0  ;;  %v8649_v44 = vadd.f32 %v13426_v7, %v8610_v33  ;;  %8550 = vst.msk [vmem:[#allocation4 + $0xb0] sm:$0xff] %vm225_vm1, %v8518_v40  ;;  %v10923_v41 = vpop.f32.mrb[24].mxu1  ;;  %v8494_v10 = vld [vmem:[#allocation4 + $0xf0] sm:$0xff]  ;;  %v8587_v57 = vld [vmem:[%s11194_s7 + $0xd8] sm:$0xff] }
 0x42a   : > { %8744 = vst.msk [vmem:[%s13442_s25 + $0x88] sm:$0xff] %vm225_vm1, %v8712_v53  ;;  %v8682_v25 = vadd.f32 %v8650_v37, %v8579_v46  ;;  %v8521_v3 = vadd.f32 %v10923_v41, %v8489_v13  ;;  %v8425_v14 = vpop.f32.mrb[25].mxu1  ;;  %v8586_v33 = vld [vmem:[%s11194_s7 + $0xd0] sm:$0xff] }
 0x42b   : > { %8743 = vst.msk [vmem:[%s13442_s25 + $0x80] sm:$0xff] %vm225_vm1, %v8711_v20  ;;  %v8681_v2 = vadd.f32 %v8649_v44, %v8578_v31  ;;  %v8613_v0 = vld [vmem:[#allocation4 + $0xa8] sm:$0xff]  ;;  %v8520_v45 = vadd.f32 %v8488_v17, %v8425_v14 }
 0x42c   : > { %v8714_v1 = vmax.f32 %v8682_v25, 0.0  ;;  %v8652_v38 = vadd.f32 %v13426_v7, %v8613_v0  ;;  %v8612_v24 = vld [vmem:[#allocation4 + $0xa0] sm:$0xff]  ;;  %8553 = vst.msk [vmem:[#allocation4 + $0xc8] sm:$0xff] %vm225_vm1, %v8521_v3  ;;  %v8589_v3 = vld [vmem:[%s11194_s7 + $0xe8] sm:$0xff] }
 0x42d   : > { %v8713_v18 = vmax.f32 %v8681_v2, 0.0  ;;  %v8651_v12 = vadd.f32 %v13426_v7, %v8612_v24  ;;  %8552 = vst.msk [vmem:[#allocation4 + $0xc0] sm:$0xff] %vm225_vm1, %v8520_v45  ;;  %v10926_v59 = vpop.f32.mrb[26].mxu1  ;;  %v8591_v24 = vld [vmem:[%s11194_s7 + $0xf8] sm:$0xff] }
 0x42e   : > { %8746 = vst.msk [vmem:[%s13442_s25 + $0x98] sm:$0xff] %vm225_vm1, %v8714_v1  ;;  %v8684_v28 = vadd.f32 %v8652_v38, %v8581_v8  ;;  %v8523_v22 = vadd.f32 %v10926_v59, %v8491_v35  ;;  %v8435_v62 = vpop.f32.mrb[27].mxu1  ;;  %v8588_v8 = vld [vmem:[%s11194_s7 + $0xe0] sm:$0xff]  ;;  %v8590_v35 = vld [vmem:[%s11194_s7 + $0xf0] sm:$0xff] }
 0x42f   : > { %8745 = vst.msk [vmem:[%s13442_s25 + $0x90] sm:$0xff] %vm225_vm1, %v8713_v18  ;;  %v8683_v32 = vadd.f32 %v8651_v12, %v8580_v47  ;;  %v8615_v4 = vld [vmem:[#allocation4 + $0xb8] sm:$0xff]  ;;  %v8522_v15 = vadd.f32 %v8490_v34, %v8435_v62 }
 0x430   : > { %v8716_v48 = vmax.f32 %v8684_v28, 0.0  ;;  %v8654_v16 = vadd.f32 %v13426_v7, %v8615_v4  ;;  %v8614_v56 = vld [vmem:[#allocation4 + $0xb0] sm:$0xff]  ;;  %8555 = vst.msk [vmem:[#allocation4 + $0xd8] sm:$0xff] %vm225_vm1, %v8523_v22 }
 0x431   : > { %v8715_v6 = vmax.f32 %v8683_v32, 0.0  ;;  %v8653_v36 = vadd.f32 %v13426_v7, %v8614_v56  ;;  %8554 = vst.msk [vmem:[#allocation4 + $0xd0] sm:$0xff] %vm225_vm1, %v8522_v15  ;;  %v10929_v29 = vpop.f32.mrb[28].mxu1 }
 0x432   : > { %8748 = vst.msk [vmem:[%s13442_s25 + $0xa8] sm:$0xff] %vm225_vm1, %v8716_v48  ;;  %v8686_v9 = vadd.f32 %v8654_v16, %v8583_v21  ;;  %v8525_v5 = vadd.f32 %v10929_v29, %v8493_v30  ;;  %v8445_v27 = vpop.f32.mrb[29].mxu1 }
 0x433   : > { %8747 = vst.msk [vmem:[%s13442_s25 + $0xa0] sm:$0xff] %vm225_vm1, %v8715_v6  ;;  %v8685_v49 = vadd.f32 %v8653_v36, %v8582_v39  ;;  %v8617_v50 = vld [vmem:[#allocation4 + $0xc8] sm:$0xff]  ;;  %v8524_v43 = vadd.f32 %v8492_v19, %v8445_v27 }
 0x434   : > { %v8718_v26 = vmax.f32 %v8686_v9, 0.0  ;;  %v8656_v23 = vadd.f32 %v13426_v7, %v8617_v50  ;;  %v8616_v52 = vld [vmem:[#allocation4 + $0xc0] sm:$0xff]  ;;  %8557 = vst.msk [vmem:[#allocation4 + $0xe8] sm:$0xff] %vm225_vm1, %v8525_v5 }
 0x435   : > { %v8717_v60 = vmax.f32 %v8685_v49, 0.0  ;;  %v8655_v54 = vadd.f32 %v13426_v7, %v8616_v52  ;;  %8556 = vst.msk [vmem:[#allocation4 + $0xe0] sm:$0xff] %vm225_vm1, %v8524_v43  ;;  %v10932_v58 = vpop.f32.mrb[30].mxu1 }
 0x436   : > { %8750 = vst.msk [vmem:[%s13442_s25 + $0xb8] sm:$0xff] %vm225_vm1, %v8718_v26  ;;  %v8688_v42 = vadd.f32 %v8656_v23, %v8585_v55  ;;  %v8527_v51 = vadd.f32 %v10932_v58, %v8495_v63  ;;  %v8455_v61 = vpop.f32.mrb[31].mxu1 }
 0x437   : > { %8749 = vst.msk [vmem:[%s13442_s25 + $0xb0] sm:$0xff] %vm225_vm1, %v8717_v60  ;;  %v8687_v46 = vadd.f32 %v8655_v54, %v8584_v11  ;;  %v8619_v40 = vld [vmem:[#allocation4 + $0xd8] sm:$0xff]  ;;  %v8526_v53 = vadd.f32 %v8494_v10, %v8455_v61 }
 0x438   : > { %v8720_v37 = vmax.f32 %v8688_v42, 0.0  ;;  %v8658_v31 = vadd.f32 %v13426_v7, %v8619_v40  ;;  %v8618_v20 = vld [vmem:[#allocation4 + $0xd0] sm:$0xff]  ;;  %8559 = vst.msk [vmem:[#allocation4 + $0xf8] sm:$0xff] %vm225_vm1, %v8527_v51 }
 0x439   : > { %v8719_v44 = vmax.f32 %v8687_v46, 0.0  ;;  %v8657_v41 = vadd.f32 %v13426_v7, %v8618_v20  ;;  %8558 = vst.msk [vmem:[#allocation4 + $0xf0] sm:$0xff] %vm225_vm1, %v8526_v53 }
 0x43a   : > { %8752 = vst.msk [vmem:[%s13442_s25 + $0xc8] sm:$0xff] %vm225_vm1, %v8720_v37  ;;  %v8690_v13 = vadd.f32 %v8658_v31, %v8587_v57 }
 0x43b   : > { %8751 = vst.msk [vmem:[%s13442_s25 + $0xc0] sm:$0xff] %vm225_vm1, %v8719_v44  ;;  %v8689_v25 = vadd.f32 %v8657_v41, %v8586_v33  ;;  %v8621_v14 = vld [vmem:[#allocation4 + $0xe8] sm:$0xff] }
 0x43c   : > { %v8722_v17 = vmax.f32 %v8690_v13, 0.0  ;;  %v8660_v2 = vadd.f32 %v13426_v7, %v8621_v14  ;;  %v8620_v0 = vld [vmem:[#allocation4 + $0xe0] sm:$0xff] }
 0x43d   : > { %v8721_v45 = vmax.f32 %v8689_v25, 0.0  ;;  %v8659_v1 = vadd.f32 %v13426_v7, %v8620_v0 }
 0x43e   : > { %8754 = vst.msk [vmem:[%s13442_s25 + $0xd8] sm:$0xff] %vm225_vm1, %v8722_v17  ;;  %v8692_v38 = vadd.f32 %v8660_v2, %v8589_v3 }
 0x43f   : > { %8753 = vst.msk [vmem:[%s13442_s25 + $0xd0] sm:$0xff] %vm225_vm1, %v8721_v45  ;;  %v8691_v47 = vadd.f32 %v8659_v1, %v8588_v8  ;;  %v8623_v18 = vld [vmem:[#allocation4 + $0xf8] sm:$0xff] }
 0x440   : > { %v8724_v12 = vmax.f32 %v8692_v38, 0.0  ;;  %v8662_v59 = vadd.f32 %v13426_v7, %v8623_v18  ;;  %v8622_v28 = vld [vmem:[#allocation4 + $0xf0] sm:$0xff] }
 0x441   : > { %v8723_v22 = vmax.f32 %v8691_v47, 0.0  ;;  %v8661_v62 = vadd.f32 %v13426_v7, %v8622_v28 }
 0x442   : > { %8756 = vst.msk [vmem:[%s13442_s25 + $0xe8] sm:$0xff] %vm225_vm1, %v8724_v12  ;;  %v8694_v34 = vadd.f32 %v8662_v59, %v8591_v24 }
 0x443   : > { %8755 = vst.msk [vmem:[%s13442_s25 + $0xe0] sm:$0xff] %vm225_vm1, %v8723_v22  ;;  %v8693_v32 = vadd.f32 %v8661_v62, %v8590_v35 }
 0x444   : > { %v8726_v21 = vmax.f32 %v8694_v34, 0.0 }
 0x445   : > { %v8725_v4 = vmax.f32 %v8693_v32, 0.0 }
 0x446   : > { %8758 = vst.msk [vmem:[%s13442_s25 + $0xf8] sm:$0xff] %vm225_vm1, %v8726_v21 }
 0x447   : > { %8757 = vst.msk [vmem:[%s13442_s25 + $0xf0] sm:$0xff] %vm225_vm1, %v8725_v4 }
 0x448 PF: > { %s15_s18 = sadd.s32 1, %s10949_s18  }
 0x449   : > { %p12_p4 = scmp.ge.s32.totalorder %s15_s18, 4  }
 0x44b   :  { %14 = sbr.rel (!%p12_p4) target bundleno = 1 (0x1), region = 92 }

</bundles_post_ra>
